<compile_context>
chip_gen: v6e
topology: v6e:2x2x1
jax: 0.10.0
libtpu: 0.0.40
codegen_flags: <defaults>
</compile_context>

<pallas_src>
import functools
import math

import numpy as np
import jax
import jax.numpy as jnp
from jax.experimental import pallas as pl
from jax.experimental.pallas import tpu as pltpu


# ----------------------------- Pallas kernel --------------------------------


def _im2col_taps(a16, sel_ref):
    """Per-tap selection matmuls: returns list of (P_out, Cin) float32 tap tensors."""
    k2 = sel_ref.shape[0]
    return [jnp.dot(sel_ref[t], a16, preferred_element_type=jnp.float32)
            for t in range(k2)]              # static unroll; all stays in VMEM


def _conv_from_taps(taps, w_ref, shift_ref, *, relu):
    """Finish a conv from its taps: one big-K MXU dot + folded-BN shift (+ ReLU)."""
    patches = taps[0] if len(taps) == 1 else jnp.concatenate(taps, axis=-1)
    patches = patches.astype(jnp.bfloat16)                     # (P_out, K2*Cin)
    y = jnp.dot(patches, w_ref[...], preferred_element_type=jnp.float32)
    y = y + shift_ref[...]                                     # BN scale folded into W
    if relu:
        y = jnp.maximum(y, 0.0)
    return y


def _route_kernel(x_ref, *refs):
    """Whole Route forward for one batch sample: 3 residual blocks + global avg pool."""
    out_ref = refs[-1]
    prm = refs[:-1]
    n_blocks = len(prm) // 8

    act = x_ref[0]                                             # (H*W, Cin) bf16
    for b in range(n_blocks):
        (sel1, sel2, w1, w2, w_sc, b1, b2, b_sc) = prm[8 * b:8 * (b + 1)]
        a16 = act if b == 0 else act.astype(jnp.bfloat16)

        k2 = sel1.shape[0]
        k = int(math.isqrt(k2))
        center = (k // 2) * k + (k // 2)      # center tap == 1x1 stride-2 subsample

        # main branch conv1: stride-2 conv -> BN -> ReLU
        taps1 = _im2col_taps(a16, sel1)
        h = _conv_from_taps(taps1, w1, b1, relu=True)

        # shortcut: 1x1 stride-2 conv -> BN (reuses conv1's center tap, no extra gather)
        sc = jnp.dot(taps1[center].astype(jnp.bfloat16), w_sc[...],
                     preferred_element_type=jnp.float32) + b_sc[...]

        # main branch conv2: stride-1 conv -> BN
        taps2 = _im2col_taps(h.astype(jnp.bfloat16), sel2)
        y = _conv_from_taps(taps2, w2, b2, relu=False)

        act = jnp.maximum(y + sc, 0.0)                         # residual add, then ReLU

    # AdaptiveAvgPool2d((1,1)): mean over the remaining spatial positions (rows).
    out_ref[0] = jnp.mean(act, axis=0, keepdims=True)          # (1, Cout), lane-dense


# ------------------------------ JAX wrapper ----------------------------------


def _zero_map(i, *, ndim):
    return (0,) * ndim


def route_forward(x_nchw, flat_params):
    """Route.forward. x_nchw: (N, 64, H, W) like PyTorch. Returns (N, 256, 1, 1)."""
    n, c, h, w = x_nchw.shape
    # flat NHWC, bf16 (consumed in bf16 by the MXU anyway) -> half the HBM read
    x = jnp.transpose(x_nchw, (0, 2, 3, 1)).reshape(n, h * w, c).astype(jnp.bfloat16)
    cout = flat_params[-1].shape[-1]          # last block's BN shift: (1, Cout)

    in_specs = [pl.BlockSpec((1, h * w, c), lambda i: (i, 0, 0))]
    for arr in flat_params:  # weights / selections / shifts: whole array, fetched once
        in_specs.append(
            pl.BlockSpec(arr.shape, functools.partial(_zero_map, ndim=arr.ndim)))

    pooled = pl.pallas_call(
        _route_kernel,
        out_shape=jax.ShapeDtypeStruct((n, 1, cout), jnp.float32),
        grid=(n,),
        in_specs=in_specs,
        out_specs=pl.BlockSpec((1, 1, cout), lambda i: (i, 0, 0)),
        compiler_params=pltpu.CompilerParams(dimension_semantics=("parallel",)),
    )(x, *flat_params)
    return pooled.reshape(n, cout, 1, 1)                       # NCHW like AdaptiveAvgPool


# --------------------- one-time parameter preparation ------------------------


def _selection_mats(h, w, k, stride, pad):
    """0/1 matrices S with (S[t] @ x_flat)[p_out] = padded input at tap t of output p_out."""
    oh = (h + 2 * pad - k) // stride + 1
    ow = (w + 2 * pad - k) // stride + 1
    sel = np.zeros((k * k, oh * ow, h * w), np.float32)
    for kh in range(k):
        for kw in range(k):
            t = kh * k + kw
            for i in range(oh):
                ih = i * stride + kh - pad
                if not 0 <= ih < h:
                    continue                      # zero-padding row -> all-zero S row
                for j in range(ow):
                    iw = j * stride + kw - pad
                    if 0 <= iw < w:
                        sel[t, i * ow + j, ih * w + iw] = 1.0
    return sel, oh, ow


def prepare_route_params(params, in_hw):
    """Hoisted out of the jitted forward: reshape weights, fold BN scale, build selections."""
    h, w = in_hw
    flat = []
    for name in ("block1", "block2", "block3"):
        p = params[name]
        cout, cin, k, _ = p["w1"].shape
        pad = (k - 1) // 2
        sel1, oh, ow = _selection_mats(h, w, k, 2, pad)       # conv1: stride 2
        sel2, _, _ = _selection_mats(oh, ow, k, 1, pad)       # conv2: stride 1
        # (Cout, Cin, K, K) -> (K*K*Cin, Cout), BN scale folded into the weight.
        w1 = jnp.transpose(p["w1"], (2, 3, 1, 0)).reshape(k * k * cin, cout) * p["s1"][None, :]
        w2 = jnp.transpose(p["w2"], (2, 3, 1, 0)).reshape(k * k * cout, cout) * p["s2"][None, :]
        w_sc = jnp.transpose(p["w_sc"], (2, 3, 1, 0)).reshape(cin, cout) * p["s_sc"][None, :]
        flat += [
            jnp.asarray(sel1, jnp.bfloat16),
            jnp.asarray(sel2, jnp.bfloat16),
            w1.astype(jnp.bfloat16),
            w2.astype(jnp.bfloat16),
            w_sc.astype(jnp.bfloat16),
            p["b1"].reshape(1, cout).astype(jnp.float32),
            p["b2"].reshape(1, cout).astype(jnp.float32),
            p["b_sc"].reshape(1, cout).astype(jnp.float32),
        ]
        h, w = oh, ow
    return tuple(flat)


# --------------------------- parameter construction --------------------------


def _bn_params(key, c, eps=1e-5):
    """Inference-mode BatchNorm folded into per-channel scale & shift."""
    k1, k2, k3, k4 = jax.random.split(key, 4)
    gamma = 1.0 + 0.1 * jax.random.normal(k1, (c,), jnp.float32)
    beta = 0.1 * jax.random.normal(k2, (c,), jnp.float32)
    mean = 0.05 * jax.random.normal(k3, (c,), jnp.float32)
    var = 1.0 + 0.1 * jax.random.uniform(k4, (c,), jnp.float32)
    s = gamma / jnp.sqrt(var + eps)
    b = beta - mean * s
    return s, b


def _conv_w(key, cout, cin, k):
    std = 1.0 / math.sqrt(cin * k * k)
    return std * jax.random.normal(key, (cout, cin, k, k), jnp.float32)


def _make_block_params(key, cin, cout, k):
    ks = jax.random.split(key, 6)
    s1, b1 = _bn_params(ks[1], cout)
    s2, b2 = _bn_params(ks[3], cout)
    ssc, bsc = _bn_params(ks[5], cout)
    return {
        "w1": _conv_w(ks[0], cout, cin, k), "s1": s1, "b1": b1,
        "w2": _conv_w(ks[2], cout, cout, k), "s2": s2, "b2": b2,
        "w_sc": _conv_w(ks[4], cout, cin, 1), "s_sc": ssc, "b_sc": bsc,
    }


# ------------------------ plain-JAX reference (f32) ---------------------------


def _ref_conv_bn(x, w, scale, shift, stride, pad):
    y = jax.lax.conv_general_dilated(
        x, jnp.transpose(w, (2, 3, 1, 0)),
        window_strides=(stride, stride),
        padding=[(pad, pad), (pad, pad)],
        dimension_numbers=("NHWC", "HWIO", "NHWC"))
    return y * scale + shift


def route_reference(x_nchw, params):
    x = jnp.transpose(x_nchw, (0, 2, 3, 1))
    for name in ("block1", "block2", "block3"):
        p = params[name]
        k = p["w1"].shape[-1]
        pad = (k - 1) // 2
        sc = _ref_conv_bn(x, p["w_sc"], p["s_sc"], p["b_sc"], 2, 0)
        h = jax.nn.relu(_ref_conv_bn(x, p["w1"], p["s1"], p["b1"], 2, pad))
        y = _ref_conv_bn(h, p["w2"], p["s2"], p["b2"], 1, pad)
        x = jax.nn.relu(y + sc)
    return jnp.mean(x, axis=(1, 2)).reshape(x.shape[0], -1, 1, 1)


# ----------------------------------- main ------------------------------------

if __name__ == "__main__":
    kernel_size = 3
    key = jax.random.PRNGKey(0)
    k_b1, k_b2, k_b3, k_x = jax.random.split(key, 4)

    params = {
        "block1": _make_block_params(k_b1, 64, 64, kernel_size),     # stride 2
        "block2": _make_block_params(k_b2, 64, 128, kernel_size),    # stride 2
        "block3": _make_block_params(k_b3, 128, 256, kernel_size),   # stride 2
    }

    # Route's first ResidualBlock expects 64 input channels; small spatial = 16.
    x = jax.random.normal(k_x, (2, 64, 16, 16), jnp.float32)  # NCHW like PyTorch

    flat_params = prepare_route_params(params, (16, 16))      # hoisted, runs once

    y = jax.block_until_ready(jax.jit(route_forward)(x, flat_params))

    assert y.shape == (2, 256, 1, 1), y.shape
    assert bool(jnp.all(jnp.isfinite(y)))

    # Loose check vs. an independent f32 reference (kernel uses bf16 MXU inputs).
    y_ref = jax.block_until_ready(jax.jit(route_reference)(x, params))
    err = float(jnp.max(jnp.abs(y - y_ref)) / (jnp.max(jnp.abs(y_ref)) + 1e-6))
    assert err < 0.1, f"normalized error too large: {err}"

    print("KERNEL_OK")
</pallas_src>

<mosaic_0001>
module attributes {stable_mosaic.version = 11 : i64} {
  func.func @_route_kernel(%arg0: i32, %arg1: memref<1x256x64xbf16, #tpu.memory_space<vmem>>, %arg2: memref<9x64x256xbf16, #tpu.memory_space<vmem>>, %arg3: memref<9x64x64xbf16, #tpu.memory_space<vmem>>, %arg4: memref<576x64xbf16, #tpu.memory_space<vmem>>, %arg5: memref<576x64xbf16, #tpu.memory_space<vmem>>, %arg6: memref<64x64xbf16, #tpu.memory_space<vmem>>, %arg7: memref<1x64xf32, #tpu.memory_space<vmem>>, %arg8: memref<1x64xf32, #tpu.memory_space<vmem>>, %arg9: memref<1x64xf32, #tpu.memory_space<vmem>>, %arg10: memref<9x16x64xbf16, #tpu.memory_space<vmem>>, %arg11: memref<9x16x16xbf16, #tpu.memory_space<vmem>>, %arg12: memref<576x128xbf16, #tpu.memory_space<vmem>>, %arg13: memref<1152x128xbf16, #tpu.memory_space<vmem>>, %arg14: memref<64x128xbf16, #tpu.memory_space<vmem>>, %arg15: memref<1x128xf32, #tpu.memory_space<vmem>>, %arg16: memref<1x128xf32, #tpu.memory_space<vmem>>, %arg17: memref<1x128xf32, #tpu.memory_space<vmem>>, %arg18: memref<9x4x16xbf16, #tpu.memory_space<vmem>>, %arg19: memref<9x4x4xbf16, #tpu.memory_space<vmem>>, %arg20: memref<1152x256xbf16, #tpu.memory_space<vmem>>, %arg21: memref<2304x256xbf16, #tpu.memory_space<vmem>>, %arg22: memref<128x256xbf16, #tpu.memory_space<vmem>>, %arg23: memref<1x256xf32, #tpu.memory_space<vmem>>, %arg24: memref<1x256xf32, #tpu.memory_space<vmem>>, %arg25: memref<1x256xf32, #tpu.memory_space<vmem>>, %arg26: memref<1x1x256xf32, #tpu.memory_space<vmem>>) attributes {dimension_semantics = [#tpu.dimension_semantics<parallel>], iteration_bounds = array<i64: 2>, scalar_prefetch = 0 : i64, scratch_operands = 0 : i64, tpu.core_type = #tpu.core_type<tc>, window_params = [{transform_indices = @transform_0, window_bounds = array<i64: 1, 256, 64>}, {pipeline_mode = #tpu.pipeline_mode<synchronous>, transform_indices = @transform_1, window_bounds = array<i64: 9, 64, 256>}, {pipeline_mode = #tpu.pipeline_mode<synchronous>, transform_indices = @transform_2, window_bounds = array<i64: 9, 64, 64>}, {pipeline_mode = #tpu.pipeline_mode<synchronous>, transform_indices = @transform_3, window_bounds = array<i64: 576, 64>}, {pipeline_mode = #tpu.pipeline_mode<synchronous>, transform_indices = @transform_4, window_bounds = array<i64: 576, 64>}, {pipeline_mode = #tpu.pipeline_mode<synchronous>, transform_indices = @transform_5, window_bounds = array<i64: 64, 64>}, {pipeline_mode = #tpu.pipeline_mode<synchronous>, transform_indices = @transform_6, window_bounds = array<i64: 1, 64>}, {pipeline_mode = #tpu.pipeline_mode<synchronous>, transform_indices = @transform_7, window_bounds = array<i64: 1, 64>}, {pipeline_mode = #tpu.pipeline_mode<synchronous>, transform_indices = @transform_8, window_bounds = array<i64: 1, 64>}, {pipeline_mode = #tpu.pipeline_mode<synchronous>, transform_indices = @transform_9, window_bounds = array<i64: 9, 16, 64>}, {pipeline_mode = #tpu.pipeline_mode<synchronous>, transform_indices = @transform_10, window_bounds = array<i64: 9, 16, 16>}, {pipeline_mode = #tpu.pipeline_mode<synchronous>, transform_indices = @transform_11, window_bounds = array<i64: 576, 128>}, {pipeline_mode = #tpu.pipeline_mode<synchronous>, transform_indices = @transform_12, window_bounds = array<i64: 1152, 128>}, {pipeline_mode = #tpu.pipeline_mode<synchronous>, transform_indices = @transform_13, window_bounds = array<i64: 64, 128>}, {pipeline_mode = #tpu.pipeline_mode<synchronous>, transform_indices = @transform_14, window_bounds = array<i64: 1, 128>}, {pipeline_mode = #tpu.pipeline_mode<synchronous>, transform_indices = @transform_15, window_bounds = array<i64: 1, 128>}, {pipeline_mode = #tpu.pipeline_mode<synchronous>, transform_indices = @transform_16, window_bounds = array<i64: 1, 128>}, {pipeline_mode = #tpu.pipeline_mode<synchronous>, transform_indices = @transform_17, window_bounds = array<i64: 9, 4, 16>}, {pipeline_mode = #tpu.pipeline_mode<synchronous>, transform_indices = @transform_18, window_bounds = array<i64: 9, 4, 4>}, {pipeline_mode = #tpu.pipeline_mode<synchronous>, transform_indices = @transform_19, window_bounds = array<i64: 1152, 256>}, {pipeline_mode = #tpu.pipeline_mode<synchronous>, transform_indices = @transform_20, window_bounds = array<i64: 2304, 256>}, {pipeline_mode = #tpu.pipeline_mode<synchronous>, transform_indices = @transform_21, window_bounds = array<i64: 128, 256>}, {pipeline_mode = #tpu.pipeline_mode<synchronous>, transform_indices = @transform_22, window_bounds = array<i64: 1, 256>}, {pipeline_mode = #tpu.pipeline_mode<synchronous>, transform_indices = @transform_23, window_bounds = array<i64: 1, 256>}, {pipeline_mode = #tpu.pipeline_mode<synchronous>, transform_indices = @transform_24, window_bounds = array<i64: 1, 256>}, {transform_indices = @transform_25, window_bounds = array<i64: 1, 1, 256>}]} {
    %c0 = arith.constant 0 : index
    %c0_0 = arith.constant 0 : index
    %c0_1 = arith.constant 0 : index
    %0 = vector.load %arg1[%c0, %c0_0, %c0_1] : memref<1x256x64xbf16, #tpu.memory_space<vmem>>, vector<1x256x64xbf16>
    %1 = vector.shape_cast %0 : vector<1x256x64xbf16> to vector<256x64xbf16>
    %c0_2 = arith.constant 0 : index
    %c0_3 = arith.constant 0 : index
    %c0_4 = arith.constant 0 : index
    %2 = vector.load %arg2[%c0_2, %c0_3, %c0_4] : memref<9x64x256xbf16, #tpu.memory_space<vmem>>, vector<1x64x256xbf16>
    %3 = vector.shape_cast %2 : vector<1x64x256xbf16> to vector<64x256xbf16>
    %cst = arith.constant dense<0.000000e+00> : vector<64x64xf32>
    %4 = tpu.matmul %3, %1, %cst {dimension_numbers = #tpu.dot_dimension_numbers<[1], [0], [0], [1], [0, 0, 1, 1], [], []>} : vector<64x256xbf16>, vector<256x64xbf16>, vector<64x64xf32> -> vector<64x64xf32>
    %c1 = arith.constant 1 : index
    %c0_5 = arith.constant 0 : index
    %c0_6 = arith.constant 0 : index
    %5 = vector.load %arg2[%c1, %c0_5, %c0_6] : memref<9x64x256xbf16, #tpu.memory_space<vmem>>, vector<1x64x256xbf16>
    %6 = vector.shape_cast %5 : vector<1x64x256xbf16> to vector<64x256xbf16>
    %cst_7 = arith.constant dense<0.000000e+00> : vector<64x64xf32>
    %7 = tpu.matmul %6, %1, %cst_7 {dimension_numbers = #tpu.dot_dimension_numbers<[1], [0], [0], [1], [0, 0, 1, 1], [], []>} : vector<64x256xbf16>, vector<256x64xbf16>, vector<64x64xf32> -> vector<64x64xf32>
    %c2 = arith.constant 2 : index
    %c0_8 = arith.constant 0 : index
    %c0_9 = arith.constant 0 : index
    %8 = vector.load %arg2[%c2, %c0_8, %c0_9] : memref<9x64x256xbf16, #tpu.memory_space<vmem>>, vector<1x64x256xbf16>
    %9 = vector.shape_cast %8 : vector<1x64x256xbf16> to vector<64x256xbf16>
    %cst_10 = arith.constant dense<0.000000e+00> : vector<64x64xf32>
    %10 = tpu.matmul %9, %1, %cst_10 {dimension_numbers = #tpu.dot_dimension_numbers<[1], [0], [0], [1], [0, 0, 1, 1], [], []>} : vector<64x256xbf16>, vector<256x64xbf16>, vector<64x64xf32> -> vector<64x64xf32>
    %c3 = arith.constant 3 : index
    %c0_11 = arith.constant 0 : index
    %c0_12 = arith.constant 0 : index
    %11 = vector.load %arg2[%c3, %c0_11, %c0_12] : memref<9x64x256xbf16, #tpu.memory_space<vmem>>, vector<1x64x256xbf16>
    %12 = vector.shape_cast %11 : vector<1x64x256xbf16> to vector<64x256xbf16>
    %cst_13 = arith.constant dense<0.000000e+00> : vector<64x64xf32>
    %13 = tpu.matmul %12, %1, %cst_13 {dimension_numbers = #tpu.dot_dimension_numbers<[1], [0], [0], [1], [0, 0, 1, 1], [], []>} : vector<64x256xbf16>, vector<256x64xbf16>, vector<64x64xf32> -> vector<64x64xf32>
    %c4 = arith.constant 4 : index
    %c0_14 = arith.constant 0 : index
    %c0_15 = arith.constant 0 : index
    %14 = vector.load %arg2[%c4, %c0_14, %c0_15] : memref<9x64x256xbf16, #tpu.memory_space<vmem>>, vector<1x64x256xbf16>
    %15 = vector.shape_cast %14 : vector<1x64x256xbf16> to vector<64x256xbf16>
    %cst_16 = arith.constant dense<0.000000e+00> : vector<64x64xf32>
    %16 = tpu.matmul %15, %1, %cst_16 {dimension_numbers = #tpu.dot_dimension_numbers<[1], [0], [0], [1], [0, 0, 1, 1], [], []>} : vector<64x256xbf16>, vector<256x64xbf16>, vector<64x64xf32> -> vector<64x64xf32>
    %c5 = arith.constant 5 : index
    %c0_17 = arith.constant 0 : index
    %c0_18 = arith.constant 0 : index
    %17 = vector.load %arg2[%c5, %c0_17, %c0_18] : memref<9x64x256xbf16, #tpu.memory_space<vmem>>, vector<1x64x256xbf16>
    %18 = vector.shape_cast %17 : vector<1x64x256xbf16> to vector<64x256xbf16>
    %cst_19 = arith.constant dense<0.000000e+00> : vector<64x64xf32>
    %19 = tpu.matmul %18, %1, %cst_19 {dimension_numbers = #tpu.dot_dimension_numbers<[1], [0], [0], [1], [0, 0, 1, 1], [], []>} : vector<64x256xbf16>, vector<256x64xbf16>, vector<64x64xf32> -> vector<64x64xf32>
    %c6 = arith.constant 6 : index
    %c0_20 = arith.constant 0 : index
    %c0_21 = arith.constant 0 : index
    %20 = vector.load %arg2[%c6, %c0_20, %c0_21] : memref<9x64x256xbf16, #tpu.memory_space<vmem>>, vector<1x64x256xbf16>
    %21 = vector.shape_cast %20 : vector<1x64x256xbf16> to vector<64x256xbf16>
    %cst_22 = arith.constant dense<0.000000e+00> : vector<64x64xf32>
    %22 = tpu.matmul %21, %1, %cst_22 {dimension_numbers = #tpu.dot_dimension_numbers<[1], [0], [0], [1], [0, 0, 1, 1], [], []>} : vector<64x256xbf16>, vector<256x64xbf16>, vector<64x64xf32> -> vector<64x64xf32>
    %c7 = arith.constant 7 : index
    %c0_23 = arith.constant 0 : index
    %c0_24 = arith.constant 0 : index
    %23 = vector.load %arg2[%c7, %c0_23, %c0_24] : memref<9x64x256xbf16, #tpu.memory_space<vmem>>, vector<1x64x256xbf16>
    %24 = vector.shape_cast %23 : vector<1x64x256xbf16> to vector<64x256xbf16>
    %cst_25 = arith.constant dense<0.000000e+00> : vector<64x64xf32>
    %25 = tpu.matmul %24, %1, %cst_25 {dimension_numbers = #tpu.dot_dimension_numbers<[1], [0], [0], [1], [0, 0, 1, 1], [], []>} : vector<64x256xbf16>, vector<256x64xbf16>, vector<64x64xf32> -> vector<64x64xf32>
    %c8 = arith.constant 8 : index
    %c0_26 = arith.constant 0 : index
    %c0_27 = arith.constant 0 : index
    %26 = vector.load %arg2[%c8, %c0_26, %c0_27] : memref<9x64x256xbf16, #tpu.memory_space<vmem>>, vector<1x64x256xbf16>
    %27 = vector.shape_cast %26 : vector<1x64x256xbf16> to vector<64x256xbf16>
    %cst_28 = arith.constant dense<0.000000e+00> : vector<64x64xf32>
    %28 = tpu.matmul %27, %1, %cst_28 {dimension_numbers = #tpu.dot_dimension_numbers<[1], [0], [0], [1], [0, 0, 1, 1], [], []>} : vector<64x256xbf16>, vector<256x64xbf16>, vector<64x64xf32> -> vector<64x64xf32>
    %29 = tpu.concatenate %4, %7, %10, %13, %16, %19, %22, %25, %28 in 1 : vector<64x64xf32>, vector<64x64xf32>, vector<64x64xf32>, vector<64x64xf32>, vector<64x64xf32>, vector<64x64xf32>, vector<64x64xf32>, vector<64x64xf32>, vector<64x64xf32> -> vector<64x576xf32>
    %30 = arith.truncf %29 : vector<64x576xf32> to vector<64x576xbf16>
    %c0_29 = arith.constant 0 : index
    %c0_30 = arith.constant 0 : index
    %31 = vector.load %arg4[%c0_29, %c0_30] : memref<576x64xbf16, #tpu.memory_space<vmem>>, vector<576x64xbf16>
    %cst_31 = arith.constant dense<0.000000e+00> : vector<64x64xf32>
    %32 = tpu.matmul %30, %31, %cst_31 {dimension_numbers = #tpu.dot_dimension_numbers<[1], [0], [0], [1], [0, 0, 1, 1], [], []>} : vector<64x576xbf16>, vector<576x64xbf16>, vector<64x64xf32> -> vector<64x64xf32>
    %c0_32 = arith.constant 0 : index
    %c0_33 = arith.constant 0 : index
    %33 = vector.load %arg7[%c0_32, %c0_33] : memref<1x64xf32, #tpu.memory_space<vmem>>, vector<1x64xf32>
    %34 = vector.broadcast %33 : vector<1x64xf32> to vector<64x64xf32>
    %35 = arith.addf %32, %34 : vector<64x64xf32>
    %cst_34 = arith.constant 0.000000e+00 : f32
    %36 = vector.broadcast %cst_34 : f32 to vector<64x64xf32>
    %37 = arith.maximumf %35, %36 : vector<64x64xf32>
    %38 = arith.truncf %16 : vector<64x64xf32> to vector<64x64xbf16>
    %c0_35 = arith.constant 0 : index
    %c0_36 = arith.constant 0 : index
    %39 = vector.load %arg6[%c0_35, %c0_36] : memref<64x64xbf16, #tpu.memory_space<vmem>>, vector<64x64xbf16>
    %cst_37 = arith.constant dense<0.000000e+00> : vector<64x64xf32>
    %40 = tpu.matmul %38, %39, %cst_37 {dimension_numbers = #tpu.dot_dimension_numbers<[1], [0], [0], [1], [0, 0, 1, 1], [], []>} : vector<64x64xbf16>, vector<64x64xbf16>, vector<64x64xf32> -> vector<64x64xf32>
    %c0_38 = arith.constant 0 : index
    %c0_39 = arith.constant 0 : index
    %41 = vector.load %arg9[%c0_38, %c0_39] : memref<1x64xf32, #tpu.memory_space<vmem>>, vector<1x64xf32>
    %42 = vector.broadcast %41 : vector<1x64xf32> to vector<64x64xf32>
    %43 = arith.addf %40, %42 : vector<64x64xf32>
    %44 = arith.truncf %37 : vector<64x64xf32> to vector<64x64xbf16>
    %c0_40 = arith.constant 0 : index
    %c0_41 = arith.constant 0 : index
    %c0_42 = arith.constant 0 : index
    %45 = vector.load %arg3[%c0_40, %c0_41, %c0_42] : memref<9x64x64xbf16, #tpu.memory_space<vmem>>, vector<1x64x64xbf16>
    %46 = vector.shape_cast %45 : vector<1x64x64xbf16> to vector<64x64xbf16>
    %cst_43 = arith.constant dense<0.000000e+00> : vector<64x64xf32>
    %47 = tpu.matmul %46, %44, %cst_43 {dimension_numbers = #tpu.dot_dimension_numbers<[1], [0], [0], [1], [0, 0, 1, 1], [], []>} : vector<64x64xbf16>, vector<64x64xbf16>, vector<64x64xf32> -> vector<64x64xf32>
    %c1_44 = arith.constant 1 : index
    %c0_45 = arith.constant 0 : index
    %c0_46 = arith.constant 0 : index
    %48 = vector.load %arg3[%c1_44, %c0_45, %c0_46] : memref<9x64x64xbf16, #tpu.memory_space<vmem>>, vector<1x64x64xbf16>
    %49 = vector.shape_cast %48 : vector<1x64x64xbf16> to vector<64x64xbf16>
    %cst_47 = arith.constant dense<0.000000e+00> : vector<64x64xf32>
    %50 = tpu.matmul %49, %44, %cst_47 {dimension_numbers = #tpu.dot_dimension_numbers<[1], [0], [0], [1], [0, 0, 1, 1], [], []>} : vector<64x64xbf16>, vector<64x64xbf16>, vector<64x64xf32> -> vector<64x64xf32>
    %c2_48 = arith.constant 2 : index
    %c0_49 = arith.constant 0 : index
    %c0_50 = arith.constant 0 : index
    %51 = vector.load %arg3[%c2_48, %c0_49, %c0_50] : memref<9x64x64xbf16, #tpu.memory_space<vmem>>, vector<1x64x64xbf16>
    %52 = vector.shape_cast %51 : vector<1x64x64xbf16> to vector<64x64xbf16>
    %cst_51 = arith.constant dense<0.000000e+00> : vector<64x64xf32>
    %53 = tpu.matmul %52, %44, %cst_51 {dimension_numbers = #tpu.dot_dimension_numbers<[1], [0], [0], [1], [0, 0, 1, 1], [], []>} : vector<64x64xbf16>, vector<64x64xbf16>, vector<64x64xf32> -> vector<64x64xf32>
    %c3_52 = arith.constant 3 : index
    %c0_53 = arith.constant 0 : index
    %c0_54 = arith.constant 0 : index
    %54 = vector.load %arg3[%c3_52, %c0_53, %c0_54] : memref<9x64x64xbf16, #tpu.memory_space<vmem>>, vector<1x64x64xbf16>
    %55 = vector.shape_cast %54 : vector<1x64x64xbf16> to vector<64x64xbf16>
    %cst_55 = arith.constant dense<0.000000e+00> : vector<64x64xf32>
    %56 = tpu.matmul %55, %44, %cst_55 {dimension_numbers = #tpu.dot_dimension_numbers<[1], [0], [0], [1], [0, 0, 1, 1], [], []>} : vector<64x64xbf16>, vector<64x64xbf16>, vector<64x64xf32> -> vector<64x64xf32>
    %c4_56 = arith.constant 4 : index
    %c0_57 = arith.constant 0 : index
    %c0_58 = arith.constant 0 : index
    %57 = vector.load %arg3[%c4_56, %c0_57, %c0_58] : memref<9x64x64xbf16, #tpu.memory_space<vmem>>, vector<1x64x64xbf16>
    %58 = vector.shape_cast %57 : vector<1x64x64xbf16> to vector<64x64xbf16>
    %cst_59 = arith.constant dense<0.000000e+00> : vector<64x64xf32>
    %59 = tpu.matmul %58, %44, %cst_59 {dimension_numbers = #tpu.dot_dimension_numbers<[1], [0], [0], [1], [0, 0, 1, 1], [], []>} : vector<64x64xbf16>, vector<64x64xbf16>, vector<64x64xf32> -> vector<64x64xf32>
    %c5_60 = arith.constant 5 : index
    %c0_61 = arith.constant 0 : index
    %c0_62 = arith.constant 0 : index
    %60 = vector.load %arg3[%c5_60, %c0_61, %c0_62] : memref<9x64x64xbf16, #tpu.memory_space<vmem>>, vector<1x64x64xbf16>
    %61 = vector.shape_cast %60 : vector<1x64x64xbf16> to vector<64x64xbf16>
    %cst_63 = arith.constant dense<0.000000e+00> : vector<64x64xf32>
    %62 = tpu.matmul %61, %44, %cst_63 {dimension_numbers = #tpu.dot_dimension_numbers<[1], [0], [0], [1], [0, 0, 1, 1], [], []>} : vector<64x64xbf16>, vector<64x64xbf16>, vector<64x64xf32> -> vector<64x64xf32>
    %c6_64 = arith.constant 6 : index
    %c0_65 = arith.constant 0 : index
    %c0_66 = arith.constant 0 : index
    %63 = vector.load %arg3[%c6_64, %c0_65, %c0_66] : memref<9x64x64xbf16, #tpu.memory_space<vmem>>, vector<1x64x64xbf16>
    %64 = vector.shape_cast %63 : vector<1x64x64xbf16> to vector<64x64xbf16>
    %cst_67 = arith.constant dense<0.000000e+00> : vector<64x64xf32>
    %65 = tpu.matmul %64, %44, %cst_67 {dimension_numbers = #tpu.dot_dimension_numbers<[1], [0], [0], [1], [0, 0, 1, 1], [], []>} : vector<64x64xbf16>, vector<64x64xbf16>, vector<64x64xf32> -> vector<64x64xf32>
    %c7_68 = arith.constant 7 : index
    %c0_69 = arith.constant 0 : index
    %c0_70 = arith.constant 0 : index
    %66 = vector.load %arg3[%c7_68, %c0_69, %c0_70] : memref<9x64x64xbf16, #tpu.memory_space<vmem>>, vector<1x64x64xbf16>
    %67 = vector.shape_cast %66 : vector<1x64x64xbf16> to vector<64x64xbf16>
    %cst_71 = arith.constant dense<0.000000e+00> : vector<64x64xf32>
    %68 = tpu.matmul %67, %44, %cst_71 {dimension_numbers = #tpu.dot_dimension_numbers<[1], [0], [0], [1], [0, 0, 1, 1], [], []>} : vector<64x64xbf16>, vector<64x64xbf16>, vector<64x64xf32> -> vector<64x64xf32>
    %c8_72 = arith.constant 8 : index
    %c0_73 = arith.constant 0 : index
    %c0_74 = arith.constant 0 : index
    %69 = vector.load %arg3[%c8_72, %c0_73, %c0_74] : memref<9x64x64xbf16, #tpu.memory_space<vmem>>, vector<1x64x64xbf16>
    %70 = vector.shape_cast %69 : vector<1x64x64xbf16> to vector<64x64xbf16>
    %cst_75 = arith.constant dense<0.000000e+00> : vector<64x64xf32>
    %71 = tpu.matmul %70, %44, %cst_75 {dimension_numbers = #tpu.dot_dimension_numbers<[1], [0], [0], [1], [0, 0, 1, 1], [], []>} : vector<64x64xbf16>, vector<64x64xbf16>, vector<64x64xf32> -> vector<64x64xf32>
    %72 = tpu.concatenate %47, %50, %53, %56, %59, %62, %65, %68, %71 in 1 : vector<64x64xf32>, vector<64x64xf32>, vector<64x64xf32>, vector<64x64xf32>, vector<64x64xf32>, vector<64x64xf32>, vector<64x64xf32>, vector<64x64xf32>, vector<64x64xf32> -> vector<64x576xf32>
    %73 = arith.truncf %72 : vector<64x576xf32> to vector<64x576xbf16>
    %c0_76 = arith.constant 0 : index
    %c0_77 = arith.constant 0 : index
    %74 = vector.load %arg5[%c0_76, %c0_77] : memref<576x64xbf16, #tpu.memory_space<vmem>>, vector<576x64xbf16>
    %cst_78 = arith.constant dense<0.000000e+00> : vector<64x64xf32>
    %75 = tpu.matmul %73, %74, %cst_78 {dimension_numbers = #tpu.dot_dimension_numbers<[1], [0], [0], [1], [0, 0, 1, 1], [], []>} : vector<64x576xbf16>, vector<576x64xbf16>, vector<64x64xf32> -> vector<64x64xf32>
    %c0_79 = arith.constant 0 : index
    %c0_80 = arith.constant 0 : index
    %76 = vector.load %arg8[%c0_79, %c0_80] : memref<1x64xf32, #tpu.memory_space<vmem>>, vector<1x64xf32>
    %77 = vector.broadcast %76 : vector<1x64xf32> to vector<64x64xf32>
    %78 = arith.addf %75, %77 : vector<64x64xf32>
    %79 = arith.addf %78, %43 : vector<64x64xf32>
    %cst_81 = arith.constant 0.000000e+00 : f32
    %80 = vector.broadcast %cst_81 : f32 to vector<64x64xf32>
    %81 = arith.maximumf %79, %80 : vector<64x64xf32>
    %82 = arith.truncf %81 : vector<64x64xf32> to vector<64x64xbf16>
    %c0_82 = arith.constant 0 : index
    %c0_83 = arith.constant 0 : index
    %c0_84 = arith.constant 0 : index
    %83 = vector.load %arg10[%c0_82, %c0_83, %c0_84] : memref<9x16x64xbf16, #tpu.memory_space<vmem>>, vector<1x16x64xbf16>
    %84 = vector.shape_cast %83 : vector<1x16x64xbf16> to vector<16x64xbf16>
    %cst_85 = arith.constant dense<0.000000e+00> : vector<16x64xf32>
    %85 = tpu.matmul %84, %82, %cst_85 {dimension_numbers = #tpu.dot_dimension_numbers<[1], [0], [0], [1], [0, 0, 1, 1], [], []>} : vector<16x64xbf16>, vector<64x64xbf16>, vector<16x64xf32> -> vector<16x64xf32>
    %c1_86 = arith.constant 1 : index
    %c0_87 = arith.constant 0 : index
    %c0_88 = arith.constant 0 : index
    %86 = vector.load %arg10[%c1_86, %c0_87, %c0_88] : memref<9x16x64xbf16, #tpu.memory_space<vmem>>, vector<1x16x64xbf16>
    %87 = vector.shape_cast %86 : vector<1x16x64xbf16> to vector<16x64xbf16>
    %cst_89 = arith.constant dense<0.000000e+00> : vector<16x64xf32>
    %88 = tpu.matmul %87, %82, %cst_89 {dimension_numbers = #tpu.dot_dimension_numbers<[1], [0], [0], [1], [0, 0, 1, 1], [], []>} : vector<16x64xbf16>, vector<64x64xbf16>, vector<16x64xf32> -> vector<16x64xf32>
    %c2_90 = arith.constant 2 : index
    %c0_91 = arith.constant 0 : index
    %c0_92 = arith.constant 0 : index
    %89 = vector.load %arg10[%c2_90, %c0_91, %c0_92] : memref<9x16x64xbf16, #tpu.memory_space<vmem>>, vector<1x16x64xbf16>
    %90 = vector.shape_cast %89 : vector<1x16x64xbf16> to vector<16x64xbf16>
    %cst_93 = arith.constant dense<0.000000e+00> : vector<16x64xf32>
    %91 = tpu.matmul %90, %82, %cst_93 {dimension_numbers = #tpu.dot_dimension_numbers<[1], [0], [0], [1], [0, 0, 1, 1], [], []>} : vector<16x64xbf16>, vector<64x64xbf16>, vector<16x64xf32> -> vector<16x64xf32>
    %c3_94 = arith.constant 3 : index
    %c0_95 = arith.constant 0 : index
    %c0_96 = arith.constant 0 : index
    %92 = vector.load %arg10[%c3_94, %c0_95, %c0_96] : memref<9x16x64xbf16, #tpu.memory_space<vmem>>, vector<1x16x64xbf16>
    %93 = vector.shape_cast %92 : vector<1x16x64xbf16> to vector<16x64xbf16>
    %cst_97 = arith.constant dense<0.000000e+00> : vector<16x64xf32>
    %94 = tpu.matmul %93, %82, %cst_97 {dimension_numbers = #tpu.dot_dimension_numbers<[1], [0], [0], [1], [0, 0, 1, 1], [], []>} : vector<16x64xbf16>, vector<64x64xbf16>, vector<16x64xf32> -> vector<16x64xf32>
    %c4_98 = arith.constant 4 : index
    %c0_99 = arith.constant 0 : index
    %c0_100 = arith.constant 0 : index
    %95 = vector.load %arg10[%c4_98, %c0_99, %c0_100] : memref<9x16x64xbf16, #tpu.memory_space<vmem>>, vector<1x16x64xbf16>
    %96 = vector.shape_cast %95 : vector<1x16x64xbf16> to vector<16x64xbf16>
    %cst_101 = arith.constant dense<0.000000e+00> : vector<16x64xf32>
    %97 = tpu.matmul %96, %82, %cst_101 {dimension_numbers = #tpu.dot_dimension_numbers<[1], [0], [0], [1], [0, 0, 1, 1], [], []>} : vector<16x64xbf16>, vector<64x64xbf16>, vector<16x64xf32> -> vector<16x64xf32>
    %c5_102 = arith.constant 5 : index
    %c0_103 = arith.constant 0 : index
    %c0_104 = arith.constant 0 : index
    %98 = vector.load %arg10[%c5_102, %c0_103, %c0_104] : memref<9x16x64xbf16, #tpu.memory_space<vmem>>, vector<1x16x64xbf16>
    %99 = vector.shape_cast %98 : vector<1x16x64xbf16> to vector<16x64xbf16>
    %cst_105 = arith.constant dense<0.000000e+00> : vector<16x64xf32>
    %100 = tpu.matmul %99, %82, %cst_105 {dimension_numbers = #tpu.dot_dimension_numbers<[1], [0], [0], [1], [0, 0, 1, 1], [], []>} : vector<16x64xbf16>, vector<64x64xbf16>, vector<16x64xf32> -> vector<16x64xf32>
    %c6_106 = arith.constant 6 : index
    %c0_107 = arith.constant 0 : index
    %c0_108 = arith.constant 0 : index
    %101 = vector.load %arg10[%c6_106, %c0_107, %c0_108] : memref<9x16x64xbf16, #tpu.memory_space<vmem>>, vector<1x16x64xbf16>
    %102 = vector.shape_cast %101 : vector<1x16x64xbf16> to vector<16x64xbf16>
    %cst_109 = arith.constant dense<0.000000e+00> : vector<16x64xf32>
    %103 = tpu.matmul %102, %82, %cst_109 {dimension_numbers = #tpu.dot_dimension_numbers<[1], [0], [0], [1], [0, 0, 1, 1], [], []>} : vector<16x64xbf16>, vector<64x64xbf16>, vector<16x64xf32> -> vector<16x64xf32>
    %c7_110 = arith.constant 7 : index
    %c0_111 = arith.constant 0 : index
    %c0_112 = arith.constant 0 : index
    %104 = vector.load %arg10[%c7_110, %c0_111, %c0_112] : memref<9x16x64xbf16, #tpu.memory_space<vmem>>, vector<1x16x64xbf16>
    %105 = vector.shape_cast %104 : vector<1x16x64xbf16> to vector<16x64xbf16>
    %cst_113 = arith.constant dense<0.000000e+00> : vector<16x64xf32>
    %106 = tpu.matmul %105, %82, %cst_113 {dimension_numbers = #tpu.dot_dimension_numbers<[1], [0], [0], [1], [0, 0, 1, 1], [], []>} : vector<16x64xbf16>, vector<64x64xbf16>, vector<16x64xf32> -> vector<16x64xf32>
    %c8_114 = arith.constant 8 : index
    %c0_115 = arith.constant 0 : index
    %c0_116 = arith.constant 0 : index
    %107 = vector.load %arg10[%c8_114, %c0_115, %c0_116] : memref<9x16x64xbf16, #tpu.memory_space<vmem>>, vector<1x16x64xbf16>
    %108 = vector.shape_cast %107 : vector<1x16x64xbf16> to vector<16x64xbf16>
    %cst_117 = arith.constant dense<0.000000e+00> : vector<16x64xf32>
    %109 = tpu.matmul %108, %82, %cst_117 {dimension_numbers = #tpu.dot_dimension_numbers<[1], [0], [0], [1], [0, 0, 1, 1], [], []>} : vector<16x64xbf16>, vector<64x64xbf16>, vector<16x64xf32> -> vector<16x64xf32>
    %110 = tpu.concatenate %85, %88, %91, %94, %97, %100, %103, %106, %109 in 1 : vector<16x64xf32>, vector<16x64xf32>, vector<16x64xf32>, vector<16x64xf32>, vector<16x64xf32>, vector<16x64xf32>, vector<16x64xf32>, vector<16x64xf32>, vector<16x64xf32> -> vector<16x576xf32>
    %111 = arith.truncf %110 : vector<16x576xf32> to vector<16x576xbf16>
    %c0_118 = arith.constant 0 : index
    %c0_119 = arith.constant 0 : index
    %112 = vector.load %arg12[%c0_118, %c0_119] : memref<576x128xbf16, #tpu.memory_space<vmem>>, vector<576x128xbf16>
    %cst_120 = arith.constant dense<0.000000e+00> : vector<16x128xf32>
    %113 = tpu.matmul %111, %112, %cst_120 {dimension_numbers = #tpu.dot_dimension_numbers<[1], [0], [0], [1], [0, 0, 1, 1], [], []>} : vector<16x576xbf16>, vector<576x128xbf16>, vector<16x128xf32> -> vector<16x128xf32>
    %c0_121 = arith.constant 0 : index
    %c0_122 = arith.constant 0 : index
    %114 = vector.load %arg15[%c0_121, %c0_122] : memref<1x128xf32, #tpu.memory_space<vmem>>, vector<1x128xf32>
    %115 = vector.broadcast %114 : vector<1x128xf32> to vector<16x128xf32>
    %116 = arith.addf %113, %115 : vector<16x128xf32>
    %cst_123 = arith.constant 0.000000e+00 : f32
    %117 = vector.broadcast %cst_123 : f32 to vector<16x128xf32>
    %118 = arith.maximumf %116, %117 : vector<16x128xf32>
    %119 = arith.truncf %97 : vector<16x64xf32> to vector<16x64xbf16>
    %c0_124 = arith.constant 0 : index
    %c0_125 = arith.constant 0 : index
    %120 = vector.load %arg14[%c0_124, %c0_125] : memref<64x128xbf16, #tpu.memory_space<vmem>>, vector<64x128xbf16>
    %cst_126 = arith.constant dense<0.000000e+00> : vector<16x128xf32>
    %121 = tpu.matmul %119, %120, %cst_126 {dimension_numbers = #tpu.dot_dimension_numbers<[1], [0], [0], [1], [0, 0, 1, 1], [], []>} : vector<16x64xbf16>, vector<64x128xbf16>, vector<16x128xf32> -> vector<16x128xf32>
    %c0_127 = arith.constant 0 : index
    %c0_128 = arith.constant 0 : index
    %122 = vector.load %arg17[%c0_127, %c0_128] : memref<1x128xf32, #tpu.memory_space<vmem>>, vector<1x128xf32>
    %123 = vector.broadcast %122 : vector<1x128xf32> to vector<16x128xf32>
    %124 = arith.addf %121, %123 : vector<16x128xf32>
    %125 = arith.truncf %118 : vector<16x128xf32> to vector<16x128xbf16>
    %c0_129 = arith.constant 0 : index
    %c0_130 = arith.constant 0 : index
    %c0_131 = arith.constant 0 : index
    %126 = vector.load %arg11[%c0_129, %c0_130, %c0_131] : memref<9x16x16xbf16, #tpu.memory_space<vmem>>, vector<1x16x16xbf16>
    %127 = vector.shape_cast %126 : vector<1x16x16xbf16> to vector<16x16xbf16>
    %cst_132 = arith.constant dense<0.000000e+00> : vector<16x128xf32>
    %128 = tpu.matmul %127, %125, %cst_132 {dimension_numbers = #tpu.dot_dimension_numbers<[1], [0], [0], [1], [0, 0, 1, 1], [], []>} : vector<16x16xbf16>, vector<16x128xbf16>, vector<16x128xf32> -> vector<16x128xf32>
    %c1_133 = arith.constant 1 : index
    %c0_134 = arith.constant 0 : index
    %c0_135 = arith.constant 0 : index
    %129 = vector.load %arg11[%c1_133, %c0_134, %c0_135] : memref<9x16x16xbf16, #tpu.memory_space<vmem>>, vector<1x16x16xbf16>
    %130 = vector.shape_cast %129 : vector<1x16x16xbf16> to vector<16x16xbf16>
    %cst_136 = arith.constant dense<0.000000e+00> : vector<16x128xf32>
    %131 = tpu.matmul %130, %125, %cst_136 {dimension_numbers = #tpu.dot_dimension_numbers<[1], [0], [0], [1], [0, 0, 1, 1], [], []>} : vector<16x16xbf16>, vector<16x128xbf16>, vector<16x128xf32> -> vector<16x128xf32>
    %c2_137 = arith.constant 2 : index
    %c0_138 = arith.constant 0 : index
    %c0_139 = arith.constant 0 : index
    %132 = vector.load %arg11[%c2_137, %c0_138, %c0_139] : memref<9x16x16xbf16, #tpu.memory_space<vmem>>, vector<1x16x16xbf16>
    %133 = vector.shape_cast %132 : vector<1x16x16xbf16> to vector<16x16xbf16>
    %cst_140 = arith.constant dense<0.000000e+00> : vector<16x128xf32>
    %134 = tpu.matmul %133, %125, %cst_140 {dimension_numbers = #tpu.dot_dimension_numbers<[1], [0], [0], [1], [0, 0, 1, 1], [], []>} : vector<16x16xbf16>, vector<16x128xbf16>, vector<16x128xf32> -> vector<16x128xf32>
    %c3_141 = arith.constant 3 : index
    %c0_142 = arith.constant 0 : index
    %c0_143 = arith.constant 0 : index
    %135 = vector.load %arg11[%c3_141, %c0_142, %c0_143] : memref<9x16x16xbf16, #tpu.memory_space<vmem>>, vector<1x16x16xbf16>
    %136 = vector.shape_cast %135 : vector<1x16x16xbf16> to vector<16x16xbf16>
    %cst_144 = arith.constant dense<0.000000e+00> : vector<16x128xf32>
    %137 = tpu.matmul %136, %125, %cst_144 {dimension_numbers = #tpu.dot_dimension_numbers<[1], [0], [0], [1], [0, 0, 1, 1], [], []>} : vector<16x16xbf16>, vector<16x128xbf16>, vector<16x128xf32> -> vector<16x128xf32>
    %c4_145 = arith.constant 4 : index
    %c0_146 = arith.constant 0 : index
    %c0_147 = arith.constant 0 : index
    %138 = vector.load %arg11[%c4_145, %c0_146, %c0_147] : memref<9x16x16xbf16, #tpu.memory_space<vmem>>, vector<1x16x16xbf16>
    %139 = vector.shape_cast %138 : vector<1x16x16xbf16> to vector<16x16xbf16>
    %cst_148 = arith.constant dense<0.000000e+00> : vector<16x128xf32>
    %140 = tpu.matmul %139, %125, %cst_148 {dimension_numbers = #tpu.dot_dimension_numbers<[1], [0], [0], [1], [0, 0, 1, 1], [], []>} : vector<16x16xbf16>, vector<16x128xbf16>, vector<16x128xf32> -> vector<16x128xf32>
    %c5_149 = arith.constant 5 : index
    %c0_150 = arith.constant 0 : index
    %c0_151 = arith.constant 0 : index
    %141 = vector.load %arg11[%c5_149, %c0_150, %c0_151] : memref<9x16x16xbf16, #tpu.memory_space<vmem>>, vector<1x16x16xbf16>
    %142 = vector.shape_cast %141 : vector<1x16x16xbf16> to vector<16x16xbf16>
    %cst_152 = arith.constant dense<0.000000e+00> : vector<16x128xf32>
    %143 = tpu.matmul %142, %125, %cst_152 {dimension_numbers = #tpu.dot_dimension_numbers<[1], [0], [0], [1], [0, 0, 1, 1], [], []>} : vector<16x16xbf16>, vector<16x128xbf16>, vector<16x128xf32> -> vector<16x128xf32>
    %c6_153 = arith.constant 6 : index
    %c0_154 = arith.constant 0 : index
    %c0_155 = arith.constant 0 : index
    %144 = vector.load %arg11[%c6_153, %c0_154, %c0_155] : memref<9x16x16xbf16, #tpu.memory_space<vmem>>, vector<1x16x16xbf16>
    %145 = vector.shape_cast %144 : vector<1x16x16xbf16> to vector<16x16xbf16>
    %cst_156 = arith.constant dense<0.000000e+00> : vector<16x128xf32>
    %146 = tpu.matmul %145, %125, %cst_156 {dimension_numbers = #tpu.dot_dimension_numbers<[1], [0], [0], [1], [0, 0, 1, 1], [], []>} : vector<16x16xbf16>, vector<16x128xbf16>, vector<16x128xf32> -> vector<16x128xf32>
    %c7_157 = arith.constant 7 : index
    %c0_158 = arith.constant 0 : index
    %c0_159 = arith.constant 0 : index
    %147 = vector.load %arg11[%c7_157, %c0_158, %c0_159] : memref<9x16x16xbf16, #tpu.memory_space<vmem>>, vector<1x16x16xbf16>
    %148 = vector.shape_cast %147 : vector<1x16x16xbf16> to vector<16x16xbf16>
    %cst_160 = arith.constant dense<0.000000e+00> : vector<16x128xf32>
    %149 = tpu.matmul %148, %125, %cst_160 {dimension_numbers = #tpu.dot_dimension_numbers<[1], [0], [0], [1], [0, 0, 1, 1], [], []>} : vector<16x16xbf16>, vector<16x128xbf16>, vector<16x128xf32> -> vector<16x128xf32>
    %c8_161 = arith.constant 8 : index
    %c0_162 = arith.constant 0 : index
    %c0_163 = arith.constant 0 : index
    %150 = vector.load %arg11[%c8_161, %c0_162, %c0_163] : memref<9x16x16xbf16, #tpu.memory_space<vmem>>, vector<1x16x16xbf16>
    %151 = vector.shape_cast %150 : vector<1x16x16xbf16> to vector<16x16xbf16>
    %cst_164 = arith.constant dense<0.000000e+00> : vector<16x128xf32>
    %152 = tpu.matmul %151, %125, %cst_164 {dimension_numbers = #tpu.dot_dimension_numbers<[1], [0], [0], [1], [0, 0, 1, 1], [], []>} : vector<16x16xbf16>, vector<16x128xbf16>, vector<16x128xf32> -> vector<16x128xf32>
    %153 = tpu.concatenate %128, %131, %134, %137, %140, %143, %146, %149, %152 in 1 : vector<16x128xf32>, vector<16x128xf32>, vector<16x128xf32>, vector<16x128xf32>, vector<16x128xf32>, vector<16x128xf32>, vector<16x128xf32>, vector<16x128xf32>, vector<16x128xf32> -> vector<16x1152xf32>
    %154 = arith.truncf %153 : vector<16x1152xf32> to vector<16x1152xbf16>
    %c0_165 = arith.constant 0 : index
    %c0_166 = arith.constant 0 : index
    %155 = vector.load %arg13[%c0_165, %c0_166] : memref<1152x128xbf16, #tpu.memory_space<vmem>>, vector<1152x128xbf16>
    %cst_167 = arith.constant dense<0.000000e+00> : vector<16x128xf32>
    %156 = tpu.matmul %154, %155, %cst_167 {dimension_numbers = #tpu.dot_dimension_numbers<[1], [0], [0], [1], [0, 0, 1, 1], [], []>} : vector<16x1152xbf16>, vector<1152x128xbf16>, vector<16x128xf32> -> vector<16x128xf32>
    %c0_168 = arith.constant 0 : index
    %c0_169 = arith.constant 0 : index
    %157 = vector.load %arg16[%c0_168, %c0_169] : memref<1x128xf32, #tpu.memory_space<vmem>>, vector<1x128xf32>
    %158 = vector.broadcast %157 : vector<1x128xf32> to vector<16x128xf32>
    %159 = arith.addf %156, %158 : vector<16x128xf32>
    %160 = arith.addf %159, %124 : vector<16x128xf32>
    %cst_170 = arith.constant 0.000000e+00 : f32
    %161 = vector.broadcast %cst_170 : f32 to vector<16x128xf32>
    %162 = arith.maximumf %160, %161 : vector<16x128xf32>
    %163 = arith.truncf %162 : vector<16x128xf32> to vector<16x128xbf16>
    %c0_171 = arith.constant 0 : index
    %c0_172 = arith.constant 0 : index
    %c0_173 = arith.constant 0 : index
    %164 = vector.load %arg18[%c0_171, %c0_172, %c0_173] : memref<9x4x16xbf16, #tpu.memory_space<vmem>>, vector<1x4x16xbf16>
    %165 = vector.shape_cast %164 : vector<1x4x16xbf16> to vector<4x16xbf16>
    %cst_174 = arith.constant dense<0.000000e+00> : vector<4x128xf32>
    %166 = tpu.matmul %165, %163, %cst_174 {dimension_numbers = #tpu.dot_dimension_numbers<[1], [0], [0], [1], [0, 0, 1, 1], [], []>} : vector<4x16xbf16>, vector<16x128xbf16>, vector<4x128xf32> -> vector<4x128xf32>
    %c1_175 = arith.constant 1 : index
    %c0_176 = arith.constant 0 : index
    %c0_177 = arith.constant 0 : index
    %167 = vector.load %arg18[%c1_175, %c0_176, %c0_177] : memref<9x4x16xbf16, #tpu.memory_space<vmem>>, vector<1x4x16xbf16>
    %168 = vector.shape_cast %167 : vector<1x4x16xbf16> to vector<4x16xbf16>
    %cst_178 = arith.constant dense<0.000000e+00> : vector<4x128xf32>
    %169 = tpu.matmul %168, %163, %cst_178 {dimension_numbers = #tpu.dot_dimension_numbers<[1], [0], [0], [1], [0, 0, 1, 1], [], []>} : vector<4x16xbf16>, vector<16x128xbf16>, vector<4x128xf32> -> vector<4x128xf32>
    %c2_179 = arith.constant 2 : index
    %c0_180 = arith.constant 0 : index
    %c0_181 = arith.constant 0 : index
    %170 = vector.load %arg18[%c2_179, %c0_180, %c0_181] : memref<9x4x16xbf16, #tpu.memory_space<vmem>>, vector<1x4x16xbf16>
    %171 = vector.shape_cast %170 : vector<1x4x16xbf16> to vector<4x16xbf16>
    %cst_182 = arith.constant dense<0.000000e+00> : vector<4x128xf32>
    %172 = tpu.matmul %171, %163, %cst_182 {dimension_numbers = #tpu.dot_dimension_numbers<[1], [0], [0], [1], [0, 0, 1, 1], [], []>} : vector<4x16xbf16>, vector<16x128xbf16>, vector<4x128xf32> -> vector<4x128xf32>
    %c3_183 = arith.constant 3 : index
    %c0_184 = arith.constant 0 : index
    %c0_185 = arith.constant 0 : index
    %173 = vector.load %arg18[%c3_183, %c0_184, %c0_185] : memref<9x4x16xbf16, #tpu.memory_space<vmem>>, vector<1x4x16xbf16>
    %174 = vector.shape_cast %173 : vector<1x4x16xbf16> to vector<4x16xbf16>
    %cst_186 = arith.constant dense<0.000000e+00> : vector<4x128xf32>
    %175 = tpu.matmul %174, %163, %cst_186 {dimension_numbers = #tpu.dot_dimension_numbers<[1], [0], [0], [1], [0, 0, 1, 1], [], []>} : vector<4x16xbf16>, vector<16x128xbf16>, vector<4x128xf32> -> vector<4x128xf32>
    %c4_187 = arith.constant 4 : index
    %c0_188 = arith.constant 0 : index
    %c0_189 = arith.constant 0 : index
    %176 = vector.load %arg18[%c4_187, %c0_188, %c0_189] : memref<9x4x16xbf16, #tpu.memory_space<vmem>>, vector<1x4x16xbf16>
    %177 = vector.shape_cast %176 : vector<1x4x16xbf16> to vector<4x16xbf16>
    %cst_190 = arith.constant dense<0.000000e+00> : vector<4x128xf32>
    %178 = tpu.matmul %177, %163, %cst_190 {dimension_numbers = #tpu.dot_dimension_numbers<[1], [0], [0], [1], [0, 0, 1, 1], [], []>} : vector<4x16xbf16>, vector<16x128xbf16>, vector<4x128xf32> -> vector<4x128xf32>
    %c5_191 = arith.constant 5 : index
    %c0_192 = arith.constant 0 : index
    %c0_193 = arith.constant 0 : index
    %179 = vector.load %arg18[%c5_191, %c0_192, %c0_193] : memref<9x4x16xbf16, #tpu.memory_space<vmem>>, vector<1x4x16xbf16>
    %180 = vector.shape_cast %179 : vector<1x4x16xbf16> to vector<4x16xbf16>
    %cst_194 = arith.constant dense<0.000000e+00> : vector<4x128xf32>
    %181 = tpu.matmul %180, %163, %cst_194 {dimension_numbers = #tpu.dot_dimension_numbers<[1], [0], [0], [1], [0, 0, 1, 1], [], []>} : vector<4x16xbf16>, vector<16x128xbf16>, vector<4x128xf32> -> vector<4x128xf32>
    %c6_195 = arith.constant 6 : index
    %c0_196 = arith.constant 0 : index
    %c0_197 = arith.constant 0 : index
    %182 = vector.load %arg18[%c6_195, %c0_196, %c0_197] : memref<9x4x16xbf16, #tpu.memory_space<vmem>>, vector<1x4x16xbf16>
    %183 = vector.shape_cast %182 : vector<1x4x16xbf16> to vector<4x16xbf16>
    %cst_198 = arith.constant dense<0.000000e+00> : vector<4x128xf32>
    %184 = tpu.matmul %183, %163, %cst_198 {dimension_numbers = #tpu.dot_dimension_numbers<[1], [0], [0], [1], [0, 0, 1, 1], [], []>} : vector<4x16xbf16>, vector<16x128xbf16>, vector<4x128xf32> -> vector<4x128xf32>
    %c7_199 = arith.constant 7 : index
    %c0_200 = arith.constant 0 : index
    %c0_201 = arith.constant 0 : index
    %185 = vector.load %arg18[%c7_199, %c0_200, %c0_201] : memref<9x4x16xbf16, #tpu.memory_space<vmem>>, vector<1x4x16xbf16>
    %186 = vector.shape_cast %185 : vector<1x4x16xbf16> to vector<4x16xbf16>
    %cst_202 = arith.constant dense<0.000000e+00> : vector<4x128xf32>
    %187 = tpu.matmul %186, %163, %cst_202 {dimension_numbers = #tpu.dot_dimension_numbers<[1], [0], [0], [1], [0, 0, 1, 1], [], []>} : vector<4x16xbf16>, vector<16x128xbf16>, vector<4x128xf32> -> vector<4x128xf32>
    %c8_203 = arith.constant 8 : index
    %c0_204 = arith.constant 0 : index
    %c0_205 = arith.constant 0 : index
    %188 = vector.load %arg18[%c8_203, %c0_204, %c0_205] : memref<9x4x16xbf16, #tpu.memory_space<vmem>>, vector<1x4x16xbf16>
    %189 = vector.shape_cast %188 : vector<1x4x16xbf16> to vector<4x16xbf16>
    %cst_206 = arith.constant dense<0.000000e+00> : vector<4x128xf32>
    %190 = tpu.matmul %189, %163, %cst_206 {dimension_numbers = #tpu.dot_dimension_numbers<[1], [0], [0], [1], [0, 0, 1, 1], [], []>} : vector<4x16xbf16>, vector<16x128xbf16>, vector<4x128xf32> -> vector<4x128xf32>
    %191 = tpu.concatenate %166, %169, %172, %175, %178, %181, %184, %187, %190 in 1 : vector<4x128xf32>, vector<4x128xf32>, vector<4x128xf32>, vector<4x128xf32>, vector<4x128xf32>, vector<4x128xf32>, vector<4x128xf32>, vector<4x128xf32>, vector<4x128xf32> -> vector<4x1152xf32>
    %192 = arith.truncf %191 : vector<4x1152xf32> to vector<4x1152xbf16>
    %c0_207 = arith.constant 0 : index
    %c0_208 = arith.constant 0 : index
    %193 = vector.load %arg20[%c0_207, %c0_208] : memref<1152x256xbf16, #tpu.memory_space<vmem>>, vector<1152x256xbf16>
    %cst_209 = arith.constant dense<0.000000e+00> : vector<4x256xf32>
    %194 = tpu.matmul %192, %193, %cst_209 {dimension_numbers = #tpu.dot_dimension_numbers<[1], [0], [0], [1], [0, 0, 1, 1], [], []>} : vector<4x1152xbf16>, vector<1152x256xbf16>, vector<4x256xf32> -> vector<4x256xf32>
    %c0_210 = arith.constant 0 : index
    %c0_211 = arith.constant 0 : index
    %195 = vector.load %arg23[%c0_210, %c0_211] : memref<1x256xf32, #tpu.memory_space<vmem>>, vector<1x256xf32>
    %196 = vector.broadcast %195 : vector<1x256xf32> to vector<4x256xf32>
    %197 = arith.addf %194, %196 : vector<4x256xf32>
    %cst_212 = arith.constant 0.000000e+00 : f32
    %198 = vector.broadcast %cst_212 : f32 to vector<4x256xf32>
    %199 = arith.maximumf %197, %198 : vector<4x256xf32>
    %200 = arith.truncf %178 : vector<4x128xf32> to vector<4x128xbf16>
    %c0_213 = arith.constant 0 : index
    %c0_214 = arith.constant 0 : index
    %201 = vector.load %arg22[%c0_213, %c0_214] : memref<128x256xbf16, #tpu.memory_space<vmem>>, vector<128x256xbf16>
    %cst_215 = arith.constant dense<0.000000e+00> : vector<4x256xf32>
    %202 = tpu.matmul %200, %201, %cst_215 {dimension_numbers = #tpu.dot_dimension_numbers<[1], [0], [0], [1], [0, 0, 1, 1], [], []>} : vector<4x128xbf16>, vector<128x256xbf16>, vector<4x256xf32> -> vector<4x256xf32>
    %c0_216 = arith.constant 0 : index
    %c0_217 = arith.constant 0 : index
    %203 = vector.load %arg25[%c0_216, %c0_217] : memref<1x256xf32, #tpu.memory_space<vmem>>, vector<1x256xf32>
    %204 = vector.broadcast %203 : vector<1x256xf32> to vector<4x256xf32>
    %205 = arith.addf %202, %204 : vector<4x256xf32>
    %206 = arith.truncf %199 : vector<4x256xf32> to vector<4x256xbf16>
    %c0_218 = arith.constant 0 : index
    %c0_219 = arith.constant 0 : index
    %c0_220 = arith.constant 0 : index
    %207 = vector.load %arg19[%c0_218, %c0_219, %c0_220] : memref<9x4x4xbf16, #tpu.memory_space<vmem>>, vector<1x4x4xbf16>
    %208 = vector.shape_cast %207 : vector<1x4x4xbf16> to vector<4x4xbf16>
    %cst_221 = arith.constant dense<0.000000e+00> : vector<4x256xf32>
    %209 = tpu.matmul %208, %206, %cst_221 {dimension_numbers = #tpu.dot_dimension_numbers<[1], [0], [0], [1], [0, 0, 1, 1], [], []>} : vector<4x4xbf16>, vector<4x256xbf16>, vector<4x256xf32> -> vector<4x256xf32>
    %c1_222 = arith.constant 1 : index
    %c0_223 = arith.constant 0 : index
    %c0_224 = arith.constant 0 : index
    %210 = vector.load %arg19[%c1_222, %c0_223, %c0_224] : memref<9x4x4xbf16, #tpu.memory_space<vmem>>, vector<1x4x4xbf16>
    %211 = vector.shape_cast %210 : vector<1x4x4xbf16> to vector<4x4xbf16>
    %cst_225 = arith.constant dense<0.000000e+00> : vector<4x256xf32>
    %212 = tpu.matmul %211, %206, %cst_225 {dimension_numbers = #tpu.dot_dimension_numbers<[1], [0], [0], [1], [0, 0, 1, 1], [], []>} : vector<4x4xbf16>, vector<4x256xbf16>, vector<4x256xf32> -> vector<4x256xf32>
    %c2_226 = arith.constant 2 : index
    %c0_227 = arith.constant 0 : index
    %c0_228 = arith.constant 0 : index
    %213 = vector.load %arg19[%c2_226, %c0_227, %c0_228] : memref<9x4x4xbf16, #tpu.memory_space<vmem>>, vector<1x4x4xbf16>
    %214 = vector.shape_cast %213 : vector<1x4x4xbf16> to vector<4x4xbf16>
    %cst_229 = arith.constant dense<0.000000e+00> : vector<4x256xf32>
    %215 = tpu.matmul %214, %206, %cst_229 {dimension_numbers = #tpu.dot_dimension_numbers<[1], [0], [0], [1], [0, 0, 1, 1], [], []>} : vector<4x4xbf16>, vector<4x256xbf16>, vector<4x256xf32> -> vector<4x256xf32>
    %c3_230 = arith.constant 3 : index
    %c0_231 = arith.constant 0 : index
    %c0_232 = arith.constant 0 : index
    %216 = vector.load %arg19[%c3_230, %c0_231, %c0_232] : memref<9x4x4xbf16, #tpu.memory_space<vmem>>, vector<1x4x4xbf16>
    %217 = vector.shape_cast %216 : vector<1x4x4xbf16> to vector<4x4xbf16>
    %cst_233 = arith.constant dense<0.000000e+00> : vector<4x256xf32>
    %218 = tpu.matmul %217, %206, %cst_233 {dimension_numbers = #tpu.dot_dimension_numbers<[1], [0], [0], [1], [0, 0, 1, 1], [], []>} : vector<4x4xbf16>, vector<4x256xbf16>, vector<4x256xf32> -> vector<4x256xf32>
    %c4_234 = arith.constant 4 : index
    %c0_235 = arith.constant 0 : index
    %c0_236 = arith.constant 0 : index
    %219 = vector.load %arg19[%c4_234, %c0_235, %c0_236] : memref<9x4x4xbf16, #tpu.memory_space<vmem>>, vector<1x4x4xbf16>
    %220 = vector.shape_cast %219 : vector<1x4x4xbf16> to vector<4x4xbf16>
    %cst_237 = arith.constant dense<0.000000e+00> : vector<4x256xf32>
    %221 = tpu.matmul %220, %206, %cst_237 {dimension_numbers = #tpu.dot_dimension_numbers<[1], [0], [0], [1], [0, 0, 1, 1], [], []>} : vector<4x4xbf16>, vector<4x256xbf16>, vector<4x256xf32> -> vector<4x256xf32>
    %c5_238 = arith.constant 5 : index
    %c0_239 = arith.constant 0 : index
    %c0_240 = arith.constant 0 : index
    %222 = vector.load %arg19[%c5_238, %c0_239, %c0_240] : memref<9x4x4xbf16, #tpu.memory_space<vmem>>, vector<1x4x4xbf16>
    %223 = vector.shape_cast %222 : vector<1x4x4xbf16> to vector<4x4xbf16>
    %cst_241 = arith.constant dense<0.000000e+00> : vector<4x256xf32>
    %224 = tpu.matmul %223, %206, %cst_241 {dimension_numbers = #tpu.dot_dimension_numbers<[1], [0], [0], [1], [0, 0, 1, 1], [], []>} : vector<4x4xbf16>, vector<4x256xbf16>, vector<4x256xf32> -> vector<4x256xf32>
    %c6_242 = arith.constant 6 : index
    %c0_243 = arith.constant 0 : index
    %c0_244 = arith.constant 0 : index
    %225 = vector.load %arg19[%c6_242, %c0_243, %c0_244] : memref<9x4x4xbf16, #tpu.memory_space<vmem>>, vector<1x4x4xbf16>
    %226 = vector.shape_cast %225 : vector<1x4x4xbf16> to vector<4x4xbf16>
    %cst_245 = arith.constant dense<0.000000e+00> : vector<4x256xf32>
    %227 = tpu.matmul %226, %206, %cst_245 {dimension_numbers = #tpu.dot_dimension_numbers<[1], [0], [0], [1], [0, 0, 1, 1], [], []>} : vector<4x4xbf16>, vector<4x256xbf16>, vector<4x256xf32> -> vector<4x256xf32>
    %c7_246 = arith.constant 7 : index
    %c0_247 = arith.constant 0 : index
    %c0_248 = arith.constant 0 : index
    %228 = vector.load %arg19[%c7_246, %c0_247, %c0_248] : memref<9x4x4xbf16, #tpu.memory_space<vmem>>, vector<1x4x4xbf16>
    %229 = vector.shape_cast %228 : vector<1x4x4xbf16> to vector<4x4xbf16>
    %cst_249 = arith.constant dense<0.000000e+00> : vector<4x256xf32>
    %230 = tpu.matmul %229, %206, %cst_249 {dimension_numbers = #tpu.dot_dimension_numbers<[1], [0], [0], [1], [0, 0, 1, 1], [], []>} : vector<4x4xbf16>, vector<4x256xbf16>, vector<4x256xf32> -> vector<4x256xf32>
    %c8_250 = arith.constant 8 : index
    %c0_251 = arith.constant 0 : index
    %c0_252 = arith.constant 0 : index
    %231 = vector.load %arg19[%c8_250, %c0_251, %c0_252] : memref<9x4x4xbf16, #tpu.memory_space<vmem>>, vector<1x4x4xbf16>
    %232 = vector.shape_cast %231 : vector<1x4x4xbf16> to vector<4x4xbf16>
    %cst_253 = arith.constant dense<0.000000e+00> : vector<4x256xf32>
    %233 = tpu.matmul %232, %206, %cst_253 {dimension_numbers = #tpu.dot_dimension_numbers<[1], [0], [0], [1], [0, 0, 1, 1], [], []>} : vector<4x4xbf16>, vector<4x256xbf16>, vector<4x256xf32> -> vector<4x256xf32>
    %234 = tpu.concatenate %209, %212, %215, %218, %221, %224, %227, %230, %233 in 1 : vector<4x256xf32>, vector<4x256xf32>, vector<4x256xf32>, vector<4x256xf32>, vector<4x256xf32>, vector<4x256xf32>, vector<4x256xf32>, vector<4x256xf32>, vector<4x256xf32> -> vector<4x2304xf32>
    %235 = arith.truncf %234 : vector<4x2304xf32> to vector<4x2304xbf16>
    %c0_254 = arith.constant 0 : index
    %c0_255 = arith.constant 0 : index
    %236 = vector.load %arg21[%c0_254, %c0_255] : memref<2304x256xbf16, #tpu.memory_space<vmem>>, vector<2304x256xbf16>
    %cst_256 = arith.constant dense<0.000000e+00> : vector<4x256xf32>
    %237 = tpu.matmul %235, %236, %cst_256 {dimension_numbers = #tpu.dot_dimension_numbers<[1], [0], [0], [1], [0, 0, 1, 1], [], []>} : vector<4x2304xbf16>, vector<2304x256xbf16>, vector<4x256xf32> -> vector<4x256xf32>
    %c0_257 = arith.constant 0 : index
    %c0_258 = arith.constant 0 : index
    %238 = vector.load %arg24[%c0_257, %c0_258] : memref<1x256xf32, #tpu.memory_space<vmem>>, vector<1x256xf32>
    %239 = vector.broadcast %238 : vector<1x256xf32> to vector<4x256xf32>
    %240 = arith.addf %237, %239 : vector<4x256xf32>
    %241 = arith.addf %240, %205 : vector<4x256xf32>
    %cst_259 = arith.constant 0.000000e+00 : f32
    %242 = vector.broadcast %cst_259 : f32 to vector<4x256xf32>
    %243 = arith.maximumf %241, %242 : vector<4x256xf32>
    %cst_260 = arith.constant dense<0.000000e+00> : vector<256xf32>
    %244 = vector.multi_reduction <add>, %243, %cst_260 [0] : vector<4x256xf32> to vector<256xf32>
    %245 = vector.shape_cast %244 : vector<256xf32> to vector<1x256xf32>
    %cst_261 = arith.constant 4.000000e+00 : f32
    %246 = vector.broadcast %cst_261 : f32 to vector<1x256xf32>
    %247 = arith.divf %245, %246 : vector<1x256xf32>
    %c0_262 = arith.constant 0 : index
    %c0_263 = arith.constant 0 : index
    %c0_264 = arith.constant 0 : index
    %248 = vector.load %arg26[%c0_262, %c0_263, %c0_264] : memref<1x1x256xf32, #tpu.memory_space<vmem>>, vector<1x1x256xf32>
    %249 = vector.shape_cast %248 : vector<1x1x256xf32> to vector<1x256xf32>
    %250 = vector.shape_cast %247 : vector<1x256xf32> to vector<1x1x256xf32>
    tpu.vector_store %arg26[%c0_262, %c0_263, %c0_264], %250 {strides = array<i32>} : memref<1x1x256xf32, #tpu.memory_space<vmem>>, vector<1x1x256xf32>,
    return
  }
  func.func @transform_0(%arg0: i32) -> (i32, i32, i32) {
    %c0_i32 = arith.constant 0 : i32
    %c0_i32_0 = arith.constant 0 : i32
    %c0_i32_1 = arith.constant 0 : i32
    return %arg0, %c0_i32, %c0_i32_0 : i32, i32, i32
  }
  func.func @transform_1(%arg0: i32) -> (i32, i32, i32) {
    %c0_i32 = arith.constant 0 : i32
    %c0_i32_0 = arith.constant 0 : i32
    %c0_i32_1 = arith.constant 0 : i32
    %c0_i32_2 = arith.constant 0 : i32
    return %c0_i32, %c0_i32_0, %c0_i32_1 : i32, i32, i32
  }
  func.func @transform_2(%arg0: i32) -> (i32, i32, i32) {
    %c0_i32 = arith.constant 0 : i32
    %c0_i32_0 = arith.constant 0 : i32
    %c0_i32_1 = arith.constant 0 : i32
    %c0_i32_2 = arith.constant 0 : i32
    return %c0_i32, %c0_i32_0, %c0_i32_1 : i32, i32, i32
  }
  func.func @transform_3(%arg0: i32) -> (i32, i32) {
    %c0_i32 = arith.constant 0 : i32
    %c0_i32_0 = arith.constant 0 : i32
    %c0_i32_1 = arith.constant 0 : i32
    return %c0_i32, %c0_i32_0 : i32, i32
  }
  func.func @transform_4(%arg0: i32) -> (i32, i32) {
    %c0_i32 = arith.constant 0 : i32
    %c0_i32_0 = arith.constant 0 : i32
    %c0_i32_1 = arith.constant 0 : i32
    return %c0_i32, %c0_i32_0 : i32, i32
  }
  func.func @transform_5(%arg0: i32) -> (i32, i32) {
    %c0_i32 = arith.constant 0 : i32
    %c0_i32_0 = arith.constant 0 : i32
    %c0_i32_1 = arith.constant 0 : i32
    return %c0_i32, %c0_i32_0 : i32, i32
  }
  func.func @transform_6(%arg0: i32) -> (i32, i32) {
    %c0_i32 = arith.constant 0 : i32
    %c0_i32_0 = arith.constant 0 : i32
    %c0_i32_1 = arith.constant 0 : i32
    return %c0_i32, %c0_i32_0 : i32, i32
  }
  func.func @transform_7(%arg0: i32) -> (i32, i32) {
    %c0_i32 = arith.constant 0 : i32
    %c0_i32_0 = arith.constant 0 : i32
    %c0_i32_1 = arith.constant 0 : i32
    return %c0_i32, %c0_i32_0 : i32, i32
  }
  func.func @transform_8(%arg0: i32) -> (i32, i32) {
    %c0_i32 = arith.constant 0 : i32
    %c0_i32_0 = arith.constant 0 : i32
    %c0_i32_1 = arith.constant 0 : i32
    return %c0_i32, %c0_i32_0 : i32, i32
  }
  func.func @transform_9(%arg0: i32) -> (i32, i32, i32) {
    %c0_i32 = arith.constant 0 : i32
    %c0_i32_0 = arith.constant 0 : i32
    %c0_i32_1 = arith.constant 0 : i32
    %c0_i32_2 = arith.constant 0 : i32
    return %c0_i32, %c0_i32_0, %c0_i32_1 : i32, i32, i32
  }
  func.func @transform_10(%arg0: i32) -> (i32, i32, i32) {
    %c0_i32 = arith.constant 0 : i32
    %c0_i32_0 = arith.constant 0 : i32
    %c0_i32_1 = arith.constant 0 : i32
    %c0_i32_2 = arith.constant 0 : i32
    return %c0_i32, %c0_i32_0, %c0_i32_1 : i32, i32, i32
  }
  func.func @transform_11(%arg0: i32) -> (i32, i32) {
    %c0_i32 = arith.constant 0 : i32
    %c0_i32_0 = arith.constant 0 : i32
    %c0_i32_1 = arith.constant 0 : i32
    return %c0_i32, %c0_i32_0 : i32, i32
  }
  func.func @transform_12(%arg0: i32) -> (i32, i32) {
    %c0_i32 = arith.constant 0 : i32
    %c0_i32_0 = arith.constant 0 : i32
    %c0_i32_1 = arith.constant 0 : i32
    return %c0_i32, %c0_i32_0 : i32, i32
  }
  func.func @transform_13(%arg0: i32) -> (i32, i32) {
    %c0_i32 = arith.constant 0 : i32
    %c0_i32_0 = arith.constant 0 : i32
    %c0_i32_1 = arith.constant 0 : i32
    return %c0_i32, %c0_i32_0 : i32, i32
  }
  func.func @transform_14(%arg0: i32) -> (i32, i32) {
    %c0_i32 = arith.constant 0 : i32
    %c0_i32_0 = arith.constant 0 : i32
    %c0_i32_1 = arith.constant 0 : i32
    return %c0_i32, %c0_i32_0 : i32, i32
  }
  func.func @transform_15(%arg0: i32) -> (i32, i32) {
    %c0_i32 = arith.constant 0 : i32
    %c0_i32_0 = arith.constant 0 : i32
    %c0_i32_1 = arith.constant 0 : i32
    return %c0_i32, %c0_i32_0 : i32, i32
  }
  func.func @transform_16(%arg0: i32) -> (i32, i32) {
    %c0_i32 = arith.constant 0 : i32
    %c0_i32_0 = arith.constant 0 : i32
    %c0_i32_1 = arith.constant 0 : i32
    return %c0_i32, %c0_i32_0 : i32, i32
  }
  func.func @transform_17(%arg0: i32) -> (i32, i32, i32) {
    %c0_i32 = arith.constant 0 : i32
    %c0_i32_0 = arith.constant 0 : i32
    %c0_i32_1 = arith.constant 0 : i32
    %c0_i32_2 = arith.constant 0 : i32
    return %c0_i32, %c0_i32_0, %c0_i32_1 : i32, i32, i32
  }
  func.func @transform_18(%arg0: i32) -> (i32, i32, i32) {
    %c0_i32 = arith.constant 0 : i32
    %c0_i32_0 = arith.constant 0 : i32
    %c0_i32_1 = arith.constant 0 : i32
    %c0_i32_2 = arith.constant 0 : i32
    return %c0_i32, %c0_i32_0, %c0_i32_1 : i32, i32, i32
  }
  func.func @transform_19(%arg0: i32) -> (i32, i32) {
    %c0_i32 = arith.constant 0 : i32
    %c0_i32_0 = arith.constant 0 : i32
    %c0_i32_1 = arith.constant 0 : i32
    return %c0_i32, %c0_i32_0 : i32, i32
  }
  func.func @transform_20(%arg0: i32) -> (i32, i32) {
    %c0_i32 = arith.constant 0 : i32
    %c0_i32_0 = arith.constant 0 : i32
    %c0_i32_1 = arith.constant 0 : i32
    return %c0_i32, %c0_i32_0 : i32, i32
  }
  func.func @transform_21(%arg0: i32) -> (i32, i32) {
    %c0_i32 = arith.constant 0 : i32
    %c0_i32_0 = arith.constant 0 : i32
    %c0_i32_1 = arith.constant 0 : i32
    return %c0_i32, %c0_i32_0 : i32, i32
  }
  func.func @transform_22(%arg0: i32) -> (i32, i32) {
    %c0_i32 = arith.constant 0 : i32
    %c0_i32_0 = arith.constant 0 : i32
    %c0_i32_1 = arith.constant 0 : i32
    return %c0_i32, %c0_i32_0 : i32, i32
  }
  func.func @transform_23(%arg0: i32) -> (i32, i32) {
    %c0_i32 = arith.constant 0 : i32
    %c0_i32_0 = arith.constant 0 : i32
    %c0_i32_1 = arith.constant 0 : i32
    return %c0_i32, %c0_i32_0 : i32, i32
  }
  func.func @transform_24(%arg0: i32) -> (i32, i32) {
    %c0_i32 = arith.constant 0 : i32
    %c0_i32_0 = arith.constant 0 : i32
    %c0_i32_1 = arith.constant 0 : i32
    return %c0_i32, %c0_i32_0 : i32, i32
  }
  func.func @transform_25(%arg0: i32) -> (i32, i32, i32) {
    %c0_i32 = arith.constant 0 : i32
    %c0_i32_0 = arith.constant 0 : i32
    %c0_i32_1 = arith.constant 0 : i32
    return %arg0, %c0_i32, %c0_i32_0 : i32, i32, i32
  }
}

</mosaic_0001>

<bundles_post_ra>
// kernel: route_forward.1
= control target key start
LH: loop header
LB: loop body
LE: loop exit
PB: predicated region body
PF: predicated region fallthrough
CT: control target
= control target key end

     0   :  { %s18204_s0 = inlined_call_operand.vmem [shape: bf16[2,256,64], index: 0, kind: input, shape index: {}]   ;;  %s18205_s1 = inlined_call_operand.hbm [shape: bf16[9,64,256], index: 1, kind: input, shape index: {}]   ;;  %s18206_s2 = inlined_call_operand.hbm [shape: bf16[9,64,64], index: 2, kind: input, shape index: {}]   ;;  %s18207_s3 = inlined_call_operand.vmem [shape: bf16[576,64], index: 3, kind: input, shape index: {}]   ;;  %s18208_s4 = inlined_call_operand.vmem [shape: bf16[576,64], index: 4, kind: input, shape index: {}]   ;;  %s18209_s5 = inlined_call_operand.hbm [shape: bf16[64,64], index: 5, kind: input, shape index: {}]   ;;  %s18210_s6 = inlined_call_operand.hbm [shape: f32[1,64], index: 6, kind: input, shape index: {}]   ;;  %s18211_s7 = inlined_call_operand.hbm [shape: f32[1,64], index: 7, kind: input, shape index: {}]   ;;  %s18212_s8 = inlined_call_operand.hbm [shape: f32[1,64], index: 8, kind: input, shape index: {}]   ;;  %s18213_s9 = inlined_call_operand.hbm [shape: bf16[9,16,64], index: 9, kind: input, shape index: {}]   ;;  %s18214_s10 = inlined_call_operand.hbm [shape: bf16[9,16,16], index: 10, kind: input, shape index: {}]   ;;  %s18215_s11 = inlined_call_operand.hbm [shape: bf16[576,128], index: 11, kind: input, shape index: {}]   ;;  %s18216_s12 = inlined_call_operand.hbm [shape: bf16[1152,128], index: 12, kind: input, shape index: {}]   ;;  %s18217_s13 = inlined_call_operand.hbm [shape: bf16[64,128], index: 13, kind: input, shape index: {}]   ;;  %s18218_s14 = inlined_call_operand.hbm [shape: f32[1,128], index: 14, kind: input, shape index: {}]   ;;  %s18219_s15 = inlined_call_operand.hbm [shape: f32[1,128], index: 15, kind: input, shape index: {}]   ;;  %s18220_s16 = inlined_call_operand.hbm [shape: f32[1,128], index: 16, kind: input, shape index: {}]   ;;  %s18221_s17 = inlined_call_operand.hbm [shape: bf16[9,4,16], index: 17, kind: input, shape index: {}]   ;;  %s18222_s18 = inlined_call_operand.vmem [shape: bf16[9,4,4], index: 18, kind: input, shape index: {}]   ;;  %s18223_s19 = inlined_call_operand.vmem [shape: bf16[1152,256], index: 19, kind: input, shape index: {}]   ;;  %s18224_s20 = inlined_call_operand.hbm [shape: bf16[2304,256], index: 20, kind: input, shape index: {}]   ;;  %s18225_s21 = inlined_call_operand.hbm [shape: bf16[128,256], index: 21, kind: input, shape index: {}]   ;;  %s18226_s22 = inlined_call_operand.hbm [shape: f32[1,256], index: 22, kind: input, shape index: {}]   ;;  %s18227_s23 = inlined_call_operand.hbm [shape: f32[1,256], index: 23, kind: input, shape index: {}]   ;;  %s18228_s24 = inlined_call_operand.hbm [shape: f32[1,256], index: 24, kind: input, shape index: {}]   ;;  %s18229_s25 = inlined_call_operand.hbm [shape: f32[2,1,256], index: 25, kind: output, shape index: {}]  }
   0x1   :  { %18250 = sst [smem:[#allocation56_spill]] %s18204_s0 }
   0x2   :  { %18251 = sst [smem:[#allocation57_spill]] %s18205_s1 }
   0x3   :  { %18252 = sst [smem:[#allocation58_spill]] %s18206_s2 }
   0x4   :  { %18253 = sst [smem:[#allocation59_spill]] %s18207_s3 }
   0x5   :  { %18254 = sst [smem:[#allocation60_spill]] %s18208_s4 }
   0x6   :  { %18255 = sst [smem:[#allocation61_spill]] %s18209_s5 }
   0x7   :  { %18256 = sst [smem:[#allocation62_spill]] %s18210_s6 }
   0x8   :  { %18257 = sst [smem:[#allocation63_spill]] %s18211_s7 }
   0x9   :  { %18258 = sst [smem:[#allocation64_spill]] %s18212_s8 }
   0xa   :  { %18259 = sst [smem:[#allocation65_spill]] %s18213_s9 }
   0xb   :  { %18260 = sst [smem:[#allocation66_spill]] %s18222_s18 }
   0xc   :  { %18261 = sst [smem:[#allocation67_spill]] %s18229_s25 }
   0xd   :  { %30 = vsyncpa [#allocation3], 0 }
   0xe   :  { %31 = vsyncpa [#allocation6], 0 }
   0xf   :  { %32 = vsyncpa [#allocation9], 0 }
  0x10   :  { %33 = vsyncpa [#allocation12], 0 }
  0x11   :  { %34 = vsyncpa [#allocation15], 0 }
  0x12   :  { %35 = vsyncpa [#allocation18], 0 }
  0x13   :  { %36 = vsyncpa [#allocation21], 0 }
  0x14   :  { %37 = vsyncpa [#allocation24], 0 }
  0x15   :  { %38 = vsyncpa [#allocation27], 0 }
  0x16   :  { %39 = vsyncpa [#allocation30], 0 }
  0x17   :  { %40 = vsyncpa [#allocation33], 0 }
  0x18   :  { %41 = vsyncpa [#allocation4], 0 }
  0x19   :  { %43 = vsyncpa [#allocation4 + $0x1], 0  ;;  %s15971_s29 = smov 0   ;;  %s15973_s2 = smov 0  }
  0x1a   :  { %s15975_s6 = smov 0   ;;  %s15977_s30 = smov 0  }
  0x1b LB: > { %18262 = sst [smem:[#allocation47_spill]] %s15795_s29  ;;  %s15992_s7 = sadd.s32 4294967295, %s15807_s30   ;;  %s15807_s30 = sphi %s15977_s30, %s18322_s30   ;;  %s15803_s6 = sphi %s15975_s6, %s18325_s6   ;;  %s15799_s2 = sphi %s15973_s2, %s18324_s2   ;;  %s15795_s29 = sphi %s15971_s29, %s18323_s29  }
  0x1c   : > { %18263 = sst [smem:[#allocation48_spill]] %s15799_s2  ;;  %s11457_s3 = sadd.s32 4294967294, %s15807_s30  }
  0x1d   : > { %18264 = sst [smem:[#allocation49_spill]] %s15803_s6  ;;  %s15996_s26 = sadd.s32 1, %s15807_s30  }
  0x1e   : > { %18265 = sst [smem:[#allocation50_spill]] %s15807_s30  ;;  %s586_s1 = sadd.s32 1, %s15803_s6 }
  0x1f   : > { %18266 = sst [smem:[#allocation51_spill]] %s15996_s26  ;;  %s583_s8 = ssub.s32 %s15807_s30, %s15996_s26 }
  0x20   : > { %p596_p0 = scmp.ne.s32.totalorder %s15803_s6, %s15799_s2  ;;  %p584_p1 = scmp.eq.s32.totalorder %s583_s8, 0 }
  0x21   : > { %p597_p2 = scmp.eq.s32.totalorder %s15992_s7, 1  ;;  %p602_p3 = scmp.ne.s32.totalorder %s15799_s2, %s15795_s29 }
  0x22   : > { %p603_p4 = scmp.eq.s32.totalorder %s11457_s3, 1  ;;  %p11458_p7 = scmp.ge.s32.totalorder %s15807_s30, 1 }
  0x23   : > { %s16007_s27 = scalar_select %p584_p1, %s15803_s6, %s586_s1  }
  0x24   : > { %p16009_p5 = por %p597_p2, %p596_p0  ;;  %p16013_p6 = por %p603_p4, %p602_p3 }
  0x25   : > { %18267 = sst [smem:[#allocation52_spill]] %s16007_s27  ;;  %p610_p8 = scmp.lt.s32.totalorder %s15807_s30, 3 }
  0x26   : > { %s18268_s4 = scalar_select %p16009_p5, 1, 0 }
  0x27   : > { %s18270_s28 = scalar_select %p16013_p6, 1, 0 }
  0x28   : > { %18269 = sst [smem:[#allocation53_spill]] %s18268_s4  ;;  %p18243_p9 = scmp.eq.s32.totalorder %s15992_s7, 0 }
  0x29   : > { %18271 = sst [smem:[#allocation54_spill]] %s18270_s28  ;;  %p16020_p10 = pnand %p11458_p7, %p610_p8 }
  0x2a   : > { %s15809_s5 = smov [#allocation5]   ;;  %s15810_s1 = smov [#allocation8]  }
  0x2b   : > { %s18272_s9 = scalar_select %p16020_p10, 1, 0 }
  0x2c   : > { %s635_s0 = sshll.u32 %s15809_s5, 4  ;;  %p13780_p11 = pneg %p16020_p10  ;;  %s636_s0 = int_to_ptr.vmem [resolvable:$true] %s635_s0 }
  0x2d   : > { %s668_s8 = sshll.u32 %s15810_s1, 4  ;;  %s15811_s27 = smov [#allocation11]   ;;  %s669_s8 = int_to_ptr.vmem [resolvable:$true] %s668_s8 }
  0x2e   : > { %p16028_p12 = pnand %p18243_p9, %p13780_p11  ;;  %s690_s6 = sshll.u32 %s15811_s27, 4  ;;  %s691_s6 = int_to_ptr.vmem [resolvable:$true] %s690_s6 }
  0x2f   : > { %s15194_s5 = scalar_lea.vmem %s636_s0, 4608  ;;  %p15202_p3 = scmp.lt.s32.totalorder %s636_s0, %s636_s0 }
  0x30   : > { %p16034_p13 = pneg %p16028_p12  ;;  %p15195_p0 = scmp.ne.s32.totalorder %s636_s0, %s15194_s5 }
  0x31   : > { %p15203_p4 = scmp.lt.s32.totalorder %s15194_s5, %s15194_s5 }
  0x32   : > { %p15197_p1 = pnand %p15195_p0, %p16034_p13 }
  0x33   : > { %p15204_p7 = por %p15203_p4, %p15202_p3 }
  0x34   : > { %p15198_p2 = pneg %p15197_p1 }
  0x36   : > { %p15205_p8 = pnand %p15204_p7, %p15198_p2 }
  0x38   : > { %15208 = shalt.err (!%p15205_p8)
}
  0x39   : > { %s15812_s1 = smov 64   ;;  %s15813_s27 = smov 4  }
  0x3a   : > { %s18275_s30 = sld [smem:[#allocation58_spill]]  ;;  %s15220_s25 = scalar_lea.vmem %s669_s8, 16 }
  0x3b   : > { %p15221_p11 = scmp.ne.s32.totalorder %s669_s8, %s15220_s25  ;;  %s15227_s5 = scalar_lea.vmem %s669_s8, 32 }
  0x3c   : > { %p15228_p2 = scmp.lt.s32.totalorder %s669_s8, %s669_s8  ;;  %p15229_p3 = scmp.lt.s32.totalorder %s15227_s5, %s15220_s25 }
  0x3d   : > { %p15223_p0 = pnand %p15221_p11, %p16034_p13 }
  0x3e   : > { %p15230_p4 = por %p15229_p3, %p15228_p2 }
  0x3f   : > { %p15224_p1 = pneg %p15223_p0 }
  0x40   : > { %13786 = dma.hbm_to_vmem [thread:$0]  (!%p16028_p12), %s18275_s30, 4608, %s636_s0, [#allocation6], %s15812_s1, %s15812_s1, %s15813_s27  }
  0x41   : > { %p15231_p7 = pnand %p15230_p4, %p15224_p1 }
  0x43   : > { %15234 = shalt.err (!%p15231_p7)
}
  0x44   : > { %s18276_s18 = sld [smem:[#allocation62_spill]]  ;;  %s15246_s29 = scalar_lea.vmem %s691_s6, 16 }
  0x45   : > { %p15247_p8 = scmp.ne.s32.totalorder %s691_s6, %s15246_s29  ;;  %s15253_s30 = scalar_lea.vmem %s691_s6, 32 }
  0x46   : > { %p15254_p0 = scmp.lt.s32.totalorder %s691_s6, %s691_s6  ;;  %p15255_p6 = scmp.lt.s32.totalorder %s15253_s30, %s15246_s29 }
  0x47   : > { %p15249_p9 = pnand %p15247_p8, %p16034_p13 }
  0x48   : > { %p15256_p5 = por %p15255_p6, %p15254_p0 }
  0x49   : > { %p15250_p11 = pneg %p15249_p9 }
  0x4a   : > { %13792 = dma.hbm_to_vmem [thread:$0]  (!%p16028_p12), %s18276_s18, 16, %s669_s8, [#allocation9]  }
  0x4b   : > { %p15257_p2 = pnand %p15256_p5, %p15250_p11 }
  0x4d   : > { %15260 = shalt.err (!%p15257_p2)
}
  0x4e   : > { %s18277_s0 = sld [smem:[#allocation64_spill]]  ;;  %s15814_s18 = smov [#allocation14]  }
  0x4f   : > { %s713_s2 = sshll.u32 %s15814_s18, 4  ;;  %s15815_s4 = smov [#allocation17]   ;;  %s714_s2 = int_to_ptr.vmem [resolvable:$true] %s713_s2 }
  0x50   : > { %s739_s8 = sshll.u32 %s15815_s4, 4  ;;  %s15272_s5 = scalar_lea.vmem %s714_s2, 1152  ;;  %s740_s8 = int_to_ptr.vmem [resolvable:$true] %s739_s8 }
  0x51   : > { %p15273_p9 = scmp.ne.s32.totalorder %s714_s2, %s15272_s5  ;;  %p15280_p6 = scmp.lt.s32.totalorder %s714_s2, %s714_s2 }
  0x52   : > { %p15281_p5 = scmp.lt.s32.totalorder %s15272_s5, %s15272_s5 }
  0x53   : > { %p15275_p1 = pnand %p15273_p9, %p16034_p13 }
  0x54   : > { %13798 = dma.hbm_to_vmem [thread:$0]  (!%p16028_p12), %s18277_s0, 16, %s691_s6, [#allocation12]  }
  0x55   : > { %p15276_p3 = pneg %p15275_p1  ;;  %p15282_p4 = por %p15281_p5, %p15280_p6 }
  0x57   : > { %p15283_p7 = pnand %p15282_p4, %p15276_p3 }
  0x59   : > { %15286 = shalt.err (!%p15283_p7)
}
  0x5a   : > { %13804 = dma.hbm_to_vmem [thread:$0]  (!%p16028_p12), %s18214_s10, 1152, %s714_s2, [#allocation15], %s15812_s1, %s15812_s1, %s15813_s27  }
  0x5b   : > { %s15298_s30 = scalar_lea.vmem %s740_s8, 9216  ;;  %p15306_p2 = scmp.lt.s32.totalorder %s740_s8, %s740_s8 }
  0x5c   : > { %p15299_p8 = scmp.ne.s32.totalorder %s740_s8, %s15298_s30  ;;  %p15307_p9 = scmp.lt.s32.totalorder %s15298_s30, %s15298_s30 }
  0x5e   : > { %p15301_p11 = pnand %p15299_p8, %p16034_p13  ;;  %p15308_p1 = por %p15307_p9, %p15306_p2 }
  0x60   : > { %p15302_p0 = pneg %p15301_p11 }
  0x62   : > { %p15309_p3 = pnand %p15308_p1, %p15302_p0 }
  0x64   : > { %15312 = shalt.err (!%p15309_p3)
}
  0x65   : > { %13810 = dma.hbm_to_vmem [thread:$0]  (!%p16028_p12), %s18216_s12, 9216, %s740_s8, [#allocation18], %s15812_s1, %s15812_s1, %s15813_s27  }
  0x66   : > { %s15816_s0 = smov [#allocation20]   ;;  %s15817_s2 = smov [#allocation23]  }
  0x67   : > { %s766_s18 = sshll.u32 %s15816_s0, 4  ;;  %s788_s4 = sshll.u32 %s15817_s2, 4  ;;  %s767_s18 = int_to_ptr.vmem [resolvable:$true] %s766_s18  ;;  %s789_s4 = int_to_ptr.vmem [resolvable:$true] %s788_s4 }
  0x68   : > { %s15324_s5 = scalar_lea.vmem %s767_s18, 16  ;;  %s15331_s6 = scalar_lea.vmem %s767_s18, 32 }
  0x69   : > { %p15325_p6 = scmp.ne.s32.totalorder %s767_s18, %s15324_s5  ;;  %p15332_p7 = scmp.lt.s32.totalorder %s767_s18, %s767_s18 }
  0x6a   : > { %p15333_p8 = scmp.lt.s32.totalorder %s15331_s6, %s15324_s5 }
  0x6b   : > { %p15327_p5 = pnand %p15325_p6, %p16034_p13 }
  0x6c   : > { %p15334_p11 = por %p15333_p8, %p15332_p7 }
  0x6d   : > { %p15328_p4 = pneg %p15327_p5 }
  0x6f   : > { %p15335_p0 = pnand %p15334_p11, %p15328_p4 }
  0x71   : > { %15338 = shalt.err (!%p15335_p0)
}
  0x72   : > { %13816 = dma.hbm_to_vmem [thread:$0]  (!%p16028_p12), %s18218_s14, 16, %s767_s18, [#allocation21]  }
  0x73   : > { %s15350_s30 = scalar_lea.vmem %s789_s4, 16  ;;  %s15357_s25 = scalar_lea.vmem %s789_s4, 32 }
  0x74   : > { %p15351_p2 = scmp.ne.s32.totalorder %s789_s4, %s15350_s30  ;;  %p15358_p3 = scmp.lt.s32.totalorder %s789_s4, %s789_s4 }
  0x75   : > { %p15359_p6 = scmp.lt.s32.totalorder %s15357_s25, %s15350_s30 }
  0x76   : > { %p15353_p9 = pnand %p15351_p2, %p16034_p13 }
  0x77   : > { %p15360_p5 = por %p15359_p6, %p15358_p3 }
  0x78   : > { %p15354_p1 = pneg %p15353_p9 }
  0x7a   : > { %p15361_p7 = pnand %p15360_p5, %p15354_p1 }
  0x7c   : > { %15364 = shalt.err (!%p15361_p7)
}
  0x7d   : > { %13822 = dma.hbm_to_vmem [thread:$0]  (!%p16028_p12), %s18220_s16, 16, %s789_s4, [#allocation24]  }
  0x7e   : > { %s15818_s18 = smov [#allocation26]   ;;  %s15819_s5 = smov [#allocation29]  }
  0x7f   : > { %s817_s2 = sshll.u32 %s15818_s18, 4  ;;  %s844_s6 = sshll.u32 %s15819_s5, 4  ;;  %s818_s2 = int_to_ptr.vmem [resolvable:$true] %s817_s2  ;;  %s845_s6 = int_to_ptr.vmem [resolvable:$true] %s844_s6 }
  0x80   : > { %s15376_s29 = scalar_lea.vmem %s818_s2, 36864  ;;  %p15384_p0 = scmp.lt.s32.totalorder %s818_s2, %s818_s2 }
  0x81   : > { %p15377_p4 = scmp.ne.s32.totalorder %s818_s2, %s15376_s29  ;;  %p15385_p2 = scmp.lt.s32.totalorder %s15376_s29, %s15376_s29 }
  0x83   : > { %p15379_p8 = pnand %p15377_p4, %p16034_p13  ;;  %p15386_p9 = por %p15385_p2, %p15384_p0 }
  0x85   : > { %p15380_p11 = pneg %p15379_p8 }
  0x87   : > { %p15387_p1 = pnand %p15386_p9, %p15380_p11 }
  0x89   : > { %15390 = shalt.err (!%p15387_p1)
}
  0x8a   : > { %s18245_s8 = smov 128   ;;  %s15821_s30 = smov 8  }
  0x8b   : > { %13828 = dma.hbm_to_vmem [thread:$0]  (!%p16028_p12), %s18224_s20, 36864, %s818_s2, [#allocation27], %s18245_s8, %s18245_s8, %s15821_s30  }
  0x8c   : > { %s15402_s28 = scalar_lea.vmem %s845_s6, 32  ;;  %p15410_p7 = scmp.lt.s32.totalorder %s845_s6, %s845_s6 }
  0x8d   : > { %p15403_p3 = scmp.ne.s32.totalorder %s845_s6, %s15402_s28  ;;  %p15411_p4 = scmp.lt.s32.totalorder %s15402_s28, %s15402_s28 }
  0x8f   : > { %p15405_p6 = pnand %p15403_p3, %p16034_p13  ;;  %p15412_p8 = por %p15411_p4, %p15410_p7 }
  0x91   : > { %p15406_p5 = pneg %p15405_p6 }
  0x93   : > { %p15413_p11 = pnand %p15412_p8, %p15406_p5 }
  0x95   : > { %15416 = shalt.err (!%p15413_p11)
}
  0x96   : > { %13834 = dma.hbm_to_vmem [thread:$0]  (!%p16028_p12), %s18226_s22, 32, %s845_s6, [#allocation30]  }
  0x97   : > { %s15822_s5 = smov [#allocation2]   ;;  %s15823_s29 = smov [#allocation7]  }
  0x98   : > { %s622_s2 = sshll.u32 %s15822_s5, 4  ;;  %s654_s4 = sshll.u32 %s15823_s29, 4  ;;  %s623_s2 = int_to_ptr.vmem [resolvable:$true] %s622_s2  ;;  %s655_s4 = int_to_ptr.vmem [resolvable:$true] %s654_s4 }
  0x99   : > { %s15428_s25 = scalar_lea.vmem %s623_s2, 9216  ;;  %p15436_p1 = scmp.lt.s32.totalorder %s623_s2, %s623_s2 }
  0x9a   : > { %p15429_p0 = scmp.ne.s32.totalorder %s623_s2, %s15428_s25  ;;  %p15437_p3 = scmp.lt.s32.totalorder %s15428_s25, %s15428_s25 }
  0x9c   : > { %p15431_p2 = pnand %p15429_p0, %p16034_p13  ;;  %p15438_p6 = por %p15437_p3, %p15436_p1 }
  0x9e   : > { %p15432_p9 = pneg %p15431_p2 }
  0xa0   : > { %p15439_p5 = pnand %p15438_p6, %p15432_p9 }
  0xa2   : > { %15442 = shalt.err (!%p15439_p5)
}
  0xa3   : > { %s18278_s0 = sld [smem:[#allocation57_spill]]  ;;  %s15454_s18 = scalar_lea.vmem %s655_s4, 512 }
  0xa4   : > { %p15455_p7 = scmp.ne.s32.totalorder %s655_s4, %s15454_s18  ;;  %p15462_p11 = scmp.lt.s32.totalorder %s655_s4, %s655_s4 }
  0xa5   : > { %p15463_p0 = scmp.lt.s32.totalorder %s15454_s18, %s15454_s18 }
  0xa6   : > { %p15457_p4 = pnand %p15455_p7, %p16034_p13 }
  0xa7   : > { %p15464_p2 = por %p15463_p0, %p15462_p11 }
  0xa8   : > { %p15458_p8 = pneg %p15457_p4 }
  0xa9   : > { %13783 = dma.hbm_to_vmem [thread:$0]  (!%p16028_p12), %s18278_s0, 9216, %s623_s2, [#allocation3], %s18245_s8, %s18245_s8, %s15821_s30  }
  0xaa   : > { %p15465_p9 = pnand %p15464_p2, %p15458_p8 }
  0xac   : > { %15468 = shalt.err (!%p15465_p9)
}
  0xad   : > { %s18279_s25 = sld [smem:[#allocation61_spill]]  ;;  %s15824_s2 = smov [#allocation10]  }
  0xae   : > { %s679_s6 = sshll.u32 %s15824_s2, 4  ;;  %s15825_s28 = smov [#allocation13]   ;;  %s680_s6 = int_to_ptr.vmem [resolvable:$true] %s679_s6 }
  0xaf   : > { %s700_s0 = sshll.u32 %s15825_s28, 4  ;;  %s15480_s8 = scalar_lea.vmem %s680_s6, 16  ;;  %s701_s0 = int_to_ptr.vmem [resolvable:$true] %s700_s0 }
  0xb0   : > { %p15481_p1 = scmp.ne.s32.totalorder %s680_s6, %s15480_s8  ;;  %s15487_s18 = scalar_lea.vmem %s680_s6, 32 }
  0xb1   : > { %p15488_p5 = scmp.lt.s32.totalorder %s680_s6, %s680_s6  ;;  %p15489_p7 = scmp.lt.s32.totalorder %s15487_s18, %s15480_s8 }
  0xb2   : > { %p15483_p3 = pnand %p15481_p1, %p16034_p13 }
  0xb3   : > { %13789 = dma.hbm_to_vmem [thread:$0]  (!%p16028_p12), %s18279_s25, 512, %s655_s4, [#allocation6], %s15812_s1, %s15812_s1, %s15813_s27  }
  0xb4   : > { %p15484_p6 = pneg %p15483_p3  ;;  %p15490_p4 = por %p15489_p7, %p15488_p5 }
  0xb6   : > { %p15491_p8 = pnand %p15490_p4, %p15484_p6 }
  0xb8   : > { %15494 = shalt.err (!%p15491_p8)
}
  0xb9   : > { %s18280_s29 = sld [smem:[#allocation63_spill]]  ;;  %s15506_s25 = scalar_lea.vmem %s701_s0, 1152 }
  0xba   : > { %p15507_p11 = scmp.ne.s32.totalorder %s701_s0, %s15506_s25  ;;  %p15514_p9 = scmp.lt.s32.totalorder %s701_s0, %s701_s0 }
  0xbb   : > { %p15515_p1 = scmp.lt.s32.totalorder %s15506_s25, %s15506_s25 }
  0xbc   : > { %p15509_p0 = pnand %p15507_p11, %p16034_p13 }
  0xbd   : > { %p15516_p3 = por %p15515_p1, %p15514_p9 }
  0xbe   : > { %p15510_p2 = pneg %p15509_p0 }
  0xbf   : > { %13795 = dma.hbm_to_vmem [thread:$0]  (!%p16028_p12), %s18280_s29, 16, %s680_s6, [#allocation9]  }
  0xc0   : > { %p15517_p10 = pnand %p15516_p3, %p15510_p2 }
  0xc2   : > { %15520 = shalt.err (!%p15517_p10)
}
  0xc3   : > { %s18281_s28 = sld [smem:[#allocation65_spill]]  ;;  %s15826_s6 = smov [#allocation16]  }
  0xc4   : > { %s726_s18 = sshll.u32 %s15826_s6, 4  ;;  %s15827_s5 = smov [#allocation19]   ;;  %s727_s18 = int_to_ptr.vmem [resolvable:$true] %s726_s18 }
  0xc5   : > { %s752_s4 = sshll.u32 %s15827_s5, 4  ;;  %s15532_s29 = scalar_lea.vmem %s727_s18, 4608  ;;  %s753_s4 = int_to_ptr.vmem [resolvable:$true] %s752_s4 }
  0xc6   : > { %p15533_p6 = scmp.ne.s32.totalorder %s727_s18, %s15532_s29  ;;  %p15540_p7 = scmp.lt.s32.totalorder %s727_s18, %s727_s18 }
  0xc7   : > { %p15541_p4 = scmp.lt.s32.totalorder %s15532_s29, %s15532_s29 }
  0xc8   : > { %p15535_p5 = pnand %p15533_p6, %p16034_p13 }
  0xc9   : > { %13801 = dma.hbm_to_vmem [thread:$0]  (!%p16028_p12), %s18281_s28, 1152, %s701_s0, [#allocation12], %s15812_s1, %s15812_s1, %s15813_s27  }
  0xca   : > { %p15536_p10 = pneg %p15535_p5  ;;  %p15542_p8 = por %p15541_p4, %p15540_p7 }
  0xcc   : > { %p15543_p11 = pnand %p15542_p8, %p15536_p10 }
  0xce   : > { %15546 = shalt.err (!%p15543_p11)
}
  0xcf   : > { %13807 = dma.hbm_to_vmem [thread:$0]  (!%p16028_p12), %s18215_s11, 4608, %s727_s18, [#allocation15], %s15812_s1, %s15812_s1, %s15813_s27  }
  0xd0   : > { %s15558_s8 = scalar_lea.vmem %s753_s4, 512  ;;  %p15566_p1 = scmp.lt.s32.totalorder %s753_s4, %s753_s4 }
  0xd1   : > { %p15559_p0 = scmp.ne.s32.totalorder %s753_s4, %s15558_s8  ;;  %p15567_p3 = scmp.lt.s32.totalorder %s15558_s8, %s15558_s8 }
  0xd3   : > { %p15561_p2 = pnand %p15559_p0, %p16034_p13  ;;  %p15568_p6 = por %p15567_p3, %p15566_p1 }
  0xd5   : > { %p15562_p9 = pneg %p15561_p2 }
  0xd7   : > { %p15569_p5 = pnand %p15568_p6, %p15562_p9 }
  0xd9   : > { %15572 = shalt.err (!%p15569_p5)
}
  0xda   : > { %13813 = dma.hbm_to_vmem [thread:$0]  (!%p16028_p12), %s18217_s13, 512, %s753_s4, [#allocation18], %s15812_s1, %s15812_s1, %s15813_s27  }
  0xdb   : > { %s15828_s6 = smov [#allocation22]   ;;  %s15829_s5 = smov [#allocation25]  }
  0xdc   : > { %s777_s18 = sshll.u32 %s15828_s6, 4  ;;  %s798_s29 = sshll.u32 %s15829_s5, 4  ;;  %s778_s18 = int_to_ptr.vmem [resolvable:$true] %s777_s18  ;;  %s799_s29 = int_to_ptr.vmem [resolvable:$true] %s798_s29 }
  0xdd   : > { %s15584_s0 = scalar_lea.vmem %s778_s18, 16  ;;  %s15591_s25 = scalar_lea.vmem %s778_s18, 32 }
  0xde   : > { %p15585_p10 = scmp.ne.s32.totalorder %s778_s18, %s15584_s0  ;;  %p15592_p8 = scmp.lt.s32.totalorder %s778_s18, %s778_s18 }
  0xdf   : > { %p15593_p11 = scmp.lt.s32.totalorder %s15591_s25, %s15584_s0 }
  0xe0   : > { %p15587_p7 = pnand %p15585_p10, %p16034_p13 }
  0xe1   : > { %p15594_p0 = por %p15593_p11, %p15592_p8 }
  0xe2   : > { %p15588_p4 = pneg %p15587_p7 }
  0xe4   : > { %p15595_p2 = pnand %p15594_p0, %p15588_p4 }
  0xe6   : > { %15598 = shalt.err (!%p15595_p2)
}
  0xe7   : > { %13819 = dma.hbm_to_vmem [thread:$0]  (!%p16028_p12), %s18219_s15, 16, %s778_s18, [#allocation21]  }
  0xe8   : > { %s15610_s27 = scalar_lea.vmem %s799_s29, 288  ;;  %p15618_p6 = scmp.lt.s32.totalorder %s799_s29, %s799_s29 }
  0xe9   : > { %p15611_p9 = scmp.ne.s32.totalorder %s799_s29, %s15610_s27  ;;  %p15619_p5 = scmp.lt.s32.totalorder %s15610_s27, %s15610_s27 }
  0xeb   : > { %p15613_p1 = pnand %p15611_p9, %p16034_p13  ;;  %p15620_p10 = por %p15619_p5, %p15618_p6 }
  0xed   : > { %p15614_p3 = pneg %p15613_p1 }
  0xef   : > { %p15621_p7 = pnand %p15620_p10, %p15614_p3 }
  0xf1   : > { %15624 = shalt.err (!%p15621_p7)
}
  0xf2   : > { %s15830_s4 = smov 32   ;;  %s15831_s2 = smov 2  }
  0xf3   : > { %13825 = dma.hbm_to_vmem [thread:$0]  (!%p16028_p12), %s18221_s17, 288, %s799_s29, [#allocation24], %s15830_s4, %s15830_s4, %s15831_s2  }
  0xf4   : > { %s15832_s18 = smov [#allocation28]   ;;  %s15833_s0 = smov [#allocation31]  }
  0xf5   : > { %s830_s5 = sshll.u32 %s15832_s18, 4  ;;  %s855_s25 = sshll.u32 %s15833_s0, 4  ;;  %s831_s5 = int_to_ptr.vmem [resolvable:$true] %s830_s5  ;;  %s856_s25 = int_to_ptr.vmem [resolvable:$true] %s855_s25 }
  0xf6   : > { %s15636_s8 = scalar_lea.vmem %s831_s5, 2048  ;;  %p15644_p0 = scmp.lt.s32.totalorder %s831_s5, %s831_s5 }
  0xf7   : > { %p15637_p4 = scmp.ne.s32.totalorder %s831_s5, %s15636_s8  ;;  %p15645_p2 = scmp.lt.s32.totalorder %s15636_s8, %s15636_s8 }
  0xf9   : > { %p15639_p8 = pnand %p15637_p4, %p16034_p13  ;;  %p15646_p9 = por %p15645_p2, %p15644_p0 }
  0xfb   : > { %p15640_p11 = pneg %p15639_p8 }
  0xfd   : > { %p15647_p1 = pnand %p15646_p9, %p15640_p11 }
  0xff   : > { %15650 = shalt.err (!%p15647_p1)
}
 0x100   : > { %s18282_s1 = smov 128   ;;  %s15662_s4 = scalar_lea.vmem %s856_s25, 32 }
 0x101   : > { %13831 = dma.hbm_to_vmem [thread:$0]  (!%p16028_p12), %s18225_s21, 2048, %s831_s5, [#allocation27], %s18282_s1, %s18282_s1, %s15821_s30  }
 0x102   : > { %p15663_p3 = scmp.ne.s32.totalorder %s856_s25, %s15662_s4  ;;  %p15670_p10 = scmp.lt.s32.totalorder %s856_s25, %s856_s25 }
 0x103   : > { %p15671_p7 = scmp.lt.s32.totalorder %s15662_s4, %s15662_s4 }
 0x104   : > { %p15665_p6 = pnand %p15663_p3, %p16034_p13 }
 0x105   : > { %p15672_p4 = por %p15671_p7, %p15670_p10 }
 0x106   : > { %p15666_p5 = pneg %p15665_p6 }
 0x108   : > { %p15673_p8 = pnand %p15672_p4, %p15666_p5 }
 0x10a   : > { %15676 = shalt.err (!%p15673_p8)
}
 0x10b   : > { %13837 = dma.hbm_to_vmem [thread:$0]  (!%p16028_p12), %s18227_s23, 32, %s856_s25, [#allocation30]  }
 0x10c   : > { %s15834_s6 = smov [#allocation32]  }
 0x10d   : > { %s866_s30 = sshll.u32 %s15834_s6, 4  ;;  %s867_s30 = int_to_ptr.vmem [resolvable:$true] %s866_s30 }
 0x10e   : > { %s15688_s18 = scalar_lea.vmem %s867_s30, 32  ;;  %p15696_p9 = scmp.lt.s32.totalorder %s867_s30, %s867_s30 }
 0x10f   : > { %p15689_p11 = scmp.ne.s32.totalorder %s867_s30, %s15688_s18  ;;  %p15697_p1 = scmp.lt.s32.totalorder %s15688_s18, %s15688_s18 }
 0x111   : > { %p15691_p0 = pnand %p15689_p11, %p16034_p13  ;;  %p15698_p3 = por %p15697_p1, %p15696_p9 }
 0x113   : > { %p15692_p2 = pneg %p15691_p0 }
 0x115   : > { %p15699_p6 = pnand %p15698_p3, %p15692_p2 }
 0x117   : > { %15702 = shalt.err (!%p15699_p6)
}
 0x118   : > { %13840 = dma.hbm_to_vmem [thread:$0]  (!%p16028_p12), %s18228_s24, 32, %s867_s30, [#allocation33]  }
 0x119   : > { %p18283_p5 = scmp.ne.s32.totalorder %s18272_s9, 0 }
 0x11b   : > { %887 = sbr.rel (%p18283_p5) target bundleno = 3873 (0xf21), region = 120 }
 0x120   : > { %p18284_p10 = scmp.eq.s32.totalorder %s15992_s7, 0 }
 0x122   : > { %15746 = dma.done.wait (%p18284_p10), [#allocation3], 9216   ;;  %p18285_p13 = pmov %p18284_p10 }
 0x123   : > { %p18286_p7 = pmov %p18284_p10 }
 0x124   : > { %15748 = vsyncadd (%p18285_p13), [#allocation3], 4294958080 }
 0x125   : > { %15750 = dma.done.wait (%p18286_p7), [#allocation6], 5120   ;;  %p18287_p4 = pmov %p18286_p7 }
 0x127   : > { %15752 = vsyncadd (%p18287_p4), [#allocation6], 4294962176  ;;  %p18288_p8 = pmov %p18287_p4 }
 0x128   : > { %p18289_p12 = pmov %p18287_p4 }
 0x129   : > { %15754 = dma.done.wait (%p18288_p8), [#allocation9], 32  }
 0x12a   : > { %15756 = vsyncadd (%p18289_p12), [#allocation9], 4294967264  ;;  %p18290_p11 = pmov %p18287_p4 }
 0x12b   : > { %p18291_p0 = pmov %p18287_p4 }
 0x12c   : > { %15758 = dma.done.wait (%p18290_p11), [#allocation12], 1168  }
 0x12d   : > { %15760 = vsyncadd (%p18291_p0), [#allocation12], 4294966128  ;;  %p18292_p2 = pmov %p18291_p0 }
 0x12e   : > { %p18293_p9 = pmov %p18291_p0 }
 0x12f   : > { %15762 = dma.done.wait (%p18292_p2), [#allocation15], 5760  }
 0x130   : > { %15764 = vsyncadd (%p18293_p9), [#allocation15], 4294961536  ;;  %p18294_p1 = pmov %p18291_p0 }
 0x131   : > { %p18295_p3 = pmov %p18291_p0 }
 0x132   : > { %15766 = dma.done.wait (%p18294_p1), [#allocation18], 9728  }
 0x133   : > { %15768 = vsyncadd (%p18295_p3), [#allocation18], 4294957568  ;;  %p18296_p6 = pmov %p18291_p0 }
 0x134   : > { %p18297_p5 = pmov %p18291_p0 }
 0x135   : > { %15770 = dma.done.wait (%p18296_p6), [#allocation21], 32  }
 0x136   : > { %15772 = vsyncadd (%p18297_p5), [#allocation21], 4294967264  ;;  %p18298_p10 = pmov %p18291_p0 }
 0x137   : > { %p18299_p13 = pmov %p18291_p0 }
 0x138   : > { %15774 = dma.done.wait (%p18298_p10), [#allocation24], 304  }
 0x139   : > { %15776 = vsyncadd (%p18299_p13), [#allocation24], 4294966992  ;;  %p18300_p7 = pmov %p18291_p0 }
 0x13a   : > { %p18301_p4 = pmov %p18291_p0 }
 0x13b   : > { %15778 = dma.done.wait (%p18300_p7), [#allocation27], 38912  }
 0x13c   : > { %15780 = vsyncadd (%p18301_p4), [#allocation27], 4294928384  ;;  %p18302_p8 = pmov %p18291_p0 }
 0x13d   : > { %p18303_p12 = pmov %p18291_p0 }
 0x13e   : > { %15782 = dma.done.wait (%p18302_p8), [#allocation30], 64  }
 0x13f   : > { %15784 = vsyncadd (%p18303_p12), [#allocation30], 4294967232  ;;  %p18304_p11 = pmov %p18291_p0 }
 0x141   : > { %15786 = dma.done.wait (%p18304_p11), [#allocation33], 32  }
 0x142   : > { %15788 = vsyncadd (%p18291_p0), [#allocation33], 4294967264  ;;  %p1031_p2 = scmp.lt.s32.totalorder %s15992_s7, 1  ;;  %s18305_s8 = sld [smem:[#allocation56_spill]]  ;;  %v14147_v11 = vld [vmem:[#allocation2 + $0x4] ss:$8 sps:$4 sm:$0xff]  }
 0x143   : > { %v14150_v12 = vld [vmem:[#allocation2 + $0xc4] ss:$8 sps:$4 sm:$0xff]   ;;  %1245 = vmatprep.mubr.bf16.mxu0 %v14147_v11  ;;  %v14145_v18 = vld [vmem:[#allocation2] ss:$8 sps:$4 sm:$0xff]   ;;  %v14151_v20 = vld [vmem:[#allocation2 + $0x14] ss:$8 sps:$4 sm:$0xff]  }
 0x144   : > { %s1032_s26 = scalar_select %p1031_p2, %s15992_s7, 1  ;;  %1587 = vmatprep.mubr.bf16.mxu1 %v14150_v12  ;;  %v14148_v19 = vld [vmem:[#allocation2 + $0xc0] ss:$8 sps:$4 sm:$0xff]   ;;  %v14153_v21 = vld [vmem:[#allocation2 + $0xd4] ss:$8 sps:$4 sm:$0xff]   ;;  %vm2318_vm0 = vcmask 523264  }
 0x145   : > { %v14155_v22 = vld [vmem:[#allocation2 + $0x10] ss:$8 sps:$4 sm:$0xff]   ;;  %v14157_v24 = vld [vmem:[#allocation2 + $0x24] ss:$8 sps:$4 sm:$0xff]   ;;  %v14161_v26 = vld [vmem:[#allocation2 + $0x20] ss:$8 sps:$4 sm:$0xff]  }
 0x146   : > { %s12396_s9 = sshll.u32 %s1032_s26, 7  ;;  %v14156_v23 = vld [vmem:[#allocation2 + $0xd0] ss:$8 sps:$4 sm:$0xff]   ;;  %v14159_v25 = vld [vmem:[#allocation2 + $0xe4] ss:$8 sps:$4 sm:$0xff]   ;;  %s18306_s4 = sld [smem:[#allocation59_spill]] }
 0x147   : > { %v14162_v27 = vld [vmem:[#allocation2 + $0xe0] ss:$8 sps:$4 sm:$0xff]   ;;  %v14163_v28 = vld [vmem:[#allocation2 + $0x34] ss:$8 sps:$4 sm:$0xff]   ;;  %v14167_v30 = vld [vmem:[#allocation2 + $0x30] ss:$8 sps:$4 sm:$0xff]  }
 0x148   : > { %s16259_s1 = scalar_lea.vmem %s18305_s8, %s12396_s9  ;;  %v14165_v29 = vld [vmem:[#allocation2 + $0xf4] ss:$8 sps:$4 sm:$0xff]   ;;  %v14168_v31 = vld [vmem:[#allocation2 + $0xf0] ss:$8 sps:$4 sm:$0xff]   ;;  %v14171_v32 = vld [vmem:[#allocation2 + $0x44] ss:$8 sps:$4 sm:$0xff]  }
 0x149   : > { %v16262_v0 = vld [vmem:[%s16259_s1 + $0x78] sm:$0xff]   ;;  %v16270_v2 = vld [vmem:[%s16259_s1 + $0x70] sm:$0xff]   ;;  %v16280_v4 = vld [vmem:[%s16259_s1 + $0x68] sm:$0xff]   ;;  %s15835_s27 = smov 64   ;;  %s18310_s6 = sld [smem:[#allocation60_spill]]  ;;  %vm15837_vm1 = vmmov 0  }
 0x14a   : > { %v16265_v1 = vld [vmem:[%s16259_s1 + $0x38] sm:$0xff]   ;;  %12398 = vmatprep.subr.bf16.mxu0 %v16262_v0  ;;  %12518 = vmatprep.subr.bf16.mxu1 %v16262_v0  ;;  %v16275_v3 = vld [vmem:[%s16259_s1 + $0x30] sm:$0xff]   ;;  %v16285_v5 = vld [vmem:[%s16259_s1 + $0x28] sm:$0xff]   ;;  %vm5687_vm2 = vcmask 130048   ;;  %vm8602_vm3 = vcmask 1041408   ;;  %s18312_s5 = sld [smem:[#allocation66_spill]] }
 0x14b   : > { %12399 = vmatpush3.bf16.msra.mxu0 %v16265_v1  ;;  %12519 = vmatpush3.bf16.msra.mxu1 %v16265_v1  ;;  %v16290_v6 = vld [vmem:[%s16259_s1 + $0x60] sm:$0xff]   ;;  %v16300_v8 = vld [vmem:[%s16259_s1 + $0x58] sm:$0xff]   ;;  %v16310_v10 = vld [vmem:[%s16259_s1 + $0x50] sm:$0xff]   ;;  %vm8598_vm4 = vcmask 31744   ;;  %vm11149_vm5 = vcmask 1043456   ;;  %s18314_s8 = sld [smem:[#allocation53_spill]] }
 0x14c   : > { %12400 = vmatprep.subr.bf16.mxu0 %v16270_v2  ;;  %12520 = vmatprep.subr.bf16.mxu1 %v16270_v2  ;;  %v16295_v7 = vld [vmem:[%s16259_s1 + $0x20] sm:$0xff]   ;;  %v16305_v9 = vld [vmem:[%s16259_s1 + $0x18] sm:$0xff]   ;;  %v16315_v13 = vld [vmem:[%s16259_s1 + $0x10] sm:$0xff]   ;;  %s18315_s30 = sld [smem:[#allocation67_spill]] }
 0x14d   : > { %v16320_v14 = vld [vmem:[%s16259_s1 + $0x48] sm:$0xff]   ;;  %v16330_v16 = vld [vmem:[%s16259_s1 + $0x40] sm:$0xff]   ;;  %v14175_v36 = vld [vmem:[#allocation2 + $0x54] ss:$8 sps:$4 sm:$0xff]  }
 0x14e   : > { %v16325_v15 = vld [vmem:[%s16259_s1 + $0x8] sm:$0xff]   ;;  %v16335_v17 = vld [vmem:[%s16259_s1] sm:$0xff]   ;;  %v14177_v37 = vld [vmem:[#allocation2 + $0x154] ss:$8 sps:$4 sm:$0xff]  }
 0x14f   : > { %12401 = vmatpush3.bf16.msra.mxu0 %v16275_v3  ;;  %12521 = vmatpush3.bf16.msra.mxu1 %v16275_v3  ;;  %v14174_v33 = vld [vmem:[#allocation2 + $0x144] ss:$8 sps:$4 sm:$0xff]   ;;  %v14169_v34 = vld [vmem:[#allocation2 + $0x40] ss:$8 sps:$4 sm:$0xff]   ;;  %v14179_v38 = vld [vmem:[#allocation2 + $0x50] ss:$8 sps:$4 sm:$0xff]   ;;  %s18311_s18 = smov %s18310_s6 }
 0x150   : > { %12402 = vmatprep.subr.bf16.mxu0 %v16280_v4  ;;  %12522 = vmatprep.subr.bf16.mxu1 %v16280_v4  ;;  %v14172_v35 = vld [vmem:[#allocation2 + $0x140] ss:$8 sps:$4 sm:$0xff]   ;;  %v14180_v39 = vld [vmem:[#allocation2 + $0x150] ss:$8 sps:$4 sm:$0xff]   ;;  %v14181_v40 = vld [vmem:[#allocation2 + $0x64] ss:$8 sps:$4 sm:$0xff]  }
 0x151   : > { %v14183_v41 = vld [vmem:[#allocation2 + $0x164] ss:$8 sps:$4 sm:$0xff]   ;;  %v14185_v42 = vld [vmem:[#allocation2 + $0x60] ss:$8 sps:$4 sm:$0xff]   ;;  %v14187_v44 = vld [vmem:[#allocation2 + $0x74] ss:$8 sps:$4 sm:$0xff]  }
 0x152   : > { %v14186_v43 = vld [vmem:[#allocation2 + $0x160] ss:$8 sps:$4 sm:$0xff]   ;;  %v14189_v45 = vld [vmem:[#allocation2 + $0x174] ss:$8 sps:$4 sm:$0xff]   ;;  %v14191_v46 = vld [vmem:[#allocation2 + $0x70] ss:$8 sps:$4 sm:$0xff]   ;;  %s18316_s0 = smov %s18315_s30 }
 0x153   : > { %12403 = vmatpush3.bf16.msra.mxu0 %v16285_v5  ;;  %12523 = vmatpush3.bf16.msra.mxu1 %v16285_v5  ;;  %v14192_v47 = vld [vmem:[#allocation2 + $0x170] ss:$8 sps:$4 sm:$0xff]   ;;  %v14195_v48 = vld [vmem:[#allocation2 + $0x1c4] ss:$8 sps:$4 sm:$0xff]   ;;  %v14193_v50 = vld [vmem:[#allocation2 + $0x1c0] ss:$8 sps:$4 sm:$0xff]  }
 0x154   : > { %12404 = vmatprep.subr.bf16.mxu0 %v16290_v6  ;;  %12524 = vmatprep.subr.bf16.mxu1 %v16290_v6  ;;  %v14206_v49 = vld [vmem:[#allocation2 + $0x84] ss:$8 sps:$4 sm:$0xff]   ;;  %v14196_v51 = vld [vmem:[#allocation2 + $0x1d4] ss:$8 sps:$4 sm:$0xff]   ;;  %v14204_v52 = vld [vmem:[#allocation2 + $0x80] ss:$8 sps:$4 sm:$0xff]  }
 0x155   : > { %v14208_v53 = vld [vmem:[#allocation2 + $0x94] ss:$8 sps:$4 sm:$0xff]   ;;  %v14198_v54 = vld [vmem:[#allocation2 + $0x1d0] ss:$8 sps:$4 sm:$0xff]   ;;  %v14199_v55 = vld [vmem:[#allocation2 + $0x1e4] ss:$8 sps:$4 sm:$0xff]  }
 0x156   : > { %v14210_v56 = vld [vmem:[#allocation2 + $0x90] ss:$8 sps:$4 sm:$0xff]   ;;  %v14211_v57 = vld [vmem:[#allocation2 + $0xa4] ss:$8 sps:$4 sm:$0xff]   ;;  %v14201_v58 = vld [vmem:[#allocation2 + $0x1e0] ss:$8 sps:$4 sm:$0xff]  }
 0x157   : > { %12405 = vmatpush3.bf16.msra.mxu0 %v16295_v7  ;;  %12525 = vmatpush3.bf16.msra.mxu1 %v16295_v7  ;;  %v14202_v59 = vld [vmem:[#allocation2 + $0x1f4] ss:$8 sps:$4 sm:$0xff]   ;;  %v14213_v60 = vld [vmem:[#allocation2 + $0xa0] ss:$8 sps:$4 sm:$0xff]   ;;  %v14207_v62 = vld [vmem:[#allocation2 + $0x1f0] ss:$8 sps:$4 sm:$0xff]  }
 0x158   : > { %12406 = vmatprep.subr.bf16.mxu0 %v16300_v8  ;;  %12526 = vmatprep.subr.bf16.mxu1 %v16300_v8  ;;  %v14214_v61 = vld [vmem:[#allocation2 + $0xb4] ss:$8 sps:$4 sm:$0xff]   ;;  %v14216_v63 = vld [vmem:[#allocation2 + $0xb0] ss:$8 sps:$4 sm:$0xff]   ;;  %v15173_v11 = vld [vmem:[%s16259_s1 + $0x60] sm:$0xff]   ;;  %p18317_p1 = scmp.ne.s32.totalorder %s18314_s8, 0 }
 0x159   : > { %v14225_v12 = vld [vmem:[#allocation2 + $0x120] ss:$8 sps:$4 sm:$0xff]  }
 0x15b   : > { %12407 = vmatpush3.bf16.msra.mxu0 %v16305_v9  ;;  %12527 = vmatpush3.bf16.msra.mxu1 %v16305_v9 }
 0x15c   : > { %12408 = vmatprep.subr.bf16.mxu0 %v16310_v10  ;;  %12528 = vmatprep.subr.bf16.mxu1 %v16310_v10 }
 0x15f   : > { %12409 = vmatpush3.bf16.msra.mxu0 %v16315_v13  ;;  %12529 = vmatpush3.bf16.msra.mxu1 %v16315_v13 }
 0x160   : > { %12410 = vmatprep.subr.bf16.mxu0 %v16320_v14  ;;  %12530 = vmatprep.subr.bf16.mxu1 %v16320_v14 }
 0x163   : > { %12411 = vmatpush3.bf16.msra.mxu0 %v16325_v15  ;;  %12531 = vmatpush3.bf16.msra.mxu1 %v16325_v15 }
 0x164   : > { %12412 = vmatprep.subr.bf16.mxu0 %v16330_v16  ;;  %12532 = vmatprep.subr.bf16.mxu1 %v16330_v16 }
 0x167   : > { %12413 = vmatpush3.bf16.msra.mxu0 %v16335_v17  ;;  %12533 = vmatpush3.bf16.msra.mxu1 %v16335_v17 }
 0x168   : > { %12438 = vmatprep.subr.bf16.mxu0 %v16262_v0  ;;  %12598 = vmatprep.subr.bf16.mxu1 %v16262_v0 }
 0x16a   : > { %1246 = vmatmul.mubr.bf16.vlgmr.msra.gmra.mxu0 %v14145_v18  ;;  %1588 = vmatmul.mubr.bf16.vlgmr.msra.gmra.mxu1 %v14148_v19  ;;  %v14228_v18 = vld [vmem:[#allocation2 + $0x130] ss:$8 sps:$4 sm:$0xff]   ;;  %v14231_v19 = vld [vmem:[#allocation2 + $0x184] ss:$8 sps:$4 sm:$0xff]  }
 0x16b   : > { %12439 = vmatpush3.bf16.msra.mxu0 %v16265_v1  ;;  %12599 = vmatpush3.bf16.msra.mxu1 %v16265_v1 }
 0x16c   : > { %12440 = vmatprep.subr.bf16.mxu0 %v16270_v2  ;;  %12600 = vmatprep.subr.bf16.mxu1 %v16270_v2 }
 0x16d   : > { %1253 = vmatprep.mubr.bf16.mxu0 %v14151_v20  ;;  %1595 = vmatprep.mubr.bf16.mxu1 %v14153_v21  ;;  %v15178_v20 = vld [vmem:[%s16259_s1 + $0x10] sm:$0xff]   ;;  %v15179_v21 = vld [vmem:[%s16259_s1 + $0x48] sm:$0xff]  }
 0x16f   : > { %12441 = vmatpush3.bf16.msra.mxu0 %v16275_v3  ;;  %12601 = vmatpush3.bf16.msra.mxu1 %v16275_v3 }
 0x170   : > { %12442 = vmatprep.subr.bf16.mxu0 %v16280_v4  ;;  %12602 = vmatprep.subr.bf16.mxu1 %v16280_v4 }
 0x172   : > { %1254 = vmatmul.mubr.bf16.gmra.mxu0 %v14155_v22  ;;  %1596 = vmatmul.mubr.bf16.gmra.mxu1 %v14156_v23  ;;  %v15180_v22 = vld [vmem:[%s16259_s1 + $0x8] sm:$0xff]   ;;  %v15181_v23 = vld [vmem:[%s16259_s1 + $0x40] sm:$0xff]  }
 0x173   : > { %12443 = vmatpush3.bf16.msra.mxu0 %v16285_v5  ;;  %12603 = vmatpush3.bf16.msra.mxu1 %v16285_v5 }
 0x174   : > { %12444 = vmatprep.subr.bf16.mxu0 %v16290_v6  ;;  %12604 = vmatprep.subr.bf16.mxu1 %v16290_v6 }
 0x175   : > { %1261 = vmatprep.mubr.bf16.mxu0 %v14157_v24  ;;  %1603 = vmatprep.mubr.bf16.mxu1 %v14159_v25  ;;  %v14229_v24 = vld [vmem:[#allocation2 + $0x180] ss:$8 sps:$4 sm:$0xff]   ;;  %v14232_v25 = vld [vmem:[#allocation2 + $0x194] ss:$8 sps:$4 sm:$0xff]  }
 0x177   : > { %12445 = vmatpush3.bf16.msra.mxu0 %v16295_v7  ;;  %12605 = vmatpush3.bf16.msra.mxu1 %v16295_v7 }
 0x178   : > { %12446 = vmatprep.subr.bf16.mxu0 %v16300_v8  ;;  %12606 = vmatprep.subr.bf16.mxu1 %v16300_v8 }
 0x17a   : > { %1262 = vmatmul.mubr.bf16.gmra.mxu0 %v14161_v26  ;;  %1604 = vmatmul.mubr.bf16.gmra.mxu1 %v14162_v27  ;;  %v15182_v26 = vld [vmem:[%s16259_s1] sm:$0xff]   ;;  %v14234_v27 = vld [vmem:[#allocation2 + $0x190] ss:$8 sps:$4 sm:$0xff]  }
 0x17b   : > { %12447 = vmatpush3.bf16.msra.mxu0 %v16305_v9  ;;  %12607 = vmatpush3.bf16.msra.mxu1 %v16305_v9 }
 0x17c   : > { %12448 = vmatprep.subr.bf16.mxu0 %v16310_v10  ;;  %12608 = vmatprep.subr.bf16.mxu1 %v16310_v10 }
 0x17d   : > { %1269 = vmatprep.mubr.bf16.mxu0 %v14163_v28  ;;  %1611 = vmatprep.mubr.bf16.mxu1 %v14165_v29  ;;  %v14235_v28 = vld [vmem:[#allocation2 + $0x1a4] ss:$8 sps:$4 sm:$0xff]   ;;  %v14237_v29 = vld [vmem:[#allocation2 + $0x1a0] ss:$8 sps:$4 sm:$0xff]  }
 0x17f   : > { %12449 = vmatpush3.bf16.msra.mxu0 %v16315_v13  ;;  %12609 = vmatpush3.bf16.msra.mxu1 %v16315_v13 }
 0x180   : > { %12450 = vmatprep.subr.bf16.mxu0 %v16320_v14  ;;  %12610 = vmatprep.subr.bf16.mxu1 %v16320_v14 }
 0x182   : > { %1270 = vmatmul.mubr.bf16.gmra.mxu0 %v14167_v30  ;;  %1612 = vmatmul.mubr.bf16.gmra.mxu1 %v14168_v31  ;;  %v14238_v30 = vld [vmem:[#allocation2 + $0x1b4] ss:$8 sps:$4 sm:$0xff]   ;;  %v14240_v31 = vld [vmem:[#allocation2 + $0x1b0] ss:$8 sps:$4 sm:$0xff]  }
 0x183   : > { %12451 = vmatpush3.bf16.msra.mxu0 %v16325_v15  ;;  %12611 = vmatpush3.bf16.msra.mxu1 %v16325_v15 }
 0x184   : > { %12452 = vmatprep.subr.bf16.mxu0 %v16330_v16  ;;  %12612 = vmatprep.subr.bf16.mxu1 %v16330_v16 }
 0x185   : > { %1359 = vmatprep.mubr.bf16.mxu0 %v14171_v32  ;;  %1815 = vmatprep.mubr.bf16.mxu1 %v14174_v33  ;;  %v14243_v32 = vld [vmem:[#allocation2 + $0x204] ss:$8 sps:$4 sm:$0xff]   ;;  %v14241_v33 = vld [vmem:[#allocation2 + $0x200] ss:$8 sps:$4 sm:$0xff]  }
 0x187   : > { %12453 = vmatpush3.bf16.msra.mxu0 %v16335_v17  ;;  %12613 = vmatpush3.bf16.msra.mxu1 %v16335_v17 }
 0x188   : > { %12678 = vmatprep.subr.bf16.mxu1 %v16262_v0  ;;  %12478 = vmatprep.subr.bf16.mxu0 %v16262_v0 }
 0x18a   : > { %1360 = vmatmul.mubr.bf16.vlgmr.msra.gmra.mxu0 %v14169_v34  ;;  %1816 = vmatmul.mubr.bf16.vlgmr.msra.gmra.mxu1 %v14172_v35  ;;  %v14244_v34 = vld [vmem:[#allocation2 + $0x214] ss:$8 sps:$4 sm:$0xff]   ;;  %v14246_v35 = vld [vmem:[#allocation2 + $0x210] ss:$8 sps:$4 sm:$0xff]  }
 0x18b   : > { %12679 = vmatpush3.bf16.msra.mxu1 %v16265_v1  ;;  %1367 = vmatprep.mubr.bf16.mxu0 %v14175_v36  ;;  %v14247_v36 = vld [vmem:[#allocation2 + $0x224] ss:$8 sps:$4 sm:$0xff]  }
 0x18c   : > { %12680 = vmatprep.subr.bf16.mxu1 %v16270_v2  ;;  %1823 = vmatprep.mubr.bf16.mxu1 %v14177_v37  ;;  %v14249_v37 = vld [vmem:[#allocation2 + $0x220] ss:$8 sps:$4 sm:$0xff]  }
 0x18d   : > { %12479 = vmatpush3.bf16.msra.mxu0 %v16265_v1 }
 0x18e   : > { %12480 = vmatprep.subr.bf16.mxu0 %v16270_v2 }
 0x18f   : > { %12681 = vmatpush3.bf16.msra.mxu1 %v16275_v3 }
 0x190   : > { %12682 = vmatprep.subr.bf16.mxu1 %v16280_v4 }
 0x191   : > { %12481 = vmatpush3.bf16.msra.mxu0 %v16275_v3 }
 0x192   : > { %1368 = vmatmul.mubr.bf16.gmra.mxu0 %v14179_v38  ;;  %1824 = vmatmul.mubr.bf16.gmra.mxu1 %v14180_v39  ;;  %v14250_v38 = vld [vmem:[#allocation2 + $0x234] ss:$8 sps:$4 sm:$0xff]   ;;  %v14252_v39 = vld [vmem:[#allocation2 + $0x230] ss:$8 sps:$4 sm:$0xff]  }
 0x193   : > { %12683 = vmatpush3.bf16.msra.mxu1 %v16285_v5  ;;  %1375 = vmatprep.mubr.bf16.mxu0 %v14181_v40  ;;  %v14253_v40 = vld [vmem:[%s18306_s4 + $0x78] sm:$0xff]  }
 0x194   : > { %12684 = vmatprep.subr.bf16.mxu1 %v16290_v6  ;;  %1831 = vmatprep.mubr.bf16.mxu1 %v14183_v41 }
 0x195   : > { %12482 = vmatprep.subr.bf16.mxu0 %v16280_v4 }
 0x196   : > { %12483 = vmatpush3.bf16.msra.mxu0 %v16285_v5 }
 0x197   : > { %12685 = vmatpush3.bf16.msra.mxu1 %v16295_v7  ;;  %12484 = vmatprep.subr.bf16.mxu0 %v16290_v6 }
 0x198   : > { %12686 = vmatprep.subr.bf16.mxu1 %v16300_v8 }
 0x19a   : > { %1376 = vmatmul.mubr.bf16.gmra.mxu0 %v14185_v42  ;;  %1832 = vmatmul.mubr.bf16.gmra.mxu1 %v14186_v43 }
 0x19b   : > { %12687 = vmatpush3.bf16.msra.mxu1 %v16305_v9  ;;  %1383 = vmatprep.mubr.bf16.mxu0 %v14187_v44 }
 0x19c   : > { %12688 = vmatprep.subr.bf16.mxu1 %v16310_v10  ;;  %1839 = vmatprep.mubr.bf16.mxu1 %v14189_v45  ;;  %v14254_v45 = vld [vmem:[%s18306_s4 + $0x38] sm:$0xff]  }
 0x19d   : > { %12485 = vmatpush3.bf16.msra.mxu0 %v16295_v7 }
 0x19e   : > { %12486 = vmatprep.subr.bf16.mxu0 %v16300_v8 }
 0x19f   : > { %12689 = vmatpush3.bf16.msra.mxu1 %v16315_v13 }
 0x1a0   : > { %12690 = vmatprep.subr.bf16.mxu1 %v16320_v14 }
 0x1a1   : > { %12487 = vmatpush3.bf16.msra.mxu0 %v16305_v9 }
 0x1a2   : > { %1384 = vmatmul.mubr.bf16.gmra.mxu0 %v14191_v46  ;;  %1840 = vmatmul.mubr.bf16.gmra.mxu1 %v14192_v47 }
 0x1a3   : > { %12691 = vmatpush3.bf16.msra.mxu1 %v16325_v15  ;;  %2043 = vmatprep.mubr.bf16.mxu1 %v14195_v48 }
 0x1a4   : > { %12692 = vmatprep.subr.bf16.mxu1 %v16330_v16  ;;  %12488 = vmatprep.subr.bf16.mxu0 %v16310_v10 }
 0x1a5   : > { %12489 = vmatpush3.bf16.msra.mxu0 %v16315_v13  ;;  %1473 = vmatprep.mubr.bf16.mxu0 %v14206_v49  ;;  %v14255_v49 = vld [vmem:[%s18306_s4 + $0x70] sm:$0xff]  }
 0x1a6   : > { %12490 = vmatprep.subr.bf16.mxu0 %v16320_v14 }
 0x1a7   : > { %12693 = vmatpush3.bf16.msra.mxu1 %v16335_v17 }
 0x1a8   : > { %12758 = vmatprep.subr.bf16.mxu1 %v14253_v40 }
 0x1a9   : > { %12491 = vmatpush3.bf16.msra.mxu0 %v16325_v15 }
 0x1aa   : > { %2044 = vmatmul.mubr.bf16.vlgmr.msra.gmra.mxu1 %v14193_v50  ;;  %12492 = vmatprep.subr.bf16.mxu0 %v16330_v16 }
 0x1ab   : > { %2051 = vmatprep.mubr.bf16.mxu1 %v14196_v51  ;;  %12759 = vmatpush3.bf16.msra.mxu1 %v14254_v45  ;;  %v14271_v45 = vld [vmem:[%s18306_s4 + $0xf0] sm:$0xff]  }
 0x1ac   : > { %12760 = vmatprep.subr.bf16.mxu1 %v14255_v49 }
 0x1ad   : > { %12493 = vmatpush3.bf16.msra.mxu0 %v16335_v17 }
 0x1ae   : > { %12558 = vmatprep.subr.bf16.mxu0 %v16262_v0  ;;  %v14219_v0 = vld [vmem:[#allocation2 + $0x104] ss:$8 sps:$4 sm:$0xff]  }
 0x1b0   : > { %1474 = vmatmul.mubr.bf16.vlgmr.msra.gmra.mxu0 %v14204_v52  ;;  %v14256_v52 = vld [vmem:[%s18306_s4 + $0x30] sm:$0xff]  }
 0x1b1   : > { %12559 = vmatpush3.bf16.msra.mxu0 %v16265_v1  ;;  %1481 = vmatprep.mubr.bf16.mxu0 %v14208_v53  ;;  %v14217_v1 = vld [vmem:[#allocation2 + $0x100] ss:$8 sps:$4 sm:$0xff]  }
 0x1b2   : > { %2052 = vmatmul.mubr.bf16.gmra.mxu1 %v14198_v54  ;;  %12560 = vmatprep.subr.bf16.mxu0 %v16270_v2  ;;  %v14220_v2 = vld [vmem:[#allocation2 + $0x114] ss:$8 sps:$4 sm:$0xff]   ;;  %v14257_v53 = vld [vmem:[%s18306_s4 + $0x68] sm:$0xff]  }
 0x1b3   : > { %2059 = vmatprep.mubr.bf16.mxu1 %v14199_v55  ;;  %12761 = vmatpush3.bf16.msra.mxu1 %v14256_v52 }
 0x1b4   : > { %12762 = vmatprep.subr.bf16.mxu1 %v14257_v53 }
 0x1b5   : > { %12561 = vmatpush3.bf16.msra.mxu0 %v16275_v3  ;;  %v15167_v3 = vld [vmem:[%s16259_s1 + $0x78] sm:$0xff]  }
 0x1b6   : > { %12562 = vmatprep.subr.bf16.mxu0 %v16280_v4  ;;  %v15168_v4 = vld [vmem:[%s16259_s1 + $0x38] sm:$0xff]  }
 0x1b8   : > { %1482 = vmatmul.mubr.bf16.gmra.mxu0 %v14210_v56 }
 0x1b9   : > { %12563 = vmatpush3.bf16.msra.mxu0 %v16285_v5  ;;  %1489 = vmatprep.mubr.bf16.mxu0 %v14211_v57  ;;  %v15169_v5 = vld [vmem:[%s16259_s1 + $0x70] sm:$0xff]  }
 0x1ba   : > { %2060 = vmatmul.mubr.bf16.gmra.mxu1 %v14201_v58  ;;  %12564 = vmatprep.subr.bf16.mxu0 %v16290_v6  ;;  %v14222_v6 = vld [vmem:[#allocation2 + $0x110] ss:$8 sps:$4 sm:$0xff]   ;;  %v14258_v58 = vld [vmem:[%s18306_s4 + $0x28] sm:$0xff]  }
 0x1bb   : > { %2067 = vmatprep.mubr.bf16.mxu1 %v14202_v59  ;;  %12763 = vmatpush3.bf16.msra.mxu1 %v14258_v58 }
 0x1bd   : > { %12565 = vmatpush3.bf16.msra.mxu0 %v16295_v7  ;;  %v14223_v7 = vld [vmem:[#allocation2 + $0x124] ss:$8 sps:$4 sm:$0xff]  }
 0x1be   : > { %12566 = vmatprep.subr.bf16.mxu0 %v16300_v8  ;;  %v15170_v8 = vld [vmem:[%s16259_s1 + $0x30] sm:$0xff]  }
 0x1c0   : > { %1490 = vmatmul.mubr.bf16.gmra.mxu0 %v14213_v60  ;;  %v14259_v60 = vld [vmem:[%s18306_s4 + $0x60] sm:$0xff]  }
 0x1c1   : > { %12567 = vmatpush3.bf16.msra.mxu0 %v16305_v9  ;;  %1497 = vmatprep.mubr.bf16.mxu0 %v14214_v61  ;;  %v15171_v9 = vld [vmem:[%s16259_s1 + $0x68] sm:$0xff]  }
 0x1c2   : > { %2068 = vmatmul.mubr.bf16.gmra.mxu1 %v14207_v62  ;;  %12568 = vmatprep.subr.bf16.mxu0 %v16310_v10  ;;  %v15172_v10 = vld [vmem:[%s16259_s1 + $0x28] sm:$0xff]  }
 0x1c3   : > { %12764 = vmatprep.subr.bf16.mxu1 %v14259_v60 }
 0x1c5   : > { %12569 = vmatpush3.bf16.msra.mxu0 %v16315_v13  ;;  %v14226_v13 = vld [vmem:[#allocation2 + $0x134] ss:$8 sps:$4 sm:$0xff]  }
 0x1c6   : > { %12570 = vmatprep.subr.bf16.mxu0 %v16320_v14  ;;  %v15174_v14 = vld [vmem:[%s16259_s1 + $0x20] sm:$0xff]  }
 0x1c8   : > { %1498 = vmatmul.mubr.bf16.gmra.mxu0 %v14216_v63  ;;  %v14260_v63 = vld [vmem:[%s18306_s4 + $0x20] sm:$0xff]  }
 0x1c9   : > { %12571 = vmatpush3.bf16.msra.mxu0 %v16325_v15  ;;  %1701 = vmatprep.mubr.bf16.mxu0 %v14219_v0  ;;  %v15175_v15 = vld [vmem:[%s16259_s1 + $0x58] sm:$0xff]  }
 0x1ca   : > { %12572 = vmatprep.subr.bf16.mxu0 %v16330_v16  ;;  %v15176_v16 = vld [vmem:[%s16259_s1 + $0x18] sm:$0xff]   ;;  %12765 = vmatpush3.bf16.msra.mxu1 %v14260_v63  ;;  %v14275_v63 = vld [vmem:[%s18306_s4 + $0xe0] sm:$0xff]  }
 0x1cd   : > { %12573 = vmatpush3.bf16.msra.mxu0 %v16335_v17  ;;  %v15177_v17 = vld [vmem:[%s16259_s1 + $0x50] sm:$0xff]   ;;  %s12397_s1 = sshll.u32 %s15992_s7, 5 }
 0x1ce   : > { %12638 = vmatprep.subr.bf16.mxu0 %v15167_v3  ;;  %s11203_s26 = scalar_lea.hbm %s18315_s30, %s12397_s1 }
 0x1d0   : > { %1702 = vmatmul.mubr.bf16.vlgmr.msra.gmra.mxu0 %v14217_v1  ;;  %v14261_v1 = vld [vmem:[%s18306_s4 + $0x58] sm:$0xff]  }
 0x1d1   : > { %12639 = vmatpush3.bf16.msra.mxu0 %v15168_v4  ;;  %1709 = vmatprep.mubr.bf16.mxu0 %v14220_v2 }
 0x1d2   : > { %12640 = vmatprep.subr.bf16.mxu0 %v15169_v5  ;;  %12766 = vmatprep.subr.bf16.mxu1 %v14261_v1  ;;  %v14276_v1 = vld [vmem:[%s18306_s4 + $0xa0] sm:$0xff]  }
 0x1d5   : > { %12641 = vmatpush3.bf16.msra.mxu0 %v15170_v8 }
 0x1d6   : > { %12642 = vmatprep.subr.bf16.mxu0 %v15171_v9 }
 0x1d8   : > { %1710 = vmatmul.mubr.bf16.gmra.mxu0 %v14222_v6  ;;  %v14262_v6 = vld [vmem:[%s18306_s4 + $0x18] sm:$0xff]  }
 0x1d9   : > { %12643 = vmatpush3.bf16.msra.mxu0 %v15172_v10  ;;  %1717 = vmatprep.mubr.bf16.mxu0 %v14223_v7 }
 0x1da   : > { %12644 = vmatprep.subr.bf16.mxu0 %v15173_v11  ;;  %12767 = vmatpush3.bf16.msra.mxu1 %v14262_v6 }
 0x1dd   : > { %12645 = vmatpush3.bf16.msra.mxu0 %v15174_v14 }
 0x1de   : > { %12646 = vmatprep.subr.bf16.mxu0 %v15175_v15 }
 0x1e0   : > { %1718 = vmatmul.mubr.bf16.gmra.mxu0 %v14225_v12 }
 0x1e1   : > { %12647 = vmatpush3.bf16.msra.mxu0 %v15176_v16  ;;  %1725 = vmatprep.mubr.bf16.mxu0 %v14226_v13 }
 0x1e2   : > { %12648 = vmatprep.subr.bf16.mxu0 %v15177_v17 }
 0x1e5   : > { %12649 = vmatpush3.bf16.msra.mxu0 %v15178_v20 }
 0x1e6   : > { %12650 = vmatprep.subr.bf16.mxu0 %v15179_v21 }
 0x1e8   : > { %1726 = vmatmul.mubr.bf16.gmra.mxu0 %v14228_v18 }
 0x1e9   : > { %12651 = vmatpush3.bf16.msra.mxu0 %v15180_v22  ;;  %1929 = vmatprep.mubr.bf16.mxu0 %v14231_v19 }
 0x1ea   : > { %12652 = vmatprep.subr.bf16.mxu0 %v15181_v23 }
 0x1ed   : > { %12653 = vmatpush3.bf16.msra.mxu0 %v15182_v26 }
 0x1ee   : > { %12718 = vmatprep.subr.bf16.mxu0 %v15167_v3 }
 0x1f0   : > { %1930 = vmatmul.mubr.bf16.vlgmr.msra.gmra.mxu0 %v14229_v24 }
 0x1f1   : > { %12719 = vmatpush3.bf16.msra.mxu0 %v15168_v4  ;;  %1937 = vmatprep.mubr.bf16.mxu0 %v14232_v25 }
 0x1f2   : > { %12720 = vmatprep.subr.bf16.mxu0 %v15169_v5 }
 0x1f5   : > { %12721 = vmatpush3.bf16.msra.mxu0 %v15170_v8 }
 0x1f6   : > { %12722 = vmatprep.subr.bf16.mxu0 %v15171_v9  ;;  %v14263_v9 = vld [vmem:[%s18306_s4 + $0x50] sm:$0xff]  }
 0x1f7   : > { %12768 = vmatprep.subr.bf16.mxu1 %v14263_v9 }
 0x1f8   : > { %1938 = vmatmul.mubr.bf16.gmra.mxu0 %v14234_v27 }
 0x1f9   : > { %12723 = vmatpush3.bf16.msra.mxu0 %v15172_v10  ;;  %1945 = vmatprep.mubr.bf16.mxu0 %v14235_v28 }
 0x1fa   : > { %12724 = vmatprep.subr.bf16.mxu0 %v15173_v11 }
 0x1fd   : > { %12725 = vmatpush3.bf16.msra.mxu0 %v15174_v14 }
 0x1fe   : > { %12726 = vmatprep.subr.bf16.mxu0 %v15175_v15  ;;  %v14264_v15 = vld [vmem:[%s18306_s4 + $0x10] sm:$0xff]  }
 0x1ff   : > { %12769 = vmatpush3.bf16.msra.mxu1 %v14264_v15 }
 0x200   : > { %1946 = vmatmul.mubr.bf16.gmra.mxu0 %v14237_v29 }
 0x201   : > { %12727 = vmatpush3.bf16.msra.mxu0 %v15176_v16  ;;  %1953 = vmatprep.mubr.bf16.mxu0 %v14238_v30  ;;  %v14267_v30 = vld [vmem:[%s18306_s4 + $0x40] sm:$0xff]  }
 0x202   : > { %12728 = vmatprep.subr.bf16.mxu0 %v15177_v17  ;;  %v14265_v17 = vld [vmem:[%s18306_s4 + $0x48] sm:$0xff]  }
 0x203   : > { %12770 = vmatprep.subr.bf16.mxu1 %v14265_v17 }
 0x205   : > { %12729 = vmatpush3.bf16.msra.mxu0 %v15178_v20 }
 0x206   : > { %12730 = vmatprep.subr.bf16.mxu0 %v15179_v21 }
 0x208   : > { %1954 = vmatmul.mubr.bf16.gmra.mxu0 %v14240_v31 }
 0x209   : > { %12731 = vmatpush3.bf16.msra.mxu0 %v15180_v22  ;;  %2157 = vmatprep.mubr.bf16.mxu0 %v14243_v32  ;;  %v14266_v22 = vld [vmem:[%s18306_s4 + $0x8] sm:$0xff]  }
 0x20a   : > { %12732 = vmatprep.subr.bf16.mxu0 %v15181_v23  ;;  %12771 = vmatpush3.bf16.msra.mxu1 %v14266_v22 }
 0x20b   : > { %12772 = vmatprep.subr.bf16.mxu1 %v14267_v30 }
 0x20d   : > { %12733 = vmatpush3.bf16.msra.mxu0 %v15182_v26 }
 0x210   : > { %2158 = vmatmul.mubr.bf16.vlgmr.msra.gmra.mxu0 %v14241_v33  ;;  %v14268_v33 = vld [vmem:[%s18306_s4] sm:$0xff]  }
 0x211   : > { %2165 = vmatprep.mubr.bf16.mxu0 %v14244_v34  ;;  %12773 = vmatpush3.bf16.msra.mxu1 %v14268_v33 }
 0x218   : > { %2166 = vmatmul.mubr.bf16.gmra.mxu0 %v14246_v35 }
 0x219   : > { %2173 = vmatprep.mubr.bf16.mxu0 %v14247_v36 }
 0x220   : > { %2174 = vmatmul.mubr.bf16.gmra.mxu0 %v14249_v37 }
 0x221   : > { %2181 = vmatprep.mubr.bf16.mxu0 %v14250_v38  ;;  %v14269_v38 = vld [vmem:[%s18306_s4 + $0xf8] sm:$0xff]  }
 0x222   : > { %12798 = vmatprep.subr.bf16.mxu0 %v14269_v38 }
 0x228   : > { %2182 = vmatmul.mubr.bf16.gmra.mxu0 %v14252_v39  ;;  %v14270_v39 = vld [vmem:[%s18306_s4 + $0xb8] sm:$0xff]  }
 0x229   : > { %12799 = vmatpush3.bf16.msra.mxu0 %v14270_v39 }
 0x22a   : > { %v12414_v41 = vpop.f32.mrf.mxu0  ;;  %v12534_v42 = vpop.f32.mrf.mxu1  ;;  %12800 = vmatprep.subr.bf16.mxu0 %v14271_v45 }
 0x22c   : > { %v12415_v43 = vpop.f32.mrf.mxu0  ;;  %v12535_v44 = vpop.f32.mrf.mxu1 }
 0x22d   : > { %v16443_v46 = vadd.f32 %v12415_v43, %v12414_v41  ;;  %v12536_v54 = vadd.f32 %v12535_v44, %v12534_v42 }
 0x22e   : > { %v16445_v47 = vpop.f32.mrf.mxu0  ;;  %v12537_v48 = vpop.f32.mrf.mxu1 }
 0x230   : > { %v16450_v50 = vpop.f32.mrf.mxu0  ;;  %v12538_v51 = vpop.f32.mrf.mxu1 }
 0x231   : > { %v12539_v55 = vadd.f32 %v12538_v51, %v12537_v48  ;;  %v14272_v48 = vld [vmem:[%s18306_s4 + $0xb0] sm:$0xff]  }
 0x232   : > { %v12420_v56 = vpop.f32.mrf.mxu0  ;;  %v12540_v57 = vpop.f32.mrf.mxu1  ;;  %12801 = vmatpush3.bf16.msra.mxu0 %v14272_v48 }
 0x233   : > { %v13949_v59 = vpack.i.bf16 %v12539_v55, %v12536_v54 }
 0x234   : > { %v12421_v61 = vpop.f32.mrf.mxu0  ;;  %v12541_v62 = vpop.f32.mrf.mxu1 }
 0x235   : > { %v16467_v0 = vadd.f32 %v12421_v61, %v12420_v56  ;;  %13950 = vrot.lane.b32.xlu0 %v13949_v59, %s15835_s27  ;;  %v12542_v7 = vadd.f32 %v12541_v62, %v12540_v57  ;;  %v14273_v56 = vld [vmem:[%s18306_s4 + $0xe8] sm:$0xff]  }
 0x236   : > { %v16473_v2 = vpop.f32.mrf.mxu0  ;;  %v12543_v3 = vpop.f32.mrf.mxu1  ;;  %v14274_v57 = vld [vmem:[%s18306_s4 + $0xa8] sm:$0xff]   ;;  %12802 = vmatprep.subr.bf16.mxu0 %v14273_v56 }
 0x237   : > { %12803 = vmatpush3.bf16.msra.mxu0 %v14274_v57  ;;  %v16576_v57 = vld [vmem:[%s18306_s4 + $0x118] sm:$0xff]  }
 0x238   : > { %v16475_v4 = vpop.f32.mrf.mxu0  ;;  %v12544_v5 = vpop.f32.mrf.mxu1  ;;  %12804 = vmatprep.subr.bf16.mxu0 %v14275_v63  ;;  %13246 = vmatprep.subr.bf16.mxu1 %v16576_v57 }
 0x239   : > { %v12545_v8 = vadd.f32 %v12544_v5, %v12543_v3 }
 0x23a   : > { %v12426_v10 = vpop.f32.mrf.mxu0  ;;  %v16483_v11 = vpop.f32.mrf.mxu1 }
 0x23b   : > { %v13959_v12 = vpack.i.bf16 %v12545_v8, %v12542_v7  ;;  %12805 = vmatpush3.bf16.msra.mxu0 %v14276_v1 }
 0x23c   : > { %v12427_v13 = vpop.f32.mrf.mxu0  ;;  %v16485_v14 = vpop.f32.mrf.mxu1 }
 0x23d   : > { %v16490_v16 = vadd.f32 %v12427_v13, %v12426_v10  ;;  %13960 = vrot.lane.b32.xlu1 %v13959_v12, %s15835_s27  ;;  %v14277_v12 = vld [vmem:[%s18306_s4 + $0xd8] sm:$0xff]  }
 0x23e   : > { %v16496_v18 = vpop.f32.mrf.mxu0  ;;  %v16498_v19 = vpop.f32.mrf.mxu1  ;;  %v14278_v13 = vld [vmem:[%s18306_s4 + $0x98] sm:$0xff]   ;;  %12806 = vmatprep.subr.bf16.mxu0 %v14277_v12 }
 0x23f   : > { %12807 = vmatpush3.bf16.msra.mxu0 %v14278_v13 }
 0x240   : > { %v16500_v20 = vpop.f32.mrf.mxu0  ;;  %v16502_v21 = vpop.f32.mrf.mxu1 }
 0x242   : > { %v12432_v23 = vpop.f32.mrf.mxu0  ;;  %v16507_v24 = vpop.f32.mrf.mxu1 }
 0x244   : > { %v12433_v25 = vpop.f32.mrf.mxu0  ;;  %v16509_v26 = vpop.f32.mrf.mxu1 }
 0x245   : > { %v16511_v27 = vadd.f32 %v12433_v25, %v12432_v23 }
 0x246   : > { %v16513_v28 = vpop.f32.mrf.mxu0  ;;  %v16515_v29 = vpop.f32.mrf.mxu1 }
 0x248   : > { %v16520_v31 = vpop.f32.mrf.mxu0  ;;  %v16522_v32 = vpop.f32.mrf.mxu1 }
 0x24a   : > { %v12454_v34 = vpop.f32.mrf.mxu0  ;;  %v12614_v35 = vpop.f32.mrf.mxu1 }
 0x24c   : > { %v12455_v36 = vpop.f32.mrf.mxu0  ;;  %v12615_v37 = vpop.f32.mrf.mxu1 }
 0x24d   : > { %v12456_v42 = vadd.f32 %v12455_v36, %v12454_v34  ;;  %v12616_v15 = vadd.f32 %v12615_v37, %v12614_v35  ;;  %v14279_v34 = vld [vmem:[%s18306_s4 + $0xd0] sm:$0xff]  }
 0x24e   : > { %v12457_v40 = vpop.f32.mrf.mxu0  ;;  %v12617_v41 = vpop.f32.mrf.mxu1  ;;  %v14280_v36 = vld [vmem:[%s18306_s4 + $0x90] sm:$0xff]   ;;  %12808 = vmatprep.subr.bf16.mxu0 %v14279_v34 }
 0x24f   : > { %12809 = vmatpush3.bf16.msra.mxu0 %v14280_v36 }
 0x250   : > { %v12458_v43 = vpop.f32.mrf.mxu0  ;;  %v12618_v44 = vpop.f32.mrf.mxu1 }
 0x251   : > { %v12459_v49 = vadd.f32 %v12458_v43, %v12457_v40  ;;  %v12619_v7 = vadd.f32 %v12618_v44, %v12617_v41  ;;  %v14281_v43 = vld [vmem:[%s18306_s4 + $0xc8] sm:$0xff]  }
 0x252   : > { %v12460_v51 = vpop.f32.mrf.mxu0  ;;  %v12620_v52 = vpop.f32.mrf.mxu1  ;;  %v14282_v44 = vld [vmem:[%s18306_s4 + $0x88] sm:$0xff]   ;;  %12810 = vmatprep.subr.bf16.mxu0 %v14281_v43 }
 0x253   : > { %v13954_v53 = vpack.i.bf16 %v12459_v49, %v12456_v42  ;;  %v13969_v23 = vpack.i.bf16 %v12619_v7, %v12616_v15  ;;  %12811 = vmatpush3.bf16.msra.mxu0 %v14282_v44 }
 0x254   : > { %v12461_v54 = vpop.f32.mrf.mxu0  ;;  %v12621_v55 = vpop.f32.mrf.mxu1 }
 0x255   : > { %13955 = vrot.lane.b32.xlu0 %v13954_v53, %s15835_s27  ;;  %v12462_v60 = vadd.f32 %v12461_v54, %v12460_v51  ;;  %v12622_v45 = vadd.f32 %v12621_v55, %v12620_v52  ;;  %v14285_v52 = vld [vmem:[%s18306_s4 + $0x80] sm:$0xff]  }
 0x256   : > { %v12463_v58 = vpop.f32.mrf.mxu0  ;;  %v12623_v59 = vpop.f32.mrf.mxu1 }
 0x258   : > { %v12464_v61 = vpop.f32.mrf.mxu0  ;;  %v12624_v62 = vpop.f32.mrf.mxu1 }
 0x259   : > { %v12465_v3 = vadd.f32 %v12464_v61, %v12463_v58  ;;  %v12625_v39 = vadd.f32 %v12624_v62, %v12623_v59  ;;  %v14284_v58 = vld [vmem:[%s18306_s4 + $0xc0] sm:$0xff]  }
 0x25a   : > { %v12466_v5 = vpop.f32.mrf.mxu0  ;;  %v12626_v6 = vpop.f32.mrf.mxu1  ;;  %12812 = vmatprep.subr.bf16.mxu0 %v14284_v58 }
 0x25b   : > { %v13964_v8 = vpack.i.bf16 %v12465_v3, %v12462_v60  ;;  %v13989_v51 = vpack.i.bf16 %v12625_v39, %v12622_v45  ;;  %12813 = vmatpush3.bf16.msra.mxu0 %v14285_v52 }
 0x25c   : > { %v12467_v9 = vpop.f32.mrf.mxu0  ;;  %v12627_v10 = vpop.f32.mrf.mxu1 }
 0x25d   : > { %13965 = vrot.lane.b32.xlu1 %v13964_v8, %s15835_s27  ;;  %v12468_v25 = vadd.f32 %v12467_v9, %v12466_v5  ;;  %v12628_v63 = vadd.f32 %v12627_v10, %v12626_v6 }
 0x25e   : > { %v12469_v17 = vpop.f32.mrf.mxu0  ;;  %v12629_v22 = vpop.f32.mrf.mxu1 }
 0x260   : > { %v12470_v30 = vpop.f32.mrf.mxu0  ;;  %v12630_v33 = vpop.f32.mrf.mxu1 }
 0x261   : > { %v12471_v38 = vadd.f32 %v12470_v30, %v12469_v17  ;;  %13970 = vrot.lane.b32.xlu1 %v13969_v23, %s15835_s27  ;;  %v12631_v60 = vadd.f32 %v12630_v33, %v12629_v22  ;;  %v12551_v22 = vadd.f32 %v16502_v21, %v16498_v19  ;;  %v12548_v30 = vadd.f32 %v16485_v14, %v16483_v11 }
 0x262   : > { %v12472_v35 = vpop.f32.mrf.mxu0  ;;  %v12632_v37 = vpop.f32.mrf.mxu1  ;;  %v12557_v11 = vadd.f32 %v16522_v32, %v16515_v29 }
 0x263   : > { %v13984_v40 = vpack.i.bf16 %v12471_v38, %v12468_v25  ;;  %v14014_v3 = vpack.i.bf16 %v12631_v60, %v12628_v63  ;;  %v13979_v36 = vpack.i.bf16 %v12551_v22, %v12548_v30 }
 0x264   : > { %v12473_v41 = vpop.f32.mrf.mxu0  ;;  %v12633_v42 = vpop.f32.mrf.mxu1 }
 0x265   : > { %13985 = vrot.lane.b32.xlu1 %v13984_v40, %s15835_s27  ;;  %v12474_v53 = vadd.f32 %v12473_v41, %v12472_v35  ;;  %v12634_v9 = vadd.f32 %v12633_v42, %v12632_v37  ;;  %v12554_v42 = vadd.f32 %v16509_v26, %v16507_v24 }
 0x266   : > { %v12475_v48 = vpop.f32.mrf.mxu0  ;;  %v12635_v49 = vpop.f32.mrf.mxu1 }
 0x267   : > { %v13999_v45 = vpack.i.bf16 %v12557_v11, %v12554_v42 }
 0x268   : > { %v12476_v54 = vpop.f32.mrf.mxu0  ;;  %v12636_v56 = vpop.f32.mrf.mxu1 }
 0x269   : > { %v12477_v55 = vadd.f32 %v12476_v54, %v12475_v48  ;;  %13990 = vrot.lane.b32.xlu1 %v13989_v51, %s15835_s27  ;;  %v12637_v5 = vadd.f32 %v12636_v56, %v12635_v49 }
 0x26a   : > { %v12694_v59 = vpop.f32.mrf.mxu1 }
 0x26b   : > { %v14004_v61 = vpack.i.bf16 %v12477_v55, %v12474_v53  ;;  %v14024_v6 = vpack.i.bf16 %v12637_v5, %v12634_v9 }
 0x26c   : > { %v12695_v62 = vpop.f32.mrf.mxu1 }
 0x26d   : > { %14005 = vrot.lane.b32.xlu1 %v14004_v61, %s15835_s27  ;;  %v12696_v12 = vadd.f32 %v12695_v62, %v12694_v59 }
 0x26e   : > { %v12697_v1 = vpop.f32.mrf.mxu1 }
 0x270   : > { %v12698_v7 = vpop.f32.mrf.mxu1  ;;  %v16587_v8 = vpop.f32.mrf.mxu0 }
 0x271   : > { %v12699_v13 = vadd.f32 %v12698_v7, %v12697_v1  ;;  %14015 = vrot.lane.b32.xlu1 %v14014_v3, %s15835_s27 }
 0x272   : > { %v12700_v15 = vpop.f32.mrf.mxu1  ;;  %v16590_v17 = vpop.f32.mrf.mxu0 }
 0x273   : > { %v13974_v10 = vpack.i.bf16 %v12699_v13, %v12696_v12 }
 0x274   : > { %v12701_v23 = vpop.f32.mrf.mxu1  ;;  %v12497_v25 = vpop.f32.mrf.mxu0 }
 0x275   : > { %14025 = vrot.lane.b32.xlu1 %v14024_v6, %s15835_s27  ;;  %13975 = vrot.lane.b32.xlu0 %v13974_v10, %s15835_s27  ;;  %v12702_v37 = vadd.f32 %v12701_v23, %v12700_v15 }
 0x276   : > { %v12703_v33 = vpop.f32.mrf.mxu1  ;;  %v12498_v34 = vpop.f32.mrf.mxu0 }
 0x278   : > { %v12704_v38 = vpop.f32.mrf.mxu1  ;;  %v16598_v35 = vpop.f32.mrf.mxu0 }
 0x279   : > { %v12705_v39 = vadd.f32 %v12704_v38, %v12703_v33  ;;  %13980 = vrot.lane.b32.xlu0 %v13979_v36, %s15835_s27 }
 0x27a   : > { %v12706_v19 = vpop.f32.mrf.mxu1  ;;  %v16601_v21 = vpop.f32.mrf.mxu0 }
 0x27b   : > { %v13994_v14 = vpack.i.bf16 %v12705_v39, %v12702_v37  ;;  %v12496_v37 = vadd.f32 %v16590_v17, %v16587_v8  ;;  %v12499_v39 = vadd.f32 %v12498_v34, %v12497_v25 }
 0x27c   : > { %v12707_v40 = vpop.f32.mrf.mxu1  ;;  %v16605_v41 = vpop.f32.mrf.mxu0 }
 0x27d   : > { %13995 = vrot.lane.b32.xlu0 %v13994_v14, %s15835_s27  ;;  %v12708_v51 = vadd.f32 %v12707_v40, %v12706_v19 }
 0x27e   : > { %v12709_v43 = vpop.f32.mrf.mxu1  ;;  %v16610_v44 = vpop.f32.mrf.mxu0 }
 0x280   : > { %v12710_v48 = vpop.f32.mrf.mxu1  ;;  %v12506_v49 = vpop.f32.mrf.mxu0 }
 0x281   : > { %v12711_v53 = vadd.f32 %v12710_v48, %v12709_v43  ;;  %14000 = vrot.lane.b32.xlu0 %v13999_v45, %s15835_s27 }
 0x282   : > { %v12712_v29 = vpop.f32.mrf.mxu1  ;;  %v12507_v32 = vpop.f32.mrf.mxu0 }
 0x283   : > { %v14009_v54 = vpack.i.bf16 %v12711_v53, %v12708_v51  ;;  %v16613_v56 = vadd.f32 %v12507_v32, %v12506_v49 }
 0x284   : > { %v12713_v58 = vpop.f32.mrf.mxu1  ;;  %v16615_v52 = vpop.f32.mrf.mxu0 }
 0x285   : > { %14010 = vrot.lane.b32.xlu0 %v14009_v54, %s15835_s27  ;;  %v12714_v60 = vadd.f32 %v12713_v58, %v12712_v29 }
 0x286   : > { %v12715_v24 = vpop.f32.mrf.mxu1  ;;  %v16618_v26 = vpop.f32.mrf.mxu0 }
 0x288   : > { %v12716_v55 = vpop.f32.mrf.mxu1  ;;  %v12512_v59 = vpop.f32.mrf.mxu0 }
 0x289   : > { %v12717_v61 = vadd.f32 %v12716_v55, %v12715_v24 }
 0x28a   : > { %v12513_v62 = vpop.f32.mrf.mxu0 }
 0x28b   : > { %v14019_v63 = vpack.i.bf16 %v12717_v61, %v12714_v60  ;;  %v16620_v1 = vadd.f32 %v12513_v62, %v12512_v59  ;;  %v12502_v62 = vadd.f32 %v16601_v21, %v16598_v35 }
 0x28c   : > { %v16622_v3 = vpop.f32.mrf.mxu0 }
 0x28d   : > { %14020 = vrot.lane.b32.xlu0 %v14019_v63, %s15835_s27  ;;  %v12505_v63 = vadd.f32 %v16610_v44, %v16605_v41 }
 0x28e   : > { %v16625_v5 = vpop.f32.mrf.mxu0 }
 0x290   : > { %v16627_v7 = vpop.f32.mrf.mxu0 }
 0x292   : > { %v16629_v9 = vpop.f32.mrf.mxu0 }
 0x294   : > { %v16631_v12 = vpop.f32.mrf.mxu0 }
 0x296   : > { %v16633_v13 = vpop.f32.mrf.mxu0 }
 0x298   : > { %v16635_v15 = vpop.f32.mrf.mxu0 }
 0x29a   : > { %v16637_v22 = vpop.f32.mrf.mxu0 }
 0x29c   : > { %v16639_v6 = vpop.f32.mrf.mxu0 }
 0x29e   : > { %v16641_v10 = vpop.f32.mrf.mxu0 }
 0x2a0   : > { %v16643_v23 = vpop.f32.mrf.mxu0 }
 0x2a2   : > { %v16645_v30 = vpop.f32.mrf.mxu0 }
 0x2a4   : > { %v16647_v33 = vpop.f32.mrf.mxu0 }
 0x2a6   : > { %v16649_v36 = vpop.f32.mrf.mxu0 }
 0x2a7   : > { %v13951_v38 = vpop.permute.xlu0 %13950 }
 0x2a8   : > { %v13953_v19 = vunpack.i.h.bf16 %v13951_v38  ;;  %v13952_v11 = vunpack.i.l.bf16 %v13951_v38  ;;  %v16653_v14 = vpop.f32.mrf.mxu0 }
 0x2aa   : > { %v2327_v40 = vsel %vm2318_vm0, %v12496_v37, %v13952_v11  ;;  %v2328_v42 = vsel %vm2318_vm0, %v12499_v39, %v13953_v19  ;;  %v16657_v43 = vpop.f32.mrf.mxu0  ;;  %v12419_v37 = vadd.f32 %v16450_v50, %v16445_v47 }
 0x2ab   : > { %v2352_v45 = vpack.c.bf16 %v2328_v42, %v2327_v40 }
 0x2ac   : > { %v16659_v48 = vpop.f32.mrf.mxu0 }
 0x2ad   : > { %2710 = vmatprep.mubr.bf16.mxu1 %v2352_v45  ;;  %v14286_v45 = vld [vmem:[%s18306_s4 + $0x110] sm:$0xff]  }
 0x2ae   : > { %v16661_v49 = vpop.f32.mrf.mxu0 }
 0x2af   : > { %v13961_v58 = vpop.permute.xlu1 %13960 }
 0x2b0   : > { %v16663_v51 = vpop.f32.mrf.mxu0  ;;  %v13963_v59 = vunpack.i.h.bf16 %v13961_v58  ;;  %v13962_v60 = vunpack.i.l.bf16 %v13961_v58 }
 0x2b2   : > { %v16665_v8 = vpop.f32.mrf.mxu0  ;;  %v2329_v40 = vsel %vm2318_vm0, %v12502_v62, %v13962_v60  ;;  %v2330_v42 = vsel %vm2318_vm0, %v12505_v63, %v13963_v59  ;;  %v12425_v60 = vadd.f32 %v16475_v4, %v16473_v2 }
 0x2b3   : > { %v2357_v50 = vpack.c.bf16 %v2330_v42, %v2329_v40  ;;  %v14288_v42 = vld [vmem:[%s18306_s4 + $0x100] sm:$0xff]  }
 0x2b4   : > { %v16667_v17 = vpop.f32.mrf.mxu0 }
 0x2b6   : > { %v16669_v25 = vpop.f32.mrf.mxu0 }
 0x2b8   : > { %v16671_v34 = vpop.f32.mrf.mxu0 }
 0x2ba   : > { %v16673_v53 = vpop.f32.mrf.mxu0 }
 0x2bc   : > { %v16675_v29 = vpop.f32.mrf.mxu0 }
 0x2be   : > { %v16677_v32 = vpop.f32.mrf.mxu0 }
 0x2c0   : > { %v16679_v54 = vpop.f32.mrf.mxu0 }
 0x2c2   : > { %v16681_v24 = vpop.f32.mrf.mxu0 }
 0x2c4   : > { %v16683_v55 = vpop.f32.mrf.mxu0 }
 0x2c6   : > { %v16685_v61 = vpop.f32.mrf.mxu0 }
 0x2c7   : > { %v13956_v38 = vpop.permute.xlu0 %13955 }
 0x2c8   : > { %v13958_v39 = vunpack.i.h.bf16 %v13956_v38  ;;  %v13957_v19 = vunpack.i.l.bf16 %v13956_v38  ;;  %v16693_v11 = vpop.f32.mrf.mxu0 }
 0x2ca   : > { %v2319_v35 = vsel %vm2318_vm0, %v16443_v46, %v13957_v19  ;;  %v2320_v21 = vsel %vm2318_vm0, %v12419_v37, %v13958_v39  ;;  %v16703_v41 = vpop.f32.mrf.mxu0  ;;  %v14287_v46 = vld [vmem:[%s18306_s4 + $0x108] sm:$0xff]   ;;  %s15840_s4 = smov [#allocation34]  }
 0x2cb   : > { %v2351_v47 = vpack.c.bf16 %v2320_v21, %v2319_v35  ;;  %s15707_s7 = sshll.u32 %s15840_s4, 4  ;;  %s15708_s7 = int_to_ptr.vmem [resolvable:$false] %s15707_s7 }
 0x2cc   : > { %v16705_v44 = vpop.f32.mrf.mxu0 }
 0x2cd   : > { %2711 = vmatmul.mubr.bf16.vlgmr.msra.gmra.mxu1 %v2351_v47 }
 0x2ce   : > { %2718 = vmatprep.mubr.bf16.mxu1 %v2357_v50  ;;  %v16707_v58 = vpop.f32.mrf.mxu0  ;;  %13247 = vmatpush3.bf16.msra.mxu1 %v16576_v57 }
 0x2cf   : > { %v13966_v59 = vpop.permute.xlu1 %13965  ;;  %13248 = vmatprep.subr.bf16.mxu1 %v14286_v45 }
 0x2d0   : > { %v13968_v62 = vunpack.i.h.bf16 %v13966_v59  ;;  %v13967_v63 = vunpack.i.l.bf16 %v13966_v59  ;;  %v16715_v38 = vpop.f32.mrf.mxu0 }
 0x2d2   : > { %v2321_v37 = vsel %vm2318_vm0, %v16467_v0, %v13967_v63  ;;  %v2322_v39 = vsel %vm2318_vm0, %v12425_v60, %v13968_v62  ;;  %v16720_v19 = vpop.f32.mrf.mxu0  ;;  %13249 = vmatpush3.bf16.msra.mxu1 %v14286_v45  ;;  %v16729_v0 = vld [vmem:[#allocation7 + $0x18] sm:$0xff]   ;;  %v12431_v45 = vadd.f32 %v16500_v20, %v16496_v18  ;;  %v12437_v18 = vadd.f32 %v16520_v31, %v16513_v28 }
 0x2d3   : > { %v13971_v57 = vpop.permute.xlu1 %13970  ;;  %v2356_v40 = vpack.c.bf16 %v2322_v39, %v2321_v37  ;;  %13250 = vmatprep.subr.bf16.mxu1 %v14287_v46  ;;  %18307 = vst [vmem:[#allocation55_spill] sm:$0xff] %v16729_v0  ;;  %v16760_v28 = vadd.f32 %v16629_v9, %v16627_v7  ;;  %v16764_v31 = vadd.f32 %v16633_v13, %v16631_v12 }
 0x2d4   : > { %v16725_v2 = vpop.f32.mrf.mxu0 }
 0x2d5   : > { %2719 = vmatmul.mubr.bf16.gmra.mxu1 %v2356_v40 }
 0x2d6   : > { %v16727_v4 = vpop.f32.mrf.mxu0  ;;  %13251 = vmatpush3.bf16.msra.mxu1 %v14287_v46 }
 0x2d7   : > { %v13986_v35 = vpop.permute.xlu1 %13985  ;;  %13252 = vmatprep.subr.bf16.mxu1 %v14288_v42 }
 0x2d8   : > { %v13988_v21 = vunpack.i.h.bf16 %v13986_v35  ;;  %v13987_v47 = vunpack.i.l.bf16 %v13986_v35  ;;  %v16733_v50 = vpop.f32.mrf.mxu0 }
 0x2da   : > { %v16735_v59 = vpop.f32.mrf.mxu0  ;;  %v2323_v60 = vsel %vm2318_vm0, %v16490_v16, %v13987_v47  ;;  %v2324_v62 = vsel %vm2318_vm0, %v12431_v45, %v13988_v21  ;;  %13253 = vmatpush3.bf16.msra.mxu1 %v14288_v42  ;;  %v13973_v21 = vunpack.i.h.bf16 %v13971_v57  ;;  %v13972_v47 = vunpack.i.l.bf16 %v13971_v57 }
 0x2db   : > { %v13991_v46 = vpop.permute.xlu1 %13990  ;;  %v2361_v63 = vpack.c.bf16 %v2324_v62, %v2323_v60  ;;  %13262 = vmatprep.subr.bf16.mxu1 %v16729_v0  ;;  %v12656_v62 = vadd.f32 %v16665_v8, %v16663_v51  ;;  %v12511_v51 = vadd.f32 %v16618_v26, %v16615_v52  ;;  %v16789_v52 = vadd.f32 %v16641_v10, %v16639_v6 }
 0x2dc   : > { %v16741_v37 = vpop.f32.mrf.mxu0  ;;  %v2336_v57 = vsel %vm2318_vm0, %v16764_v31, %v13973_v21  ;;  %v2335_v7 = vsel %vm2318_vm0, %v16760_v28, %v13972_v47  ;;  %v13992_v0 = vunpack.i.l.bf16 %v13991_v46 }
 0x2dd   : > { %v2353_v8 = vpack.c.bf16 %v2336_v57, %v2335_v7 }
 0x2de   : > { %v16745_v35 = vpop.f32.mrf.mxu0 }
 0x2df   : > { %v14006_v39 = vpop.permute.xlu1 %14005 }
 0x2e0   : > { %v14008_v20 = vunpack.i.h.bf16 %v14006_v39  ;;  %v14007_v40 = vunpack.i.l.bf16 %v14006_v39  ;;  %v16756_v60 = vpop.f32.mrf.mxu0  ;;  %v12659_v39 = vadd.f32 %v16669_v25, %v16667_v17 }
 0x2e2   : > { %v16749_v16 = vsel %vm2318_vm0, %v16511_v27, %v14007_v40  ;;  %v16752_v42 = vsel %vm2318_vm0, %v12437_v18, %v14008_v20  ;;  %v16774_v9 = vpop.f32.mrf.mxu0 }
 0x2e3   : > { %v14016_v6 = vpop.permute.xlu1 %14015 }
 0x2e4   : > { %v12749_v21 = vpop.f32.mrf.mxu0 }
 0x2e7   : > { %v13976_v27 = vpop.permute.xlu0 %13975 }
 0x2e8   : > { %v13978_v18 = vunpack.i.h.bf16 %v13976_v27  ;;  %v13977_v20 = vunpack.i.l.bf16 %v13976_v27  ;;  %v13993_v27 = vunpack.i.h.bf16 %v13991_v46  ;;  %v12662_v46 = vadd.f32 %v16673_v53, %v16671_v34 }
 0x2ea   : > { %v2343_v12 = vsel %vm2318_vm0, %v12656_v62, %v13977_v20  ;;  %v2344_v13 = vsel %vm2318_vm0, %v12659_v39, %v13978_v18  ;;  %v16785_v39 = vadd.f32 %v16637_v22, %v16635_v15  ;;  %v2338_v15 = vsel %vm2318_vm0, %v16789_v52, %v13993_v27  ;;  %v12750_v22 = vpop.f32.mrf.mxu0 }
 0x2eb   : > { %v13981_v40 = vpop.permute.xlu0 %13980  ;;  %v2354_v45 = vpack.c.bf16 %v2344_v13, %v2343_v12 }
 0x2ec   : > { %v13983_v17 = vunpack.i.h.bf16 %v13981_v40  ;;  %v13982_v25 = vunpack.i.l.bf16 %v13981_v40  ;;  %v2337_v57 = vsel %vm2318_vm0, %v16785_v39, %v13992_v0  ;;  %v14018_v40 = vunpack.i.h.bf16 %v14016_v6 }
 0x2ed   : > { %2775 = vmatprep.mubr.bf16.mxu0 %v2354_v45  ;;  %v12665_v45 = vadd.f32 %v16677_v32, %v16675_v29  ;;  %v12517_v29 = vadd.f32 %v16625_v5, %v16622_v3  ;;  %v2358_v13 = vpack.c.bf16 %v2338_v15, %v2337_v57  ;;  %v14017_v0 = vunpack.i.l.bf16 %v14016_v6 }
 0x2ee   : > { %2776 = vmatmul.mubr.bf16.vlgmr.msra.gmra.mxu0 %v2353_v8  ;;  %v2331_v47 = vsel %vm2318_vm0, %v16613_v56, %v13982_v25  ;;  %v2332_v62 = vsel %vm2318_vm0, %v12511_v51, %v13983_v17  ;;  %v12736_v51 = vadd.f32 %v16720_v19, %v16715_v38  ;;  %v12752_v8 = vpop.f32.mrf.mxu0  ;;  %v16812_v3 = vadd.f32 %v16645_v30, %v16643_v23 }
 0x2ef   : > { %v13996_v26 = vpop.permute.xlu0 %13995  ;;  %v2362_v18 = vpack.c.bf16 %v2332_v62, %v2331_v47  ;;  %v16816_v5 = vadd.f32 %v16649_v36, %v16647_v33  ;;  %v14026_v33 = vpop.permute.xlu1 %14025  ;;  %v18308_v36 = vpack.c.bf16 %v16752_v42, %v16749_v16  ;;  %v12748_v16 = vadd.f32 %v16774_v9, %v16756_v60  ;;  %v14290_v9 = vld [vmem:[#allocation7 + $0x10] sm:$0xff]  }
 0x2f0   : > { %v13998_v20 = vunpack.i.h.bf16 %v13996_v26  ;;  %v13997_v56 = vunpack.i.l.bf16 %v13996_v26  ;;  %v12753_v62 = vpop.f32.mrf.mxu0  ;;  %v2339_v23 = vsel %vm2318_vm0, %v16812_v3, %v14017_v0  ;;  %v12745_v26 = vadd.f32 %v16745_v35, %v16741_v37 }
 0x2f1   : > { %2726 = vmatprep.mubr.bf16.mxu1 %v2362_v18  ;;  %v2340_v30 = vsel %vm2318_vm0, %v16816_v5, %v14018_v40  ;;  %v12751_v42 = vadd.f32 %v12750_v22, %v12749_v21  ;;  %v12597_v57 = vadd.f32 %v16661_v49, %v16659_v48  ;;  %v12677_v37 = vadd.f32 %v16707_v58, %v16705_v44  ;;  %v18309_v49 = vld [vmem:[#allocation55_spill] sm:$0xff] }
 0x2f2   : > { %2727 = vmatmul.mubr.bf16.gmra.mxu1 %v2361_v63  ;;  %v2345_v10 = vsel %vm2318_vm0, %v12662_v46, %v13997_v56  ;;  %v2346_v7 = vsel %vm2318_vm0, %v12665_v45, %v13998_v20  ;;  %v12739_v63 = vadd.f32 %v16727_v4, %v16725_v2  ;;  %v12668_v2 = vadd.f32 %v16681_v24, %v16679_v54  ;;  %v12755_v20 = vpop.f32.mrf.mxu0 }
 0x2f3   : > { %v14001_v34 = vpop.permute.xlu0 %14000  ;;  %v2359_v53 = vpack.c.bf16 %v2346_v7, %v2345_v10  ;;  %v12671_v4 = vadd.f32 %v16685_v61, %v16683_v55  ;;  %v12742_v61 = vadd.f32 %v16735_v59, %v16733_v50  ;;  %v2363_v18 = vpack.c.bf16 %v2340_v30, %v2339_v23  ;;  %v14291_v10 = vld [vmem:[#allocation7 + $0x8] sm:$0xff]  }
 0x2f4   : > { %v14003_v32 = vunpack.i.h.bf16 %v14001_v34  ;;  %v14002_v12 = vunpack.i.l.bf16 %v14001_v34  ;;  %v2355_v47 = vpack.c.bf16 %v12739_v63, %v12736_v51  ;;  %v14028_v46 = vunpack.i.h.bf16 %v14026_v33  ;;  %v12756_v22 = vpop.f32.mrf.mxu0  ;;  %v14292_v34 = vld [vmem:[#allocation7] sm:$0xff]  }
 0x2f5   : > { %2783 = vmatprep.mubr.bf16.mxu0 %v2359_v53  ;;  %v14027_v45 = vunpack.i.l.bf16 %v14026_v33  ;;  %v12594_v56 = vadd.f32 %v16657_v43, %v16653_v14  ;;  %v12674_v50 = vadd.f32 %v16703_v41, %v16693_v11  ;;  %v2360_v35 = vpack.c.bf16 %v12745_v26, %v12742_v61 }
 0x2f6   : > { %2784 = vmatmul.mubr.bf16.gmra.mxu0 %v2358_v13  ;;  %v2333_v17 = vsel %vm2318_vm0, %v16620_v1, %v14002_v12  ;;  %v2334_v25 = vsel %vm2318_vm0, %v12517_v29, %v14003_v32  ;;  %v2365_v21 = vpack.c.bf16 %v12751_v42, %v12748_v16  ;;  %v2342_v14 = vsel %vm2318_vm0, %v12597_v57, %v14028_v46  ;;  %v11592_v42 = vld [vmem:[#allocation8] ss:$0 sm:$0xff] }
 0x2f7   : > { %v14011_v38 = vpop.permute.xlu0 %14010  ;;  %v2367_v19 = vpack.c.bf16 %v2334_v25, %v2333_v17  ;;  %v2341_v6 = vsel %vm2318_vm0, %v12594_v56, %v14027_v45  ;;  %v12754_v41 = vadd.f32 %v12753_v62, %v12752_v8  ;;  %v12757_v44 = vadd.f32 %v12756_v22, %v12755_v20 }
 0x2f8   : > { %v14013_v27 = vunpack.i.h.bf16 %v14011_v38  ;;  %v14012_v1 = vunpack.i.l.bf16 %v14011_v38  ;;  %v2368_v58 = vpack.c.bf16 %v2342_v14, %v2341_v6  ;;  %v2881_v53 = vpack.c.bf16 %v16764_v31, %v16760_v28  ;;  %v14293_v28 = vld [vmem:[#allocation5 + $0x20] sm:$0xff]  }
 0x2f9   : > { %2734 = vmatprep.mubr.bf16.mxu1 %v2367_v19  ;;  %v2370_v7 = vpack.c.bf16 %v12757_v44, %v12754_v41  ;;  %v2882_v29 = vpack.c.bf16 %v16789_v52, %v16785_v39  ;;  %v2883_v32 = vpack.c.bf16 %v16816_v5, %v16812_v3  ;;  %v2884_v12 = vpack.c.bf16 %v12597_v57, %v12594_v56  ;;  %v14294_v31 = vld [vmem:[#allocation5] sm:$0xff]  }
 0x2fa   : > { %2735 = vmatmul.mubr.bf16.gmra.mxu1 %v18308_v36  ;;  %v2347_v54 = vsel %vm2318_vm0, %v12668_v2, %v14012_v1  ;;  %v2348_v24 = vsel %vm2318_vm0, %v12671_v4, %v14013_v27 }
 0x2fb   : > { %13254 = vmatprep.mubr.msk.bf16.mxu1 %vm2318_vm0, %v2355_v47  ;;  %v2364_v55 = vpack.c.bf16 %v2348_v24, %v2347_v54 }
 0x2fd   : > { %2791 = vmatprep.mubr.bf16.mxu0 %v2364_v55 }
 0x2fe   : > { %2792 = vmatmul.mubr.bf16.gmra.mxu0 %v2363_v18 }
 0x2ff   : > { %v14021_v59 = vpop.permute.xlu0 %14020 }
 0x300   : > { %v14023_v15 = vunpack.i.h.bf16 %v14021_v59  ;;  %v14022_v60 = vunpack.i.l.bf16 %v14021_v59 }
 0x302   : > { %13255 = vmatmul.mubr.msk.bf16.vlgmr.msra.gmra.mxu1 %vm2318_vm0, %v2360_v35  ;;  %v2349_v43 = vsel %vm2318_vm0, %v12674_v50, %v14022_v60  ;;  %v2350_v48 = vsel %vm2318_vm0, %v12677_v37, %v14023_v15 }
 0x303   : > { %13258 = vmatprep.mubr.msk.bf16.mxu1 %vm2318_vm0, %v2365_v21  ;;  %13263 = vmatpush3.bf16.msra.mxu1 %v18309_v49  ;;  %v2369_v11 = vpack.c.bf16 %v2350_v48, %v2349_v43 }
 0x304   : > { %13264 = vmatprep.subr.bf16.mxu1 %v14290_v9 }
 0x305   : > { %2799 = vmatprep.mubr.bf16.mxu0 %v2369_v11 }
 0x306   : > { %2800 = vmatmul.mubr.bf16.gmra.mxu0 %v2368_v58 }
 0x307   : > { %13265 = vmatpush3.bf16.msra.mxu1 %v14290_v9  ;;  %13286 = vmatprep.mubr.msk.bf16.mxu0 %vm2318_vm0, %v14294_v31 }
 0x308   : > { %13266 = vmatprep.subr.bf16.mxu1 %v14291_v10 }
 0x30a   : > { %13259 = vmatmul.mubr.msk.bf16.gmra.mxu1 %vm2318_vm0, %v2370_v7 }
 0x30b   : > { %13267 = vmatpush3.bf16.msra.mxu1 %v14291_v10  ;;  %13270 = vmatprep.mubr.msk.bf16.mxu1 %vm2318_vm0, %v2881_v53 }
 0x30c   : > { %13268 = vmatprep.subr.bf16.mxu1 %v14292_v34 }
 0x30f   : > { %13269 = vmatpush3.bf16.msra.mxu1 %v14292_v34 }
 0x312   : > { %13271 = vmatmul.mubr.msk.bf16.vlgmr.msra.gmra.mxu1 %vm2318_vm0, %v2882_v29 }
 0x313   : > { %13274 = vmatprep.mubr.msk.bf16.mxu1 %vm2318_vm0, %v2883_v32 }
 0x31a   : > { %13275 = vmatmul.mubr.msk.bf16.gmra.mxu1 %vm2318_vm0, %v2884_v12 }
 0x31b   : > { %13302 = vmatprep.mubr.msk.bf16.mxu1 %vm2318_vm0, %v14293_v28 }
 0x38d   : > { %v16866_v13 = vpop.f32.mrf.mxu1 }
 0x38f   : > { %v12775_v40 = vpop.f32.mrf.mxu1 }
 0x390   : > { %v12776_v31 = vadd.f32 %v12775_v40, %v16866_v13 }
 0x391   : > { %v12777_v39 = vpop.f32.mrf.mxu1 }
 0x393   : > { %v12778_v52 = vpop.f32.mrf.mxu1 }
 0x394   : > { %v12779_v10 = vadd.f32 %v12778_v52, %v12777_v39 }
 0x395   : > { %v12780_v0 = vpop.f32.mrf.mxu1 }
 0x397   : > { %v12781_v51 = vpop.f32.mrf.mxu1 }
 0x398   : > { %v12782_v14 = vadd.f32 %v12781_v51, %v12780_v0 }
 0x399   : > { %v12783_v63 = vpop.f32.mrf.mxu1 }
 0x39b   : > { %v12784_v17 = vpop.f32.mrf.mxu1 }
 0x39c   : > { %v12785_v15 = vadd.f32 %v12784_v17, %v12783_v63  ;;  %v2721_v63 = vadd.f32 %v12782_v14, %v11592_v42  ;;  %v14313_v14 = vld [vmem:[#allocation5 + $0xb0] sm:$0xff]  }
 0x39e   : > { %v2724_v7 = vadd.f32 %v12785_v15, %v11592_v42  ;;  %v14307_v15 = vld [vmem:[#allocation5 + $0x78] sm:$0xff]  }
 0x3ae   : > { %v16868_v8 = vpop.f32.mrf.mxu0 }
 0x3b0   : > { %v16870_v25 = vpop.f32.mrf.mxu0 }
 0x3b1   : > { %v12816_v39 = vadd.f32 %v16870_v25, %v16868_v8 }
 0x3b2   : > { %v12786_v3 = vpop.f32.mrf.mxu1  ;;  %v12817_v5 = vpop.f32.mrf.mxu0 }
 0x3b4   : > { %v12787_v38 = vpop.f32.mrf.mxu1  ;;  %v12818_v19 = vpop.f32.mrf.mxu0 }
 0x3b5   : > { %v12788_v20 = vadd.f32 %v12787_v38, %v12786_v3  ;;  %v12819_v17 = vadd.f32 %v12818_v19, %v12817_v5 }
 0x3b6   : > { %v12789_v2 = vpop.f32.mrf.mxu1  ;;  %v12820_v4 = vpop.f32.mrf.mxu0 }
 0x3b7   : > { %v2729_v43 = vadd.f32 %v12788_v20, %v11592_v42  ;;  %v14300_v20 = vld [vmem:[#allocation5 + $0x18] sm:$0xff]  }
 0x3b8   : > { %v12790_v27 = vpop.f32.mrf.mxu1  ;;  %v12821_v1 = vpop.f32.mrf.mxu0 }
 0x3b9   : > { %v12791_v50 = vadd.f32 %v12790_v27, %v12789_v2  ;;  %v12822_v34 = vadd.f32 %v12821_v1, %v12820_v4  ;;  %v2716_v27 = vadd.f32 %v12779_v10, %v11592_v42  ;;  %v14321_v10 = vld [vmem:[#allocation5 + $0xf0] sm:$0xff]  }
 0x3ba   : > { %v12792_v47 = vpop.f32.mrf.mxu1  ;;  %v12823_v62 = vpop.f32.mrf.mxu0 }
 0x3bb   : > { %v2732_v11 = vadd.f32 %v12791_v50, %v11592_v42  ;;  %v2786_v52 = vadd.f32 %v12822_v34, %v2721_v63  ;;  %v14303_v50 = vld [vmem:[#allocation5 + $0x68] sm:$0xff]   ;;  %v14322_v34 = vld [vmem:[#allocation5 + $0xf8] sm:$0xff]  }
 0x3bc   : > { %v12793_v23 = vpop.f32.mrf.mxu1  ;;  %v12824_v30 = vpop.f32.mrf.mxu0  ;;  %v14330_v63 = vld [vmem:[%s18311_s18 + $0x38] sm:$0xff]  }
 0x3bd   : > { %v12794_v46 = vadd.f32 %v12793_v23, %v12792_v47  ;;  %v12825_v41 = vadd.f32 %v12824_v30, %v12823_v62  ;;  %v2713_v23 = vadd.f32 %v12776_v31, %v11592_v42  ;;  %v14329_v31 = vld [vmem:[%s18310_s6 + $0x78] sm:$0xff]  }
 0x3be   : > { %v12795_v33 = vpop.f32.mrf.mxu1  ;;  %v12826_v36 = vpop.f32.mrf.mxu0 }
 0x3bf   : > { %v2737_v59 = vadd.f32 %v12794_v46, %v11592_v42  ;;  %v2789_v51 = vadd.f32 %v12825_v41, %v2724_v7  ;;  %v2778_v5 = vadd.f32 %v12816_v39, %v2713_v23  ;;  %v14296_v46 = vld [vmem:[#allocation5 + $0x8] sm:$0xff]   ;;  %v14318_v41 = vld [vmem:[#allocation5 + $0xc0] sm:$0xff]   ;;  %v14323_v7 = vld [vmem:[#allocation5 + $0xd0] sm:$0xff]  }
 0x3c0   : > { %v12796_v54 = vpop.f32.mrf.mxu1  ;;  %v12827_v24 = vpop.f32.mrf.mxu0 }
 0x3c1   : > { %v12797_v37 = vadd.f32 %v12796_v54, %v12795_v33  ;;  %v12828_v21 = vadd.f32 %v12827_v24, %v12826_v36  ;;  %v2781_v33 = vadd.f32 %v12819_v17, %v2716_v27  ;;  %v14331_v17 = vld [vmem:[%s18311_s18 + $0x70] sm:$0xff]  }
 0x3c2   : > { %v12829_v55 = vpop.f32.mrf.mxu0  ;;  %v13256_v61 = vpop.f32.mrf.mxu1 }
 0x3c3   : > { %v2740_v44 = vadd.f32 %v12797_v37, %v11592_v42  ;;  %v2794_v32 = vadd.f32 %v12828_v21, %v2729_v43  ;;  %v2851_v30 = vadd.f32 %v13256_v61, %v2786_v52  ;;  %v14299_v42 = vld [vmem:[#allocation5 + $0x38] sm:$0xff]   ;;  %v14305_v37 = vld [vmem:[#allocation5 + $0x70] sm:$0xff]   ;;  %v14310_v21 = vld [vmem:[#allocation5 + $0x80] sm:$0xff]  }
 0x3c4   : > { %v12830_v26 = vpop.f32.mrf.mxu0  ;;  %v16872_v18 = vpop.f32.mrf.mxu1  ;;  %v14314_v43 = vld [vmem:[#allocation5 + $0x90] sm:$0xff]  }
 0x3c5   : > { %v12831_v22 = vadd.f32 %v12830_v26, %v12829_v55  ;;  %v2875_v8 = vmax.f32 %v2851_v30, 0.0  ;;  %v2843_v25 = vadd.f32 %v16872_v18, %v2778_v5  ;;  %v14295_v18 = vld [vmem:[#allocation5 + $0x28] sm:$0xff]   ;;  %v14339_v5 = vld [vmem:[%s18311_s18 + $0x50] sm:$0xff]  }
 0x3c6   : > { %v12832_v45 = vpop.f32.mrf.mxu0  ;;  %v13257_v16 = vpop.f32.mrf.mxu1 }
 0x3c7   : > { %v2797_v28 = vadd.f32 %v12831_v22, %v2732_v11  ;;  %v2854_v4 = vadd.f32 %v13257_v16, %v2789_v51  ;;  %v2873_v61 = vmax.f32 %v2843_v25, 0.0  ;;  %v14298_v16 = vld [vmem:[#allocation5 + $0x10] sm:$0xff]   ;;  %v14311_v22 = vld [vmem:[#allocation5 + $0xa8] sm:$0xff]   ;;  %v14317_v11 = vld [vmem:[#allocation5 + $0xe0] sm:$0xff]  }
 0x3c8   : > { %v12833_v56 = vpop.f32.mrf.mxu0  ;;  %v2845_v57 = vpop.f32.mrf.mxu1  ;;  %v14333_v51 = vld [vmem:[%s18311_s18 + $0x68] sm:$0xff]  }
 0x3c9   : > { %v12834_v35 = vadd.f32 %v12833_v56, %v12832_v45  ;;  %v2876_v19 = vmax.f32 %v2854_v4, 0.0  ;;  %v2846_v36 = vadd.f32 %v2845_v57, %v2781_v33  ;;  %v14297_v45 = vld [vmem:[#allocation5 + $0x30] sm:$0xff]   ;;  %v14301_v56 = vld [vmem:[#allocation5 + $0x60] sm:$0xff]   ;;  %v14337_v33 = vld [vmem:[%s18311_s18 + $0x58] sm:$0xff]  }
 0x3ca   : > { %v12835_v60 = vpop.f32.mrf.mxu0  ;;  %v13260_v9 = vpop.f32.mrf.mxu1  ;;  %v14302_v57 = vld [vmem:[#allocation5 + $0x40] sm:$0xff]  }
 0x3cb   : > { %v2802_v6 = vadd.f32 %v12834_v35, %v2737_v59  ;;  %v16888_v24 = vpack.c.bf16 %v2876_v19, %v2875_v8  ;;  %v2874_v55 = vmax.f32 %v2846_v36, 0.0  ;;  %v14304_v59 = vld [vmem:[#allocation5 + $0x48] sm:$0xff]   ;;  %v14306_v35 = vld [vmem:[#allocation5 + $0x50] sm:$0xff]  }
 0x3cc   : > { %v12836_v48 = vpop.f32.mrf.mxu0  ;;  %v2858_v49 = vpop.f32.mrf.mxu1  ;;  %v14340_v19 = vld [vmem:[%s18311_s18 + $0x10] sm:$0xff]  }
 0x3cd   : > { %v12837_v58 = vadd.f32 %v12836_v48, %v12835_v60  ;;  %v2867_v29 = vadd.f32 %v13260_v9, %v2802_v6  ;;  %v2859_v3 = vadd.f32 %v2858_v49, %v2794_v32  ;;  %v16894_v26 = vpack.c.bf16 %v2874_v55, %v2873_v61  ;;  %v14308_v60 = vld [vmem:[#allocation5 + $0x58] sm:$0xff]   ;;  %v14309_v9 = vld [vmem:[#allocation5 + $0xa0] sm:$0xff]   ;;  %v14312_v6 = vld [vmem:[#allocation5 + $0x88] sm:$0xff]  }
 0x3ce   : > { %v13261_v53 = vpop.f32.mrf.mxu1  ;;  %v14315_v48 = vld [vmem:[#allocation5 + $0xb8] sm:$0xff]   ;;  %v14326_v32 = vld [vmem:[#allocation5 + $0x108] sm:$0xff]  }
 0x3cf   : > { %v2805_v12 = vadd.f32 %v12837_v58, %v2740_v44  ;;  %v2879_v1 = vmax.f32 %v2867_v29, 0.0  ;;  %v2877_v13 = vmax.f32 %v2859_v3, 0.0  ;;  %v14316_v49 = vld [vmem:[#allocation5 + $0x98] sm:$0xff]   ;;  %v14319_v44 = vld [vmem:[#allocation5 + $0xe8] sm:$0xff]   ;;  %v14325_v29 = vld [vmem:[#allocation5 + $0x100] sm:$0xff]  }
 0x3d0   : > { %v2861_v0 = vpop.f32.mrf.mxu1  ;;  %v14320_v58 = vld [vmem:[#allocation5 + $0xc8] sm:$0xff]  }
 0x3d1   : > { %v2870_v38 = vadd.f32 %v13261_v53, %v2805_v12  ;;  %v2862_v2 = vadd.f32 %v2861_v0, %v2797_v28  ;;  %v14324_v53 = vld [vmem:[#allocation5 + $0xd8] sm:$0xff]   ;;  %v14327_v12 = vld [vmem:[#allocation5 + $0x110] sm:$0xff]   ;;  %v14334_v3 = vld [vmem:[%s18311_s18 + $0x28] sm:$0xff]  }
 0x3d2   : > { %v14328_v28 = vld [vmem:[#allocation5 + $0x118] sm:$0xff]   ;;  %v14332_v0 = vld [vmem:[%s18311_s18 + $0x30] sm:$0xff]  }
 0x3d3   : > { %v2880_v47 = vmax.f32 %v2870_v38, 0.0  ;;  %v2878_v62 = vmax.f32 %v2862_v2, 0.0  ;;  %v17010_v38 = vpop.f32.mrf.mxu1 }
 0x3d5   : > { %v16877_v40 = vpack.c.bf16 %v2880_v47, %v2879_v1  ;;  %v16879_v54 = vpack.c.bf16 %v2878_v62, %v2877_v13  ;;  %v17012_v2 = vpop.f32.mrf.mxu1  ;;  %v14335_v47 = vld [vmem:[%s18311_s18 + $0x60] sm:$0xff]   ;;  %v14338_v13 = vld [vmem:[%s18311_s18 + $0x18] sm:$0xff]  }
 0x3d6   : > { %v14336_v62 = vld [vmem:[%s18311_s18 + $0x20] sm:$0xff]  }
 0x3d7   : > { %13278 = vmatprep.subr.bf16.mxu0 %v16877_v40  ;;  %13294 = vmatprep.subr.bf16.mxu1 %v16877_v40  ;;  %v17014_v27 = vpop.f32.mrf.mxu1 }
 0x3d8   : > { %13279 = vmatpush3.bf16.msra.mxu0 %v16877_v40  ;;  %13295 = vmatpush3.bf16.msra.mxu1 %v16877_v40 }
 0x3d9   : > { %13280 = vmatprep.subr.bf16.mxu0 %v16879_v54  ;;  %13296 = vmatprep.subr.bf16.mxu1 %v16879_v54  ;;  %v17016_v39 = vpop.f32.mrf.mxu1 }
 0x3db   : > { %v17018_v52 = vpop.f32.mrf.mxu1 }
 0x3dc   : > { %13281 = vmatpush3.bf16.msra.mxu0 %v16879_v54  ;;  %13297 = vmatpush3.bf16.msra.mxu1 %v16879_v54 }
 0x3dd   : > { %13282 = vmatprep.subr.bf16.mxu0 %v16888_v24  ;;  %13298 = vmatprep.subr.bf16.mxu1 %v16888_v24  ;;  %v17020_v4 = vpop.f32.mrf.mxu1 }
 0x3df   : > { %v17022_v1 = vpop.f32.mrf.mxu1 }
 0x3e0   : > { %13283 = vmatpush3.bf16.msra.mxu0 %v16888_v24  ;;  %13299 = vmatpush3.bf16.msra.mxu1 %v16888_v24 }
 0x3e1   : > { %13284 = vmatprep.subr.bf16.mxu0 %v16894_v26  ;;  %13300 = vmatprep.subr.bf16.mxu1 %v16894_v26  ;;  %v17030_v23 = vpop.f32.mrf.mxu1 }
 0x3e4   : > { %13285 = vmatpush3.bf16.msra.mxu0 %v16894_v26  ;;  %13301 = vmatpush3.bf16.msra.mxu1 %v16894_v26 }
 0x3e5   : > { %13310 = vmatprep.subr.bf16.mxu0 %v16877_v40  ;;  %13326 = vmatprep.subr.bf16.mxu1 %v16877_v40 }
 0x3e7   : > { %13303 = vmatmul.mubr.msk.bf16.vlgmr.msra.gmra.mxu1 %vm2318_vm0, %v14295_v18  ;;  %13287 = vmatmul.mubr.msk.bf16.vlgmr.msra.gmra.mxu0 %vm2318_vm0, %v14296_v46  ;;  %v14343_v46 = vld [vmem:[%s18311_s18 + $0x40] sm:$0xff]  }
 0x3e8   : > { %13311 = vmatpush3.bf16.msra.mxu0 %v16877_v40  ;;  %13327 = vmatpush3.bf16.msra.mxu1 %v16877_v40 }
 0x3e9   : > { %13312 = vmatprep.subr.bf16.mxu0 %v16879_v54  ;;  %13328 = vmatprep.subr.bf16.mxu1 %v16879_v54 }
 0x3ea   : > { %13306 = vmatprep.mubr.msk.bf16.mxu1 %vm2318_vm0, %v14297_v45  ;;  %13290 = vmatprep.mubr.msk.bf16.mxu0 %vm2318_vm0, %v14298_v16  ;;  %v14344_v45 = vld [vmem:[%s18311_s18] sm:$0xff]  }
 0x3ec   : > { %13313 = vmatpush3.bf16.msra.mxu0 %v16879_v54  ;;  %13329 = vmatpush3.bf16.msra.mxu1 %v16879_v54 }
 0x3ed   : > { %13314 = vmatprep.subr.bf16.mxu0 %v16888_v24  ;;  %13330 = vmatprep.subr.bf16.mxu1 %v16888_v24 }
 0x3ef   : > { %13307 = vmatmul.mubr.msk.bf16.gmra.mxu1 %vm2318_vm0, %v14299_v42  ;;  %13291 = vmatmul.mubr.msk.bf16.gmra.mxu0 %vm2318_vm0, %v14300_v20  ;;  %v14345_v20 = vld [vmem:[%s18311_s18 + $0xf8] sm:$0xff]  }
 0x3f0   : > { %13315 = vmatpush3.bf16.msra.mxu0 %v16888_v24  ;;  %13331 = vmatpush3.bf16.msra.mxu1 %v16888_v24 }
 0x3f1   : > { %13316 = vmatprep.subr.bf16.mxu0 %v16894_v26  ;;  %13332 = vmatprep.subr.bf16.mxu1 %v16894_v26 }
 0x3f2   : > { %13334 = vmatprep.mubr.msk.bf16.mxu1 %vm2318_vm0, %v14301_v56  ;;  %13318 = vmatprep.mubr.msk.bf16.mxu0 %vm2318_vm0, %v14302_v57  ;;  %v14346_v56 = vld [vmem:[%s18311_s18 + $0xb8] sm:$0xff]  }
 0x3f4   : > { %13317 = vmatpush3.bf16.msra.mxu0 %v16894_v26  ;;  %13333 = vmatpush3.bf16.msra.mxu1 %v16894_v26 }
 0x3f5   : > { %13342 = vmatprep.subr.bf16.mxu0 %v16877_v40  ;;  %13358 = vmatprep.subr.bf16.mxu1 %v16877_v40 }
 0x3f7   : > { %13335 = vmatmul.mubr.msk.bf16.vlgmr.msra.gmra.mxu1 %vm2318_vm0, %v14303_v50  ;;  %13319 = vmatmul.mubr.msk.bf16.vlgmr.msra.gmra.mxu0 %vm2318_vm0, %v14304_v59  ;;  %v14347_v59 = vld [vmem:[%s18311_s18 + $0xf0] sm:$0xff]  }
 0x3f8   : > { %13343 = vmatpush3.bf16.msra.mxu0 %v16877_v40  ;;  %13359 = vmatpush3.bf16.msra.mxu1 %v16877_v40 }
 0x3f9   : > { %13344 = vmatprep.subr.bf16.mxu0 %v16879_v54  ;;  %13360 = vmatprep.subr.bf16.mxu1 %v16879_v54 }
 0x3fa   : > { %13338 = vmatprep.mubr.msk.bf16.mxu1 %vm2318_vm0, %v14305_v37  ;;  %13322 = vmatprep.mubr.msk.bf16.mxu0 %vm2318_vm0, %v14306_v35  ;;  %v14348_v37 = vld [vmem:[%s18311_s18 + $0xb0] sm:$0xff]  }
 0x3fc   : > { %13345 = vmatpush3.bf16.msra.mxu0 %v16879_v54  ;;  %13361 = vmatpush3.bf16.msra.mxu1 %v16879_v54 }
 0x3fd   : > { %13346 = vmatprep.subr.bf16.mxu0 %v16888_v24  ;;  %13362 = vmatprep.subr.bf16.mxu1 %v16888_v24 }
 0x3ff   : > { %13339 = vmatmul.mubr.msk.bf16.gmra.mxu1 %vm2318_vm0, %v14307_v15  ;;  %13323 = vmatmul.mubr.msk.bf16.gmra.mxu0 %vm2318_vm0, %v14308_v60 }
 0x400   : > { %13347 = vmatpush3.bf16.msra.mxu0 %v16888_v24  ;;  %13363 = vmatpush3.bf16.msra.mxu1 %v16888_v24 }
 0x401   : > { %13348 = vmatprep.subr.bf16.mxu0 %v16894_v26  ;;  %13364 = vmatprep.subr.bf16.mxu1 %v16894_v26 }
 0x402   : > { %13366 = vmatprep.mubr.msk.bf16.mxu1 %vm2318_vm0, %v14309_v9  ;;  %13350 = vmatprep.mubr.msk.bf16.mxu0 %vm2318_vm0, %v14310_v21  ;;  %v14349_v9 = vld [vmem:[%s18311_s18 + $0xe8] sm:$0xff]  }
 0x403   : > { %v14350_v21 = vld [vmem:[%s18311_s18 + $0xa8] sm:$0xff]  }
 0x404   : > { %13349 = vmatpush3.bf16.msra.mxu0 %v16894_v26  ;;  %13365 = vmatpush3.bf16.msra.mxu1 %v16894_v26 }
 0x405   : > { %13374 = vmatprep.subr.bf16.mxu0 %v16877_v40  ;;  %13390 = vmatprep.subr.bf16.mxu1 %v16877_v40 }
 0x407   : > { %13367 = vmatmul.mubr.msk.bf16.vlgmr.msra.gmra.mxu1 %vm2318_vm0, %v14311_v22  ;;  %13351 = vmatmul.mubr.msk.bf16.vlgmr.msra.gmra.mxu0 %vm2318_vm0, %v14312_v6 }
 0x408   : > { %13375 = vmatpush3.bf16.msra.mxu0 %v16877_v40  ;;  %13391 = vmatpush3.bf16.msra.mxu1 %v16877_v40 }
 0x409   : > { %13376 = vmatprep.subr.bf16.mxu0 %v16879_v54  ;;  %13392 = vmatprep.subr.bf16.mxu1 %v16879_v54 }
 0x40a   : > { %13370 = vmatprep.mubr.msk.bf16.mxu1 %vm2318_vm0, %v14313_v14  ;;  %13354 = vmatprep.mubr.msk.bf16.mxu0 %vm2318_vm0, %v14314_v43  ;;  %v14351_v43 = vld [vmem:[%s18311_s18 + $0xe0] sm:$0xff]  }
 0x40c   : > { %13377 = vmatpush3.bf16.msra.mxu0 %v16879_v54  ;;  %13393 = vmatpush3.bf16.msra.mxu1 %v16879_v54 }
 0x40d   : > { %13378 = vmatprep.subr.bf16.mxu0 %v16888_v24  ;;  %13394 = vmatprep.subr.bf16.mxu1 %v16888_v24 }
 0x40f   : > { %13371 = vmatmul.mubr.msk.bf16.gmra.mxu1 %vm2318_vm0, %v14315_v48  ;;  %13355 = vmatmul.mubr.msk.bf16.gmra.mxu0 %vm2318_vm0, %v14316_v49  ;;  %v14352_v48 = vld [vmem:[%s18311_s18 + $0xa0] sm:$0xff]  }
 0x410   : > { %13379 = vmatpush3.bf16.msra.mxu0 %v16888_v24  ;;  %13395 = vmatpush3.bf16.msra.mxu1 %v16888_v24 }
 0x411   : > { %13380 = vmatprep.subr.bf16.mxu0 %v16894_v26  ;;  %13396 = vmatprep.subr.bf16.mxu1 %v16894_v26 }
 0x412   : > { %13398 = vmatprep.mubr.msk.bf16.mxu1 %vm2318_vm0, %v14317_v11  ;;  %13382 = vmatprep.mubr.msk.bf16.mxu0 %vm2318_vm0, %v14318_v41  ;;  %v14353_v41 = vld [vmem:[%s18311_s18 + $0xd8] sm:$0xff]  }
 0x414   : > { %13381 = vmatpush3.bf16.msra.mxu0 %v16894_v26  ;;  %13397 = vmatpush3.bf16.msra.mxu1 %v16894_v26 }
 0x415   : > { %13406 = vmatprep.subr.bf16.mxu0 %v16877_v40  ;;  %12926 = vmatprep.subr.bf16.mxu1 %v14329_v31  ;;  %v14358_v31 = vld [vmem:[%s18311_s18 + $0x88] sm:$0xff]  }
 0x417   : > { %13399 = vmatmul.mubr.msk.bf16.vlgmr.msra.gmra.mxu1 %vm2318_vm0, %v14319_v44  ;;  %13383 = vmatmul.mubr.msk.bf16.vlgmr.msra.gmra.mxu0 %vm2318_vm0, %v14320_v58  ;;  %v14354_v44 = vld [vmem:[%s18311_s18 + $0x98] sm:$0xff]  }
 0x418   : > { %13407 = vmatpush3.bf16.msra.mxu0 %v16877_v40  ;;  %13402 = vmatprep.mubr.msk.bf16.mxu1 %vm2318_vm0, %v14321_v10 }
 0x419   : > { %13408 = vmatprep.subr.bf16.mxu0 %v16879_v54  ;;  %13386 = vmatprep.mubr.msk.bf16.mxu0 %vm2318_vm0, %v14323_v7  ;;  %v14355_v7 = vld [vmem:[%s18311_s18 + $0xd0] sm:$0xff]  }
 0x41a   : > { %12927 = vmatpush3.bf16.msra.mxu1 %v14330_v63 }
 0x41b   : > { %12928 = vmatprep.subr.bf16.mxu1 %v14331_v17 }
 0x41c   : > { %13409 = vmatpush3.bf16.msra.mxu0 %v16879_v54  ;;  %v14341_v54 = vld [vmem:[%s18311_s18 + $0x48] sm:$0xff]  }
 0x41d   : > { %13410 = vmatprep.subr.bf16.mxu0 %v16888_v24 }
 0x41e   : > { %12929 = vmatpush3.bf16.msra.mxu1 %v14332_v0 }
 0x41f   : > { %13403 = vmatmul.mubr.msk.bf16.gmra.mxu1 %vm2318_vm0, %v14322_v34  ;;  %13387 = vmatmul.mubr.msk.bf16.gmra.mxu0 %vm2318_vm0, %v14324_v53  ;;  %v14356_v34 = vld [vmem:[%s18311_s18 + $0x90] sm:$0xff]  }
 0x420   : > { %13411 = vmatpush3.bf16.msra.mxu0 %v16888_v24  ;;  %13414 = vmatprep.mubr.msk.bf16.mxu0 %vm2318_vm0, %v14325_v29  ;;  %v14342_v24 = vld [vmem:[%s18311_s18 + $0x8] sm:$0xff]  }
 0x421   : > { %13412 = vmatprep.subr.bf16.mxu0 %v16894_v26  ;;  %12930 = vmatprep.subr.bf16.mxu1 %v14333_v51 }
 0x422   : > { %12931 = vmatpush3.bf16.msra.mxu1 %v14334_v3  ;;  %v14360_v3 = vld [vmem:[%s18311_s18 + $0xc0] sm:$0xff]  }
 0x423   : > { %12932 = vmatprep.subr.bf16.mxu1 %v14335_v47  ;;  %v14361_v47 = vld [vmem:[%s18311_s18 + $0x80] sm:$0xff]  }
 0x424   : > { %13413 = vmatpush3.bf16.msra.mxu0 %v16894_v26 }
 0x425   : > { %12966 = vmatprep.subr.bf16.mxu0 %v14345_v20 }
 0x426   : > { %12933 = vmatpush3.bf16.msra.mxu1 %v14336_v62 }
 0x427   : > { %13415 = vmatmul.mubr.msk.bf16.vlgmr.msra.gmra.mxu0 %vm2318_vm0, %v14326_v32  ;;  %12934 = vmatprep.subr.bf16.mxu1 %v14337_v33 }
 0x428   : > { %13418 = vmatprep.mubr.msk.bf16.mxu0 %vm2318_vm0, %v14327_v12  ;;  %12967 = vmatpush3.bf16.msra.mxu0 %v14346_v56 }
 0x429   : > { %12968 = vmatprep.subr.bf16.mxu0 %v14347_v59 }
 0x42a   : > { %12935 = vmatpush3.bf16.msra.mxu1 %v14338_v13  ;;  %v17132_v13 = vld [vmem:[%s18311_s18 + $0x118] sm:$0xff]  }
 0x42b   : > { %12936 = vmatprep.subr.bf16.mxu1 %v14339_v5 }
 0x42c   : > { %12969 = vmatpush3.bf16.msra.mxu0 %v14348_v37 }
 0x42d   : > { %12970 = vmatprep.subr.bf16.mxu0 %v14349_v9 }
 0x42e   : > { %12937 = vmatpush3.bf16.msra.mxu1 %v14340_v19 }
 0x42f   : > { %13419 = vmatmul.mubr.msk.bf16.gmra.mxu0 %vm2318_vm0, %v14328_v28  ;;  %12938 = vmatprep.subr.bf16.mxu1 %v14341_v54  ;;  %v14357_v28 = vld [vmem:[%s18311_s18 + $0xc8] sm:$0xff]  }
 0x430   : > { %12971 = vmatpush3.bf16.msra.mxu0 %v14350_v21 }
 0x431   : > { %12972 = vmatprep.subr.bf16.mxu0 %v14351_v43 }
 0x432   : > { %12939 = vmatpush3.bf16.msra.mxu1 %v14342_v24 }
 0x433   : > { %12940 = vmatprep.subr.bf16.mxu1 %v14343_v46 }
 0x434   : > { %12973 = vmatpush3.bf16.msra.mxu0 %v14352_v48 }
 0x435   : > { %12974 = vmatprep.subr.bf16.mxu0 %v14353_v41 }
 0x436   : > { %12941 = vmatpush3.bf16.msra.mxu1 %v14344_v45 }
 0x437   : > { %13422 = vmatprep.subr.bf16.mxu1 %v17132_v13 }
 0x438   : > { %12975 = vmatpush3.bf16.msra.mxu0 %v14354_v44 }
 0x439   : > { %12976 = vmatprep.subr.bf16.mxu0 %v14355_v7 }
 0x43c   : > { %12977 = vmatpush3.bf16.msra.mxu0 %v14356_v34 }
 0x43d   : > { %12978 = vmatprep.subr.bf16.mxu0 %v14357_v28 }
 0x440   : > { %12979 = vmatpush3.bf16.msra.mxu0 %v14358_v31 }
 0x441   : > { %12980 = vmatprep.subr.bf16.mxu0 %v14360_v3 }
 0x444   : > { %12981 = vmatpush3.bf16.msra.mxu0 %v14361_v47 }
 0x4a7   : > { %v13304_v30 = vpop.f32.mrf.mxu1  ;;  %v17108_v29 = vpop.f32.mrf.mxu0 }
 0x4a9   : > { %v3185_v40 = vpop.f32.mrf.mxu1  ;;  %v17117_v17 = vpop.f32.mrf.mxu0 }
 0x4ab   : > { %v13305_v36 = vpop.f32.mrf.mxu1 }
 0x4ac   : > { %v14044_v26 = vpack.i.bf16 %v13305_v36, %v13304_v30  ;;  %v17127_v30 = vpop.f32.mrf.mxu0 }
 0x4ad   : > { %v3188_v8 = vpop.f32.mrf.mxu1 }
 0x4ae   : > { %v14034_v25 = vpack.i.bf16 %v3188_v8, %v3185_v40  ;;  %v3082_v19 = vpop.f32.mrf.mxu0 }
 0x4af   : > { %v17050_v55 = vpop.f32.mrf.mxu1 }
 0x4b0   : > { %14035 = vrot.lane.b32.xlu1 %v14034_v25, %s15835_s27  ;;  %v17139_v25 = vpop.f32.mrf.mxu0 }
 0x4b1   : > { %v17053_v61 = vpop.f32.mrf.mxu1 }
 0x4b2   : > { %v17143_v46 = vpop.f32.mrf.mxu0 }
 0x4b3   : > { %v17055_v18 = vpop.f32.mrf.mxu1 }
 0x4b4   : > { %14045 = vrot.lane.b32.xlu1 %v14044_v26, %s15835_s27  ;;  %v14084_v36 = vpack.i.bf16 %v17055_v18, %v17050_v55  ;;  %v17148_v55 = vpop.f32.mrf.mxu0 }
 0x4b5   : > { %v3204_v16 = vpop.f32.mrf.mxu1 }
 0x4b6   : > { %v14064_v0 = vpack.i.bf16 %v3204_v16, %v17053_v61  ;;  %v17151_v56 = vpop.f32.mrf.mxu0 }
 0x4b7   : > { %v13336_v42 = vpop.f32.mrf.mxu1 }
 0x4b8   : > { %v13320_v59 = vpop.f32.mrf.mxu0 }
 0x4b9   : > { %v3397_v57 = vpop.f32.mrf.mxu1 }
 0x4bb   : > { %v13337_v50 = vpop.f32.mrf.mxu1 }
 0x4bc   : > { %v14039_v6 = vpack.i.bf16 %v13337_v50, %v13336_v42 }
 0x4bd   : > { %v3400_v35 = vpop.f32.mrf.mxu1 }
 0x4be   : > { %v14029_v15 = vpack.i.bf16 %v3400_v35, %v3397_v57  ;;  %v3291_v35 = vpop.f32.mrf.mxu0 }
 0x4bf   : > { %v17076_v60 = vpop.f32.mrf.mxu1 }
 0x4c0   : > { %14030 = vrot.lane.b32.xlu0 %v14029_v15, %s15835_s27  ;;  %v13321_v9 = vpop.f32.mrf.mxu0 }
 0x4c1   : > { %v17085_v22 = vpop.f32.mrf.mxu1 }
 0x4c2   : > { %v3294_v21 = vpop.f32.mrf.mxu0 }
 0x4c3   : > { %v17087_v14 = vpop.f32.mrf.mxu1 }
 0x4c4   : > { %14040 = vrot.lane.b32.xlu0 %v14039_v6, %s15835_s27  ;;  %v14079_v57 = vpack.i.bf16 %v17087_v14, %v17076_v60 }
 0x4c5   : > { %v3416_v49 = vpop.f32.mrf.mxu1 }
 0x4c6   : > { %v14059_v45 = vpack.i.bf16 %v3416_v49, %v17085_v22  ;;  %v17158_v22 = vpop.f32.mrf.mxu0 }
 0x4c7   : > { %v13368_v11 = vpop.f32.mrf.mxu1 }
 0x4c8   : > { %v17160_v6 = vpop.f32.mrf.mxu0 }
 0x4c9   : > { %v3609_v58 = vpop.f32.mrf.mxu1 }
 0x4ca   : > { %v17162_v43 = vpop.f32.mrf.mxu0 }
 0x4cb   : > { %v13369_v10 = vpop.f32.mrf.mxu1 }
 0x4cc   : > { %v14074_v33 = vpack.i.bf16 %v13369_v10, %v13368_v11  ;;  %v17164_v60 = vpop.f32.mrf.mxu0 }
 0x4cd   : > { %v3612_v53 = vpop.f32.mrf.mxu1 }
 0x4ce   : > { %v14049_v32 = vpack.i.bf16 %v3612_v53, %v3609_v58  ;;  %v17166_v14 = vpop.f32.mrf.mxu0 }
 0x4cf   : > { %v13372_v12 = vpop.f32.mrf.mxu1 }
 0x4d0   : > { %14050 = vrot.lane.b32.xlu1 %v14049_v32, %s15835_s27  ;;  %v17168_v48 = vpop.f32.mrf.mxu0 }
 0x4d1   : > { %v3625_v63 = vpop.f32.mrf.mxu1 }
 0x4d2   : > { %v17170_v49 = vpop.f32.mrf.mxu0 }
 0x4d3   : > { %v13373_v51 = vpop.f32.mrf.mxu1 }
 0x4d4   : > { %14065 = vrot.lane.b32.xlu1 %v14064_v0, %s15835_s27  ;;  %v14104_v16 = vpack.i.bf16 %v13373_v51, %v13372_v12  ;;  %v17172_v11 = vpop.f32.mrf.mxu0 }
 0x4d5   : > { %v3628_v62 = vpop.f32.mrf.mxu1 }
 0x4d6   : > { %v14094_v24 = vpack.i.bf16 %v3628_v62, %v3625_v63  ;;  %v17174_v41 = vpop.f32.mrf.mxu0 }
 0x4d7   : > { %v13400_v40 = vpop.f32.mrf.mxu1 }
 0x4d8   : > { %14075 = vrot.lane.b32.xlu1 %v14074_v33, %s15835_s27  ;;  %v17176_v44 = vpop.f32.mrf.mxu0 }
 0x4d9   : > { %v3821_v5 = vpop.f32.mrf.mxu1 }
 0x4da   : > { %v17178_v58 = vpop.f32.mrf.mxu0 }
 0x4db   : > { %v13401_v54 = vpop.f32.mrf.mxu1 }
 0x4dc   : > { %14085 = vrot.lane.b32.xlu1 %v14084_v36, %s15835_s27  ;;  %v14069_v18 = vpack.i.bf16 %v13401_v54, %v13400_v40  ;;  %v17180_v10 = vpop.f32.mrf.mxu0 }
 0x4dd   : > { %v3824_v8 = vpop.f32.mrf.mxu1 }
 0x4de   : > { %v14054_v61 = vpack.i.bf16 %v3824_v8, %v3821_v5  ;;  %v17182_v34 = vpop.f32.mrf.mxu0 }
 0x4df   : > { %v13404_v26 = vpop.f32.mrf.mxu1 }
 0x4e0   : > { %14095 = vrot.lane.b32.xlu1 %v14094_v24, %s15835_s27  ;;  %14055 = vrot.lane.b32.xlu0 %v14054_v61, %s15835_s27  ;;  %v3715_v12 = vpop.f32.mrf.mxu0  ;;  %v14362_v24 = vld [vmem:[%s18311_s18 + $0x110] sm:$0xff]  }
 0x4e1   : > { %v3837_v42 = vpop.f32.mrf.mxu1 }
 0x4e2   : > { %v17189_v33 = vpop.f32.mrf.mxu0 }
 0x4e3   : > { %v13405_v20 = vpop.f32.mrf.mxu1 }
 0x4e4   : > { %14105 = vrot.lane.b32.xlu1 %v14104_v16, %s15835_s27  ;;  %14060 = vrot.lane.b32.xlu0 %v14059_v45, %s15835_s27  ;;  %v14099_v15 = vpack.i.bf16 %v13405_v20, %v13404_v26  ;;  %v3718_v45 = vpop.f32.mrf.mxu0 }
 0x4e5   : > { %v3840_v50 = vpop.f32.mrf.mxu1 }
 0x4e6   : > { %v14089_v37 = vpack.i.bf16 %v3840_v50, %v3837_v42  ;;  %v17197_v42 = vpop.f32.mrf.mxu0 }
 0x4e8   : > { %14070 = vrot.lane.b32.xlu0 %v14069_v18, %s15835_s27  ;;  %v14363_v18 = vld [vmem:[%s18311_s18 + $0x108] sm:$0xff]  }
 0x4ec   : > { %14080 = vrot.lane.b32.xlu0 %v14079_v57, %s15835_s27 }
 0x4f0   : > { %14090 = vrot.lane.b32.xlu0 %v14089_v37, %s15835_s27 }
 0x4f4   : > { %14100 = vrot.lane.b32.xlu0 %v14099_v15, %s15835_s27 }
 0x522   : > { %v14036_v7 = vpop.permute.xlu1 %14035 }
 0x523   : > { %v14038_v53 = vunpack.i.h.bf16 %v14036_v7  ;;  %v14037_v32 = vunpack.i.l.bf16 %v14036_v7 }
 0x525   : > { %v4086_v0 = vsel %vm2318_vm0, %v17117_v17, %v14037_v32  ;;  %v4087_v51 = vsel %vm2318_vm0, %v3082_v19, %v14038_v53 }
 0x526   : > { %v14046_v3 = vpop.permute.xlu1 %14045  ;;  %v4118_v36 = vpack.c.bf16 %v4087_v51, %v4086_v0 }
 0x527   : > { %v14048_v61 = vunpack.i.h.bf16 %v14046_v3  ;;  %v14047_v17 = vunpack.i.l.bf16 %v14046_v3 }
 0x529   : > { %v4088_v20 = vsel %vm2318_vm0, %v17108_v29, %v14047_v17  ;;  %v4089_v57 = vsel %vm2318_vm0, %v17127_v30, %v14048_v61 }
 0x52a   : > { %v4123_v50 = vpack.c.bf16 %v4089_v57, %v4088_v20 }
 0x532   : > { %v14031_v28 = vpop.permute.xlu0 %14030 }
 0x533   : > { %v14033_v31 = vunpack.i.h.bf16 %v14031_v28  ;;  %v14032_v63 = vunpack.i.l.bf16 %v14031_v28 }
 0x535   : > { %v4094_v47 = vsel %vm2318_vm0, %v3291_v35, %v14032_v63  ;;  %v4095_v62 = vsel %vm2318_vm0, %v3294_v21, %v14033_v31 }
 0x536   : > { %v14041_v40 = vpop.permute.xlu0 %14040  ;;  %v4119_v5 = vpack.c.bf16 %v4095_v62, %v4094_v47 }
 0x537   : > { %v14043_v54 = vunpack.i.h.bf16 %v14041_v40  ;;  %v14042_v8 = vunpack.i.l.bf16 %v14041_v40 }
 0x538   : > { %4477 = vmatprep.mubr.bf16.mxu1 %v4119_v5 }
 0x539   : > { %4478 = vmatmul.mubr.bf16.vlgmr.msra.gmra.mxu1 %v4118_v36  ;;  %v4096_v19 = vsel %vm2318_vm0, %v13320_v59, %v14042_v8  ;;  %v4097_v26 = vsel %vm2318_vm0, %v13321_v9, %v14043_v54  ;;  %v17206_v59 = vpop.f32.mrf.mxu0 }
 0x53a   : > { %v4124_v16 = vpack.c.bf16 %v4097_v26, %v4096_v19  ;;  %13423 = vmatpush3.bf16.msra.mxu1 %v17132_v13  ;;  %v14364_v13 = vld [vmem:[%s18311_s18 + $0x100] sm:$0xff]  }
 0x53b   : > { %13424 = vmatprep.subr.bf16.mxu1 %v14362_v24  ;;  %v17211_v37 = vpop.f32.mrf.mxu0 }
 0x53c   : > { %4485 = vmatprep.mubr.bf16.mxu1 %v4124_v16 }
 0x53d   : > { %v17213_v29 = vpop.f32.mrf.mxu0 }
 0x53e   : > { %13425 = vmatpush3.bf16.msra.mxu1 %v14362_v24 }
 0x53f   : > { %13426 = vmatprep.subr.bf16.mxu1 %v14363_v18  ;;  %v17215_v15 = vpop.f32.mrf.mxu0 }
 0x541   : > { %4486 = vmatmul.mubr.bf16.gmra.mxu1 %v4123_v50  ;;  %v17217_v9 = vpop.f32.mrf.mxu0 }
 0x542   : > { %13427 = vmatpush3.bf16.msra.mxu1 %v14363_v18  ;;  %v14051_v35 = vpop.permute.xlu1 %14050 }
 0x543   : > { %13428 = vmatprep.subr.bf16.mxu1 %v14364_v13  ;;  %v14053_v21 = vunpack.i.h.bf16 %v14051_v35  ;;  %v14052_v7 = vunpack.i.l.bf16 %v14051_v35  ;;  %v17219_v63 = vpop.f32.mrf.mxu0 }
 0x545   : > { %v4102_v0 = vsel %vm2318_vm0, %v17168_v48, %v14052_v7  ;;  %v4103_v51 = vsel %vm2318_vm0, %v17172_v11, %v14053_v21  ;;  %v3930_v17 = vpop.f32.mrf.mxu0 }
 0x546   : > { %13429 = vmatpush3.bf16.msra.mxu1 %v14364_v13  ;;  %v14066_v30 = vpop.permute.xlu1 %14065  ;;  %v4120_v54 = vpack.c.bf16 %v4103_v51, %v4102_v0 }
 0x547   : > { %v14068_v3 = vunpack.i.h.bf16 %v14066_v30  ;;  %v14067_v47 = vunpack.i.l.bf16 %v14066_v30  ;;  %v17235_v13 = vpop.f32.mrf.mxu0 }
 0x549   : > { %v4090_v19 = vsel %vm2318_vm0, %v17143_v46, %v14067_v47  ;;  %v4091_v48 = vsel %vm2318_vm0, %v17151_v56, %v14068_v3 }
 0x54a   : > { %v14076_v53 = vpop.permute.xlu1 %14075  ;;  %v4128_v20 = vpack.c.bf16 %v4091_v48, %v4090_v19 }
 0x54b   : > { %v14078_v11 = vunpack.i.h.bf16 %v14076_v53  ;;  %v14077_v26 = vunpack.i.l.bf16 %v14076_v53 }
 0x54d   : > { %v4104_v46 = vsel %vm2318_vm0, %v17166_v14, %v14077_v26  ;;  %v4105_v56 = vsel %vm2318_vm0, %v17170_v49, %v14078_v11  ;;  %v3943_v14 = vpop.f32.mrf.mxu0 }
 0x54e   : > { %v14086_v8 = vpop.permute.xlu1 %14085 }
 0x54f   : > { %v14088_v35 = vunpack.i.h.bf16 %v14086_v8  ;;  %v14087_v30 = vunpack.i.l.bf16 %v14086_v8 }
 0x551   : > { %v4092_v49 = vsel %vm2318_vm0, %v17139_v25, %v14087_v30  ;;  %v4093_v0 = vsel %vm2318_vm0, %v17148_v55, %v14088_v35 }
 0x552   : > { %v14056_v32 = vpop.permute.xlu0 %14055 }
 0x553   : > { %v14058_v28 = vunpack.i.h.bf16 %v14056_v32  ;;  %v14057_v31 = vunpack.i.l.bf16 %v14056_v32  ;;  %v4125_v32 = vpack.c.bf16 %v4105_v56, %v4104_v46 }
 0x555   : > { %v4110_v62 = vsel %vm2318_vm0, %v3715_v12, %v14057_v31  ;;  %v4111_v40 = vsel %vm2318_vm0, %v3718_v45, %v14058_v28 }
 0x556   : > { %v14061_v5 = vpop.permute.xlu0 %14060  ;;  %v4121_v36 = vpack.c.bf16 %v4111_v40, %v4110_v62  ;;  %v4122_v40 = vpack.c.bf16 %v3930_v17, %v17217_v9 }
 0x557   : > { %v14063_v24 = vunpack.i.h.bf16 %v14061_v5  ;;  %v14062_v61 = vunpack.i.l.bf16 %v14061_v5  ;;  %v4133_v5 = vpack.c.bf16 %v4093_v0, %v4092_v49 }
 0x558   : > { %4542 = vmatprep.mubr.bf16.mxu0 %v4121_v36 }
 0x559   : > { %4543 = vmatmul.mubr.bf16.vlgmr.msra.gmra.mxu0 %v4120_v54  ;;  %v4098_v12 = vsel %vm2318_vm0, %v17160_v6, %v14062_v61  ;;  %v4099_v45 = vsel %vm2318_vm0, %v17164_v60, %v14063_v24  ;;  %v14096_v6 = vpop.permute.xlu1 %14095  ;;  %v13421_v54 = vpop.f32.mrf.mxu0 }
 0x55a   : > { %v14071_v16 = vpop.permute.xlu0 %14070  ;;  %v4129_v18 = vpack.c.bf16 %v4099_v45, %v4098_v12  ;;  %v14098_v51 = vunpack.i.h.bf16 %v14096_v6  ;;  %v14097_v3 = vunpack.i.l.bf16 %v14096_v6  ;;  %v4127_v45 = vpack.c.bf16 %v17219_v63, %v17215_v15 }
 0x55b   : > { %v14073_v57 = vunpack.i.h.bf16 %v14071_v16  ;;  %v14072_v50 = vunpack.i.l.bf16 %v14071_v16 }
 0x55c   : > { %4493 = vmatprep.mubr.bf16.mxu1 %v4129_v18  ;;  %v4106_v55 = vsel %vm2318_vm0, %v17176_v44, %v14097_v3  ;;  %v4107_v8 = vsel %vm2318_vm0, %v17180_v10, %v14098_v51  ;;  %v3946_v44 = vpop.f32.mrf.mxu0 }
 0x55d   : > { %4494 = vmatmul.mubr.bf16.gmra.mxu1 %v4128_v20  ;;  %v4112_v60 = vsel %vm2318_vm0, %v17182_v34, %v14072_v50  ;;  %v4113_v21 = vsel %vm2318_vm0, %v17189_v33, %v14073_v57  ;;  %v14106_v24 = vpop.permute.xlu1 %14105  ;;  %v4130_v17 = vpack.c.bf16 %v4107_v8, %v4106_v55  ;;  %v15836_v20 = vmov 0.0   ;;  %v17302_v55 = vld [vmem:[#allocation11] ss:$0 sm:$0xff] }
 0x55e   : > { %v14081_v7 = vpop.permute.xlu0 %14080  ;;  %v4126_v53 = vpack.c.bf16 %v4113_v21, %v4112_v60  ;;  %v14108_v11 = vunpack.i.h.bf16 %v14106_v24  ;;  %v14107_v26 = vunpack.i.l.bf16 %v14106_v24  ;;  %13438 = vmatprep.subr.bf16.mxu0 %v15836_v20  ;;  %13450 = vmatprep.subr.bf16.mxu1 %v15836_v20 }
 0x55f   : > { %v14083_v28 = vunpack.i.h.bf16 %v14081_v7  ;;  %v14082_v31 = vunpack.i.l.bf16 %v14081_v7 }
 0x560   : > { %4550 = vmatprep.mubr.bf16.mxu0 %v4126_v53  ;;  %v4108_v16 = vsel %vm2318_vm0, %v17174_v41, %v14107_v26  ;;  %v4109_v18 = vsel %vm2318_vm0, %v17178_v58, %v14108_v11  ;;  %v2982_v26 = vadd.f32 %v17014_v27, %v17302_v55 }
 0x561   : > { %4551 = vmatmul.mubr.bf16.gmra.mxu0 %v4125_v32  ;;  %v4100_v34 = vsel %vm2318_vm0, %v17158_v22, %v14082_v31  ;;  %v4101_v33 = vsel %vm2318_vm0, %v17162_v43, %v14083_v28 }
 0x562   : > { %v14091_v47 = vpop.permute.xlu0 %14090  ;;  %v4134_v62 = vpack.c.bf16 %v4101_v33, %v4100_v34  ;;  %v17299_v34 = vld [vmem:[#allocation10] ss:$0 sm:$0xff] }
 0x563   : > { %v14093_v36 = vunpack.i.h.bf16 %v14091_v47  ;;  %v14092_v25 = vunpack.i.l.bf16 %v14091_v47 }
 0x564   : > { %4501 = vmatprep.mubr.bf16.mxu1 %v4134_v62 }
 0x565   : > { %4502 = vmatmul.mubr.bf16.gmra.mxu1 %v4133_v5  ;;  %v4114_v22 = vsel %vm2318_vm0, %v17206_v59, %v14092_v25  ;;  %v4115_v43 = vsel %vm2318_vm0, %v17213_v29, %v14093_v36  ;;  %v4132_v29 = vpack.c.bf16 %v3946_v44, %v3943_v14 }
 0x566   : > { %v14101_v9 = vpop.permute.xlu0 %14100  ;;  %v4131_v61 = vpack.c.bf16 %v4115_v43, %v4114_v22  ;;  %13430 = vmatprep.mubr.msk.bf16.mxu1 %vm2318_vm0, %v4122_v40 }
 0x567   : > { %v14103_v19 = vunpack.i.h.bf16 %v14101_v9  ;;  %v14102_v48 = vunpack.i.l.bf16 %v14101_v9 }
 0x568   : > { %4558 = vmatprep.mubr.bf16.mxu0 %v4131_v61 }
 0x569   : > { %4559 = vmatmul.mubr.bf16.gmra.mxu0 %v4130_v17  ;;  %v4116_v10 = vsel %vm2318_vm0, %v17197_v42, %v14102_v48  ;;  %v4117_v59 = vsel %vm2318_vm0, %v17211_v37, %v14103_v19  ;;  %v4135_v42 = vpack.c.bf16 %v4109_v18, %v4108_v16  ;;  %v4137_v37 = vpack.c.bf16 %v13421_v54, %v17235_v13 }
 0x56a   : > { %v4136_v12 = vpack.c.bf16 %v4117_v59, %v4116_v10  ;;  %v2979_v17 = vadd.f32 %v17010_v38, %v17302_v55 }
 0x56c   : > { %4566 = vmatprep.mubr.bf16.mxu0 %v4136_v12 }
 0x56d   : > { %13431 = vmatmul.mubr.msk.bf16.vlgmr.msra.gmra.mxu1 %vm2318_vm0, %v4127_v45 }
 0x56e   : > { %13434 = vmatprep.mubr.msk.bf16.mxu1 %vm2318_vm0, %v4132_v29 }
 0x571   : > { %4567 = vmatmul.mubr.bf16.gmra.mxu0 %v4135_v42 }
 0x572   : > { %13446 = vmatprep.mubr.msk.bf16.mxu0 %vm15837_vm1, %v15836_v20 }
 0x575   : > { %13435 = vmatmul.mubr.msk.bf16.gmra.mxu1 %vm2318_vm0, %v4137_v37 }
 0x576   : > { %13458 = vmatprep.mubr.msk.bf16.mxu1 %vm15837_vm1, %v15836_v20 }
 0x5f9   : > { %v17283_v41 = vpop.f32.mrf.mxu1 }
 0x5fb   : > { %v17285_v58 = vpop.f32.mrf.mxu1 }
 0x5fd   : > { %v17287_v15 = vpop.f32.mrf.mxu1 }
 0x5ff   : > { %v17289_v63 = vpop.f32.mrf.mxu1 }
 0x601   : > { %v12948_v57 = vpop.f32.mrf.mxu1 }
 0x603   : > { %v12949_v50 = vpop.f32.mrf.mxu1 }
 0x604   : > { %v12950_v49 = vadd.f32 %v12949_v50, %v12948_v57 }
 0x605   : > { %v12951_v13 = vpop.f32.mrf.mxu1 }
 0x606   : > { %v4488_v62 = vadd.f32 %v12950_v49, %v17299_v34 }
 0x607   : > { %v12952_v56 = vpop.f32.mrf.mxu1 }
 0x608   : > { %v12953_v40 = vadd.f32 %v12952_v56, %v12951_v13 }
 0x60a   : > { %v4491_v22 = vadd.f32 %v12953_v40, %v17299_v34 }
 0x619   : > { %v17291_v46 = vpop.f32.mrf.mxu0 }
 0x61b   : > { %v17293_v35 = vpop.f32.mrf.mxu0 }
 0x61d   : > { %v12954_v30 = vpop.f32.mrf.mxu1  ;;  %v17295_v6 = vpop.f32.mrf.mxu0 }
 0x61f   : > { %v12955_v60 = vpop.f32.mrf.mxu1  ;;  %v17297_v21 = vpop.f32.mrf.mxu0 }
 0x620   : > { %v12956_v12 = vadd.f32 %v12955_v60, %v12954_v30 }
 0x621   : > { %v12957_v7 = vpop.f32.mrf.mxu1  ;;  %v12988_v53 = vpop.f32.mrf.mxu0 }
 0x622   : > { %v4496_v27 = vadd.f32 %v12956_v12, %v17299_v34  ;;  %v14366_v12 = vld [vmem:[#allocation13] sm:$0xff]  }
 0x623   : > { %v12958_v32 = vpop.f32.mrf.mxu1  ;;  %v12989_v28 = vpop.f32.mrf.mxu0 }
 0x624   : > { %v12990_v3 = vadd.f32 %v12989_v28, %v12988_v53  ;;  %v12959_v29 = vadd.f32 %v12958_v32, %v12957_v7 }
 0x625   : > { %v12960_v31 = vpop.f32.mrf.mxu1  ;;  %v12991_v14 = vpop.f32.mrf.mxu0 }
 0x626   : > { %v4553_v54 = vadd.f32 %v12990_v3, %v4488_v62 }
 0x627   : > { %v12961_v0 = vpop.f32.mrf.mxu1  ;;  %v12992_v51 = vpop.f32.mrf.mxu0 }
 0x628   : > { %v12993_v25 = vadd.f32 %v12992_v51, %v12991_v14  ;;  %v12962_v19 = vadd.f32 %v12961_v0, %v12960_v31  ;;  %v4499_v14 = vadd.f32 %v12959_v29, %v17299_v34  ;;  %v2995_v51 = vadd.f32 %v17018_v52, %v17302_v55  ;;  %v14367_v29 = vld [vmem:[#allocation13 + $0x18] sm:$0xff]  }
 0x629   : > { %v12963_v33 = vpop.f32.mrf.mxu1  ;;  %v12994_v47 = vpop.f32.mrf.mxu0 }
 0x62a   : > { %v4556_v48 = vadd.f32 %v12993_v25, %v4491_v22  ;;  %v4504_v18 = vadd.f32 %v12962_v19, %v17299_v34  ;;  %v12944_v25 = vadd.f32 %v17285_v58, %v17283_v41 }
 0x62b   : > { %v12964_v5 = vpop.f32.mrf.mxu1  ;;  %v12995_v36 = vpop.f32.mrf.mxu0 }
 0x62c   : > { %v12965_v42 = vadd.f32 %v12964_v5, %v12963_v33  ;;  %v12996_v50 = vadd.f32 %v12995_v36, %v12994_v47  ;;  %v12947_v33 = vadd.f32 %v17289_v63, %v17287_v15  ;;  %v2998_v5 = vadd.f32 %v17022_v1, %v17302_v55 }
 0x62d   : > { %v12997_v8 = vpop.f32.mrf.mxu0  ;;  %v13432_v24 = vpop.f32.mrf.mxu1  ;;  %v2990_v36 = vadd.f32 %v17302_v55, %v17030_v23  ;;  %v2987_v63 = vadd.f32 %v17302_v55, %v17020_v4  ;;  %v12984_v1 = vadd.f32 %v17293_v35, %v17291_v46  ;;  %v4480_v41 = vadd.f32 %v12944_v25, %v17299_v34  ;;  %v14388_v25 = vld [vmem:[#allocation16 + $0x40] sm:$0xff]  }
 0x62e   : > { %v4618_v43 = vadd.f32 %v13432_v24, %v4553_v54  ;;  %v4507_v7 = vadd.f32 %v12965_v42, %v17299_v34  ;;  %v4561_v47 = vadd.f32 %v12996_v50, %v4496_v27  ;;  %v12987_v54 = vadd.f32 %v17297_v21, %v17295_v6  ;;  %v14371_v42 = vld [vmem:[#allocation13 + $0x38] sm:$0xff]   ;;  %v14374_v50 = vld [vmem:[#allocation16 + $0x78] sm:$0xff]   ;;  %v14381_v27 = vld [vmem:[#allocation16 + $0x20] sm:$0xff]  }
 0x62f   : > { %v12998_v9 = vpop.f32.mrf.mxu0  ;;  %v4609_v61 = vpop.f32.mrf.mxu1  ;;  %v4545_v19 = vadd.f32 %v12984_v1, %v4480_v41  ;;  %v2974_v4 = vadd.f32 %v17302_v55, %v17016_v39  ;;  %v2971_v46 = vadd.f32 %v17302_v55, %v17012_v2  ;;  %v14365_v55 = vld [vmem:[#allocation13 + $0x8] sm:$0xff]  }
 0x630   : > { %v4642_v10 = vadd.f32 %v4618_v43, %v2979_v17  ;;  %v12999_v53 = vadd.f32 %v12998_v9, %v12997_v8  ;;  %v4483_v43 = vadd.f32 %v12947_v33, %v17299_v34 }
 0x631   : > { %v13000_v44 = vpop.f32.mrf.mxu0  ;;  %v13433_v11 = vpop.f32.mrf.mxu1 }
 0x632   : > { %v4621_v59 = vadd.f32 %v13433_v11, %v4556_v48  ;;  %v4650_v56 = vmax.f32 %v4642_v10, 0.0  ;;  %v4564_v40 = vadd.f32 %v12999_v53, %v4499_v14  ;;  %v4548_v58 = vadd.f32 %v12987_v54, %v4483_v43  ;;  %v14378_v53 = vld [vmem:[#allocation16 + $0x68] sm:$0xff]   ;;  %v14382_v14 = vld [vmem:[#allocation16 + $0x58] sm:$0xff]   ;;  %v14389_v54 = vld [vmem:[#allocation16] sm:$0xff]  }
 0x633   : > { %v13001_v45 = vpop.f32.mrf.mxu0  ;;  %v4612_v16 = vpop.f32.mrf.mxu1 }
 0x634   : > { %v4643_v37 = vadd.f32 %v4621_v59, %v2982_v26  ;;  %v13002_v57 = vadd.f32 %v13001_v45, %v13000_v44  ;;  %v4613_v48 = vadd.f32 %v4612_v16, %v4548_v58  ;;  %v4610_v26 = vadd.f32 %v4609_v61, %v4545_v19  ;;  %v14368_v45 = vld [vmem:[#allocation13 + $0x10] sm:$0xff]   ;;  %v14369_v16 = vld [vmem:[#allocation13 + $0x28] sm:$0xff]  }
 0x635   : > { %v13003_v38 = vpop.f32.mrf.mxu0  ;;  %v13436_v13 = vpop.f32.mrf.mxu1  ;;  %v14396_v19 = vld [vmem:[#allocation16 + $0xe0] sm:$0xff]  }
 0x636   : > { %v4651_v28 = vmax.f32 %v4643_v37, 0.0  ;;  %v4569_v31 = vadd.f32 %v13002_v57, %v4504_v18  ;;  %v4641_v35 = vadd.f32 %v4613_v48, %v2974_v4  ;;  %v4640_v59 = vadd.f32 %v4610_v26, %v2971_v46  ;;  %v14370_v18 = vld [vmem:[#allocation13 + $0x20] sm:$0xff]   ;;  %v14372_v37 = vld [vmem:[#allocation13 + $0x30] sm:$0xff]  }
 0x637   : > { %v13004_v30 = vpop.f32.mrf.mxu0  ;;  %v4625_v60 = vpop.f32.mrf.mxu1  ;;  %v14373_v57 = vld [vmem:[#allocation13 + $0x40] sm:$0xff]   ;;  %v14397_v48 = vld [vmem:[#allocation16 + $0xa0] sm:$0xff]  }
 0x638   : > { %v17313_v32 = vpack.c.bf16 %v4651_v28, %v4650_v56  ;;  %v4634_v49 = vadd.f32 %v13436_v13, %v4569_v31  ;;  %v13005_v0 = vadd.f32 %v13004_v30, %v13003_v38  ;;  %v4626_v24 = vadd.f32 %v4625_v60, %v4561_v47  ;;  %v14375_v38 = vld [vmem:[#allocation16 + $0x38] sm:$0xff]   ;;  %v14376_v13 = vld [vmem:[#allocation16 + $0x70] sm:$0xff]   ;;  %v14379_v28 = vld [vmem:[#allocation16 + $0x28] sm:$0xff]  }
 0x639   : > { %v13437_v3 = vpop.f32.mrf.mxu1  ;;  %v4649_v39 = vmax.f32 %v4641_v35, 0.0  ;;  %v4648_v61 = vmax.f32 %v4640_v59, 0.0  ;;  %v14377_v56 = vld [vmem:[#allocation16 + $0x30] sm:$0xff]   ;;  %v14380_v31 = vld [vmem:[#allocation16 + $0x60] sm:$0xff]   ;;  %v14383_v30 = vld [vmem:[#allocation16 + $0x18] sm:$0xff]  }
 0x63a   : > { %v4572_v62 = vadd.f32 %v13005_v0, %v4507_v7  ;;  %v4646_v8 = vadd.f32 %v4634_v49, %v2995_v51  ;;  %v4644_v6 = vadd.f32 %v4626_v24, %v2987_v63  ;;  %v14384_v60 = vld [vmem:[#allocation16 + $0x50] sm:$0xff]   ;;  %v14405_v59 = vld [vmem:[#allocation16 + $0xc8] sm:$0xff]  }
 0x63b   : > { %v4628_v52 = vpop.f32.mrf.mxu1  ;;  %v17353_v2 = vpack.c.bf16 %v4649_v39, %v4648_v61  ;;  %v14385_v51 = vld [vmem:[#allocation16 + $0x10] sm:$0xff]  }
 0x63c   : > { %v4637_v22 = vadd.f32 %v13437_v3, %v4572_v62  ;;  %v4629_v15 = vadd.f32 %v4628_v52, %v4564_v40  ;;  %v4654_v17 = vmax.f32 %v4646_v8, 0.0  ;;  %v4652_v10 = vmax.f32 %v4644_v6, 0.0  ;;  %v14386_v3 = vld [vmem:[#allocation16 + $0x48] sm:$0xff]   ;;  %v14390_v52 = vld [vmem:[#allocation16 + $0xf8] sm:$0xff]   ;;  %v14393_v63 = vld [vmem:[#allocation16 + $0xb0] sm:$0xff]  }
 0x63d   : > { %v14391_v8 = vld [vmem:[#allocation16 + $0xb8] sm:$0xff]   ;;  %v14402_v4 = vld [vmem:[#allocation16 + $0xd0] sm:$0xff]  }
 0x63e   : > { %v4647_v23 = vadd.f32 %v4637_v22, %v2998_v5  ;;  %v4645_v9 = vadd.f32 %v4629_v15, %v2990_v36  ;;  %v14387_v36 = vld [vmem:[#allocation16 + $0x8] sm:$0xff]   ;;  %v14392_v15 = vld [vmem:[#allocation16 + $0xf0] sm:$0xff]  }
 0x63f   : > { %v14403_v46 = vld [vmem:[#allocation16 + $0x90] sm:$0xff]  }
 0x640   : > { %v4655_v21 = vmax.f32 %v4647_v23, 0.0  ;;  %v4653_v11 = vmax.f32 %v4645_v9, 0.0  ;;  %v14394_v23 = vld [vmem:[#allocation16 + $0xe8] sm:$0xff]  }
 0x642   : > { %v17333_v44 = vpack.c.bf16 %v4655_v21, %v4654_v17  ;;  %v17343_v34 = vpack.c.bf16 %v4653_v11, %v4652_v10  ;;  %v14395_v17 = vld [vmem:[#allocation16 + $0xa8] sm:$0xff]   ;;  %v14400_v11 = vld [vmem:[#allocation16 + $0x98] sm:$0xff]  }
 0x644   : > { %13439 = vmatpush3.bf16.msra.mxu0 %v17333_v44  ;;  %13451 = vmatpush3.bf16.msra.mxu1 %v17333_v44 }
 0x645   : > { %13440 = vmatprep.subr.bf16.mxu0 %v15836_v20  ;;  %13452 = vmatprep.subr.bf16.mxu1 %v15836_v20 }
 0x648   : > { %13441 = vmatpush3.bf16.msra.mxu0 %v17343_v34  ;;  %13453 = vmatpush3.bf16.msra.mxu1 %v17343_v34 }
 0x649   : > { %13442 = vmatprep.subr.bf16.mxu0 %v15836_v20  ;;  %13454 = vmatprep.subr.bf16.mxu1 %v15836_v20 }
 0x64c   : > { %13443 = vmatpush3.bf16.msra.mxu0 %v17313_v32  ;;  %13455 = vmatpush3.bf16.msra.mxu1 %v17313_v32 }
 0x64d   : > { %13444 = vmatprep.subr.bf16.mxu0 %v15836_v20  ;;  %13456 = vmatprep.subr.bf16.mxu1 %v15836_v20 }
 0x650   : > { %13445 = vmatpush3.bf16.msra.mxu0 %v17353_v2  ;;  %13457 = vmatpush3.bf16.msra.mxu1 %v17353_v2 }
 0x651   : > { %13462 = vmatprep.subr.bf16.mxu0 %v15836_v20  ;;  %13474 = vmatprep.subr.bf16.mxu1 %v15836_v20 }
 0x653   : > { %13459 = vmatmul.mubr.msk.bf16.vlgmr.msra.gmra.mxu1 %vm2318_vm0, %v14365_v55  ;;  %13447 = vmatmul.mubr.msk.bf16.vlgmr.msra.gmra.mxu0 %vm2318_vm0, %v14366_v12  ;;  %v14406_v55 = vld [vmem:[#allocation16 + $0x88] sm:$0xff]  }
 0x654   : > { %13463 = vmatpush3.bf16.msra.mxu0 %v17333_v44  ;;  %13475 = vmatpush3.bf16.msra.mxu1 %v17333_v44 }
 0x655   : > { %13464 = vmatprep.subr.bf16.mxu0 %v15836_v20  ;;  %13476 = vmatprep.subr.bf16.mxu1 %v15836_v20 }
 0x656   : > { %13482 = vmatprep.mubr.msk.bf16.mxu1 %vm15837_vm1, %v15836_v20  ;;  %13470 = vmatprep.mubr.msk.bf16.mxu0 %vm15837_vm1, %v15836_v20 }
 0x658   : > { %13465 = vmatpush3.bf16.msra.mxu0 %v17343_v34  ;;  %13477 = vmatpush3.bf16.msra.mxu1 %v17343_v34 }
 0x659   : > { %13466 = vmatprep.subr.bf16.mxu0 %v15836_v20  ;;  %13478 = vmatprep.subr.bf16.mxu1 %v15836_v20 }
 0x65c   : > { %13467 = vmatpush3.bf16.msra.mxu0 %v17313_v32  ;;  %13479 = vmatpush3.bf16.msra.mxu1 %v17313_v32 }
 0x65d   : > { %13468 = vmatprep.subr.bf16.mxu0 %v15836_v20  ;;  %13480 = vmatprep.subr.bf16.mxu1 %v15836_v20 }
 0x660   : > { %13469 = vmatpush3.bf16.msra.mxu0 %v17353_v2  ;;  %13481 = vmatpush3.bf16.msra.mxu1 %v17353_v2 }
 0x661   : > { %13486 = vmatprep.subr.bf16.mxu0 %v15836_v20  ;;  %13498 = vmatprep.subr.bf16.mxu1 %v15836_v20 }
 0x663   : > { %13483 = vmatmul.mubr.msk.bf16.vlgmr.msra.gmra.mxu1 %vm2318_vm0, %v14367_v29  ;;  %13471 = vmatmul.mubr.msk.bf16.vlgmr.msra.gmra.mxu0 %vm2318_vm0, %v14368_v45  ;;  %v14408_v45 = vld [vmem:[#allocation16 + $0xc0] sm:$0xff]  }
 0x664   : > { %13487 = vmatpush3.bf16.msra.mxu0 %v17333_v44  ;;  %13499 = vmatpush3.bf16.msra.mxu1 %v17333_v44 }
 0x665   : > { %13488 = vmatprep.subr.bf16.mxu0 %v15836_v20  ;;  %13500 = vmatprep.subr.bf16.mxu1 %v15836_v20 }
 0x666   : > { %13506 = vmatprep.mubr.msk.bf16.mxu1 %vm15837_vm1, %v15836_v20  ;;  %13494 = vmatprep.mubr.msk.bf16.mxu0 %vm15837_vm1, %v15836_v20 }
 0x668   : > { %13489 = vmatpush3.bf16.msra.mxu0 %v17343_v34  ;;  %13501 = vmatpush3.bf16.msra.mxu1 %v17343_v34 }
 0x669   : > { %13490 = vmatprep.subr.bf16.mxu0 %v15836_v20  ;;  %13502 = vmatprep.subr.bf16.mxu1 %v15836_v20 }
 0x66c   : > { %13491 = vmatpush3.bf16.msra.mxu0 %v17313_v32  ;;  %13503 = vmatpush3.bf16.msra.mxu1 %v17313_v32 }
 0x66d   : > { %13492 = vmatprep.subr.bf16.mxu0 %v15836_v20  ;;  %13504 = vmatprep.subr.bf16.mxu1 %v15836_v20 }
 0x670   : > { %13493 = vmatpush3.bf16.msra.mxu0 %v17353_v2  ;;  %13505 = vmatpush3.bf16.msra.mxu1 %v17353_v2 }
 0x671   : > { %13510 = vmatprep.subr.bf16.mxu0 %v15836_v20  ;;  %13522 = vmatprep.subr.bf16.mxu1 %v15836_v20 }
 0x673   : > { %13507 = vmatmul.mubr.msk.bf16.vlgmr.msra.gmra.mxu1 %vm2318_vm0, %v14369_v16  ;;  %13495 = vmatmul.mubr.msk.bf16.vlgmr.msra.gmra.mxu0 %vm2318_vm0, %v14370_v18  ;;  %v14409_v16 = vld [vmem:[#allocation16 + $0x80] sm:$0xff]  }
 0x674   : > { %13511 = vmatpush3.bf16.msra.mxu0 %v17333_v44  ;;  %13523 = vmatpush3.bf16.msra.mxu1 %v17333_v44 }
 0x675   : > { %13512 = vmatprep.subr.bf16.mxu0 %v15836_v20  ;;  %13524 = vmatprep.subr.bf16.mxu1 %v15836_v20 }
 0x676   : > { %13530 = vmatprep.mubr.msk.bf16.mxu1 %vm15837_vm1, %v15836_v20  ;;  %13518 = vmatprep.mubr.msk.bf16.mxu0 %vm15837_vm1, %v15836_v20 }
 0x678   : > { %13513 = vmatpush3.bf16.msra.mxu0 %v17343_v34  ;;  %13525 = vmatpush3.bf16.msra.mxu1 %v17343_v34 }
 0x679   : > { %13514 = vmatprep.subr.bf16.mxu0 %v15836_v20  ;;  %13526 = vmatprep.subr.bf16.mxu1 %v15836_v20 }
 0x67c   : > { %13515 = vmatpush3.bf16.msra.mxu0 %v17313_v32  ;;  %13527 = vmatpush3.bf16.msra.mxu1 %v17313_v32 }
 0x67d   : > { %13516 = vmatprep.subr.bf16.mxu0 %v15836_v20  ;;  %13528 = vmatprep.subr.bf16.mxu1 %v15836_v20 }
 0x680   : > { %13517 = vmatpush3.bf16.msra.mxu0 %v17353_v2  ;;  %13529 = vmatpush3.bf16.msra.mxu1 %v17353_v2 }
 0x681   : > { %13534 = vmatprep.subr.bf16.mxu0 %v15836_v20  ;;  %13059 = vmatprep.subr.bf16.mxu1 %v14374_v50 }
 0x683   : > { %13531 = vmatmul.mubr.msk.bf16.vlgmr.msra.gmra.mxu1 %vm2318_vm0, %v14371_v42  ;;  %13519 = vmatmul.mubr.msk.bf16.vlgmr.msra.gmra.mxu0 %vm2318_vm0, %v14372_v37 }
 0x684   : > { %13535 = vmatpush3.bf16.msra.mxu0 %v17333_v44  ;;  %13542 = vmatprep.mubr.msk.bf16.mxu0 %vm15837_vm1, %v15836_v20  ;;  %v14399_v44 = vld [vmem:[#allocation16 + $0xd8] sm:$0xff]  }
 0x685   : > { %13536 = vmatprep.subr.bf16.mxu0 %v15836_v20  ;;  %13060 = vmatpush3.bf16.msra.mxu1 %v14375_v38 }
 0x686   : > { %13061 = vmatprep.subr.bf16.mxu1 %v14376_v13 }
 0x688   : > { %13537 = vmatpush3.bf16.msra.mxu0 %v17343_v34 }
 0x689   : > { %13538 = vmatprep.subr.bf16.mxu0 %v15836_v20  ;;  %13062 = vmatpush3.bf16.msra.mxu1 %v14377_v56 }
 0x68a   : > { %13063 = vmatprep.subr.bf16.mxu1 %v14378_v53 }
 0x68c   : > { %13539 = vmatpush3.bf16.msra.mxu0 %v17313_v32 }
 0x68d   : > { %13540 = vmatprep.subr.bf16.mxu0 %v15836_v20  ;;  %13064 = vmatpush3.bf16.msra.mxu1 %v14379_v28 }
 0x68e   : > { %13065 = vmatprep.subr.bf16.mxu1 %v14380_v31 }
 0x690   : > { %13541 = vmatpush3.bf16.msra.mxu0 %v17353_v2 }
 0x691   : > { %13066 = vmatpush3.bf16.msra.mxu1 %v14381_v27  ;;  %13081 = vmatprep.subr.bf16.mxu0 %v14390_v52  ;;  %v14401_v52 = vld [vmem:[#allocation16 + $0x110] sm:$0xff]  }
 0x692   : > { %13067 = vmatprep.subr.bf16.mxu1 %v14382_v14 }
 0x693   : > { %13543 = vmatmul.mubr.msk.bf16.vlgmr.msra.gmra.mxu0 %vm2318_vm0, %v14373_v57 }
 0x694   : > { %13082 = vmatpush3.bf16.msra.mxu0 %v14391_v8 }
 0x695   : > { %13068 = vmatpush3.bf16.msra.mxu1 %v14383_v30  ;;  %13083 = vmatprep.subr.bf16.mxu0 %v14392_v15 }
 0x696   : > { %13069 = vmatprep.subr.bf16.mxu1 %v14384_v60 }
 0x698   : > { %13084 = vmatpush3.bf16.msra.mxu0 %v14393_v63 }
 0x699   : > { %13070 = vmatpush3.bf16.msra.mxu1 %v14385_v51  ;;  %13085 = vmatprep.subr.bf16.mxu0 %v14394_v23 }
 0x69a   : > { %13071 = vmatprep.subr.bf16.mxu1 %v14386_v3 }
 0x69c   : > { %13086 = vmatpush3.bf16.msra.mxu0 %v14395_v17  ;;  %v14410_v17 = vld [vmem:[#allocation19 + $0x18] sm:$0xff]  }
 0x69d   : > { %13072 = vmatpush3.bf16.msra.mxu1 %v14387_v36  ;;  %13087 = vmatprep.subr.bf16.mxu0 %v14396_v19  ;;  %v14412_v19 = vld [vmem:[#allocation19 + $0x8] sm:$0xff]  }
 0x69e   : > { %13073 = vmatprep.subr.bf16.mxu1 %v14388_v25  ;;  %v14398_v25 = vld [vmem:[#allocation16 + $0x118] sm:$0xff]  }
 0x6a0   : > { %13088 = vmatpush3.bf16.msra.mxu0 %v14397_v48  ;;  %v14413_v48 = vld [vmem:[#allocation19] sm:$0xff]  }
 0x6a1   : > { %13074 = vmatpush3.bf16.msra.mxu1 %v14389_v54  ;;  %13089 = vmatprep.subr.bf16.mxu0 %v14399_v44 }
 0x6a2   : > { %13546 = vmatprep.subr.bf16.mxu1 %v15836_v20 }
 0x6a4   : > { %13090 = vmatpush3.bf16.msra.mxu0 %v14400_v11 }
 0x6a5   : > { %13091 = vmatprep.subr.bf16.mxu0 %v14402_v4 }
 0x6a8   : > { %13092 = vmatpush3.bf16.msra.mxu0 %v14403_v46 }
 0x6a9   : > { %13093 = vmatprep.subr.bf16.mxu0 %v14405_v59 }
 0x6ac   : > { %13094 = vmatpush3.bf16.msra.mxu0 %v14406_v55  ;;  %v11773_v55 = vld [vmem:[#allocation20] ss:$0 sm:$0xff] }
 0x6ad   : > { %13095 = vmatprep.subr.bf16.mxu0 %v14408_v45 }
 0x6b0   : > { %13096 = vmatpush3.bf16.msra.mxu0 %v14409_v16 }
 0x6b1   : > { %13558 = vmatprep.subr.bf16.mxu0 %v15836_v20 }
 0x713   : > { %v4756_v7 = vpop.f32.mrf.mxu1  ;;  %v17436_v32 = vpop.f32.mrf.mxu0 }
 0x715   : > { %v13460_v49 = vpop.f32.mrf.mxu1  ;;  %v13448_v0 = vpop.f32.mrf.mxu0 }
 0x717   : > { %v4759_v33 = vpop.f32.mrf.mxu1  ;;  %v17438_v47 = vpop.f32.mrf.mxu0 }
 0x718   : > { %v14114_v62 = vpack.i.bf16 %v4759_v33, %v4756_v7 }
 0x719   : > { %v13461_v40 = vpop.f32.mrf.mxu1  ;;  %v13449_v5 = vpop.f32.mrf.mxu0 }
 0x71a   : > { %14115 = vrot.lane.b32.xlu1 %v14114_v62, %s15835_s27 }
 0x723   : > { %v4860_v24 = vpop.f32.mrf.mxu1  ;;  %v17442_v22 = vpop.f32.mrf.mxu0 }
 0x725   : > { %v13484_v43 = vpop.f32.mrf.mxu1  ;;  %v13472_v1 = vpop.f32.mrf.mxu0 }
 0x727   : > { %v4863_v9 = vpop.f32.mrf.mxu1  ;;  %v17444_v41 = vpop.f32.mrf.mxu0 }
 0x728   : > { %v14109_v58 = vpack.i.bf16 %v4863_v9, %v4860_v24 }
 0x729   : > { %v13485_v6 = vpop.f32.mrf.mxu1  ;;  %v13473_v21 = vpop.f32.mrf.mxu0 }
 0x72a   : > { %14110 = vrot.lane.b32.xlu0 %v14109_v58, %s15835_s27  ;;  %v14411_v21 = vld [vmem:[#allocation19 + $0x10] sm:$0xff]  }
 0x733   : > { %v4964_v26 = vpop.f32.mrf.mxu1  ;;  %v17447_v10 = vpop.f32.mrf.mxu0 }
 0x735   : > { %v13508_v35 = vpop.f32.mrf.mxu1  ;;  %v13496_v34 = vpop.f32.mrf.mxu0 }
 0x737   : > { %v4967_v39 = vpop.f32.mrf.mxu1  ;;  %v17449_v61 = vpop.f32.mrf.mxu0 }
 0x738   : > { %v14124_v2 = vpack.i.bf16 %v4967_v39, %v4964_v26  ;;  %v5595_v44 = vpack.c.bf16 %v17449_v61, %v17447_v10 }
 0x739   : > { %v13509_v12 = vpop.f32.mrf.mxu1  ;;  %v13497_v29 = vpop.f32.mrf.mxu0 }
 0x73a   : > { %14125 = vrot.lane.b32.xlu1 %v14124_v2, %s15835_s27 }
 0x743   : > { %v5068_v18 = vpop.f32.mrf.mxu1  ;;  %v5016_v42 = vpop.f32.mrf.mxu0 }
 0x745   : > { %v13532_v37 = vpop.f32.mrf.mxu1  ;;  %v13520_v57 = vpop.f32.mrf.mxu0 }
 0x747   : > { %v5071_v50 = vpop.f32.mrf.mxu1  ;;  %v5019_v38 = vpop.f32.mrf.mxu0 }
 0x748   : > { %v14119_v13 = vpack.i.bf16 %v5071_v50, %v5068_v18 }
 0x749   : > { %v13533_v56 = vpop.f32.mrf.mxu1  ;;  %v13521_v53 = vpop.f32.mrf.mxu0 }
 0x74a   : > { %14120 = vrot.lane.b32.xlu0 %v14119_v13, %s15835_s27  ;;  %s18313_s27 = sld [smem:[#allocation48_spill]] }
 0x750   : > { %s1028_s3 = sand.u32 1, %s18313_s27  }
 0x751   : > { %s11501_s25 = sshll.u32 %s1028_s3, 1  ;;  %s11191_s9 = scalar_lea.sflag [#allocation4], %s1028_s3 }
 0x752   : > { %s1030_s29 = scalar_lea.vmem [#allocation34], %s11501_s25  ;;  %s15709_s25 = scalar_lea.vmem %s15708_s7, 64 }
 0x753   : > { %v5120_v28 = vpop.f32.mrf.mxu0  ;;  %s11205_s2 = sshll.u32 %s1030_s29, 4  ;;  %s11206_s2 = int_to_ptr.vmem [resolvable:$true] %s11205_s2 }
 0x754   : > { %s15703_s27 = scalar_lea.vmem %s11206_s2, 32  ;;  %p15710_p5 = scmp.lt.s32.totalorder %s11206_s2, %s15708_s7 }
 0x755   : > { %v13544_v31 = vpop.f32.mrf.mxu0  ;;  %p15704_p9 = scmp.ne.s32.totalorder %s11206_s2, %s15703_s27  ;;  %p15711_p10 = scmp.lt.s32.totalorder %s15709_s25, %s15703_s27 }
 0x757   : > { %v5123_v27 = vpop.f32.mrf.mxu0  ;;  %p15705_p3 = pnand %p15704_p9, %p18317_p1  ;;  %p15712_p13 = por %p15711_p10, %p15710_p5 }
 0x758   : > { %v5171_v14 = vpack.c.bf16 %v5123_v27, %v5120_v28  ;;  %v14414_v27 = vld [vmem:[#allocation14] sm:$0xff]  }
 0x759   : > { %v13545_v30 = vpop.f32.mrf.mxu0  ;;  %p15706_p6 = pneg %p15705_p3 }
 0x75b   : > { %p15713_p7 = pnand %p15712_p13, %p15706_p6 }
 0x78c   : > { %v14116_v60 = vpop.permute.xlu1 %14115 }
 0x78d   : > { %v14118_v7 = vunpack.i.h.bf16 %v14116_v60  ;;  %v14117_v49 = vunpack.i.l.bf16 %v14116_v60 }
 0x78f   : > { %v5159_v33 = vsel %vm2318_vm0, %v17436_v32, %v14117_v49  ;;  %v5160_v62 = vsel %vm2318_vm0, %v17438_v47, %v14118_v7  ;;  %v14404_v32 = vld [vmem:[#allocation16 + $0x108] sm:$0xff]   ;;  %v14407_v47 = vld [vmem:[#allocation16 + $0x100] sm:$0xff]  }
 0x790   : > { %v5167_v54 = vpack.c.bf16 %v5160_v62, %v5159_v33  ;;  %v14416_v49 = vld [vmem:[#allocation14 + $0x8] sm:$0xff]   ;;  %v14428_v33 = vld [vmem:[#allocation17 + $0xf8] sm:$0xff]  }
 0x791   : > { %v14420_v62 = vld [vmem:[#allocation14 + $0x28] sm:$0xff]  }
 0x79c   : > { %v14111_v0 = vpop.permute.xlu0 %14110 }
 0x79d   : > { %v14113_v51 = vunpack.i.h.bf16 %v14111_v0  ;;  %v14112_v3 = vunpack.i.l.bf16 %v14111_v0  ;;  %v14417_v0 = vld [vmem:[#allocation14 + $0x20] sm:$0xff]  }
 0x79f   : > { %v5161_v40 = vsel %vm2318_vm0, %v17442_v22, %v14112_v3  ;;  %v5162_v5 = vsel %vm2318_vm0, %v17444_v41, %v14113_v51  ;;  %v14418_v51 = vld [vmem:[#allocation14 + $0x18] sm:$0xff]   ;;  %v14419_v3 = vld [vmem:[#allocation14 + $0x30] sm:$0xff]  }
 0x7a0   : > { %v5168_v36 = vpack.c.bf16 %v5162_v5, %v5161_v40  ;;  %v14422_v40 = vld [vmem:[#allocation14 + $0x40] sm:$0xff]  }
 0x7a1   : > { %v14423_v5 = vld [vmem:[#allocation17 + $0x78] sm:$0xff]  }
 0x7a2   : > { %5502 = vmatprep.mubr.bf16.mxu1 %v5168_v36  ;;  %v14430_v36 = vld [vmem:[#allocation17 + $0xb8] sm:$0xff]  }
 0x7a3   : > { %5503 = vmatmul.mubr.bf16.vlgmr.msra.gmra.mxu1 %v5167_v54  ;;  %v14434_v54 = vld [vmem:[#allocation17 + $0xb0] sm:$0xff]  }
 0x7a4   : > { %13547 = vmatpush3.bf16.msra.mxu1 %v14398_v25  ;;  %13554 = vmatprep.mubr.msk.bf16.mxu1 %vm15837_vm1, %v15836_v20  ;;  %v14432_v25 = vld [vmem:[#allocation17 + $0xf0] sm:$0xff]  }
 0x7a5   : > { %13548 = vmatprep.subr.bf16.mxu1 %v15836_v20 }
 0x7a8   : > { %13549 = vmatpush3.bf16.msra.mxu1 %v14401_v52  ;;  %v14436_v52 = vld [vmem:[#allocation17 + $0xe8] sm:$0xff]  }
 0x7a9   : > { %13550 = vmatprep.subr.bf16.mxu1 %v15836_v20 }
 0x7ac   : > { %13551 = vmatpush3.bf16.msra.mxu1 %v14404_v32  ;;  %v14126_v8 = vpop.permute.xlu1 %14125  ;;  %v14421_v32 = vld [vmem:[#allocation14 + $0x38] sm:$0xff]  }
 0x7ad   : > { %13552 = vmatprep.subr.bf16.mxu1 %v15836_v20  ;;  %v14128_v24 = vunpack.i.h.bf16 %v14126_v8  ;;  %v14127_v22 = vunpack.i.l.bf16 %v14126_v8  ;;  %v14425_v8 = vld [vmem:[#allocation17 + $0x70] sm:$0xff]  }
 0x7af   : > { %v5163_v1 = vsel %vm2318_vm0, %v17447_v10, %v14127_v22  ;;  %v5164_v23 = vsel %vm2318_vm0, %v17449_v61, %v14128_v24  ;;  %v14426_v24 = vld [vmem:[#allocation17 + $0x30] sm:$0xff]   ;;  %v14427_v22 = vld [vmem:[#allocation17 + $0x68] sm:$0xff]  }
 0x7b0   : > { %13553 = vmatpush3.bf16.msra.mxu1 %v14407_v47  ;;  %v5169_v6 = vpack.c.bf16 %v5164_v23, %v5163_v1  ;;  %v14424_v47 = vld [vmem:[#allocation17 + $0x38] sm:$0xff]  }
 0x7b1   : > { %13570 = vmatprep.subr.bf16.mxu1 %v15836_v20  ;;  %v14435_v1 = vld [vmem:[#allocation17 + $0x58] sm:$0xff]  }
 0x7b2   : > { %v14437_v23 = vld [vmem:[#allocation17 + $0x18] sm:$0xff]  }
 0x7b3   : > { %13555 = vmatmul.mubr.msk.bf16.vlgmr.msra.gmra.mxu1 %vm2318_vm0, %v5171_v14  ;;  %v14415_v14 = vld [vmem:[#allocation14 + $0x10] sm:$0xff]  }
 0x7b4   : > { %13572 = vmatprep.mubr.msk.bf16.mxu1 %vm15837_vm1, %v15836_v20 }
 0x7bc   : > { %v14121_v15 = vpop.permute.xlu0 %14120 }
 0x7bd   : > { %v14123_v63 = vunpack.i.h.bf16 %v14121_v15  ;;  %v14122_v43 = vunpack.i.l.bf16 %v14121_v15  ;;  %v14429_v15 = vld [vmem:[#allocation17 + $0x28] sm:$0xff]  }
 0x7bf   : > { %v5165_v9 = vsel %vm2318_vm0, %v5016_v42, %v14122_v43  ;;  %v5166_v41 = vsel %vm2318_vm0, %v5019_v38, %v14123_v63  ;;  %v14431_v63 = vld [vmem:[#allocation17 + $0x60] sm:$0xff]  }
 0x7c0   : > { %v5170_v58 = vpack.c.bf16 %v5166_v41, %v5165_v9  ;;  %v14433_v43 = vld [vmem:[#allocation17 + $0x20] sm:$0xff]   ;;  %v14438_v9 = vld [vmem:[#allocation17 + $0xa8] sm:$0xff]   ;;  %v14439_v41 = vld [vmem:[#allocation17 + $0x50] sm:$0xff]  }
 0x7c2   : > { %5543 = vmatprep.mubr.bf16.mxu0 %v5170_v58  ;;  %v14440_v58 = vld [vmem:[#allocation17 + $0xe0] sm:$0xff]  }
 0x7c3   : > { %5544 = vmatmul.mubr.bf16.vlgmr.msra.gmra.mxu0 %v5169_v6  ;;  %v14442_v6 = vld [vmem:[#allocation17 + $0xa0] sm:$0xff]  }
 0x7c4   : > { %13559 = vmatpush3.bf16.msra.mxu0 %v14410_v17  ;;  %13566 = vmatprep.mubr.msk.bf16.mxu0 %vm15837_vm1, %v15836_v20  ;;  %v14441_v17 = vld [vmem:[#allocation17 + $0x10] sm:$0xff]  }
 0x7c5   : > { %13560 = vmatprep.subr.bf16.mxu0 %v15836_v20 }
 0x7c8   : > { %13561 = vmatpush3.bf16.msra.mxu0 %v14411_v21  ;;  %v14443_v21 = vld [vmem:[#allocation17 + $0x48] sm:$0xff]  }
 0x7c9   : > { %13562 = vmatprep.subr.bf16.mxu0 %v15836_v20 }
 0x7cc   : > { %13563 = vmatpush3.bf16.msra.mxu0 %v14412_v19  ;;  %v14444_v19 = vld [vmem:[#allocation17 + $0xd8] sm:$0xff]  }
 0x7cd   : > { %13564 = vmatprep.subr.bf16.mxu0 %v15836_v20 }
 0x7d0   : > { %13565 = vmatpush3.bf16.msra.mxu0 %v14413_v48  ;;  %v14445_v48 = vld [vmem:[#allocation17 + $0x8] sm:$0xff]  }
 0x7d1   : > { %13582 = vmatprep.subr.bf16.mxu0 %v15836_v20 }
 0x7d3   : > { %13567 = vmatmul.mubr.msk.bf16.vlgmr.msra.gmra.mxu0 %vm2318_vm0, %v5595_v44  ;;  %v14446_v44 = vld [vmem:[#allocation17 + $0x98] sm:$0xff]  }
 0x7d4   : > { %13584 = vmatprep.mubr.msk.bf16.mxu0 %vm15837_vm1, %v15836_v20 }
 0x863   : > { %v13075_v11 = vpop.f32.mrf.mxu1 }
 0x865   : > { %v13076_v4 = vpop.f32.mrf.mxu1 }
 0x866   : > { %v13077_v2 = vadd.f32 %v13076_v4, %v13075_v11  ;;  %v14447_v11 = vld [vmem:[#allocation17 + $0x40] sm:$0xff]   ;;  %v14448_v4 = vld [vmem:[#allocation17 + $0xd0] sm:$0xff]  }
 0x867   : > { %v13078_v26 = vpop.f32.mrf.mxu1 }
 0x868   : > { %v5505_v10 = vadd.f32 %v13077_v2, %v11773_v55  ;;  %v14457_v2 = vld [vmem:[#allocation17 + $0x80] sm:$0xff]  }
 0x869   : > { %v13079_v46 = vpop.f32.mrf.mxu1 }
 0x86a   : > { %v13080_v61 = vadd.f32 %v13079_v46, %v13078_v26  ;;  %v14449_v26 = vld [vmem:[#allocation17] sm:$0xff]   ;;  %v14450_v46 = vld [vmem:[#allocation17 + $0x90] sm:$0xff]  }
 0x86c   : > { %v5508_v37 = vadd.f32 %v13080_v61, %v11773_v55  ;;  %v14460_v55 = vld [vmem:[#allocation17 + $0x1f8] sm:$0xff]  }
 0x873   : > { %v5586_v35 = vpop.f32.mrf.mxu1 }
 0x875   : > { %v13556_v34 = vpop.f32.mrf.mxu1 }
 0x876   : > { %v14452_v34 = vld [vmem:[#allocation17 + $0x178] sm:$0xff]  }
 0x877   : > { %v5589_v59 = vpop.f32.mrf.mxu1 }
 0x879   : > { %v13557_v39 = vpop.f32.mrf.mxu1 }
 0x87a   : > { %v14455_v39 = vld [vmem:[#allocation17 + $0xc0] sm:$0xff]  }
 0x883   : > { %v13097_v12 = vpop.f32.mrf.mxu0 }
 0x885   : > { %v13098_v29 = vpop.f32.mrf.mxu0 }
 0x886   : > { %v13099_v45 = vadd.f32 %v13098_v29, %v13097_v12 }
 0x887   : > { %v13100_v16 = vpop.f32.mrf.mxu0 }
 0x888   : > { %v5546_v18 = vadd.f32 %v13099_v45, %v5505_v10 }
 0x889   : > { %v13101_v42 = vpop.f32.mrf.mxu0 }
 0x88a   : > { %v13102_v57 = vadd.f32 %v13101_v42, %v13100_v16  ;;  %v5587_v50 = vadd.f32 %v5586_v35, %v5546_v18  ;;  %v14451_v35 = vld [vmem:[#allocation17 + $0xc8] sm:$0xff]  }
 0x88c   : > { %v5549_v38 = vadd.f32 %v13102_v57, %v5508_v37  ;;  %v5593_v56 = vmax.f32 %v5587_v50, 0.0 }
 0x88e   : > { %v5590_v13 = vadd.f32 %v5589_v59, %v5549_v38  ;;  %v14453_v59 = vld [vmem:[#allocation17 + $0x88] sm:$0xff]  }
 0x890   : > { %v5594_v53 = vmax.f32 %v5590_v13, 0.0 }
 0x892   : > { %v5679_v28 = vpack.c.bf16 %v5594_v53, %v5593_v56 }
 0x893   : > { %v17488_v31 = vpop.f32.mrf.mxu0 }
 0x894   : > { %13571 = vmatpush3.bf16.msra.mxu1 %v5679_v28  ;;  %13583 = vmatpush3.bf16.msra.mxu0 %v5679_v28 }
 0x895   : > { %v13568_v30 = vpop.f32.mrf.mxu0  ;;  %13576 = vmatprep.subr.bf16.mxu1 %v15836_v20  ;;  %13594 = vmatprep.subr.bf16.mxu0 %v15836_v20 }
 0x896   : > { %v14456_v30 = vld [vmem:[#allocation17 + $0x170] sm:$0xff]  }
 0x897   : > { %v17492_v60 = vpop.f32.mrf.mxu0  ;;  %13573 = vmatmul.mubr.msk.bf16.vlgmr.msra.gmra.mxu1 %vm5687_vm2, %v14414_v27  ;;  %13585 = vmatmul.mubr.msk.bf16.vlgmr.msra.gmra.mxu0 %vm5687_vm2, %v14415_v14 }
 0x898   : > { %13577 = vmatpush3.bf16.msra.mxu1 %v5679_v28  ;;  %13595 = vmatpush3.bf16.msra.mxu0 %v5679_v28 }
 0x899   : > { %v13569_v7 = vpop.f32.mrf.mxu0  ;;  %13578 = vmatprep.mubr.msk.bf16.mxu1 %vm15837_vm1, %v15836_v20  ;;  %13588 = vmatprep.subr.bf16.mxu1 %v15836_v20 }
 0x89a   : > { %13596 = vmatprep.mubr.msk.bf16.mxu0 %vm15837_vm1, %v15836_v20  ;;  %13606 = vmatprep.subr.bf16.mxu0 %v15836_v20 }
 0x89f   : > { %13579 = vmatmul.mubr.msk.bf16.vlgmr.msra.gmra.mxu1 %vm5687_vm2, %v14416_v49  ;;  %13597 = vmatmul.mubr.msk.bf16.vlgmr.msra.gmra.mxu0 %vm5687_vm2, %v14417_v0 }
 0x8a0   : > { %13589 = vmatpush3.bf16.msra.mxu1 %v5679_v28  ;;  %13607 = vmatpush3.bf16.msra.mxu0 %v5679_v28 }
 0x8a1   : > { %13590 = vmatprep.mubr.msk.bf16.mxu1 %vm15837_vm1, %v15836_v20  ;;  %13600 = vmatprep.subr.bf16.mxu1 %v15836_v20 }
 0x8a2   : > { %13608 = vmatprep.mubr.msk.bf16.mxu0 %vm15837_vm1, %v15836_v20  ;;  %13618 = vmatprep.subr.bf16.mxu0 %v15836_v20 }
 0x8a7   : > { %13591 = vmatmul.mubr.msk.bf16.vlgmr.msra.gmra.mxu1 %vm5687_vm2, %v14418_v51  ;;  %13609 = vmatmul.mubr.msk.bf16.vlgmr.msra.gmra.mxu0 %vm5687_vm2, %v14419_v3  ;;  %v14458_v51 = vld [vmem:[#allocation17 + $0x130] sm:$0xff]  }
 0x8a8   : > { %13601 = vmatpush3.bf16.msra.mxu1 %v5679_v28  ;;  %13619 = vmatpush3.bf16.msra.mxu0 %v5679_v28 }
 0x8a9   : > { %13602 = vmatprep.mubr.msk.bf16.mxu1 %vm15837_vm1, %v15836_v20  ;;  %13612 = vmatprep.subr.bf16.mxu1 %v15836_v20 }
 0x8aa   : > { %13620 = vmatprep.mubr.msk.bf16.mxu0 %vm15837_vm1, %v15836_v20  ;;  %13153 = vmatprep.subr.bf16.mxu0 %v14428_v33  ;;  %v14459_v33 = vld [vmem:[#allocation17 + $0x168] sm:$0xff]  }
 0x8af   : > { %13603 = vmatmul.mubr.msk.bf16.vlgmr.msra.gmra.mxu1 %vm5687_vm2, %v14420_v62  ;;  %13621 = vmatmul.mubr.msk.bf16.vlgmr.msra.gmra.mxu0 %vm5687_vm2, %v14422_v40 }
 0x8b0   : > { %13613 = vmatpush3.bf16.msra.mxu1 %v5679_v28  ;;  %13614 = vmatprep.mubr.msk.bf16.mxu1 %vm15837_vm1, %v15836_v20  ;;  %v14454_v28 = vld [vmem:[#allocation17 + $0x138] sm:$0xff]  }
 0x8b1   : > { %13131 = vmatprep.subr.bf16.mxu1 %v14423_v5  ;;  %13154 = vmatpush3.bf16.msra.mxu0 %v14430_v36 }
 0x8b2   : > { %13155 = vmatprep.subr.bf16.mxu0 %v14432_v25 }
 0x8b5   : > { %13156 = vmatpush3.bf16.msra.mxu0 %v14434_v54  ;;  %v14461_v54 = vld [vmem:[#allocation17 + $0x128] sm:$0xff]  }
 0x8b6   : > { %13157 = vmatprep.subr.bf16.mxu0 %v14436_v52  ;;  %v14462_v52 = vld [vmem:[#allocation17 + $0x1b8] sm:$0xff]  }
 0x8b7   : > { %13615 = vmatmul.mubr.msk.bf16.vlgmr.msra.gmra.mxu1 %vm5687_vm2, %v14421_v32  ;;  %v14463_v32 = vld [vmem:[#allocation17 + $0x160] sm:$0xff]  }
 0x8b8   : > { %13132 = vmatpush3.bf16.msra.mxu1 %v14424_v47  ;;  %v14464_v47 = vld [vmem:[#allocation17 + $0x1f0] sm:$0xff]  }
 0x8b9   : > { %13133 = vmatprep.subr.bf16.mxu1 %v14425_v8  ;;  %13158 = vmatpush3.bf16.msra.mxu0 %v14438_v9 }
 0x8ba   : > { %13159 = vmatprep.subr.bf16.mxu0 %v14440_v58 }
 0x8bc   : > { %13134 = vmatpush3.bf16.msra.mxu1 %v14426_v24 }
 0x8bd   : > { %13135 = vmatprep.subr.bf16.mxu1 %v14427_v22  ;;  %13160 = vmatpush3.bf16.msra.mxu0 %v14442_v6  ;;  %v14469_v6 = vld [vmem:[#allocation17 + $0x118] sm:$0xff]  }
 0x8be   : > { %13161 = vmatprep.subr.bf16.mxu0 %v14444_v19 }
 0x8c0   : > { %13136 = vmatpush3.bf16.msra.mxu1 %v14429_v15 }
 0x8c1   : > { %13137 = vmatprep.subr.bf16.mxu1 %v14431_v63  ;;  %13162 = vmatpush3.bf16.msra.mxu0 %v14446_v44  ;;  %v14465_v63 = vld [vmem:[#allocation17 + $0x120] sm:$0xff]  }
 0x8c2   : > { %13163 = vmatprep.subr.bf16.mxu0 %v14448_v4  ;;  %v14472_v44 = vld [vmem:[#allocation17 + $0x1e0] sm:$0xff]  }
 0x8c4   : > { %13138 = vmatpush3.bf16.msra.mxu1 %v14433_v43  ;;  %v14466_v43 = vld [vmem:[#allocation17 + $0x1b0] sm:$0xff]  }
 0x8c5   : > { %13139 = vmatprep.subr.bf16.mxu1 %v14435_v1  ;;  %13164 = vmatpush3.bf16.msra.mxu0 %v14450_v46  ;;  %v14467_v1 = vld [vmem:[#allocation17 + $0x158] sm:$0xff]   ;;  %v14473_v46 = vld [vmem:[#allocation17 + $0x110] sm:$0xff]  }
 0x8c6   : > { %13165 = vmatprep.subr.bf16.mxu0 %v14451_v35  ;;  %v14474_v35 = vld [vmem:[#allocation17 + $0x1a0] sm:$0xff]  }
 0x8c8   : > { %13140 = vmatpush3.bf16.msra.mxu1 %v14437_v23  ;;  %v14468_v23 = vld [vmem:[#allocation17 + $0x1e8] sm:$0xff]  }
 0x8c9   : > { %13141 = vmatprep.subr.bf16.mxu1 %v14439_v41  ;;  %13166 = vmatpush3.bf16.msra.mxu0 %v14453_v59  ;;  %v14476_v59 = vld [vmem:[#allocation17 + $0x1d8] sm:$0xff]  }
 0x8ca   : > { %13167 = vmatprep.subr.bf16.mxu0 %v14455_v39 }
 0x8cc   : > { %13142 = vmatpush3.bf16.msra.mxu1 %v14441_v17 }
 0x8cd   : > { %13143 = vmatprep.subr.bf16.mxu1 %v14443_v21  ;;  %13168 = vmatpush3.bf16.msra.mxu0 %v14457_v2  ;;  %v14470_v21 = vld [vmem:[#allocation17 + $0x1a8] sm:$0xff]  }
 0x8ce   : > { %13197 = vmatprep.subr.bf16.mxu0 %v14460_v55  ;;  %v14477_v55 = vld [vmem:[#allocation17 + $0x108] sm:$0xff]  }
 0x8d0   : > { %13144 = vmatpush3.bf16.msra.mxu1 %v14445_v48  ;;  %v14471_v48 = vld [vmem:[#allocation17 + $0x150] sm:$0xff]  }
 0x8d1   : > { %13145 = vmatprep.subr.bf16.mxu1 %v14447_v11 }
 0x8d4   : > { %13146 = vmatpush3.bf16.msra.mxu1 %v14449_v26 }
 0x8d5   : > { %13175 = vmatprep.subr.bf16.mxu1 %v14452_v34  ;;  %v14475_v34 = vld [vmem:[#allocation17 + $0x148] sm:$0xff]  }
 0x957   : > { %v5725_v12 = vpop.f32.mrf.mxu1  ;;  %v5829_v29 = vpop.f32.mrf.mxu0 }
 0x959   : > { %v13574_v10 = vpop.f32.mrf.mxu1  ;;  %v13586_v61 = vpop.f32.mrf.mxu0 }
 0x95a   : > { %v14479_v10 = vld [vmem:[#allocation17 + $0x140] sm:$0xff]   ;;  %v14480_v61 = vld [vmem:[#allocation17 + $0x1d0] sm:$0xff]  }
 0x95b   : > { %v5728_v45 = vpop.f32.mrf.mxu1  ;;  %v5832_v16 = vpop.f32.mrf.mxu0 }
 0x95c   : > { %v6148_v27 = vpack.c.bf16 %v5728_v45, %v5725_v12  ;;  %v6150_v5 = vpack.c.bf16 %v5832_v16, %v5829_v29  ;;  %v14478_v12 = vld [vmem:[#allocation17 + $0x198] sm:$0xff]   ;;  %v14481_v16 = vld [vmem:[#allocation17 + $0x100] sm:$0xff]  }
 0x95d   : > { %v13575_v18 = vpop.f32.mrf.mxu1  ;;  %v13587_v42 = vpop.f32.mrf.mxu0 }
 0x95e   : > { %v14482_v18 = vld [vmem:[#allocation17 + $0x190] sm:$0xff]   ;;  %v14483_v42 = vld [vmem:[#allocation17 + $0x1c8] sm:$0xff]  }
 0x95f   : > { %v5777_v37 = vpop.f32.mrf.mxu1  ;;  %v17522_v57 = vpop.f32.mrf.mxu0 }
 0x961   : > { %v13580_v50 = vpop.f32.mrf.mxu1  ;;  %v13598_v38 = vpop.f32.mrf.mxu0 }
 0x962   : > { %v14485_v50 = vld [vmem:[#allocation17 + $0x238] sm:$0xff]  }
 0x963   : > { %v5780_v13 = vpop.f32.mrf.mxu1  ;;  %v17524_v56 = vpop.f32.mrf.mxu0 }
 0x964   : > { %v6149_v53 = vpack.c.bf16 %v5780_v13, %v5777_v37  ;;  %v14484_v37 = vld [vmem:[#allocation17 + $0x188] sm:$0xff]   ;;  %v6152_v38 = vpack.c.bf16 %v17524_v56, %v17522_v57  ;;  %v14486_v13 = vld [vmem:[#allocation17 + $0x1c0] sm:$0xff]  }
 0x965   : > { %v13581_v14 = vpop.f32.mrf.mxu1  ;;  %v13599_v7 = vpop.f32.mrf.mxu0  ;;  %v14489_v57 = vld [vmem:[#allocation17 + $0x228] sm:$0xff]   ;;  %v14490_v56 = vld [vmem:[#allocation17 + $0x220] sm:$0xff]  }
 0x966   : > { %6772 = vmatprep.mubr.bf16.mxu1 %v6149_v53  ;;  %v14487_v53 = vld [vmem:[#allocation17 + $0x180] sm:$0xff]   ;;  %v14491_v14 = vld [vmem:[#allocation17 + $0x218] sm:$0xff]   ;;  %v14493_v7 = vld [vmem:[#allocation17 + $0x208] sm:$0xff]  }
 0x967   : > { %v5881_v49 = vpop.f32.mrf.mxu1  ;;  %6773 = vmatmul.mubr.bf16.vlgmr.msra.gmra.mxu1 %v6148_v27  ;;  %v17526_v0 = vpop.f32.mrf.mxu0 }
 0x968   : > { %13176 = vmatpush3.bf16.msra.mxu1 %v14454_v28  ;;  %v14488_v28 = vld [vmem:[#allocation17 + $0x230] sm:$0xff]  }
 0x969   : > { %v13592_v3 = vpop.f32.mrf.mxu1  ;;  %13177 = vmatprep.subr.bf16.mxu1 %v14456_v30  ;;  %v13610_v62 = vpop.f32.mrf.mxu0  ;;  %v14492_v30 = vld [vmem:[#allocation17 + $0x210] sm:$0xff]  }
 0x96b   : > { %v5884_v40 = vpop.f32.mrf.mxu1  ;;  %v17528_v36 = vpop.f32.mrf.mxu0 }
 0x96c   : > { %v6151_v25 = vpack.c.bf16 %v5884_v40, %v5881_v49  ;;  %13178 = vmatpush3.bf16.msra.mxu1 %v14458_v51  ;;  %v6154_v27 = vpack.c.bf16 %v17528_v36, %v17526_v0  ;;  %v14494_v49 = vld [vmem:[#allocation17 + $0x200] sm:$0xff]  }
 0x96d   : > { %13179 = vmatprep.subr.bf16.mxu1 %v14459_v33  ;;  %v13593_v8 = vpop.f32.mrf.mxu1  ;;  %v13611_v24 = vpop.f32.mrf.mxu0 }
 0x96e   : > { %6813 = vmatprep.mubr.bf16.mxu0 %v6151_v25  ;;  %v11835_v24 = vld [vmem:[#allocation22] ss:$0 sm:$0xff] }
 0x96f   : > { %6814 = vmatmul.mubr.bf16.vlgmr.msra.gmra.mxu0 %v6150_v5  ;;  %v5985_v22 = vpop.f32.mrf.mxu1  ;;  %v17530_v15 = vpop.f32.mrf.mxu0 }
 0x970   : > { %13180 = vmatpush3.bf16.msra.mxu1 %v14461_v54  ;;  %13198 = vmatpush3.bf16.msra.mxu0 %v14462_v52 }
 0x971   : > { %13181 = vmatprep.subr.bf16.mxu1 %v14463_v32  ;;  %13199 = vmatprep.subr.bf16.mxu0 %v14464_v47  ;;  %v13604_v9 = vpop.f32.mrf.mxu1  ;;  %v13622_v41 = vpop.f32.mrf.mxu0 }
 0x973   : > { %v5988_v58 = vpop.f32.mrf.mxu1  ;;  %v17532_v17 = vpop.f32.mrf.mxu0 }
 0x974   : > { %13182 = vmatpush3.bf16.msra.mxu1 %v14465_v63  ;;  %13200 = vmatpush3.bf16.msra.mxu0 %v14466_v43  ;;  %v6153_v19 = vpack.c.bf16 %v5988_v58, %v5985_v22  ;;  %v6156_v0 = vpack.c.bf16 %v17532_v17, %v17530_v15 }
 0x975   : > { %13183 = vmatprep.subr.bf16.mxu1 %v14467_v1  ;;  %13201 = vmatprep.subr.bf16.mxu0 %v14468_v23  ;;  %v13605_v11 = vpop.f32.mrf.mxu1  ;;  %v13623_v4 = vpop.f32.mrf.mxu0 }
 0x976   : > { %6854 = vmatprep.mubr.bf16.mxu1 %v6153_v19 }
 0x977   : > { %v6089_v26 = vpop.f32.mrf.mxu1 }
 0x978   : > { %13184 = vmatpush3.bf16.msra.mxu1 %v14469_v6  ;;  %13202 = vmatpush3.bf16.msra.mxu0 %v14470_v21 }
 0x979   : > { %13185 = vmatprep.subr.bf16.mxu1 %v14471_v48  ;;  %13203 = vmatprep.subr.bf16.mxu0 %v14472_v44  ;;  %v13616_v39 = vpop.f32.mrf.mxu1 }
 0x97b   : > { %v6092_v2 = vpop.f32.mrf.mxu1 }
 0x97c   : > { %13186 = vmatpush3.bf16.msra.mxu1 %v14473_v46  ;;  %13204 = vmatpush3.bf16.msra.mxu0 %v14474_v35  ;;  %v6155_v29 = vpack.c.bf16 %v6092_v2, %v6089_v26  ;;  %v11811_v26 = vld [vmem:[#allocation23] ss:$0 sm:$0xff] }
 0x97d   : > { %13187 = vmatprep.subr.bf16.mxu1 %v14475_v34  ;;  %13205 = vmatprep.subr.bf16.mxu0 %v14476_v59  ;;  %v13617_v45 = vpop.f32.mrf.mxu1  ;;  %v5673_v39 = vadd.f32 %v11811_v26, %v17488_v31  ;;  %v6995_v31 = vld [vmem:[#allocation25 + $0x2] sm:$0x3] }
 0x97e   : > { %6895 = vmatprep.mubr.bf16.mxu0 %v6155_v29 }
 0x980   : > { %13188 = vmatpush3.bf16.msra.mxu1 %v14477_v55  ;;  %13206 = vmatpush3.bf16.msra.mxu0 %v14478_v12  ;;  %v5676_v12 = vadd.f32 %v11811_v26, %v17492_v60  ;;  %v7220_v60 = vld [vmem:[#allocation25 + $0xc] sm:$0x3]  ;;  %v14531_v26 = vld [vmem:[%s18223_s19 + $0xf0] ss:$8 sps:$4 sm:$0xff]  }
 0x981   : > { %13189 = vmatprep.subr.bf16.mxu1 %v14479_v10  ;;  %13207 = vmatprep.subr.bf16.mxu0 %v14480_v61 }
 0x984   : > { %13190 = vmatpush3.bf16.msra.mxu1 %v14481_v16  ;;  %13208 = vmatpush3.bf16.msra.mxu0 %v14482_v18 }
 0x985   : > { %13209 = vmatprep.subr.bf16.mxu0 %v14483_v42  ;;  %13624 = vmatprep.subr.bf16.mxu1 %v15836_v20 }
 0x987   : > { %6855 = vmatmul.mubr.bf16.vlgmr.msra.gmra.mxu1 %v6152_v38  ;;  %v14512_v38 = vld [vmem:[%s18223_s19 + $0x174] ss:$8 sps:$4 sm:$0xff]  }
 0x988   : > { %13210 = vmatpush3.bf16.msra.mxu0 %v14484_v37  ;;  %13625 = vmatpush3.bf16.msra.mxu1 %v14485_v50  ;;  %v6950_v37 = vld [vmem:[#allocation25] sm:$0x3]  ;;  %v7130_v50 = vld [vmem:[#allocation25 + $0x8] sm:$0x3] }
 0x989   : > { %13211 = vmatprep.subr.bf16.mxu0 %v14486_v13  ;;  %13626 = vmatprep.subr.bf16.mxu1 %v15836_v20  ;;  %v7040_v13 = vld [vmem:[#allocation25 + $0x4] sm:$0x3] }
 0x98a   : > { %13640 = vmatprep.mubr.msk.bf16.mxu1 %vm15837_vm1, %v15836_v20 }
 0x98c   : > { %13212 = vmatpush3.bf16.msra.mxu0 %v14487_v53  ;;  %13627 = vmatpush3.bf16.msra.mxu1 %v14488_v28  ;;  %v7310_v53 = vld [vmem:[#allocation25 + $0x10] sm:$0x3]  ;;  %v14510_v28 = vld [vmem:[%s18223_s19 + $0x170] ss:$8 sps:$4 sm:$0xff]  }
 0x98d   : > { %13628 = vmatprep.subr.bf16.mxu1 %v15836_v20  ;;  %13644 = vmatprep.subr.bf16.mxu0 %v15836_v20 }
 0x98f   : > { %6896 = vmatmul.mubr.bf16.vlgmr.msra.gmra.mxu0 %v6154_v27  ;;  %v14518_v27 = vld [vmem:[%s18223_s19 + $0x164] ss:$8 sps:$4 sm:$0xff]  }
 0x990   : > { %13629 = vmatpush3.bf16.msra.mxu1 %v14489_v57  ;;  %13646 = vmatprep.mubr.msk.bf16.mxu0 %vm15837_vm1, %v15836_v20  ;;  %v14516_v57 = vld [vmem:[%s18223_s19 + $0x160] ss:$8 sps:$4 sm:$0xff]  }
 0x991   : > { %13630 = vmatprep.subr.bf16.mxu1 %v15836_v20 }
 0x994   : > { %13631 = vmatpush3.bf16.msra.mxu1 %v14490_v56  ;;  %v14524_v56 = vld [vmem:[%s18223_s19 + $0x154] ss:$8 sps:$4 sm:$0xff]  }
 0x995   : > { %13632 = vmatprep.subr.bf16.mxu1 %v15836_v20 }
 0x998   : > { %13633 = vmatpush3.bf16.msra.mxu1 %v14491_v14  ;;  %v7085_v14 = vld [vmem:[#allocation25 + $0x6] sm:$0x3] }
 0x999   : > { %13634 = vmatprep.subr.bf16.mxu1 %v15836_v20 }
 0x99c   : > { %13635 = vmatpush3.bf16.msra.mxu1 %v14492_v30  ;;  %v14522_v30 = vld [vmem:[%s18223_s19 + $0x150] ss:$8 sps:$4 sm:$0xff]  }
 0x99d   : > { %13636 = vmatprep.subr.bf16.mxu1 %v15836_v20 }
 0x9a0   : > { %13637 = vmatpush3.bf16.msra.mxu1 %v14493_v7  ;;  %v14530_v7 = vld [vmem:[%s18223_s19 + $0x144] ss:$8 sps:$4 sm:$0xff]  }
 0x9a1   : > { %13638 = vmatprep.subr.bf16.mxu1 %v15836_v20 }
 0x9a4   : > { %13639 = vmatpush3.bf16.msra.mxu1 %v14494_v49  ;;  %v14528_v49 = vld [vmem:[%s18223_s19 + $0x140] ss:$8 sps:$4 sm:$0xff]  }
 0x9a5   : > { %13668 = vmatprep.subr.bf16.mxu1 %v15836_v20 }
 0x9a7   : > { %13641 = vmatmul.mubr.bf16.vlgmr.msra.gmra.mxu1 %v6156_v0  ;;  %v14536_v0 = vld [vmem:[%s18223_s19 + $0x134] ss:$8 sps:$4 sm:$0xff]  }
 0x9a8   : > { %13670 = vmatprep.mubr.msk.bf16.mxu1 %vm15837_vm1, %v15836_v20 }
 0xa27   : > { %v13147_v51 = vpop.f32.mrf.mxu1 }
 0xa29   : > { %v13148_v33 = vpop.f32.mrf.mxu1 }
 0xa2a   : > { %v13149_v8 = vadd.f32 %v13148_v33, %v13147_v51  ;;  %v7175_v51 = vld [vmem:[#allocation25 + $0xa] sm:$0x3]  ;;  %v14534_v33 = vld [vmem:[%s18223_s19 + $0x130] ss:$8 sps:$4 sm:$0xff]  }
 0xa2b   : > { %v13150_v40 = vpop.f32.mrf.mxu1 }
 0xa2c   : > { %v6775_v43 = vadd.f32 %v13149_v8, %v11835_v24  ;;  %v14552_v8 = vld [vmem:[%s18223_s19 + $0x100] ss:$8 sps:$4 sm:$0xff]  }
 0xa2d   : > { %v13151_v36 = vpop.f32.mrf.mxu1 }
 0xa2e   : > { %v13152_v1 = vadd.f32 %v13151_v36, %v13150_v40  ;;  %v14540_v40 = vld [vmem:[%s18223_s19 + $0x120] ss:$8 sps:$4 sm:$0xff]  }
 0xa2f   : > { %v13169_v3 = vpop.f32.mrf.mxu0  ;;  %v7265_v36 = vld [vmem:[#allocation25 + $0xe] sm:$0x3] }
 0xa30   : > { %v6778_v21 = vadd.f32 %v13152_v1, %v11835_v24  ;;  %v14560_v24 = vld [vmem:[%s18223_s19 + $0x1f4] ss:$8 sps:$4 sm:$0xff]   ;;  %v14504_v1 = vld [vmem:[%s18223_s19 + $0x40] ss:$8 sps:$4 sm:$0xff]  }
 0xa31   : > { %v13170_v62 = vpop.f32.mrf.mxu0 }
 0xa32   : > { %v13171_v15 = vadd.f32 %v13170_v62, %v13169_v3  ;;  %v14497_v3 = vld [vmem:[%s18223_s19 + $0x74] ss:$8 sps:$4 sm:$0xff]   ;;  %v14542_v62 = vld [vmem:[%s18223_s19 + $0x124] ss:$8 sps:$4 sm:$0xff]  }
 0xa33   : > { %v13172_v5 = vpop.f32.mrf.mxu0 }
 0xa34   : > { %v6816_v41 = vadd.f32 %v13171_v15, %v6775_v43  ;;  %v14506_v15 = vld [vmem:[%s18223_s19 + $0x44] ss:$8 sps:$4 sm:$0xff]  }
 0xa35   : > { %v13173_v25 = vpop.f32.mrf.mxu0  ;;  %v14566_v43 = vld [vmem:[%s18223_s19 + $0x1e4] ss:$8 sps:$4 sm:$0xff]  }
 0xa36   : > { %v13174_v58 = vadd.f32 %v13173_v25, %v13172_v5  ;;  %v14548_v5 = vld [vmem:[%s18223_s19 + $0x114] ss:$8 sps:$4 sm:$0xff]   ;;  %v14495_v25 = vld [vmem:[%s18223_s19 + $0x70] ss:$8 sps:$4 sm:$0xff]  }
 0xa38   : > { %v6819_v44 = vadd.f32 %v13174_v58, %v6778_v21  ;;  %v14515_v58 = vld [vmem:[%s18223_s19 + $0x24] ss:$8 sps:$4 sm:$0xff]   ;;  %v14519_v21 = vld [vmem:[%s18223_s19 + $0x10] ss:$8 sps:$4 sm:$0xff]  }
 0xa47   : > { %v13191_v54 = vpop.f32.mrf.mxu1 }
 0xa49   : > { %v13192_v32 = vpop.f32.mrf.mxu1 }
 0xa4a   : > { %v13193_v23 = vadd.f32 %v13192_v32, %v13191_v54  ;;  %v14546_v54 = vld [vmem:[%s18223_s19 + $0x110] ss:$8 sps:$4 sm:$0xff]   ;;  %v14498_v32 = vld [vmem:[%s18223_s19 + $0x60] ss:$8 sps:$4 sm:$0xff]  }
 0xa4b   : > { %v13194_v22 = vpop.f32.mrf.mxu1 }
 0xa4c   : > { %v6857_v19 = vadd.f32 %v13193_v23, %v6816_v41  ;;  %v14509_v23 = vld [vmem:[%s18223_s19 + $0x34] ss:$8 sps:$4 sm:$0xff]   ;;  %v14507_v41 = vld [vmem:[%s18223_s19 + $0x30] ss:$8 sps:$4 sm:$0xff]  }
 0xa4d   : > { %v13195_v9 = vpop.f32.mrf.mxu1 }
 0xa4e   : > { %v13196_v48 = vadd.f32 %v13195_v9, %v13194_v22  ;;  %v14501_v22 = vld [vmem:[%s18223_s19 + $0x50] ss:$8 sps:$4 sm:$0xff]   ;;  %v14564_v9 = vld [vmem:[%s18223_s19 + $0x1e0] ss:$8 sps:$4 sm:$0xff]  }
 0xa4f   : > { %v13213_v52 = vpop.f32.mrf.mxu0 }
 0xa50   : > { %v6860_v35 = vadd.f32 %v13196_v48, %v6819_v44  ;;  %v14525_v48 = vld [vmem:[%s18223_s19] ss:$8 sps:$4 sm:$0xff]   ;;  %v14533_v44 = vld [vmem:[%s18223_s19 + $0xf4] ss:$8 sps:$4 sm:$0xff]  }
 0xa51   : > { %v13214_v47 = vpop.f32.mrf.mxu0 }
 0xa52   : > { %v13215_v17 = vadd.f32 %v13214_v47, %v13213_v52  ;;  %v14554_v52 = vld [vmem:[%s18223_s19 + $0x104] ss:$8 sps:$4 sm:$0xff]   ;;  %v14503_v47 = vld [vmem:[%s18223_s19 + $0x54] ss:$8 sps:$4 sm:$0xff]  }
 0xa53   : > { %v13216_v63 = vpop.f32.mrf.mxu0 }
 0xa54   : > { %v6898_v4 = vadd.f32 %v13215_v17, %v6857_v19  ;;  %v14513_v17 = vld [vmem:[%s18223_s19 + $0x20] ss:$8 sps:$4 sm:$0xff]   ;;  %v14527_v19 = vld [vmem:[%s18223_s19 + $0x4] ss:$8 sps:$4 sm:$0xff]  }
 0xa55   : > { %v13217_v6 = vpop.f32.mrf.mxu0 }
 0xa56   : > { %v13218_v11 = vadd.f32 %v13217_v6, %v13216_v63  ;;  %v14558_v63 = vld [vmem:[%s18223_s19 + $0x1f0] ss:$8 sps:$4 sm:$0xff]   ;;  %v14521_v6 = vld [vmem:[%s18223_s19 + $0x14] ss:$8 sps:$4 sm:$0xff]  }
 0xa58   : > { %v6901_v2 = vadd.f32 %v13218_v11, %v6860_v35  ;;  %v14570_v11 = vld [vmem:[%s18223_s19 + $0x1d0] ss:$8 sps:$4 sm:$0xff]   ;;  %v14576_v35 = vld [vmem:[%s18223_s19 + $0x1c0] ss:$8 sps:$4 sm:$0xff]  }
 0xa67   : > { %v6938_v46 = vpop.f32.mrf.mxu1 }
 0xa68   : > { %v6939_v34 = vadd.f32 %v6938_v46, %v6898_v4  ;;  %v14572_v4 = vld [vmem:[%s18223_s19 + $0x1d4] ss:$8 sps:$4 sm:$0xff]   ;;  %v14539_v46 = vld [vmem:[%s18223_s19 + $0xe4] ss:$8 sps:$4 sm:$0xff]  }
 0xa69   : > { %v13642_v59 = vpop.f32.mrf.mxu1 }
 0xa6a   : > { %v6945_v29 = vadd.f32 %v6939_v34, %v5673_v39  ;;  %v14578_v34 = vld [vmem:[%s18223_s19 + $0x1c4] ss:$8 sps:$4 sm:$0xff]   ;;  %v14537_v59 = vld [vmem:[%s18223_s19 + $0xe0] ss:$8 sps:$4 sm:$0xff]   ;;  %v14545_v39 = vld [vmem:[%s18223_s19 + $0xd4] ss:$8 sps:$4 sm:$0xff]  }
 0xa6b   : > { %v6941_v55 = vpop.f32.mrf.mxu1 }
 0xa6c   : > { %v6942_v10 = vadd.f32 %v6941_v55, %v6901_v2  ;;  %v6947_v16 = vmax.f32 %v6945_v29, 0.0  ;;  %v14581_v2 = vld [vmem:[%s18223_s19 + $0x1b4] ss:$8 sps:$4 sm:$0xff]   ;;  %v14579_v55 = vld [vmem:[%s18223_s19 + $0x1b0] ss:$8 sps:$4 sm:$0xff]  }
 0xa6d   : > { %v13643_v61 = vpop.f32.mrf.mxu1  ;;  %v14551_v29 = vld [vmem:[%s18223_s19 + $0xc4] ss:$8 sps:$4 sm:$0xff]  }
 0xa6e   : > { %v6946_v45 = vadd.f32 %v6942_v10, %v5676_v12  ;;  %v14543_v12 = vld [vmem:[%s18223_s19 + $0xd0] ss:$8 sps:$4 sm:$0xff]   ;;  %v14585_v10 = vld [vmem:[%s18223_s19 + $0x1a0] ss:$8 sps:$4 sm:$0xff]   ;;  %v14587_v61 = vld [vmem:[%s18223_s19 + $0x1a4] ss:$8 sps:$4 sm:$0xff]  }
 0xa70   : > { %v6948_v18 = vmax.f32 %v6946_v45, 0.0  ;;  %v14549_v45 = vld [vmem:[%s18223_s19 + $0xc0] ss:$8 sps:$4 sm:$0xff]  }
 0xa72   : > { %v6949_v42 = vpack.c.bf16 %v6948_v18, %v6947_v16  ;;  %v14557_v16 = vld [vmem:[%s18223_s19 + $0xb4] ss:$8 sps:$4 sm:$0xff]   ;;  %v14591_v18 = vld [vmem:[%s18223_s19 + $0x190] ss:$8 sps:$4 sm:$0xff]  }
 0xa74   : > { %13645 = vmatpush3.bf16.msra.mxu0 %v6949_v42  ;;  %13669 = vmatpush3.bf16.msra.mxu1 %v6949_v42 }
 0xa75   : > { %13650 = vmatprep.subr.bf16.mxu0 %v15836_v20  ;;  %13680 = vmatprep.subr.bf16.mxu1 %v15836_v20 }
 0xa77   : > { %13647 = vmatmul.mubr.msk.bf16.vlgmr.msra.gmra.mxu0 %vm5687_vm2, %v6950_v37  ;;  %13671 = vmatmul.mubr.msk.bf16.vlgmr.msra.gmra.mxu1 %vm5687_vm2, %v7130_v50  ;;  %v14555_v37 = vld [vmem:[%s18223_s19 + $0xb0] ss:$8 sps:$4 sm:$0xff]   ;;  %v14563_v50 = vld [vmem:[%s18223_s19 + $0xa4] ss:$8 sps:$4 sm:$0xff]  }
 0xa78   : > { %13651 = vmatpush3.bf16.msra.mxu0 %v6949_v42  ;;  %13681 = vmatpush3.bf16.msra.mxu1 %v6949_v42 }
 0xa79   : > { %13652 = vmatprep.mubr.msk.bf16.mxu0 %vm15837_vm1, %v15836_v20  ;;  %13656 = vmatprep.subr.bf16.mxu0 %v15836_v20 }
 0xa7a   : > { %13682 = vmatprep.mubr.msk.bf16.mxu1 %vm15837_vm1, %v15836_v20  ;;  %13692 = vmatprep.subr.bf16.mxu1 %v15836_v20 }
 0xa7f   : > { %13653 = vmatmul.mubr.msk.bf16.vlgmr.msra.gmra.mxu0 %vm5687_vm2, %v6995_v31  ;;  %13683 = vmatmul.mubr.msk.bf16.vlgmr.msra.gmra.mxu1 %vm5687_vm2, %v7220_v60  ;;  %v14597_v31 = vld [vmem:[%s18223_s19 + $0x180] ss:$8 sps:$4 sm:$0xff]   ;;  %v14599_v60 = vld [vmem:[%s18223_s19 + $0x184] ss:$8 sps:$4 sm:$0xff]  }
 0xa80   : > { %13657 = vmatpush3.bf16.msra.mxu0 %v6949_v42  ;;  %13693 = vmatpush3.bf16.msra.mxu1 %v6949_v42 }
 0xa81   : > { %13658 = vmatprep.mubr.msk.bf16.mxu0 %vm15837_vm1, %v15836_v20  ;;  %13662 = vmatprep.subr.bf16.mxu0 %v15836_v20 }
 0xa82   : > { %13694 = vmatprep.mubr.msk.bf16.mxu1 %vm15837_vm1, %v15836_v20  ;;  %8280 = vmatprep.subr.bf16.mxu1 %v14512_v38  ;;  %v14561_v38 = vld [vmem:[%s18223_s19 + $0xa0] ss:$8 sps:$4 sm:$0xff]  }
 0xa87   : > { %13659 = vmatmul.mubr.msk.bf16.vlgmr.msra.gmra.mxu0 %vm5687_vm2, %v7040_v13  ;;  %13695 = vmatmul.mubr.msk.bf16.vlgmr.msra.gmra.mxu1 %vm5687_vm2, %v7310_v53  ;;  %v14569_v13 = vld [vmem:[%s18223_s19 + $0x94] ss:$8 sps:$4 sm:$0xff]  }
 0xa88   : > { %13663 = vmatpush3.bf16.msra.mxu0 %v6949_v42  ;;  %13664 = vmatprep.mubr.msk.bf16.mxu0 %vm15837_vm1, %v15836_v20  ;;  %v14608_v53 = vld [vmem:[%s18223_s19 + $0x374] ss:$8 sps:$4 sm:$0xff]  }
 0xa89   : > { %13674 = vmatprep.subr.bf16.mxu0 %v15836_v20  ;;  %8281 = vmatpush1.bf16.msra.mxu1 %v14510_v28  ;;  %v14567_v28 = vld [vmem:[%s18223_s19 + $0x90] ss:$8 sps:$4 sm:$0xff]  }
 0xa8a   : > { %8282 = vmatprep.subr.bf16.mxu1 %v14518_v27  ;;  %v14575_v27 = vld [vmem:[%s18223_s19 + $0x84] ss:$8 sps:$4 sm:$0xff]  }
 0xa8d   : > { %8283 = vmatpush1.bf16.msra.mxu1 %v14516_v57  ;;  %v14573_v57 = vld [vmem:[%s18223_s19 + $0x80] ss:$8 sps:$4 sm:$0xff]  }
 0xa8e   : > { %8284 = vmatprep.subr.bf16.mxu1 %v14524_v56  ;;  %v14584_v56 = vld [vmem:[%s18223_s19 + $0x274] ss:$8 sps:$4 sm:$0xff]  }
 0xa8f   : > { %13665 = vmatmul.mubr.msk.bf16.vlgmr.msra.gmra.mxu0 %vm5687_vm2, %v7085_v14 }
 0xa90   : > { %13675 = vmatpush3.bf16.msra.mxu0 %v6949_v42  ;;  %13676 = vmatprep.mubr.msk.bf16.mxu0 %vm15837_vm1, %v15836_v20 }
 0xa91   : > { %13686 = vmatprep.subr.bf16.mxu0 %v15836_v20  ;;  %8285 = vmatpush1.bf16.msra.mxu1 %v14522_v30 }
 0xa92   : > { %8286 = vmatprep.subr.bf16.mxu1 %v14530_v7 }
 0xa95   : > { %8287 = vmatpush1.bf16.msra.mxu1 %v14528_v49 }
 0xa96   : > { %8288 = vmatprep.subr.bf16.mxu1 %v14536_v0 }
 0xa97   : > { %13677 = vmatmul.mubr.msk.bf16.vlgmr.msra.gmra.mxu0 %vm5687_vm2, %v7175_v51 }
 0xa98   : > { %13687 = vmatpush3.bf16.msra.mxu0 %v6949_v42  ;;  %13688 = vmatprep.mubr.msk.bf16.mxu0 %vm15837_vm1, %v15836_v20  ;;  %v14500_v20 = vld [vmem:[%s18223_s19 + $0x64] ss:$8 sps:$4 sm:$0xff]   ;;  %v14593_v42 = vld [vmem:[%s18223_s19 + $0x194] ss:$8 sps:$4 sm:$0xff]  }
 0xa99   : > { %8239 = vmatprep.subr.bf16.mxu0 %v14497_v3  ;;  %8289 = vmatpush1.bf16.msra.mxu1 %v14534_v33 }
 0xa9a   : > { %8290 = vmatprep.subr.bf16.mxu1 %v14542_v62 }
 0xa9d   : > { %8291 = vmatpush1.bf16.msra.mxu1 %v14540_v40 }
 0xa9e   : > { %8292 = vmatprep.subr.bf16.mxu1 %v14548_v5 }
 0xa9f   : > { %13689 = vmatmul.mubr.msk.bf16.vlgmr.msra.gmra.mxu0 %vm5687_vm2, %v7265_v36  ;;  %v14582_v36 = vld [vmem:[%s18223_s19 + $0x270] ss:$8 sps:$4 sm:$0xff]  }
 0xaa0   : > { %8240 = vmatpush1.bf16.msra.mxu0 %v14495_v25 }
 0xaa1   : > { %8241 = vmatprep.subr.bf16.mxu0 %v14500_v20  ;;  %8293 = vmatpush1.bf16.msra.mxu1 %v14546_v54  ;;  %v14590_v54 = vld [vmem:[%s18223_s19 + $0x264] ss:$8 sps:$4 sm:$0xff]  }
 0xaa2   : > { %8294 = vmatprep.subr.bf16.mxu1 %v14554_v52 }
 0xaa4   : > { %8242 = vmatpush1.bf16.msra.mxu0 %v14498_v32 }
 0xaa5   : > { %8243 = vmatprep.subr.bf16.mxu0 %v14503_v47  ;;  %8295 = vmatpush1.bf16.msra.mxu1 %v14552_v8  ;;  %v14588_v8 = vld [vmem:[%s18223_s19 + $0x260] ss:$8 sps:$4 sm:$0xff]  }
 0xaa6   : > { %8296 = vmatprep.subr.bf16.mxu1 %v14560_v24 }
 0xaa8   : > { %8244 = vmatpush1.bf16.msra.mxu0 %v14501_v22  ;;  %v14596_v22 = vld [vmem:[%s18223_s19 + $0x254] ss:$8 sps:$4 sm:$0xff]  }
 0xaa9   : > { %8245 = vmatprep.subr.bf16.mxu0 %v14506_v15  ;;  %8297 = vmatpush2.bf16.msra.mxu1 %v14558_v63 }
 0xaaa   : > { %8298 = vmatprep.subr.bf16.mxu1 %v14566_v43 }
 0xaac   : > { %8246 = vmatpush1.bf16.msra.mxu0 %v14504_v1  ;;  %v14594_v1 = vld [vmem:[%s18223_s19 + $0x250] ss:$8 sps:$4 sm:$0xff]  }
 0xaad   : > { %8247 = vmatprep.subr.bf16.mxu0 %v14509_v23  ;;  %8299 = vmatpush2.bf16.msra.mxu1 %v14564_v9  ;;  %v14602_v9 = vld [vmem:[%s18223_s19 + $0x244] ss:$8 sps:$4 sm:$0xff]  }
 0xaae   : > { %8300 = vmatprep.subr.bf16.mxu1 %v14572_v4 }
 0xab0   : > { %8248 = vmatpush1.bf16.msra.mxu0 %v14507_v41 }
 0xab1   : > { %8249 = vmatprep.subr.bf16.mxu0 %v14515_v58  ;;  %8301 = vmatpush2.bf16.msra.mxu1 %v14570_v11 }
 0xab2   : > { %8302 = vmatprep.subr.bf16.mxu1 %v14578_v34  ;;  %v14614_v34 = vld [vmem:[%s18223_s19 + $0x364] ss:$8 sps:$4 sm:$0xff]  }
 0xab4   : > { %8250 = vmatpush1.bf16.msra.mxu0 %v14513_v17 }
 0xab5   : > { %8251 = vmatprep.subr.bf16.mxu0 %v14521_v6  ;;  %8303 = vmatpush2.bf16.msra.mxu1 %v14576_v35  ;;  %v14600_v6 = vld [vmem:[%s18223_s19 + $0x240] ss:$8 sps:$4 sm:$0xff]   ;;  %v14611_v35 = vld [vmem:[%s18223_s19 + $0x224] ss:$8 sps:$4 sm:$0xff]  }
 0xab6   : > { %8304 = vmatprep.subr.bf16.mxu1 %v14581_v2  ;;  %v14609_v2 = vld [vmem:[%s18223_s19 + $0x220] ss:$8 sps:$4 sm:$0xff]  }
 0xab8   : > { %8252 = vmatpush1.bf16.msra.mxu0 %v14519_v21 }
 0xab9   : > { %8253 = vmatprep.subr.bf16.mxu0 %v14527_v19  ;;  %8305 = vmatpush2.bf16.msra.mxu1 %v14579_v55  ;;  %v14605_v19 = vld [vmem:[%s18223_s19 + $0x234] ss:$8 sps:$4 sm:$0xff]   ;;  %v14612_v55 = vld [vmem:[%s18223_s19 + $0x360] ss:$8 sps:$4 sm:$0xff]  }
 0xaba   : > { %8306 = vmatprep.subr.bf16.mxu1 %v14587_v61 }
 0xabc   : > { %8254 = vmatpush1.bf16.msra.mxu0 %v14525_v48 }
 0xabd   : > { %8255 = vmatprep.subr.bf16.mxu0 %v14533_v44  ;;  %8307 = vmatpush2.bf16.msra.mxu1 %v14585_v10 }
 0xabe   : > { %8308 = vmatprep.subr.bf16.mxu1 %v14593_v42  ;;  %v14623_v42 = vld [vmem:[%s18223_s19 + $0x204] ss:$8 sps:$4 sm:$0xff]  }
 0xac0   : > { %8256 = vmatpush2.bf16.msra.mxu0 %v14531_v26  ;;  %v14603_v26 = vld [vmem:[%s18223_s19 + $0x230] ss:$8 sps:$4 sm:$0xff]  }
 0xac1   : > { %8257 = vmatprep.subr.bf16.mxu0 %v14539_v46  ;;  %8309 = vmatpush2.bf16.msra.mxu1 %v14591_v18  ;;  %v14606_v46 = vld [vmem:[%s18223_s19 + $0x370] ss:$8 sps:$4 sm:$0xff]  }
 0xac2   : > { %8310 = vmatprep.subr.bf16.mxu1 %v14599_v60  ;;  %v14621_v60 = vld [vmem:[%s18223_s19 + $0x200] ss:$8 sps:$4 sm:$0xff]  }
 0xac4   : > { %8258 = vmatpush2.bf16.msra.mxu0 %v14537_v59 }
 0xac5   : > { %8259 = vmatprep.subr.bf16.mxu0 %v14545_v39  ;;  %8311 = vmatpush2.bf16.msra.mxu1 %v14597_v31 }
 0xac6   : > { %8362 = vmatprep.subr.bf16.mxu1 %v14608_v53  ;;  %v14632_v53 = vld [vmem:[%s18223_s19 + $0x334] ss:$8 sps:$4 sm:$0xff]  }
 0xac8   : > { %8260 = vmatpush2.bf16.msra.mxu0 %v14543_v12  ;;  %v14617_v12 = vld [vmem:[%s18223_s19 + $0x214] ss:$8 sps:$4 sm:$0xff]  }
 0xac9   : > { %8261 = vmatprep.subr.bf16.mxu0 %v14551_v29  ;;  %v14620_v29 = vld [vmem:[%s18223_s19 + $0x354] ss:$8 sps:$4 sm:$0xff]  }
 0xacc   : > { %8262 = vmatpush2.bf16.msra.mxu0 %v14549_v45  ;;  %v14615_v45 = vld [vmem:[%s18223_s19 + $0x210] ss:$8 sps:$4 sm:$0xff]  }
 0xacd   : > { %8263 = vmatprep.subr.bf16.mxu0 %v14557_v16  ;;  %v14618_v16 = vld [vmem:[%s18223_s19 + $0x350] ss:$8 sps:$4 sm:$0xff]  }
 0xad0   : > { %8264 = vmatpush2.bf16.msra.mxu0 %v14555_v37  ;;  %v14626_v37 = vld [vmem:[%s18223_s19 + $0x344] ss:$8 sps:$4 sm:$0xff]  }
 0xad1   : > { %8265 = vmatprep.subr.bf16.mxu0 %v14563_v50 }
 0xad4   : > { %8266 = vmatpush2.bf16.msra.mxu0 %v14561_v38  ;;  %v14624_v38 = vld [vmem:[%s18223_s19 + $0x340] ss:$8 sps:$4 sm:$0xff]  }
 0xad5   : > { %8267 = vmatprep.subr.bf16.mxu0 %v14569_v13  ;;  %v14629_v13 = vld [vmem:[%s18223_s19 + $0x2f4] ss:$8 sps:$4 sm:$0xff]  }
 0xad8   : > { %8268 = vmatpush2.bf16.msra.mxu0 %v14567_v28 }
 0xad9   : > { %8269 = vmatprep.subr.bf16.mxu0 %v14575_v27 }
 0xadc   : > { %8270 = vmatpush2.bf16.msra.mxu0 %v14573_v57  ;;  %v14627_v57 = vld [vmem:[%s18223_s19 + $0x2f0] ss:$8 sps:$4 sm:$0xff]  }
 0xadd   : > { %8321 = vmatprep.subr.bf16.mxu0 %v14584_v56  ;;  %v14630_v56 = vld [vmem:[%s18223_s19 + $0x330] ss:$8 sps:$4 sm:$0xff]  }
 0xb37   : > { %v6988_v14 = vpop.f32.mrf.mxu0  ;;  %v17786_v30 = vpop.f32.mrf.mxu1 }
 0xb38   : > { %v7354_v25 = vpack.c.bf16 %v6988_v14, %v6988_v14 }
 0xb39   : > { %v13648_v7 = vpop.f32.mrf.mxu0  ;;  %v13672_v49 = vpop.f32.mrf.mxu1 }
 0xb3a   : > { %v14635_v7 = vld [vmem:[%s18223_s19 + $0x2e4] ss:$8 sps:$4 sm:$0xff]  }
 0xb3b   : > { %v6991_v0 = vpop.f32.mrf.mxu0  ;;  %v7171_v51 = vpop.f32.mrf.mxu1  ;;  %v14638_v49 = vld [vmem:[%s18223_s19 + $0x324] ss:$8 sps:$4 sm:$0xff]  }
 0xb3d   : > { %v13649_v3 = vpop.f32.mrf.mxu0  ;;  %v13673_v33 = vpop.f32.mrf.mxu1 }
 0xb3e   : > { %v14633_v3 = vld [vmem:[%s18223_s19 + $0x2e0] ss:$8 sps:$4 sm:$0xff]  }
 0xb3f   : > { %v7033_v62 = vpop.f32.mrf.mxu0  ;;  %v17788_v40 = vpop.f32.mrf.mxu1  ;;  %v14636_v33 = vld [vmem:[%s18223_s19 + $0x320] ss:$8 sps:$4 sm:$0xff]  }
 0xb40   : > { %v7355_v5 = vpack.c.bf16 %v7033_v62, %v7033_v62  ;;  %v14641_v62 = vld [vmem:[%s18223_s19 + $0x2d4] ss:$8 sps:$4 sm:$0xff]  }
 0xb41   : > { %v13654_v20 = vpop.f32.mrf.mxu0  ;;  %v13684_v52 = vpop.f32.mrf.mxu1 }
 0xb42   : > { %8271 = vmatprep.mubr.bf16.mxu0 %v7355_v5  ;;  %v14644_v5 = vld [vmem:[%s18223_s19 + $0x314] ss:$8 sps:$4 sm:$0xff]   ;;  %v14642_v20 = vld [vmem:[%s18223_s19 + $0x310] ss:$8 sps:$4 sm:$0xff]   ;;  %v14650_v52 = vld [vmem:[%s18223_s19 + $0x304] ss:$8 sps:$4 sm:$0xff]  }
 0xb43   : > { %v7036_v32 = vpop.f32.mrf.mxu0  ;;  %8272 = vmatmul.mubr.bf16.vlgmr.msra.gmra.mxu0 %v7354_v25  ;;  %v7261_v47 = vpop.f32.mrf.mxu1  ;;  %v14639_v25 = vld [vmem:[%s18223_s19 + $0x2d0] ss:$8 sps:$4 sm:$0xff]  }
 0xb44   : > { %8322 = vmatpush1.bf16.msra.mxu0 %v14582_v36  ;;  %v14645_v32 = vld [vmem:[%s18223_s19 + $0x2c0] ss:$8 sps:$4 sm:$0xff]  }
 0xb45   : > { %v13655_v24 = vpop.f32.mrf.mxu0  ;;  %8323 = vmatprep.subr.bf16.mxu0 %v14590_v54  ;;  %v13685_v15 = vpop.f32.mrf.mxu1  ;;  %v14647_v54 = vld [vmem:[%s18223_s19 + $0x2c4] ss:$8 sps:$4 sm:$0xff]   ;;  %v14648_v47 = vld [vmem:[%s18223_s19 + $0x300] ss:$8 sps:$4 sm:$0xff]  }
 0xb46   : > { %v14656_v24 = vld [vmem:[%s18223_s19 + $0x3f4] ss:$8 sps:$4 sm:$0xff]   ;;  %v14654_v15 = vld [vmem:[%s18223_s19 + $0x3f0] ss:$8 sps:$4 sm:$0xff]  }
 0xb47   : > { %v7078_v63 = vpop.f32.mrf.mxu0  ;;  %v17802_v43 = vpop.f32.mrf.mxu1 }
 0xb48   : > { %8324 = vmatpush1.bf16.msra.mxu0 %v14588_v8  ;;  %v7356_v44 = vpack.c.bf16 %v7078_v63, %v7078_v63  ;;  %v14653_v8 = vld [vmem:[%s18223_s19 + $0x2b4] ss:$8 sps:$4 sm:$0xff]   ;;  %v14659_v63 = vld [vmem:[%s18223_s19 + $0x2a4] ss:$8 sps:$4 sm:$0xff]  }
 0xb49   : > { %v13660_v23 = vpop.f32.mrf.mxu0  ;;  %8325 = vmatprep.subr.bf16.mxu0 %v14596_v22  ;;  %v13696_v41 = vpop.f32.mrf.mxu1  ;;  %v14651_v22 = vld [vmem:[%s18223_s19 + $0x2b0] ss:$8 sps:$4 sm:$0xff]  }
 0xb4a   : > { %v14657_v23 = vld [vmem:[%s18223_s19 + $0x2a0] ss:$8 sps:$4 sm:$0xff]   ;;  %v14665_v41 = vld [vmem:[%s18223_s19 + $0x294] ss:$8 sps:$4 sm:$0xff]  }
 0xb4b   : > { %v7081_v58 = vpop.f32.mrf.mxu0  ;;  %v7351_v17 = vpop.f32.mrf.mxu1 }
 0xb4c   : > { %8326 = vmatpush1.bf16.msra.mxu0 %v14594_v1  ;;  %v14662_v1 = vld [vmem:[%s18223_s19 + $0x3e4] ss:$8 sps:$4 sm:$0xff]   ;;  %v14668_v58 = vld [vmem:[%s18223_s19 + $0x3d4] ss:$8 sps:$4 sm:$0xff]   ;;  %v14663_v17 = vld [vmem:[%s18223_s19 + $0x290] ss:$8 sps:$4 sm:$0xff]  }
 0xb4d   : > { %v13661_v21 = vpop.f32.mrf.mxu0  ;;  %8327 = vmatprep.subr.bf16.mxu0 %v14602_v9  ;;  %v13697_v48 = vpop.f32.mrf.mxu1  ;;  %v14660_v9 = vld [vmem:[%s18223_s19 + $0x3e0] ss:$8 sps:$4 sm:$0xff]  }
 0xb4e   : > { %v14671_v21 = vld [vmem:[%s18223_s19 + $0x284] ss:$8 sps:$4 sm:$0xff]   ;;  %v14669_v48 = vld [vmem:[%s18223_s19 + $0x280] ss:$8 sps:$4 sm:$0xff]  }
 0xb4f   : > { %v7123_v11 = vpop.f32.mrf.mxu0 }
 0xb50   : > { %v7357_v4 = vpack.c.bf16 %v7123_v11, %v7123_v11  ;;  %8328 = vmatpush1.bf16.msra.mxu0 %v14600_v6  ;;  %v14666_v6 = vld [vmem:[%s18223_s19 + $0x3d0] ss:$8 sps:$4 sm:$0xff]   ;;  %v14677_v11 = vld [vmem:[%s18223_s19 + $0x3b4] ss:$8 sps:$4 sm:$0xff]  }
 0xb51   : > { %8329 = vmatprep.subr.bf16.mxu0 %v14605_v19  ;;  %v13666_v59 = vpop.f32.mrf.mxu0  ;;  %v14674_v19 = vld [vmem:[%s18223_s19 + $0x3c4] ss:$8 sps:$4 sm:$0xff]  }
 0xb52   : > { %8312 = vmatprep.mubr.bf16.mxu1 %v7357_v4  ;;  %v14680_v4 = vld [vmem:[%s18223_s19 + $0x474] ss:$8 sps:$4 sm:$0xff]   ;;  %v14681_v59 = vld [vmem:[%s18223_s19 + $0x3a0] ss:$8 sps:$4 sm:$0xff]  }
 0xb53   : > { %8313 = vmatmul.mubr.bf16.vlgmr.msra.gmra.mxu1 %v7356_v44  ;;  %v7126_v39 = vpop.f32.mrf.mxu0  ;;  %v14672_v44 = vld [vmem:[%s18223_s19 + $0x3c0] ss:$8 sps:$4 sm:$0xff]  }
 0xb54   : > { %8330 = vmatpush1.bf16.msra.mxu0 %v14603_v26  ;;  %8363 = vmatpush1.bf16.msra.mxu1 %v14606_v46  ;;  %v17962_v26 = vpack.c.bf16 %v17786_v30, %v17786_v30  ;;  %v14675_v46 = vld [vmem:[%s18223_s19 + $0x3b0] ss:$8 sps:$4 sm:$0xff]   ;;  %v14686_v30 = vld [vmem:[%s18223_s19 + $0x464] ss:$8 sps:$4 sm:$0xff]   ;;  %v14684_v39 = vld [vmem:[%s18223_s19 + $0x460] ss:$8 sps:$4 sm:$0xff]  }
 0xb55   : > { %8331 = vmatprep.subr.bf16.mxu0 %v14611_v35  ;;  %8364 = vmatprep.subr.bf16.mxu1 %v14614_v34  ;;  %v13667_v10 = vpop.f32.mrf.mxu0  ;;  %v14678_v35 = vld [vmem:[%s18223_s19 + $0x470] ss:$8 sps:$4 sm:$0xff]   ;;  %v14683_v34 = vld [vmem:[%s18223_s19 + $0x3a4] ss:$8 sps:$4 sm:$0xff]  }
 0xb56   : > { %v14690_v10 = vld [vmem:[%s18223_s19 + $0x450] ss:$8 sps:$4 sm:$0xff]  }
 0xb57   : > { %v7213_v61 = vpop.f32.mrf.mxu0 }
 0xb58   : > { %8332 = vmatpush1.bf16.msra.mxu0 %v14609_v2  ;;  %8365 = vmatpush1.bf16.msra.mxu1 %v14612_v55  ;;  %v7359_v18 = vpack.c.bf16 %v7213_v61, %v7213_v61  ;;  %v14689_v2 = vld [vmem:[%s18223_s19 + $0x394] ss:$8 sps:$4 sm:$0xff]   ;;  %v14695_v61 = vld [vmem:[%s18223_s19 + $0x384] ss:$8 sps:$4 sm:$0xff]  }
 0xb59   : > { %8333 = vmatprep.subr.bf16.mxu0 %v14617_v12  ;;  %8366 = vmatprep.subr.bf16.mxu1 %v14620_v29  ;;  %v13678_v50 = vpop.f32.mrf.mxu0  ;;  %v14692_v55 = vld [vmem:[%s18223_s19 + $0x454] ss:$8 sps:$4 sm:$0xff]   ;;  %v15838_v12 = vmov 0   ;;  %v14687_v29 = vld [vmem:[%s18223_s19 + $0x390] ss:$8 sps:$4 sm:$0xff]  }
 0xb5a   : > { %8353 = vmatprep.mubr.bf16.mxu0 %v7359_v18  ;;  %v14696_v18 = vld [vmem:[%s18223_s19 + $0x440] ss:$8 sps:$4 sm:$0xff]   ;;  %v7360_v50 = vpack.c.bf16 %v17788_v40, %v17788_v40 }
 0xb5b   : > { %v7216_v31 = vpop.f32.mrf.mxu0  ;;  %v14705_v40 = vld [vmem:[%s18223_s19 + $0x420] ss:$8 sps:$4 sm:$0xff]  }
 0xb5c   : > { %8334 = vmatpush1.bf16.msra.mxu0 %v14615_v45  ;;  %8367 = vmatpush1.bf16.msra.mxu1 %v14618_v16  ;;  %v14698_v45 = vld [vmem:[%s18223_s19 + $0x444] ss:$8 sps:$4 sm:$0xff]   ;;  %v14693_v16 = vld [vmem:[%s18223_s19 + $0x380] ss:$8 sps:$4 sm:$0xff]   ;;  %v14699_v31 = vld [vmem:[%s18223_s19 + $0x430] ss:$8 sps:$4 sm:$0xff]  }
 0xb5d   : > { %8335 = vmatprep.subr.bf16.mxu0 %v14623_v42  ;;  %8368 = vmatprep.subr.bf16.mxu1 %v14626_v37  ;;  %v13679_v28 = vpop.f32.mrf.mxu0  ;;  %v14701_v42 = vld [vmem:[%s18223_s19 + $0x434] ss:$8 sps:$4 sm:$0xff]   ;;  %v14704_v37 = vld [vmem:[#allocation28 + $0x74] ss:$8 sps:$4 sm:$0xff]  }
 0xb5e   : > { %v14713_v28 = vld [vmem:[%s18223_s19 + $0x414] ss:$8 sps:$4 sm:$0xff]  }
 0xb5f   : > { %v7303_v27 = vpop.f32.mrf.mxu0 }
 0xb60   : > { %8336 = vmatpush1.bf16.msra.mxu0 %v14621_v60  ;;  %8369 = vmatpush1.bf16.msra.mxu1 %v14624_v38  ;;  %v7361_v14 = vpack.c.bf16 %v7303_v27, %v7303_v27  ;;  %v14702_v60 = vld [vmem:[#allocation28 + $0x70] ss:$8 sps:$4 sm:$0xff]   ;;  %v14716_v27 = vld [vmem:[#allocation28 + $0x54] ss:$8 sps:$4 sm:$0xff]  }
 0xb61   : > { %8337 = vmatprep.subr.bf16.mxu0 %v14629_v13  ;;  %8370 = vmatprep.subr.bf16.mxu1 %v14632_v53  ;;  %v13690_v0 = vpop.f32.mrf.mxu0  ;;  %v14707_v38 = vld [vmem:[%s18223_s19 + $0x424] ss:$8 sps:$4 sm:$0xff]   ;;  %v14710_v13 = vld [vmem:[#allocation28 + $0x64] ss:$8 sps:$4 sm:$0xff]  }
 0xb62   : > { %8394 = vmatprep.mubr.bf16.mxu1 %v7361_v14  ;;  %v14708_v53 = vld [vmem:[#allocation28 + $0x60] ss:$8 sps:$4 sm:$0xff]  }
 0xb63   : > { %v7306_v51 = vpop.f32.mrf.mxu0  ;;  %v14719_v14 = vld [vmem:[%s18223_s19 + $0x404] ss:$8 sps:$4 sm:$0xff]  }
 0xb64   : > { %8338 = vmatpush2.bf16.msra.mxu0 %v14627_v57  ;;  %8371 = vmatpush1.bf16.msra.mxu1 %v14630_v56  ;;  %v14711_v57 = vld [vmem:[%s18223_s19 + $0x410] ss:$8 sps:$4 sm:$0xff]   ;;  %v14714_v56 = vld [vmem:[#allocation28 + $0x50] ss:$8 sps:$4 sm:$0xff]   ;;  %v14725_v51 = vld [vmem:[#allocation28 + $0x34] ss:$8 sps:$4 sm:$0xff]  }
 0xb65   : > { %8339 = vmatprep.subr.bf16.mxu0 %v14635_v7  ;;  %8372 = vmatprep.subr.bf16.mxu1 %v14638_v49  ;;  %v13691_v36 = vpop.f32.mrf.mxu0  ;;  %v14722_v7 = vld [vmem:[#allocation28 + $0x44] ss:$8 sps:$4 sm:$0xff]   ;;  %v14717_v49 = vld [vmem:[%s18223_s19 + $0x400] ss:$8 sps:$4 sm:$0xff]   ;;  %v14720_v0 = vld [vmem:[#allocation28 + $0x40] ss:$8 sps:$4 sm:$0xff]  }
 0xb66   : > { %v14731_v36 = vld [vmem:[#allocation28 + $0x14] ss:$8 sps:$4 sm:$0xff]  }
 0xb68   : > { %8340 = vmatpush2.bf16.msra.mxu0 %v14633_v3  ;;  %8373 = vmatpush1.bf16.msra.mxu1 %v14636_v33  ;;  %v7362_v3 = vpack.c.bf16 %v17802_v43, %v17802_v43  ;;  %v14723_v33 = vld [vmem:[#allocation28 + $0x30] ss:$8 sps:$4 sm:$0xff]   ;;  %v7509_v43 = vlaneseq }
 0xb69   : > { %8341 = vmatprep.subr.bf16.mxu0 %v14641_v62  ;;  %8374 = vmatprep.subr.bf16.mxu1 %v14644_v5  ;;  %v14728_v62 = vld [vmem:[#allocation28 + $0x24] ss:$8 sps:$4 sm:$0xff]   ;;  %v14726_v5 = vld [vmem:[#allocation28 + $0x20] ss:$8 sps:$4 sm:$0xff]  }
 0xb6a   : > { %vm11187_vm6 = vcmp.lt.s32.totalorder %v7509_v43, 256 }
 0xb6c   : > { %8342 = vmatpush2.bf16.msra.mxu0 %v14639_v25  ;;  %8375 = vmatpush1.bf16.msra.mxu1 %v14642_v20  ;;  %v14729_v25 = vld [vmem:[#allocation28 + $0x10] ss:$8 sps:$4 sm:$0xff]   ;;  %v14734_v20 = vld [vmem:[#allocation28 + $0x4] ss:$8 sps:$4 sm:$0xff]  }
 0xb6d   : > { %8343 = vmatprep.subr.bf16.mxu0 %v14647_v54  ;;  %8376 = vmatprep.subr.bf16.mxu1 %v14650_v52  ;;  %v14732_v54 = vld [vmem:[#allocation28] ss:$8 sps:$4 sm:$0xff]  }
 0xb70   : > { %8344 = vmatpush2.bf16.msra.mxu0 %v14645_v32  ;;  %8377 = vmatpush1.bf16.msra.mxu1 %v14648_v47  ;;  %v18041_v47 = vshrl.u32 %v7509_v43, 7 }
 0xb71   : > { %8345 = vmatprep.subr.bf16.mxu0 %v14653_v8  ;;  %8378 = vmatprep.subr.bf16.mxu1 %v14656_v24 }
 0xb74   : > { %8346 = vmatpush2.bf16.msra.mxu0 %v14651_v22  ;;  %8379 = vmatpush2.bf16.msra.mxu1 %v14654_v15  ;;  %v18044_v22 = vsub.s32 0, %v18041_v47  ;;  %v7507_v15 = vld [vmem:[#allocation29] sm:$0x3] }
 0xb75   : > { %8347 = vmatprep.subr.bf16.mxu0 %v14659_v63  ;;  %8380 = vmatprep.subr.bf16.mxu1 %v14662_v1  ;;  %v18047_v63 = vsub.s32 1, %v18041_v47 }
 0xb76   : > { %v7512_v1 = vrot.slane %v7507_v15, %v18044_v22 }
 0xb78   : > { %8348 = vmatpush2.bf16.msra.mxu0 %v14657_v23  ;;  %8381 = vmatpush2.bf16.msra.mxu1 %v14660_v9  ;;  %v7516_v23 = vrot.slane %v7507_v15, %v18047_v63  ;;  %v14761_v15 = vld [vmem:[#allocation26 + $0x34] ss:$8 sps:$4 sm:$0xff]  }
 0xb79   : > { %8349 = vmatprep.subr.bf16.mxu0 %v14665_v41  ;;  %8382 = vmatprep.subr.bf16.mxu1 %v14668_v58 }
 0xb7c   : > { %8350 = vmatpush2.bf16.msra.mxu0 %v14663_v17  ;;  %8383 = vmatpush2.bf16.msra.mxu1 %v14666_v6 }
 0xb7d   : > { %8351 = vmatprep.subr.bf16.mxu0 %v14671_v21  ;;  %8384 = vmatprep.subr.bf16.mxu1 %v14674_v19 }
 0xb80   : > { %8352 = vmatpush2.bf16.msra.mxu0 %v14669_v48  ;;  %8385 = vmatpush2.bf16.msra.mxu1 %v14672_v44 }
 0xb81   : > { %8386 = vmatprep.subr.bf16.mxu1 %v14677_v11  ;;  %8403 = vmatprep.subr.bf16.mxu0 %v14680_v4 }
 0xb83   : > { %8354 = vmatmul.mubr.bf16.vlgmr.msra.gmra.mxu0 %v17962_v26 }
 0xb84   : > { %8387 = vmatpush2.bf16.msra.mxu1 %v14675_v46  ;;  %8404 = vmatpush1.bf16.msra.mxu0 %v14678_v35 }
 0xb85   : > { %8388 = vmatprep.subr.bf16.mxu1 %v14683_v34  ;;  %8405 = vmatprep.subr.bf16.mxu0 %v14686_v30 }
 0xb86   : > { %8435 = vmatprep.mubr.bf16.mxu0 %v15838_v12 }
 0xb88   : > { %8389 = vmatpush2.bf16.msra.mxu1 %v14681_v59  ;;  %8406 = vmatpush1.bf16.msra.mxu0 %v14684_v39 }
 0xb89   : > { %8390 = vmatprep.subr.bf16.mxu1 %v14689_v2  ;;  %8407 = vmatprep.subr.bf16.mxu0 %v14692_v55 }
 0xb8c   : > { %8391 = vmatpush2.bf16.msra.mxu1 %v14687_v29  ;;  %8408 = vmatpush1.bf16.msra.mxu0 %v14690_v10 }
 0xb8d   : > { %8392 = vmatprep.subr.bf16.mxu1 %v14695_v61  ;;  %8409 = vmatprep.subr.bf16.mxu0 %v14698_v45 }
 0xb90   : > { %8393 = vmatpush2.bf16.msra.mxu1 %v14693_v16  ;;  %8410 = vmatpush1.bf16.msra.mxu0 %v14696_v18 }
 0xb91   : > { %8411 = vmatprep.subr.bf16.mxu0 %v14701_v42  ;;  %8554 = vmatprep.subr.bf16.mxu1 %v14704_v37 }
 0xb93   : > { %8395 = vmatmul.mubr.bf16.vlgmr.msra.gmra.mxu1 %v7360_v50 }
 0xb94   : > { %8412 = vmatpush1.bf16.msra.mxu0 %v14699_v31  ;;  %8555 = vmatpush1.bf16.msra.mxu1 %v14702_v60 }
 0xb95   : > { %8413 = vmatprep.subr.bf16.mxu0 %v14707_v38  ;;  %8556 = vmatprep.subr.bf16.mxu1 %v14710_v13  ;;  %v8597_v38 = vld [vmem:[%s18312_s5] sm:$0x3]  ;;  %v12079_v13 = vld [vmem:[%s18312_s5 + $0x2] sm:$0x3] }
 0xb96   : > { %8586 = vmatprep.mubr.bf16.mxu1 %v15838_v12 }
 0xb98   : > { %8414 = vmatpush1.bf16.msra.mxu0 %v14705_v40  ;;  %8557 = vmatpush1.bf16.msra.mxu1 %v14708_v53 }
 0xb99   : > { %8415 = vmatprep.subr.bf16.mxu0 %v14713_v28  ;;  %8558 = vmatprep.subr.bf16.mxu1 %v14716_v27  ;;  %v12082_v28 = vld [vmem:[%s18312_s5 + $0x4] sm:$0x3]  ;;  %v12085_v27 = vld [vmem:[%s18312_s5 + $0x6] sm:$0x3] }
 0xb9c   : > { %8416 = vmatpush1.bf16.msra.mxu0 %v14711_v57  ;;  %8559 = vmatpush1.bf16.msra.mxu1 %v14714_v56 }
 0xb9d   : > { %8417 = vmatprep.subr.bf16.mxu0 %v14719_v14  ;;  %8560 = vmatprep.subr.bf16.mxu1 %v14722_v7  ;;  %v12088_v14 = vld [vmem:[%s18312_s5 + $0x8] sm:$0x3]  ;;  %v12091_v7 = vld [vmem:[%s18312_s5 + $0xa] sm:$0x3] }
 0xba0   : > { %8418 = vmatpush1.bf16.msra.mxu0 %v14717_v49  ;;  %8561 = vmatpush1.bf16.msra.mxu1 %v14720_v0  ;;  %v14737_v49 = vld [vmem:[#allocation26 + $0x74] ss:$8 sps:$4 sm:$0xff]  }
 0xba1   : > { %8562 = vmatprep.subr.bf16.mxu1 %v14725_v51  ;;  %v12094_v0 = vld [vmem:[%s18312_s5 + $0xc] sm:$0x3]  ;;  %v12097_v51 = vld [vmem:[%s18312_s5 + $0xe] sm:$0x3] }
 0xba3   : > { %8436 = vmatmul.mubr.bf16.vlgmr.msra.gmra.mxu0 %v7362_v3  ;;  %v14735_v3 = vld [vmem:[#allocation26 + $0x70] ss:$8 sps:$4 sm:$0xff]  }
 0xba4   : > { %8563 = vmatpush1.bf16.msra.mxu1 %v14723_v33  ;;  %8641 = vmatprep.mubr.bf16.mxu0 %v15838_v12  ;;  %v14740_v33 = vld [vmem:[#allocation26 + $0x174] ss:$8 sps:$4 sm:$0xff]  }
 0xba5   : > { %8564 = vmatprep.subr.bf16.mxu1 %v14728_v62  ;;  %v14743_v62 = vld [vmem:[#allocation26 + $0x64] ss:$8 sps:$4 sm:$0xff]  }
 0xba8   : > { %8565 = vmatpush1.bf16.msra.mxu1 %v14726_v5  ;;  %v14741_v5 = vld [vmem:[#allocation26 + $0x60] ss:$8 sps:$4 sm:$0xff]  }
 0xba9   : > { %8566 = vmatprep.subr.bf16.mxu1 %v14731_v36  ;;  %v14749_v36 = vld [vmem:[#allocation26 + $0x54] ss:$8 sps:$4 sm:$0xff]  }
 0xbac   : > { %8567 = vmatpush1.bf16.msra.mxu1 %v14729_v25  ;;  %v14738_v25 = vld [vmem:[#allocation26 + $0x170] ss:$8 sps:$4 sm:$0xff]  }
 0xbad   : > { %8568 = vmatprep.subr.bf16.mxu1 %v14734_v20  ;;  %v12100_v20 = vld [vmem:[%s18312_s5 + $0x10] sm:$0x3] }
 0xbb0   : > { %8569 = vmatpush1.bf16.msra.mxu1 %v14732_v54  ;;  %v14746_v54 = vld [vmem:[#allocation26 + $0x164] ss:$8 sps:$4 sm:$0xff]  }
 0xbb3   : > { %8587 = vmatmul.mubr.bf16.vlgmr.msra.gmra.mxu1 %v17962_v26 }
 0xbb4   : > { %8687 = vmatprep.mubr.bf16.mxu1 %v15838_v12 }
 0xc03   : > { %v8273_v52 = vpop.f32.mrf.mxu0 }
 0xc04   : > { %v8274_v9 = vadd.f32 %v8273_v52, %v7512_v1  ;;  %v14747_v52 = vld [vmem:[#allocation26 + $0x50] ss:$8 sps:$4 sm:$0xff]  }
 0xc05   : > { %v8275_v32 = vpop.f32.mrf.mxu0  ;;  %v14750_v1 = vld [vmem:[#allocation26 + $0x150] ss:$8 sps:$4 sm:$0xff]  }
 0xc06   : > { %v8276_v58 = vadd.f32 %v8275_v32, %v7516_v23  ;;  %v14755_v32 = vld [vmem:[#allocation26 + $0x44] ss:$8 sps:$4 sm:$0xff]  }
 0xc07   : > { %v8277_v8 = vpop.f32.mrf.mxu0  ;;  %v14758_v23 = vld [vmem:[#allocation26 + $0x144] ss:$8 sps:$4 sm:$0xff]  }
 0xc08   : > { %v14744_v8 = vld [vmem:[#allocation26 + $0x160] ss:$8 sps:$4 sm:$0xff]  }
 0xc09   : > { %v8278_v24 = vpop.f32.mrf.mxu0 }
 0xc0a   : > { %v14753_v24 = vld [vmem:[#allocation26 + $0x40] ss:$8 sps:$4 sm:$0xff]  }
 0xc13   : > { %v8314_v41 = vpop.f32.mrf.mxu1 }
 0xc14   : > { %v8315_v17 = vadd.f32 %v8314_v41, %v8274_v9  ;;  %v14759_v9 = vld [vmem:[#allocation26 + $0x30] ss:$8 sps:$4 sm:$0xff]   ;;  %v14767_v41 = vld [vmem:[#allocation26 + $0x24] ss:$8 sps:$4 sm:$0xff]  }
 0xc15   : > { %v8316_v6 = vpop.f32.mrf.mxu1 }
 0xc16   : > { %v8317_v21 = vadd.f32 %v8316_v6, %v8276_v58  ;;  %v14756_v58 = vld [vmem:[#allocation26 + $0x140] ss:$8 sps:$4 sm:$0xff]  }
 0xc17   : > { %v8318_v19 = vpop.f32.mrf.mxu1  ;;  %v14765_v6 = vld [vmem:[#allocation26 + $0x20] ss:$8 sps:$4 sm:$0xff]  }
 0xc18   : > { %v14762_v19 = vld [vmem:[#allocation26 + $0x130] ss:$8 sps:$4 sm:$0xff]  }
 0xc19   : > { %v8319_v48 = vpop.f32.mrf.mxu1 }
 0xc1a   : > { %v14770_v48 = vld [vmem:[#allocation26 + $0x124] ss:$8 sps:$4 sm:$0xff]  }
 0xc43   : > { %v8355_v44 = vpop.f32.mrf.mxu0 }
 0xc44   : > { %v8356_v59 = vadd.f32 %v8355_v44, %v8315_v17  ;;  %v14764_v17 = vld [vmem:[#allocation26 + $0x134] ss:$8 sps:$4 sm:$0xff]   ;;  %v14771_v44 = vld [vmem:[#allocation26 + $0x10] ss:$8 sps:$4 sm:$0xff]  }
 0xc45   : > { %v8357_v11 = vpop.f32.mrf.mxu0 }
 0xc46   : > { %v8358_v39 = vadd.f32 %v8357_v11, %v8317_v21  ;;  %v14773_v21 = vld [vmem:[#allocation26 + $0x14] ss:$8 sps:$4 sm:$0xff]   ;;  %v14779_v11 = vld [vmem:[#allocation26 + $0x4] ss:$8 sps:$4 sm:$0xff]  }
 0xc47   : > { %v8359_v4 = vpop.f32.mrf.mxu0 }
 0xc48   : > { %v14768_v4 = vld [vmem:[#allocation26 + $0x120] ss:$8 sps:$4 sm:$0xff]  }
 0xc49   : > { %v8360_v26 = vpop.f32.mrf.mxu0 }
 0xc4a   : > { %v14776_v26 = vld [vmem:[#allocation26 + $0x114] ss:$8 sps:$4 sm:$0xff]  }
 0xc53   : > { %v8396_v46 = vpop.f32.mrf.mxu1 }
 0xc54   : > { %v8397_v2 = vadd.f32 %v8396_v46, %v8356_v59  ;;  %v14777_v46 = vld [vmem:[#allocation26] ss:$8 sps:$4 sm:$0xff]   ;;  %v14783_v59 = vld [vmem:[#allocation26 + $0xf0] ss:$8 sps:$4 sm:$0xff]  }
 0xc55   : > { %v8398_v35 = vpop.f32.mrf.mxu1 }
 0xc56   : > { %v8399_v29 = vadd.f32 %v8398_v35, %v8358_v39  ;;  %v14785_v35 = vld [vmem:[#allocation26 + $0xf4] ss:$8 sps:$4 sm:$0xff]   ;;  %v14791_v39 = vld [vmem:[#allocation26 + $0xe4] ss:$8 sps:$4 sm:$0xff]  }
 0xc57   : > { %v8400_v34 = vpop.f32.mrf.mxu1 }
 0xc58   : > { %v14774_v34 = vld [vmem:[#allocation26 + $0x110] ss:$8 sps:$4 sm:$0xff]  }
 0xc59   : > { %v8401_v30 = vpop.f32.mrf.mxu1 }
 0xc5a   : > { %v14782_v30 = vld [vmem:[#allocation26 + $0x104] ss:$8 sps:$4 sm:$0xff]  }
 0xc63   : > { %v8437_v55 = vpop.f32.mrf.mxu0 }
 0xc64   : > { %v8438_v10 = vadd.f32 %v8437_v55, %v8397_v2  ;;  %v14780_v2 = vld [vmem:[#allocation26 + $0x100] ss:$8 sps:$4 sm:$0xff]   ;;  %v14788_v55 = vld [vmem:[#allocation26 + $0x1f4] ss:$8 sps:$4 sm:$0xff]  }
 0xc65   : > { %v8439_v61 = vpop.f32.mrf.mxu0 }
 0xc66   : > { %v8444_v45 = vmax.f32 %v8438_v10, 0.0  ;;  %v8440_v16 = vadd.f32 %v8439_v61, %v8399_v29  ;;  %v14789_v29 = vld [vmem:[#allocation26 + $0xe0] ss:$8 sps:$4 sm:$0xff]   ;;  %v14797_v10 = vld [vmem:[#allocation26 + $0xd4] ss:$8 sps:$4 sm:$0xff]  }
 0xc67   : > { %v8441_v18 = vpop.f32.mrf.mxu0  ;;  %v14786_v61 = vld [vmem:[#allocation26 + $0x1f0] ss:$8 sps:$4 sm:$0xff]  }
 0xc68   : > { %v8595_v42 = vpack.c.bf16 %v8444_v45, %v8444_v45  ;;  %v8445_v37 = vmax.f32 %v8440_v16, 0.0  ;;  %v14794_v45 = vld [vmem:[#allocation26 + $0x1e4] ss:$8 sps:$4 sm:$0xff]   ;;  %v14795_v16 = vld [vmem:[#allocation26 + $0xd0] ss:$8 sps:$4 sm:$0xff]  }
 0xc69   : > { %v8442_v50 = vpop.f32.mrf.mxu0  ;;  %v14803_v18 = vld [vmem:[#allocation26 + $0xc4] ss:$8 sps:$4 sm:$0xff]  }
 0xc6a   : > { %v8596_v31 = vpack.c.bf16 %v8445_v37, %v8445_v37  ;;  %v8604_v60 = vsel %vm8602_vm3, %v8595_v42, 0  ;;  %v14792_v42 = vld [vmem:[#allocation26 + $0x1e0] ss:$8 sps:$4 sm:$0xff]   ;;  %v14800_v37 = vld [vmem:[#allocation26 + $0x1d4] ss:$8 sps:$4 sm:$0xff]  }
 0xc6b   : > { %v14801_v50 = vld [vmem:[#allocation26 + $0xc0] ss:$8 sps:$4 sm:$0xff]  }
 0xc6c   : > { %12077 = vmatprep.subr.msk.bf16.mxu0 %vm8602_vm3, %v8596_v31  ;;  %12080 = vmatprep.subr.msk.bf16.mxu1 %vm8602_vm3, %v8596_v31 }
 0xc6d   : > { %8624 = vmatpush1.bf16.msra.mxu0 %v8604_v60  ;;  %8670 = vmatpush1.bf16.msra.mxu1 %v8604_v60 }
 0xc6e   : > { %12083 = vmatprep.subr.msk.bf16.mxu0 %vm8602_vm3, %v8596_v31  ;;  %12086 = vmatprep.subr.msk.bf16.mxu1 %vm8602_vm3, %v8596_v31 }
 0xc70   : > { %12078 = vmatmul.mubr.msk.bf16.vlgmr.msra.gmra.mxu0 %vm8598_vm4, %v8597_v38  ;;  %12081 = vmatmul.mubr.msk.bf16.vlgmr.msra.gmra.mxu1 %vm8598_vm4, %v12079_v13  ;;  %v14806_v38 = vld [vmem:[#allocation26 + $0x1c4] ss:$8 sps:$4 sm:$0xff]   ;;  %v14807_v13 = vld [vmem:[#allocation26 + $0xb0] ss:$8 sps:$4 sm:$0xff]  }
 0xc71   : > { %8716 = vmatpush1.bf16.msra.mxu0 %v8604_v60  ;;  %8762 = vmatpush1.bf16.msra.mxu1 %v8604_v60 }
 0xc72   : > { %12089 = vmatprep.subr.msk.bf16.mxu0 %vm8602_vm3, %v8596_v31  ;;  %12092 = vmatprep.subr.msk.bf16.mxu1 %vm8602_vm3, %v8596_v31 }
 0xc73   : > { %v18066_v40 = vpop.f32.mrf.mxu1  ;;  %8733 = vmatprep.mubr.bf16.mxu0 %v15838_v12  ;;  %8779 = vmatprep.mubr.bf16.mxu1 %v15838_v12 }
 0xc75   : > { %v18070_v53 = vpop.f32.mrf.mxu1 }
 0xc77   : > { %v8592_v57 = vpop.f32.mrf.mxu1 }
 0xc78   : > { %12084 = vmatmul.mubr.msk.bf16.vlgmr.msra.gmra.mxu0 %vm8598_vm4, %v12082_v28  ;;  %12087 = vmatmul.mubr.msk.bf16.vlgmr.msra.gmra.mxu1 %vm8598_vm4, %v12085_v27  ;;  %v14815_v28 = vld [vmem:[#allocation26 + $0xa4] ss:$8 sps:$4 sm:$0xff]   ;;  %v14804_v27 = vld [vmem:[#allocation26 + $0x1c0] ss:$8 sps:$4 sm:$0xff]   ;;  %v14812_v57 = vld [vmem:[#allocation26 + $0x1b4] ss:$8 sps:$4 sm:$0xff]  }
 0xc79   : > { %8808 = vmatpush1.bf16.msra.mxu0 %v8604_v60  ;;  %8854 = vmatpush1.bf16.msra.mxu1 %v8604_v60  ;;  %v8593_v56 = vpop.f32.mrf.mxu1 }
 0xc7a   : > { %12095 = vmatprep.subr.msk.bf16.mxu0 %vm8602_vm3, %v8596_v31  ;;  %12098 = vmatprep.subr.msk.bf16.mxu1 %vm8602_vm3, %v8596_v31  ;;  %v14813_v56 = vld [vmem:[#allocation26 + $0xa0] ss:$8 sps:$4 sm:$0xff]  }
 0xc7b   : > { %8825 = vmatprep.mubr.bf16.mxu0 %v15838_v12  ;;  %8871 = vmatprep.mubr.bf16.mxu1 %v15838_v12 }
 0xc80   : > { %12090 = vmatmul.mubr.msk.bf16.vlgmr.msra.gmra.mxu0 %vm8598_vm4, %v12088_v14  ;;  %12093 = vmatmul.mubr.msk.bf16.vlgmr.msra.gmra.mxu1 %vm8598_vm4, %v12091_v7  ;;  %v14821_v14 = vld [vmem:[#allocation26 + $0x94] ss:$8 sps:$4 sm:$0xff]   ;;  %v14810_v7 = vld [vmem:[#allocation26 + $0x1b0] ss:$8 sps:$4 sm:$0xff]  }
 0xc81   : > { %8900 = vmatpush1.bf16.msra.mxu0 %v8604_v60  ;;  %8946 = vmatpush1.bf16.msra.mxu1 %v8604_v60 }
 0xc82   : > { %12101 = vmatprep.subr.msk.bf16.mxu0 %vm8602_vm3, %v8596_v31  ;;  %8917 = vmatprep.mubr.bf16.mxu0 %v15838_v12  ;;  %v14809_v31 = vld [vmem:[#allocation26 + $0xb4] ss:$8 sps:$4 sm:$0xff]  }
 0xc83   : > { %8963 = vmatprep.mubr.bf16.mxu1 %v15838_v12  ;;  %10776 = vmatprep.subr.bf16.mxu1 %v14737_v49  ;;  %v14818_v49 = vld [vmem:[#allocation26 + $0x1a4] ss:$8 sps:$4 sm:$0xff]  }
 0xc88   : > { %12096 = vmatmul.mubr.msk.bf16.vlgmr.msra.gmra.mxu0 %vm8598_vm4, %v12094_v0  ;;  %12099 = vmatmul.mubr.msk.bf16.vlgmr.msra.gmra.mxu1 %vm8598_vm4, %v12097_v51  ;;  %v14819_v0 = vld [vmem:[#allocation26 + $0x90] ss:$8 sps:$4 sm:$0xff]   ;;  %v14827_v51 = vld [vmem:[#allocation26 + $0x84] ss:$8 sps:$4 sm:$0xff]  }
 0xc89   : > { %8992 = vmatpush1.bf16.msra.mxu0 %v8604_v60  ;;  %9009 = vmatprep.mubr.bf16.mxu0 %v15838_v12  ;;  %v14752_v12 = vld [vmem:[#allocation26 + $0x154] ss:$8 sps:$4 sm:$0xff]   ;;  %v14798_v60 = vld [vmem:[#allocation26 + $0x1d0] ss:$8 sps:$4 sm:$0xff]  }
 0xc8a   : > { %10817 = vmatprep.subr.bf16.mxu0 %v14740_v33  ;;  %10777 = vmatpush1.bf16.msra.mxu1 %v14735_v3  ;;  %v14816_v3 = vld [vmem:[#allocation26 + $0x1a0] ss:$8 sps:$4 sm:$0xff]   ;;  %v14824_v33 = vld [vmem:[#allocation26 + $0x194] ss:$8 sps:$4 sm:$0xff]  }
 0xc8b   : > { %10778 = vmatprep.subr.bf16.mxu1 %v14743_v62  ;;  %v14825_v62 = vld [vmem:[#allocation26 + $0x80] ss:$8 sps:$4 sm:$0xff]  }
 0xc8e   : > { %10779 = vmatpush1.bf16.msra.mxu1 %v14741_v5  ;;  %v14833_v5 = vld [vmem:[#allocation26 + $0x274] ss:$8 sps:$4 sm:$0xff]  }
 0xc8f   : > { %10780 = vmatprep.subr.bf16.mxu1 %v14749_v36  ;;  %v14822_v36 = vld [vmem:[#allocation26 + $0x190] ss:$8 sps:$4 sm:$0xff]  }
 0xc90   : > { %12102 = vmatmul.mubr.msk.bf16.vlgmr.msra.gmra.mxu0 %vm8598_vm4, %v12100_v20  ;;  %v14828_v20 = vld [vmem:[#allocation26 + $0x180] ss:$8 sps:$4 sm:$0xff]  }
 0xc91   : > { %10818 = vmatpush1.bf16.msra.mxu0 %v14738_v25  ;;  %v14830_v25 = vld [vmem:[#allocation26 + $0x184] ss:$8 sps:$4 sm:$0xff]  }
 0xc92   : > { %10819 = vmatprep.subr.bf16.mxu0 %v14746_v54  ;;  %10781 = vmatpush1.bf16.msra.mxu1 %v14747_v52  ;;  %v14836_v54 = vld [vmem:[#allocation26 + $0x374] ss:$8 sps:$4 sm:$0xff]  }
 0xc93   : > { %10782 = vmatprep.subr.bf16.mxu1 %v14755_v32 }
 0xc95   : > { %10820 = vmatpush1.bf16.msra.mxu0 %v14744_v8 }
 0xc96   : > { %10821 = vmatprep.subr.bf16.mxu0 %v14752_v12  ;;  %10783 = vmatpush1.bf16.msra.mxu1 %v14753_v24 }
 0xc97   : > { %10784 = vmatprep.subr.bf16.mxu1 %v14761_v15 }
 0xc99   : > { %10822 = vmatpush1.bf16.msra.mxu0 %v14750_v1 }
 0xc9a   : > { %10823 = vmatprep.subr.bf16.mxu0 %v14758_v23  ;;  %10785 = vmatpush1.bf16.msra.mxu1 %v14759_v9  ;;  %v14831_v23 = vld [vmem:[#allocation26 + $0x270] ss:$8 sps:$4 sm:$0xff]  }
 0xc9b   : > { %10786 = vmatprep.subr.bf16.mxu1 %v14767_v41  ;;  %v14834_v9 = vld [vmem:[#allocation26 + $0x370] ss:$8 sps:$4 sm:$0xff]  }
 0xc9d   : > { %10824 = vmatpush1.bf16.msra.mxu0 %v14756_v58 }
 0xc9e   : > { %10825 = vmatprep.subr.bf16.mxu0 %v14764_v17  ;;  %10787 = vmatpush1.bf16.msra.mxu1 %v14765_v6  ;;  %v14839_v17 = vld [vmem:[#allocation26 + $0x264] ss:$8 sps:$4 sm:$0xff]  }
 0xc9f   : > { %10788 = vmatprep.subr.bf16.mxu1 %v14773_v21  ;;  %v14842_v6 = vld [vmem:[#allocation26 + $0x364] ss:$8 sps:$4 sm:$0xff]  }
 0xca1   : > { %10826 = vmatpush1.bf16.msra.mxu0 %v14762_v19 }
 0xca2   : > { %10827 = vmatprep.subr.bf16.mxu0 %v14770_v48  ;;  %10789 = vmatpush1.bf16.msra.mxu1 %v14771_v44  ;;  %v14837_v44 = vld [vmem:[#allocation26 + $0x260] ss:$8 sps:$4 sm:$0xff]  }
 0xca3   : > { %10790 = vmatprep.subr.bf16.mxu1 %v14779_v11  ;;  %v14840_v11 = vld [vmem:[#allocation26 + $0x360] ss:$8 sps:$4 sm:$0xff]  }
 0xca5   : > { %10828 = vmatpush1.bf16.msra.mxu0 %v14768_v4  ;;  %v14845_v4 = vld [vmem:[#allocation26 + $0x254] ss:$8 sps:$4 sm:$0xff]  }
 0xca6   : > { %10829 = vmatprep.subr.bf16.mxu0 %v14776_v26  ;;  %10791 = vmatpush1.bf16.msra.mxu1 %v14777_v46  ;;  %v14848_v26 = vld [vmem:[#allocation26 + $0x354] ss:$8 sps:$4 sm:$0xff]  }
 0xca7   : > { %10792 = vmatprep.subr.bf16.mxu1 %v14785_v35 }
 0xca9   : > { %10830 = vmatpush1.bf16.msra.mxu0 %v14774_v34 }
 0xcaa   : > { %10831 = vmatprep.subr.bf16.mxu0 %v14782_v30  ;;  %10793 = vmatpush2.bf16.msra.mxu1 %v14783_v59  ;;  %v14843_v59 = vld [vmem:[#allocation26 + $0x250] ss:$8 sps:$4 sm:$0xff]  }
 0xcab   : > { %10794 = vmatprep.subr.bf16.mxu1 %v14791_v39  ;;  %v14846_v39 = vld [vmem:[#allocation26 + $0x350] ss:$8 sps:$4 sm:$0xff]  }
 0xcad   : > { %10832 = vmatpush1.bf16.msra.mxu0 %v14780_v2 }
 0xcae   : > { %10833 = vmatprep.subr.bf16.mxu0 %v14788_v55  ;;  %10795 = vmatpush2.bf16.msra.mxu1 %v14789_v29  ;;  %v14851_v29 = vld [vmem:[#allocation26 + $0x244] ss:$8 sps:$4 sm:$0xff]  }
 0xcaf   : > { %10796 = vmatprep.subr.bf16.mxu1 %v14797_v10  ;;  %v14854_v10 = vld [vmem:[#allocation26 + $0x344] ss:$8 sps:$4 sm:$0xff]  }
 0xcb1   : > { %10834 = vmatpush2.bf16.msra.mxu0 %v14786_v61 }
 0xcb2   : > { %10835 = vmatprep.subr.bf16.mxu0 %v14794_v45  ;;  %10797 = vmatpush2.bf16.msra.mxu1 %v14795_v16 }
 0xcb3   : > { %10798 = vmatprep.subr.bf16.mxu1 %v14803_v18 }
 0xcb5   : > { %10836 = vmatpush2.bf16.msra.mxu0 %v14792_v42  ;;  %v14849_v42 = vld [vmem:[#allocation26 + $0x240] ss:$8 sps:$4 sm:$0xff]  }
 0xcb6   : > { %10837 = vmatprep.subr.bf16.mxu0 %v14800_v37  ;;  %10799 = vmatpush2.bf16.msra.mxu1 %v14801_v50  ;;  %v14852_v37 = vld [vmem:[#allocation26 + $0x340] ss:$8 sps:$4 sm:$0xff]   ;;  %v14857_v50 = vld [vmem:[#allocation26 + $0x234] ss:$8 sps:$4 sm:$0xff]  }
 0xcb7   : > { %10800 = vmatprep.subr.bf16.mxu1 %v14809_v31  ;;  %v14860_v31 = vld [vmem:[#allocation26 + $0x334] ss:$8 sps:$4 sm:$0xff]  }
 0xcb9   : > { %10838 = vmatpush2.bf16.msra.mxu0 %v14798_v60 }
 0xcba   : > { %10839 = vmatprep.subr.bf16.mxu0 %v14806_v38  ;;  %10801 = vmatpush2.bf16.msra.mxu1 %v14807_v13 }
 0xcbb   : > { %10802 = vmatprep.subr.bf16.mxu1 %v14815_v28 }
 0xcbd   : > { %10840 = vmatpush2.bf16.msra.mxu0 %v14804_v27  ;;  %v14855_v27 = vld [vmem:[#allocation26 + $0x230] ss:$8 sps:$4 sm:$0xff]  }
 0xcbe   : > { %10841 = vmatprep.subr.bf16.mxu0 %v14812_v57  ;;  %10803 = vmatpush2.bf16.msra.mxu1 %v14813_v56  ;;  %v14858_v57 = vld [vmem:[#allocation26 + $0x330] ss:$8 sps:$4 sm:$0xff]   ;;  %v14863_v56 = vld [vmem:[#allocation26 + $0x224] ss:$8 sps:$4 sm:$0xff]  }
 0xcbf   : > { %10804 = vmatprep.subr.bf16.mxu1 %v14821_v14  ;;  %v14866_v14 = vld [vmem:[#allocation26 + $0x324] ss:$8 sps:$4 sm:$0xff]  }
 0xcc1   : > { %10842 = vmatpush2.bf16.msra.mxu0 %v14810_v7 }
 0xcc2   : > { %10843 = vmatprep.subr.bf16.mxu0 %v14818_v49  ;;  %10805 = vmatpush2.bf16.msra.mxu1 %v14819_v0 }
 0xcc3   : > { %10806 = vmatprep.subr.bf16.mxu1 %v14827_v51 }
 0xcc5   : > { %10844 = vmatpush2.bf16.msra.mxu0 %v14816_v3  ;;  %v14861_v3 = vld [vmem:[#allocation26 + $0x220] ss:$8 sps:$4 sm:$0xff]  }
 0xcc6   : > { %10845 = vmatprep.subr.bf16.mxu0 %v14824_v33  ;;  %10807 = vmatpush2.bf16.msra.mxu1 %v14825_v62  ;;  %v14864_v33 = vld [vmem:[#allocation26 + $0x320] ss:$8 sps:$4 sm:$0xff]   ;;  %v14869_v62 = vld [vmem:[#allocation26 + $0x214] ss:$8 sps:$4 sm:$0xff]  }
 0xcc7   : > { %10858 = vmatprep.subr.bf16.mxu1 %v14833_v5  ;;  %v14872_v5 = vld [vmem:[#allocation26 + $0x314] ss:$8 sps:$4 sm:$0xff]  }
 0xcc9   : > { %10846 = vmatpush2.bf16.msra.mxu0 %v14822_v36 }
 0xcca   : > { %10847 = vmatprep.subr.bf16.mxu0 %v14830_v25 }
 0xccd   : > { %10848 = vmatpush2.bf16.msra.mxu0 %v14828_v20  ;;  %v14867_v20 = vld [vmem:[#allocation26 + $0x210] ss:$8 sps:$4 sm:$0xff]  }
 0xcce   : > { %10899 = vmatprep.subr.bf16.mxu0 %v14836_v54  ;;  %v14870_v54 = vld [vmem:[#allocation26 + $0x310] ss:$8 sps:$4 sm:$0xff]  }
 0xd30   : > { %v8643_v52 = vpop.f32.mrf.mxu0  ;;  %v8689_v32 = vpop.f32.mrf.mxu1 }
 0xd31   : > { %v9020_v8 = vpack.c.bf16 %v8689_v32, %v8689_v32  ;;  %v9018_v41 = vpack.c.bf16 %v8643_v52, %v8643_v52  ;;  %v14875_v52 = vld [vmem:[#allocation26 + $0x204] ss:$8 sps:$4 sm:$0xff]  }
 0xd32   : > { %v8645_v12 = vpop.f32.mrf.mxu0  ;;  %v8691_v24 = vpop.f32.mrf.mxu1  ;;  %v14878_v32 = vld [vmem:[#allocation26 + $0x304] ss:$8 sps:$4 sm:$0xff]  }
 0xd33   : > { %v9019_v15 = vpack.c.bf16 %v8645_v12, %v8645_v12  ;;  %v9021_v1 = vpack.c.bf16 %v8691_v24, %v8691_v24  ;;  %v14873_v24 = vld [vmem:[#allocation26 + $0x200] ss:$8 sps:$4 sm:$0xff]  }
 0xd34   : > { %v8647_v58 = vpop.f32.mrf.mxu0  ;;  %v8693_v21 = vpop.f32.mrf.mxu1 }
 0xd35   : > { %10808 = vmatprep.mubr.bf16.mxu1 %v9019_v15  ;;  %10849 = vmatprep.mubr.bf16.mxu0 %v9021_v1  ;;  %v14876_v15 = vld [vmem:[#allocation26 + $0x300] ss:$8 sps:$4 sm:$0xff]   ;;  %v14881_v1 = vld [vmem:[#allocation26 + $0x2f4] ss:$8 sps:$4 sm:$0xff]   ;;  %v14887_v58 = vld [vmem:[#allocation26 + $0x2e4] ss:$8 sps:$4 sm:$0xff]  }
 0xd36   : > { %v8648_v19 = vpop.f32.mrf.mxu0  ;;  %10809 = vmatmul.mubr.bf16.vlgmr.msra.gmra.mxu1 %v9018_v41  ;;  %10850 = vmatmul.mubr.bf16.vlgmr.msra.gmra.mxu0 %v9020_v8  ;;  %v8694_v48 = vpop.f32.mrf.mxu1  ;;  %v14882_v41 = vld [vmem:[#allocation26 + $0x3f0] ss:$8 sps:$4 sm:$0xff]   ;;  %v14888_v21 = vld [vmem:[#allocation26 + $0x3e0] ss:$8 sps:$4 sm:$0xff]  }
 0xd37   : > { %10859 = vmatpush1.bf16.msra.mxu1 %v14831_v23  ;;  %10900 = vmatpush1.bf16.msra.mxu0 %v14834_v9  ;;  %v14884_v23 = vld [vmem:[#allocation26 + $0x3f4] ss:$8 sps:$4 sm:$0xff]   ;;  %v14879_v9 = vld [vmem:[#allocation26 + $0x2f0] ss:$8 sps:$4 sm:$0xff]  }
 0xd38   : > { %10860 = vmatprep.subr.bf16.mxu1 %v14839_v17  ;;  %10901 = vmatprep.subr.bf16.mxu0 %v14842_v6  ;;  %v18108_v46 = vpop.f32.mrf.mxu0  ;;  %v18110_v35 = vpop.f32.mrf.mxu1  ;;  %v14890_v17 = vld [vmem:[#allocation26 + $0x3e4] ss:$8 sps:$4 sm:$0xff]   ;;  %v14885_v6 = vld [vmem:[#allocation26 + $0x2e0] ss:$8 sps:$4 sm:$0xff]   ;;  %v14893_v19 = vld [vmem:[#allocation26 + $0x2d4] ss:$8 sps:$4 sm:$0xff]  }
 0xd39   : > { %v14896_v48 = vld [vmem:[#allocation26 + $0x3d4] ss:$8 sps:$4 sm:$0xff]  }
 0xd3a   : > { %v8737_v34 = vpop.f32.mrf.mxu0  ;;  %v8783_v30 = vpop.f32.mrf.mxu1 }
 0xd3b   : > { %10861 = vmatpush1.bf16.msra.mxu1 %v14837_v44  ;;  %10902 = vmatpush1.bf16.msra.mxu0 %v14840_v11  ;;  %v9023_v2 = vpack.c.bf16 %v8737_v34, %v8737_v34  ;;  %v9025_v55 = vpack.c.bf16 %v8783_v30, %v8783_v30  ;;  %v14891_v44 = vld [vmem:[#allocation26 + $0x2d0] ss:$8 sps:$4 sm:$0xff]   ;;  %v14897_v34 = vld [vmem:[#allocation26 + $0x2c0] ss:$8 sps:$4 sm:$0xff]  }
 0xd3c   : > { %10862 = vmatprep.subr.bf16.mxu1 %v14845_v4  ;;  %10903 = vmatprep.subr.bf16.mxu0 %v14848_v26  ;;  %v8739_v61 = vpop.f32.mrf.mxu0  ;;  %v8785_v45 = vpop.f32.mrf.mxu1  ;;  %v14894_v11 = vld [vmem:[#allocation26 + $0x3d0] ss:$8 sps:$4 sm:$0xff]   ;;  %v14899_v4 = vld [vmem:[#allocation26 + $0x2c4] ss:$8 sps:$4 sm:$0xff]   ;;  %v14900_v30 = vld [vmem:[#allocation26 + $0x3c0] ss:$8 sps:$4 sm:$0xff]  }
 0xd3d   : > { %10890 = vmatprep.mubr.bf16.mxu1 %v9023_v2  ;;  %10931 = vmatprep.mubr.bf16.mxu0 %v9025_v55  ;;  %v14902_v26 = vld [vmem:[#allocation26 + $0x3c4] ss:$8 sps:$4 sm:$0xff]   ;;  %v14903_v2 = vld [vmem:[#allocation26 + $0x2b0] ss:$8 sps:$4 sm:$0xff]   ;;  %v14909_v61 = vld [vmem:[#allocation26 + $0x2a0] ss:$8 sps:$4 sm:$0xff]  }
 0xd3e   : > { %v8740_v16 = vpop.f32.mrf.mxu0  ;;  %v8786_v18 = vpop.f32.mrf.mxu1  ;;  %v14906_v55 = vld [vmem:[#allocation26 + $0x3b0] ss:$8 sps:$4 sm:$0xff]   ;;  %v14912_v45 = vld [vmem:[#allocation26 + $0x3a0] ss:$8 sps:$4 sm:$0xff]  }
 0xd3f   : > { %10863 = vmatpush1.bf16.msra.mxu1 %v14843_v59  ;;  %10904 = vmatpush1.bf16.msra.mxu0 %v14846_v39  ;;  %v14905_v59 = vld [vmem:[#allocation26 + $0x2b4] ss:$8 sps:$4 sm:$0xff]  }
 0xd40   : > { %10864 = vmatprep.subr.bf16.mxu1 %v14851_v29  ;;  %10905 = vmatprep.subr.bf16.mxu0 %v14854_v10  ;;  %v18112_v60 = vpop.f32.mrf.mxu1  ;;  %v18114_v38 = vpop.f32.mrf.mxu0  ;;  %v14908_v39 = vld [vmem:[#allocation26 + $0x3b4] ss:$8 sps:$4 sm:$0xff]   ;;  %v14911_v29 = vld [vmem:[#allocation26 + $0x2a4] ss:$8 sps:$4 sm:$0xff]  }
 0xd41   : > { %v14914_v10 = vld [vmem:[#allocation26 + $0x3a4] ss:$8 sps:$4 sm:$0xff]   ;;  %v14917_v18 = vld [vmem:[#allocation26 + $0x294] ss:$8 sps:$4 sm:$0xff]  }
 0xd42   : > { %v18116_v13 = vpop.f32.mrf.mxu1  ;;  %v18118_v28 = vpop.f32.mrf.mxu0 }
 0xd43   : > { %10865 = vmatpush1.bf16.msra.mxu1 %v14849_v42  ;;  %10906 = vmatpush1.bf16.msra.mxu0 %v14852_v37  ;;  %v14920_v42 = vld [vmem:[#allocation26 + $0x394] ss:$8 sps:$4 sm:$0xff]  }
 0xd44   : > { %10866 = vmatprep.subr.bf16.mxu1 %v14857_v50  ;;  %10907 = vmatprep.subr.bf16.mxu0 %v14860_v31  ;;  %v8877_v7 = vpop.f32.mrf.mxu1  ;;  %v8831_v49 = vpop.f32.mrf.mxu0  ;;  %v14915_v50 = vld [vmem:[#allocation26 + $0x290] ss:$8 sps:$4 sm:$0xff]  }
 0xd45   : > { %v14918_v31 = vld [vmem:[#allocation26 + $0x390] ss:$8 sps:$4 sm:$0xff]   ;;  %v14921_v7 = vld [vmem:[#allocation26 + $0x280] ss:$8 sps:$4 sm:$0xff]  }
 0xd46   : > { %v8878_v0 = vpop.f32.mrf.mxu1  ;;  %v8832_v51 = vpop.f32.mrf.mxu0  ;;  %v14924_v49 = vld [vmem:[#allocation26 + $0x380] ss:$8 sps:$4 sm:$0xff]  }
 0xd47   : > { %10867 = vmatpush1.bf16.msra.mxu1 %v14855_v27  ;;  %10908 = vmatpush1.bf16.msra.mxu0 %v14858_v57  ;;  %v14923_v57 = vld [vmem:[#allocation26 + $0x284] ss:$8 sps:$4 sm:$0xff]   ;;  %v14929_v51 = vld [vmem:[#allocation26 + $0x474] ss:$8 sps:$4 sm:$0xff]  }
 0xd48   : > { %10868 = vmatprep.subr.bf16.mxu1 %v14863_v56  ;;  %10909 = vmatprep.subr.bf16.mxu0 %v14866_v14  ;;  %v18120_v36 = vpop.f32.mrf.mxu1  ;;  %v18124_v16 = vpop.f32.mrf.mxu0  ;;  %v14926_v56 = vld [vmem:[#allocation26 + $0x384] ss:$8 sps:$4 sm:$0xff]  }
 0xd4a   : > { %v18122_v25 = vpop.f32.mrf.mxu1  ;;  %v18126_v37 = vpop.f32.mrf.mxu0 }
 0xd4b   : > { %10869 = vmatpush1.bf16.msra.mxu1 %v14861_v3  ;;  %10910 = vmatpush1.bf16.msra.mxu0 %v14864_v33  ;;  %v14932_v3 = vld [vmem:[#allocation26 + $0x574] ss:$8 sps:$4 sm:$0xff]  }
 0xd4c   : > { %10870 = vmatprep.subr.bf16.mxu1 %v14869_v62  ;;  %10911 = vmatprep.subr.bf16.mxu0 %v14872_v5  ;;  %v8969_v8 = vpop.f32.mrf.mxu1  ;;  %v8923_v27 = vpop.f32.mrf.mxu0  ;;  %v9024_v62 = vpack.c.bf16 %v18110_v35, %v18110_v35  ;;  %v14927_v5 = vld [vmem:[#allocation26 + $0x470] ss:$8 sps:$4 sm:$0xff]   ;;  %v14933_v35 = vld [vmem:[#allocation26 + $0x460] ss:$8 sps:$4 sm:$0xff]  }
 0xd4d   : > { %v14938_v8 = vld [vmem:[#allocation26 + $0x564] ss:$8 sps:$4 sm:$0xff]   ;;  %v14981_v27 = vld [vmem:[#allocation26 + $0x4e0] ss:$8 sps:$4 sm:$0xff]  }
 0xd4e   : > { %v8970_v12 = vpop.f32.mrf.mxu1  ;;  %v8924_v14 = vpop.f32.mrf.mxu0 }
 0xd4f   : > { %10871 = vmatpush1.bf16.msra.mxu1 %v14867_v20  ;;  %10912 = vmatpush1.bf16.msra.mxu0 %v14870_v54  ;;  %v14930_v20 = vld [vmem:[#allocation26 + $0x570] ss:$8 sps:$4 sm:$0xff]   ;;  %v9029_v12 = vpack.c.bf16 %v18116_v13, %v18116_v13  ;;  %v14992_v14 = vld [vmem:[#allocation26 + $0x5d4] ss:$8 sps:$4 sm:$0xff]  }
 0xd50   : > { %10872 = vmatprep.subr.bf16.mxu1 %v14875_v52  ;;  %10913 = vmatprep.subr.bf16.mxu0 %v14878_v32  ;;  %v18128_v0 = vpop.f32.mrf.mxu0  ;;  %v9022_v52 = vpack.c.bf16 %v18108_v46, %v18108_v46  ;;  %v14935_v32 = vld [vmem:[#allocation26 + $0x464] ss:$8 sps:$4 sm:$0xff]   ;;  %v14941_v46 = vld [vmem:[#allocation26 + $0x454] ss:$8 sps:$4 sm:$0xff]   ;;  %v14942_v13 = vld [vmem:[#allocation26 + $0x550] ss:$8 sps:$4 sm:$0xff]  }
 0xd52   : > { %v18130_v33 = vpop.f32.mrf.mxu0 }
 0xd53   : > { %10873 = vmatpush1.bf16.msra.mxu1 %v14873_v24  ;;  %10914 = vmatpush1.bf16.msra.mxu0 %v14876_v15  ;;  %v9027_v24 = vpack.c.bf16 %v18118_v28, %v18118_v28  ;;  %v14947_v28 = vld [vmem:[#allocation26 + $0x444] ss:$8 sps:$4 sm:$0xff]  }
 0xd54   : > { %10874 = vmatprep.subr.bf16.mxu1 %v14881_v1  ;;  %10915 = vmatprep.subr.bf16.mxu0 %v14884_v23  ;;  %v9015_v54 = vpop.f32.mrf.mxu0  ;;  %v14936_v1 = vld [vmem:[#allocation26 + $0x560] ss:$8 sps:$4 sm:$0xff]   ;;  %v14944_v23 = vld [vmem:[#allocation26 + $0x554] ss:$8 sps:$4 sm:$0xff]  }
 0xd55   : > { %v15004_v54 = vld [vmem:[#allocation26 + $0x5b4] ss:$8 sps:$4 sm:$0xff]  }
 0xd56   : > { %v9016_v15 = vpop.f32.mrf.mxu0 }
 0xd57   : > { %10875 = vmatpush2.bf16.msra.mxu1 %v14879_v9  ;;  %10916 = vmatpush2.bf16.msra.mxu0 %v14882_v41  ;;  %v14939_v9 = vld [vmem:[#allocation26 + $0x450] ss:$8 sps:$4 sm:$0xff]   ;;  %v14950_v41 = vld [vmem:[#allocation26 + $0x544] ss:$8 sps:$4 sm:$0xff]   ;;  %v15008_v15 = vld [vmem:[#allocation26 + $0x5a0] ss:$8 sps:$4 sm:$0xff]  }
 0xd58   : > { %10876 = vmatprep.subr.bf16.mxu1 %v14887_v58  ;;  %10917 = vmatprep.subr.bf16.mxu0 %v14890_v17  ;;  %v14945_v58 = vld [vmem:[#allocation26 + $0x440] ss:$8 sps:$4 sm:$0xff]  }
 0xd59   : > { %v14948_v17 = vld [vmem:[#allocation26 + $0x540] ss:$8 sps:$4 sm:$0xff]  }
 0xd5b   : > { %10877 = vmatpush2.bf16.msra.mxu1 %v14885_v6  ;;  %10918 = vmatpush2.bf16.msra.mxu0 %v14888_v21  ;;  %v14953_v6 = vld [vmem:[#allocation26 + $0x434] ss:$8 sps:$4 sm:$0xff]  }
 0xd5c   : > { %10878 = vmatprep.subr.bf16.mxu1 %v14893_v19  ;;  %10919 = vmatprep.subr.bf16.mxu0 %v14896_v48  ;;  %v14956_v21 = vld [vmem:[#allocation26 + $0x534] ss:$8 sps:$4 sm:$0xff]   ;;  %v14951_v19 = vld [vmem:[#allocation26 + $0x430] ss:$8 sps:$4 sm:$0xff]  }
 0xd5d   : > { %v14954_v48 = vld [vmem:[#allocation26 + $0x530] ss:$8 sps:$4 sm:$0xff]  }
 0xd5f   : > { %10879 = vmatpush2.bf16.msra.mxu1 %v14891_v44  ;;  %10920 = vmatpush2.bf16.msra.mxu0 %v14894_v11  ;;  %v14959_v44 = vld [vmem:[#allocation26 + $0x424] ss:$8 sps:$4 sm:$0xff]  }
 0xd60   : > { %10880 = vmatprep.subr.bf16.mxu1 %v14899_v4  ;;  %10921 = vmatprep.subr.bf16.mxu0 %v14902_v26  ;;  %v14962_v11 = vld [vmem:[#allocation26 + $0x524] ss:$8 sps:$4 sm:$0xff]   ;;  %v14957_v4 = vld [vmem:[#allocation26 + $0x420] ss:$8 sps:$4 sm:$0xff]  }
 0xd61   : > { %v14960_v26 = vld [vmem:[#allocation26 + $0x520] ss:$8 sps:$4 sm:$0xff]  }
 0xd63   : > { %10881 = vmatpush2.bf16.msra.mxu1 %v14897_v34  ;;  %10922 = vmatpush2.bf16.msra.mxu0 %v14900_v30  ;;  %v14965_v34 = vld [vmem:[#allocation26 + $0x414] ss:$8 sps:$4 sm:$0xff]  }
 0xd64   : > { %10882 = vmatprep.subr.bf16.mxu1 %v14905_v59  ;;  %10923 = vmatprep.subr.bf16.mxu0 %v14908_v39  ;;  %v14968_v30 = vld [vmem:[#allocation26 + $0x514] ss:$8 sps:$4 sm:$0xff]   ;;  %v14963_v59 = vld [vmem:[#allocation26 + $0x410] ss:$8 sps:$4 sm:$0xff]  }
 0xd65   : > { %v14966_v39 = vld [vmem:[#allocation26 + $0x510] ss:$8 sps:$4 sm:$0xff]  }
 0xd67   : > { %10883 = vmatpush2.bf16.msra.mxu1 %v14903_v2  ;;  %10924 = vmatpush2.bf16.msra.mxu0 %v14906_v55  ;;  %v14971_v2 = vld [vmem:[#allocation26 + $0x404] ss:$8 sps:$4 sm:$0xff]  }
 0xd68   : > { %10884 = vmatprep.subr.bf16.mxu1 %v14911_v29  ;;  %10925 = vmatprep.subr.bf16.mxu0 %v14914_v10  ;;  %v14974_v55 = vld [vmem:[#allocation26 + $0x504] ss:$8 sps:$4 sm:$0xff]   ;;  %v14969_v29 = vld [vmem:[#allocation26 + $0x400] ss:$8 sps:$4 sm:$0xff]  }
 0xd69   : > { %v14972_v10 = vld [vmem:[#allocation26 + $0x500] ss:$8 sps:$4 sm:$0xff]  }
 0xd6b   : > { %10885 = vmatpush2.bf16.msra.mxu1 %v14909_v61  ;;  %10926 = vmatpush2.bf16.msra.mxu0 %v14912_v45  ;;  %v14977_v61 = vld [vmem:[#allocation26 + $0x4f4] ss:$8 sps:$4 sm:$0xff]  }
 0xd6c   : > { %10886 = vmatprep.subr.bf16.mxu1 %v14917_v18  ;;  %10927 = vmatprep.subr.bf16.mxu0 %v14920_v42  ;;  %v14980_v45 = vld [vmem:[#allocation26 + $0x5f4] ss:$8 sps:$4 sm:$0xff]   ;;  %v14975_v18 = vld [vmem:[#allocation26 + $0x4f0] ss:$8 sps:$4 sm:$0xff]  }
 0xd6d   : > { %v14978_v42 = vld [vmem:[#allocation26 + $0x5f0] ss:$8 sps:$4 sm:$0xff]  }
 0xd6f   : > { %10887 = vmatpush2.bf16.msra.mxu1 %v14915_v50  ;;  %10928 = vmatpush2.bf16.msra.mxu0 %v14918_v31  ;;  %v14983_v50 = vld [vmem:[#allocation26 + $0x4e4] ss:$8 sps:$4 sm:$0xff]  }
 0xd70   : > { %10888 = vmatprep.subr.bf16.mxu1 %v14923_v57  ;;  %10929 = vmatprep.subr.bf16.mxu0 %v14926_v56  ;;  %v14986_v31 = vld [vmem:[#allocation26 + $0x5e4] ss:$8 sps:$4 sm:$0xff]   ;;  %v14984_v57 = vld [vmem:[#allocation26 + $0x5e0] ss:$8 sps:$4 sm:$0xff]   ;;  %v14989_v56 = vld [vmem:[#allocation26 + $0x4d4] ss:$8 sps:$4 sm:$0xff]  }
 0xd73   : > { %10889 = vmatpush2.bf16.msra.mxu1 %v14921_v7  ;;  %10930 = vmatpush2.bf16.msra.mxu0 %v14924_v49  ;;  %v14987_v7 = vld [vmem:[#allocation26 + $0x4d0] ss:$8 sps:$4 sm:$0xff]  }
 0xd74   : > { %10940 = vmatprep.subr.bf16.mxu1 %v14929_v51  ;;  %10981 = vmatprep.subr.bf16.mxu0 %v14932_v3  ;;  %v14990_v49 = vld [vmem:[#allocation26 + $0x5d0] ss:$8 sps:$4 sm:$0xff]   ;;  %v14995_v51 = vld [vmem:[#allocation26 + $0x4c4] ss:$8 sps:$4 sm:$0xff]  }
 0xd75   : > { %v14998_v3 = vld [vmem:[#allocation26 + $0x5c4] ss:$8 sps:$4 sm:$0xff]  }
 0xd76   : > { %10891 = vmatmul.mubr.bf16.vlgmr.msra.gmra.mxu1 %v9022_v52  ;;  %10932 = vmatmul.mubr.bf16.vlgmr.msra.gmra.mxu0 %v9024_v62  ;;  %v14993_v62 = vld [vmem:[#allocation26 + $0x4c0] ss:$8 sps:$4 sm:$0xff]   ;;  %v14999_v52 = vld [vmem:[#allocation26 + $0x4b0] ss:$8 sps:$4 sm:$0xff]  }
 0xd77   : > { %10941 = vmatpush1.bf16.msra.mxu1 %v14927_v5  ;;  %10982 = vmatpush1.bf16.msra.mxu0 %v14930_v20  ;;  %v14996_v5 = vld [vmem:[#allocation26 + $0x5c0] ss:$8 sps:$4 sm:$0xff]   ;;  %v15001_v20 = vld [vmem:[#allocation26 + $0x4b4] ss:$8 sps:$4 sm:$0xff]  }
 0xd78   : > { %10942 = vmatprep.subr.bf16.mxu1 %v14935_v32  ;;  %10983 = vmatprep.subr.bf16.mxu0 %v14938_v8  ;;  %v15002_v32 = vld [vmem:[#allocation26 + $0x5b0] ss:$8 sps:$4 sm:$0xff]   ;;  %v15007_v8 = vld [vmem:[#allocation26 + $0x4a4] ss:$8 sps:$4 sm:$0xff]  }
 0xd79   : > { %10972 = vmatprep.mubr.bf16.mxu1 %v9027_v24  ;;  %11013 = vmatprep.mubr.bf16.mxu0 %v9029_v12  ;;  %v15010_v12 = vld [vmem:[#allocation26 + $0x5a4] ss:$8 sps:$4 sm:$0xff]   ;;  %v15005_v24 = vld [vmem:[#allocation26 + $0x4a0] ss:$8 sps:$4 sm:$0xff]  }
 0xd7b   : > { %10943 = vmatpush1.bf16.msra.mxu1 %v14933_v35  ;;  %10984 = vmatpush1.bf16.msra.mxu0 %v14936_v1  ;;  %v15013_v35 = vld [vmem:[#allocation26 + $0x494] ss:$8 sps:$4 sm:$0xff]  }
 0xd7c   : > { %10944 = vmatprep.subr.bf16.mxu1 %v14941_v46  ;;  %10985 = vmatprep.subr.bf16.mxu0 %v14944_v23  ;;  %v15016_v1 = vld [vmem:[#allocation26 + $0x594] ss:$8 sps:$4 sm:$0xff]   ;;  %v15011_v46 = vld [vmem:[#allocation26 + $0x490] ss:$8 sps:$4 sm:$0xff]  }
 0xd7d   : > { %v15014_v23 = vld [vmem:[#allocation26 + $0x590] ss:$8 sps:$4 sm:$0xff]  }
 0xd7f   : > { %10945 = vmatpush1.bf16.msra.mxu1 %v14939_v9  ;;  %10986 = vmatpush1.bf16.msra.mxu0 %v14942_v13  ;;  %v15019_v9 = vld [vmem:[#allocation26 + $0x484] ss:$8 sps:$4 sm:$0xff]  }
 0xd80   : > { %10946 = vmatprep.subr.bf16.mxu1 %v14947_v28  ;;  %10987 = vmatprep.subr.bf16.mxu0 %v14950_v41  ;;  %v15022_v13 = vld [vmem:[#allocation26 + $0x584] ss:$8 sps:$4 sm:$0xff]   ;;  %v15017_v28 = vld [vmem:[#allocation26 + $0x480] ss:$8 sps:$4 sm:$0xff]  }
 0xd81   : > { %v15020_v41 = vld [vmem:[#allocation26 + $0x580] ss:$8 sps:$4 sm:$0xff]  }
 0xd83   : > { %10947 = vmatpush1.bf16.msra.mxu1 %v14945_v58  ;;  %10988 = vmatpush1.bf16.msra.mxu0 %v14948_v17  ;;  %v15025_v58 = vld [vmem:[#allocation26 + $0x674] ss:$8 sps:$4 sm:$0xff]  }
 0xd84   : > { %10948 = vmatprep.subr.bf16.mxu1 %v14953_v6  ;;  %10989 = vmatprep.subr.bf16.mxu0 %v14956_v21  ;;  %v15028_v17 = vld [vmem:[#allocation26 + $0x774] ss:$8 sps:$4 sm:$0xff]   ;;  %v15023_v6 = vld [vmem:[#allocation26 + $0x670] ss:$8 sps:$4 sm:$0xff]  }
 0xd85   : > { %v15026_v21 = vld [vmem:[#allocation26 + $0x770] ss:$8 sps:$4 sm:$0xff]  }
 0xd87   : > { %10949 = vmatpush1.bf16.msra.mxu1 %v14951_v19  ;;  %10990 = vmatpush1.bf16.msra.mxu0 %v14954_v48  ;;  %v9028_v19 = vpack.c.bf16 %v18112_v60, %v18112_v60  ;;  %v9026_v48 = vpack.c.bf16 %v18114_v38, %v18114_v38  ;;  %v15037_v60 = vld [vmem:[#allocation26 + $0x654] ss:$8 sps:$4 sm:$0xff]  }
 0xd88   : > { %10950 = vmatprep.subr.bf16.mxu1 %v14959_v44  ;;  %10991 = vmatprep.subr.bf16.mxu0 %v14962_v11  ;;  %v15031_v44 = vld [vmem:[#allocation26 + $0x664] ss:$8 sps:$4 sm:$0xff]   ;;  %v15040_v38 = vld [vmem:[#allocation26 + $0x754] ss:$8 sps:$4 sm:$0xff]  }
 0xd89   : > { %v15034_v11 = vld [vmem:[#allocation26 + $0x764] ss:$8 sps:$4 sm:$0xff]  }
 0xd8b   : > { %10951 = vmatpush1.bf16.msra.mxu1 %v14957_v4  ;;  %10992 = vmatpush1.bf16.msra.mxu0 %v14960_v26  ;;  %v9033_v4 = vpack.c.bf16 %v18122_v25, %v18122_v25  ;;  %v9031_v26 = vpack.c.bf16 %v18126_v37, %v18126_v37  ;;  %v15043_v25 = vld [vmem:[#allocation26 + $0x644] ss:$8 sps:$4 sm:$0xff]  }
 0xd8c   : > { %10952 = vmatprep.subr.bf16.mxu1 %v14965_v34  ;;  %10993 = vmatprep.subr.bf16.mxu0 %v14968_v30  ;;  %v15029_v34 = vld [vmem:[#allocation26 + $0x660] ss:$8 sps:$4 sm:$0xff]   ;;  %v15046_v37 = vld [vmem:[#allocation26 + $0x744] ss:$8 sps:$4 sm:$0xff]  }
 0xd8d   : > { %v15032_v30 = vld [vmem:[#allocation26 + $0x760] ss:$8 sps:$4 sm:$0xff]  }
 0xd8f   : > { %10953 = vmatpush1.bf16.msra.mxu1 %v14963_v59  ;;  %10994 = vmatpush1.bf16.msra.mxu0 %v14966_v39  ;;  %v15035_v59 = vld [vmem:[#allocation26 + $0x650] ss:$8 sps:$4 sm:$0xff]  }
 0xd90   : > { %10954 = vmatprep.subr.bf16.mxu1 %v14971_v2  ;;  %10995 = vmatprep.subr.bf16.mxu0 %v14974_v55  ;;  %v15038_v39 = vld [vmem:[#allocation26 + $0x750] ss:$8 sps:$4 sm:$0xff]   ;;  %v15041_v2 = vld [vmem:[#allocation26 + $0x640] ss:$8 sps:$4 sm:$0xff]  }
 0xd91   : > { %v15044_v55 = vld [vmem:[#allocation26 + $0x740] ss:$8 sps:$4 sm:$0xff]  }
 0xd93   : > { %10955 = vmatpush1.bf16.msra.mxu1 %v14969_v29  ;;  %10996 = vmatpush1.bf16.msra.mxu0 %v14972_v10  ;;  %v15049_v29 = vld [vmem:[#allocation26 + $0x634] ss:$8 sps:$4 sm:$0xff]  }
 0xd94   : > { %10956 = vmatprep.subr.bf16.mxu1 %v14977_v61  ;;  %10997 = vmatprep.subr.bf16.mxu0 %v14980_v45  ;;  %v15052_v10 = vld [vmem:[#allocation26 + $0x734] ss:$8 sps:$4 sm:$0xff]   ;;  %v15047_v61 = vld [vmem:[#allocation26 + $0x630] ss:$8 sps:$4 sm:$0xff]  }
 0xd95   : > { %v15050_v45 = vld [vmem:[#allocation26 + $0x730] ss:$8 sps:$4 sm:$0xff]  }
 0xd97   : > { %10957 = vmatpush2.bf16.msra.mxu1 %v14975_v18  ;;  %10998 = vmatpush2.bf16.msra.mxu0 %v14978_v42  ;;  %v15055_v18 = vld [vmem:[#allocation26 + $0x624] ss:$8 sps:$4 sm:$0xff]  }
 0xd98   : > { %10958 = vmatprep.subr.bf16.mxu1 %v14983_v50  ;;  %10999 = vmatprep.subr.bf16.mxu0 %v14986_v31  ;;  %v15058_v42 = vld [vmem:[#allocation26 + $0x724] ss:$8 sps:$4 sm:$0xff]   ;;  %v15053_v50 = vld [vmem:[#allocation26 + $0x620] ss:$8 sps:$4 sm:$0xff]  }
 0xd99   : > { %v15056_v31 = vld [vmem:[#allocation26 + $0x720] ss:$8 sps:$4 sm:$0xff]  }
 0xd9b   : > { %10959 = vmatpush2.bf16.msra.mxu1 %v14981_v27  ;;  %11000 = vmatpush2.bf16.msra.mxu0 %v14984_v57  ;;  %v15061_v27 = vld [vmem:[#allocation26 + $0x614] ss:$8 sps:$4 sm:$0xff]  }
 0xd9c   : > { %10960 = vmatprep.subr.bf16.mxu1 %v14989_v56  ;;  %11001 = vmatprep.subr.bf16.mxu0 %v14992_v14  ;;  %v15064_v57 = vld [vmem:[#allocation26 + $0x714] ss:$8 sps:$4 sm:$0xff]   ;;  %v15059_v56 = vld [vmem:[#allocation26 + $0x610] ss:$8 sps:$4 sm:$0xff]  }
 0xd9d   : > { %v15062_v14 = vld [vmem:[#allocation26 + $0x710] ss:$8 sps:$4 sm:$0xff]  }
 0xd9f   : > { %10961 = vmatpush2.bf16.msra.mxu1 %v14987_v7  ;;  %11002 = vmatpush2.bf16.msra.mxu0 %v14990_v49  ;;  %v15067_v7 = vld [vmem:[#allocation26 + $0x604] ss:$8 sps:$4 sm:$0xff]  }
 0xda0   : > { %10962 = vmatprep.subr.bf16.mxu1 %v14995_v51  ;;  %11003 = vmatprep.subr.bf16.mxu0 %v14998_v3  ;;  %v15070_v49 = vld [vmem:[#allocation26 + $0x704] ss:$8 sps:$4 sm:$0xff]   ;;  %v15065_v51 = vld [vmem:[#allocation26 + $0x600] ss:$8 sps:$4 sm:$0xff]  }
 0xda1   : > { %v15068_v3 = vld [vmem:[#allocation26 + $0x700] ss:$8 sps:$4 sm:$0xff]  }
 0xda3   : > { %10963 = vmatpush2.bf16.msra.mxu1 %v14993_v62  ;;  %11004 = vmatpush2.bf16.msra.mxu0 %v14996_v5  ;;  %v15073_v62 = vld [vmem:[#allocation26 + $0x6f4] ss:$8 sps:$4 sm:$0xff]  }
 0xda4   : > { %10964 = vmatprep.subr.bf16.mxu1 %v15001_v20  ;;  %11005 = vmatprep.subr.bf16.mxu0 %v15004_v54  ;;  %v15076_v5 = vld [vmem:[#allocation26 + $0x7f4] ss:$8 sps:$4 sm:$0xff]   ;;  %v15071_v20 = vld [vmem:[#allocation26 + $0x6f0] ss:$8 sps:$4 sm:$0xff]  }
 0xda5   : > { %v15074_v54 = vld [vmem:[#allocation26 + $0x7f0] ss:$8 sps:$4 sm:$0xff]  }
 0xda7   : > { %10965 = vmatpush2.bf16.msra.mxu1 %v14999_v52  ;;  %11006 = vmatpush2.bf16.msra.mxu0 %v15002_v32  ;;  %v15079_v52 = vld [vmem:[#allocation26 + $0x6e4] ss:$8 sps:$4 sm:$0xff]  }
 0xda8   : > { %10966 = vmatprep.subr.bf16.mxu1 %v15007_v8  ;;  %11007 = vmatprep.subr.bf16.mxu0 %v15010_v12  ;;  %v15082_v32 = vld [vmem:[#allocation26 + $0x7e4] ss:$8 sps:$4 sm:$0xff]   ;;  %v15077_v8 = vld [vmem:[#allocation26 + $0x6e0] ss:$8 sps:$4 sm:$0xff]  }
 0xda9   : > { %v15080_v12 = vld [vmem:[#allocation26 + $0x7e0] ss:$8 sps:$4 sm:$0xff]  }
 0xdab   : > { %10967 = vmatpush2.bf16.msra.mxu1 %v15005_v24  ;;  %11008 = vmatpush2.bf16.msra.mxu0 %v15008_v15  ;;  %v15085_v24 = vld [vmem:[#allocation26 + $0x6d4] ss:$8 sps:$4 sm:$0xff]  }
 0xdac   : > { %10968 = vmatprep.subr.bf16.mxu1 %v15013_v35  ;;  %11009 = vmatprep.subr.bf16.mxu0 %v15016_v1  ;;  %v15088_v15 = vld [vmem:[#allocation26 + $0x7d4] ss:$8 sps:$4 sm:$0xff]   ;;  %v15083_v35 = vld [vmem:[#allocation26 + $0x6d0] ss:$8 sps:$4 sm:$0xff]  }
 0xdad   : > { %v15086_v1 = vld [vmem:[#allocation26 + $0x7d0] ss:$8 sps:$4 sm:$0xff]  }
 0xdaf   : > { %10969 = vmatpush2.bf16.msra.mxu1 %v15011_v46  ;;  %11010 = vmatpush2.bf16.msra.mxu0 %v15014_v23  ;;  %v15091_v46 = vld [vmem:[#allocation26 + $0x6c4] ss:$8 sps:$4 sm:$0xff]  }
 0xdb0   : > { %10970 = vmatprep.subr.bf16.mxu1 %v15019_v9  ;;  %11011 = vmatprep.subr.bf16.mxu0 %v15022_v13  ;;  %v15094_v23 = vld [vmem:[#allocation26 + $0x7c4] ss:$8 sps:$4 sm:$0xff]   ;;  %v15089_v9 = vld [vmem:[#allocation26 + $0x6c0] ss:$8 sps:$4 sm:$0xff]  }
 0xdb1   : > { %v15092_v13 = vld [vmem:[#allocation26 + $0x7c0] ss:$8 sps:$4 sm:$0xff]  }
 0xdb3   : > { %10971 = vmatpush2.bf16.msra.mxu1 %v15017_v28  ;;  %11012 = vmatpush2.bf16.msra.mxu0 %v15020_v41  ;;  %v15097_v28 = vld [vmem:[#allocation26 + $0x6b4] ss:$8 sps:$4 sm:$0xff]  }
 0xdb4   : > { %11022 = vmatprep.subr.bf16.mxu1 %v15025_v58  ;;  %11063 = vmatprep.subr.bf16.mxu0 %v15028_v17  ;;  %v15100_v41 = vld [vmem:[#allocation26 + $0x7b4] ss:$8 sps:$4 sm:$0xff]   ;;  %v15095_v58 = vld [vmem:[#allocation26 + $0x6b0] ss:$8 sps:$4 sm:$0xff]  }
 0xdb5   : > { %v15098_v17 = vld [vmem:[#allocation26 + $0x7b0] ss:$8 sps:$4 sm:$0xff]  }
 0xdb6   : > { %10973 = vmatmul.mubr.bf16.vlgmr.msra.gmra.mxu1 %v9026_v48  ;;  %11014 = vmatmul.mubr.bf16.vlgmr.msra.gmra.mxu0 %v9028_v19  ;;  %v15101_v19 = vld [vmem:[#allocation26 + $0x6a0] ss:$8 sps:$4 sm:$0xff]  }
 0xdb7   : > { %11023 = vmatpush1.bf16.msra.mxu1 %v15023_v6  ;;  %11064 = vmatpush1.bf16.msra.mxu0 %v15026_v21  ;;  %v15103_v6 = vld [vmem:[#allocation26 + $0x6a4] ss:$8 sps:$4 sm:$0xff]   ;;  %v15104_v48 = vld [vmem:[#allocation26 + $0x7a0] ss:$8 sps:$4 sm:$0xff]  }
 0xdb8   : > { %11024 = vmatprep.subr.bf16.mxu1 %v15031_v44  ;;  %11065 = vmatprep.subr.bf16.mxu0 %v15034_v11  ;;  %v15106_v21 = vld [vmem:[#allocation26 + $0x7a4] ss:$8 sps:$4 sm:$0xff]   ;;  %v15109_v44 = vld [vmem:[#allocation26 + $0x694] ss:$8 sps:$4 sm:$0xff]  }
 0xdb9   : > { %11095 = vmatprep.mubr.bf16.mxu0 %v9033_v4  ;;  %11054 = vmatprep.mubr.bf16.mxu1 %v9031_v26  ;;  %v15112_v11 = vld [vmem:[#allocation26 + $0x794] ss:$8 sps:$4 sm:$0xff]   ;;  %v15107_v4 = vld [vmem:[#allocation26 + $0x690] ss:$8 sps:$4 sm:$0xff]  }
 0xdba   : > { %v15110_v26 = vld [vmem:[#allocation26 + $0x790] ss:$8 sps:$4 sm:$0xff]  }
 0xdbb   : > { %11025 = vmatpush1.bf16.msra.mxu1 %v15029_v34  ;;  %11066 = vmatpush1.bf16.msra.mxu0 %v15032_v30  ;;  %v15115_v34 = vld [vmem:[#allocation26 + $0x684] ss:$8 sps:$4 sm:$0xff]  }
 0xdbc   : > { %11026 = vmatprep.subr.bf16.mxu1 %v15037_v60  ;;  %11067 = vmatprep.subr.bf16.mxu0 %v15040_v38  ;;  %v15118_v30 = vld [vmem:[#allocation26 + $0x784] ss:$8 sps:$4 sm:$0xff]   ;;  %v15113_v60 = vld [vmem:[#allocation26 + $0x680] ss:$8 sps:$4 sm:$0xff]  }
 0xdbd   : > { %v15116_v38 = vld [vmem:[#allocation26 + $0x780] ss:$8 sps:$4 sm:$0xff]  }
 0xdbf   : > { %11027 = vmatpush1.bf16.msra.mxu1 %v15035_v59  ;;  %11068 = vmatpush1.bf16.msra.mxu0 %v15038_v39  ;;  %v15121_v59 = vld [vmem:[#allocation26 + $0x874] ss:$8 sps:$4 sm:$0xff]   ;;  %v9324_v39 = vld [vmem:[#allocation31] sm:$0x3] }
 0xdc0   : > { %11028 = vmatprep.subr.bf16.mxu1 %v15043_v25  ;;  %11069 = vmatprep.subr.bf16.mxu0 %v15046_v37  ;;  %v9035_v25 = vpack.c.bf16 %v18130_v33, %v18130_v33  ;;  %v15119_v37 = vld [vmem:[#allocation26 + $0x870] ss:$8 sps:$4 sm:$0xff]  }
 0xdc3   : > { %11029 = vmatpush1.bf16.msra.mxu1 %v15041_v2  ;;  %11070 = vmatpush1.bf16.msra.mxu0 %v15044_v55  ;;  %v9329_v2 = vrot.slane %v9324_v39, %v18044_v22  ;;  %v9032_v55 = vpack.c.bf16 %v18120_v36, %v18120_v36 }
 0xdc4   : > { %11030 = vmatprep.subr.bf16.mxu1 %v15049_v29  ;;  %11071 = vmatprep.subr.bf16.mxu0 %v15052_v10  ;;  %v9030_v29 = vpack.c.bf16 %v18124_v16, %v18124_v16  ;;  %v15124_v10 = vld [vmem:[#allocation26 + $0x864] ss:$8 sps:$4 sm:$0xff]  }
 0xdc7   : > { %11031 = vmatpush1.bf16.msra.mxu1 %v15047_v61  ;;  %11072 = vmatpush1.bf16.msra.mxu0 %v15050_v45  ;;  %v9333_v61 = vrot.slane %v9324_v39, %v18047_v63 }
 0xdc8   : > { %11032 = vmatprep.subr.bf16.mxu1 %v15055_v18  ;;  %11073 = vmatprep.subr.bf16.mxu0 %v15058_v42  ;;  %v15122_v42 = vld [vmem:[#allocation26 + $0x860] ss:$8 sps:$4 sm:$0xff]  }
 0xdcb   : > { %11033 = vmatpush1.bf16.msra.mxu1 %v15053_v50  ;;  %11074 = vmatpush1.bf16.msra.mxu0 %v15056_v31 }
 0xdcc   : > { %11034 = vmatprep.subr.bf16.mxu1 %v15061_v27  ;;  %11075 = vmatprep.subr.bf16.mxu0 %v15064_v57  ;;  %v15127_v27 = vld [vmem:[#allocation26 + $0x854] ss:$8 sps:$4 sm:$0xff]  }
 0xdcf   : > { %11035 = vmatpush1.bf16.msra.mxu1 %v15059_v56  ;;  %11076 = vmatpush1.bf16.msra.mxu0 %v15062_v14 }
 0xdd0   : > { %11036 = vmatprep.subr.bf16.mxu1 %v15067_v7  ;;  %11077 = vmatprep.subr.bf16.mxu0 %v15070_v49  ;;  %v15125_v7 = vld [vmem:[#allocation26 + $0x850] ss:$8 sps:$4 sm:$0xff]  }
 0xdd3   : > { %11037 = vmatpush1.bf16.msra.mxu1 %v15065_v51  ;;  %11078 = vmatpush1.bf16.msra.mxu0 %v15068_v3  ;;  %v15130_v51 = vld [vmem:[#allocation26 + $0x844] ss:$8 sps:$4 sm:$0xff]  }
 0xdd4   : > { %11038 = vmatprep.subr.bf16.mxu1 %v15073_v62  ;;  %11079 = vmatprep.subr.bf16.mxu0 %v15076_v5  ;;  %v15128_v62 = vld [vmem:[#allocation26 + $0x840] ss:$8 sps:$4 sm:$0xff]   ;;  %v15133_v5 = vld [vmem:[#allocation26 + $0x834] ss:$8 sps:$4 sm:$0xff]  }
 0xdd7   : > { %11039 = vmatpush2.bf16.msra.mxu1 %v15071_v20  ;;  %11080 = vmatpush2.bf16.msra.mxu0 %v15074_v54  ;;  %v15131_v20 = vld [vmem:[#allocation26 + $0x830] ss:$8 sps:$4 sm:$0xff]   ;;  %v15136_v54 = vld [vmem:[#allocation26 + $0x824] ss:$8 sps:$4 sm:$0xff]  }
 0xdd8   : > { %11040 = vmatprep.subr.bf16.mxu1 %v15079_v52  ;;  %11081 = vmatprep.subr.bf16.mxu0 %v15082_v32  ;;  %v15134_v52 = vld [vmem:[#allocation26 + $0x820] ss:$8 sps:$4 sm:$0xff]   ;;  %v15139_v32 = vld [vmem:[#allocation26 + $0x814] ss:$8 sps:$4 sm:$0xff]  }
 0xddb   : > { %11041 = vmatpush2.bf16.msra.mxu1 %v15077_v8  ;;  %11082 = vmatpush2.bf16.msra.mxu0 %v15080_v12  ;;  %v15137_v8 = vld [vmem:[#allocation26 + $0x810] ss:$8 sps:$4 sm:$0xff]   ;;  %v15142_v12 = vld [vmem:[#allocation26 + $0x804] ss:$8 sps:$4 sm:$0xff]  }
 0xddc   : > { %11042 = vmatprep.subr.bf16.mxu1 %v15085_v24  ;;  %11083 = vmatprep.subr.bf16.mxu0 %v15088_v15  ;;  %v15140_v24 = vld [vmem:[#allocation26 + $0x800] ss:$8 sps:$4 sm:$0xff]   ;;  %v15145_v15 = vld [vmem:[#allocation26 + $0x8f4] ss:$8 sps:$4 sm:$0xff]  }
 0xddf   : > { %11043 = vmatpush2.bf16.msra.mxu1 %v15083_v35  ;;  %11084 = vmatpush2.bf16.msra.mxu0 %v15086_v1  ;;  %v15143_v35 = vld [vmem:[#allocation26 + $0x8f0] ss:$8 sps:$4 sm:$0xff]   ;;  %v15148_v1 = vld [vmem:[#allocation26 + $0x8e4] ss:$8 sps:$4 sm:$0xff]  }
 0xde0   : > { %11044 = vmatprep.subr.bf16.mxu1 %v15091_v46  ;;  %11085 = vmatprep.subr.bf16.mxu0 %v15094_v23  ;;  %v15146_v46 = vld [vmem:[#allocation26 + $0x8e0] ss:$8 sps:$4 sm:$0xff]   ;;  %v15151_v23 = vld [vmem:[#allocation26 + $0x8d4] ss:$8 sps:$4 sm:$0xff]  }
 0xde3   : > { %11045 = vmatpush2.bf16.msra.mxu1 %v15089_v9  ;;  %11086 = vmatpush2.bf16.msra.mxu0 %v15092_v13  ;;  %v15149_v9 = vld [vmem:[#allocation26 + $0x8d0] ss:$8 sps:$4 sm:$0xff]   ;;  %v15154_v13 = vld [vmem:[#allocation26 + $0x8c4] ss:$8 sps:$4 sm:$0xff]  }
 0xde4   : > { %11046 = vmatprep.subr.bf16.mxu1 %v15097_v28  ;;  %11087 = vmatprep.subr.bf16.mxu0 %v15100_v41  ;;  %v15152_v28 = vld [vmem:[#allocation26 + $0x8c0] ss:$8 sps:$4 sm:$0xff]   ;;  %v15157_v41 = vld [vmem:[#allocation26 + $0x8b4] ss:$8 sps:$4 sm:$0xff]  }
 0xde7   : > { %11047 = vmatpush2.bf16.msra.mxu1 %v15095_v58  ;;  %11088 = vmatpush2.bf16.msra.mxu0 %v15098_v17  ;;  %v15155_v58 = vld [vmem:[#allocation26 + $0x8b0] ss:$8 sps:$4 sm:$0xff]   ;;  %v15160_v17 = vld [vmem:[#allocation26 + $0x8a4] ss:$8 sps:$4 sm:$0xff]  }
 0xde8   : > { %11048 = vmatprep.subr.bf16.mxu1 %v15103_v6  ;;  %11089 = vmatprep.subr.bf16.mxu0 %v15106_v21  ;;  %v15158_v6 = vld [vmem:[#allocation26 + $0x8a0] ss:$8 sps:$4 sm:$0xff]   ;;  %v15163_v21 = vld [vmem:[#allocation26 + $0x894] ss:$8 sps:$4 sm:$0xff]  }
 0xdeb   : > { %11049 = vmatpush2.bf16.msra.mxu1 %v15101_v19  ;;  %11090 = vmatpush2.bf16.msra.mxu0 %v15104_v48  ;;  %v15161_v19 = vld [vmem:[#allocation26 + $0x890] ss:$8 sps:$4 sm:$0xff]   ;;  %v15166_v48 = vld [vmem:[#allocation26 + $0x884] ss:$8 sps:$4 sm:$0xff]  }
 0xdec   : > { %11050 = vmatprep.subr.bf16.mxu1 %v15109_v44  ;;  %11091 = vmatprep.subr.bf16.mxu0 %v15112_v11  ;;  %v15164_v44 = vld [vmem:[#allocation26 + $0x880] ss:$8 sps:$4 sm:$0xff]   ;;  %v9034_v11 = vpack.c.bf16 %v18128_v0, %v18128_v0 }
 0xdef   : > { %11051 = vmatpush2.bf16.msra.mxu1 %v15107_v4  ;;  %11092 = vmatpush2.bf16.msra.mxu0 %v15110_v26 }
 0xdf0   : > { %11052 = vmatprep.subr.bf16.mxu1 %v15115_v34  ;;  %11093 = vmatprep.subr.bf16.mxu0 %v15118_v30 }
 0xdf3   : > { %11053 = vmatpush2.bf16.msra.mxu1 %v15113_v60  ;;  %11094 = vmatpush2.bf16.msra.mxu0 %v15116_v38 }
 0xdf4   : > { %11104 = vmatprep.subr.bf16.mxu1 %v15121_v59 }
 0xdf6   : > { %11055 = vmatmul.mubr.bf16.vlgmr.msra.gmra.mxu1 %v9030_v29  ;;  %11096 = vmatmul.mubr.bf16.vlgmr.msra.gmra.mxu0 %v9032_v55  ;;  %v10810_v45 = vpop.f32.mrf.mxu1  ;;  %v10851_v18 = vpop.f32.mrf.mxu0 }
 0xdf7   : > { %v10811_v33 = vadd.f32 %v10810_v45, %v9329_v2  ;;  %11105 = vmatpush1.bf16.msra.mxu1 %v15119_v37  ;;  %11136 = vmatprep.mubr.bf16.mxu1 %v9035_v25 }
 0xdf8   : > { %v10812_v50 = vpop.f32.mrf.mxu1  ;;  %11106 = vmatprep.subr.bf16.mxu1 %v15124_v10  ;;  %v10853_v31 = vpop.f32.mrf.mxu0 }
 0xdf9   : > { %v10813_v36 = vadd.f32 %v10812_v50, %v9333_v61  ;;  %v18156_v57 = vadd.f32 %v10851_v18, %v10811_v33 }
 0xdfa   : > { %v10814_v16 = vpop.f32.mrf.mxu1  ;;  %v10855_v56 = vpop.f32.mrf.mxu0 }
 0xdfb   : > { %v18158_v14 = vadd.f32 %v10853_v31, %v10813_v36  ;;  %11107 = vmatpush1.bf16.msra.mxu1 %v15122_v42 }
 0xdfc   : > { %v10815_v49 = vpop.f32.mrf.mxu1  ;;  %11108 = vmatprep.subr.bf16.mxu1 %v15127_v27  ;;  %v10856_v3 = vpop.f32.mrf.mxu0 }
 0xdff   : > { %11109 = vmatpush1.bf16.msra.mxu1 %v15125_v7 }
 0xe00   : > { %11110 = vmatprep.subr.bf16.mxu1 %v15130_v51 }
 0xe03   : > { %11111 = vmatpush1.bf16.msra.mxu1 %v15128_v62 }
 0xe04   : > { %11112 = vmatprep.subr.bf16.mxu1 %v15133_v5 }
 0xe07   : > { %11113 = vmatpush1.bf16.msra.mxu1 %v15131_v20  ;;  %v8462_v20 = vld [vmem:[#allocation32] sm:$0x3] }
 0xe08   : > { %11114 = vmatprep.subr.bf16.mxu1 %v15136_v54  ;;  %v8467_v54 = vrot.slane %v8462_v20, %v18044_v22 }
 0xe0b   : > { %11115 = vmatpush1.bf16.msra.mxu1 %v15134_v52 }
 0xe0c   : > { %11116 = vmatprep.subr.bf16.mxu1 %v15139_v32  ;;  %v8471_v32 = vrot.slane %v8462_v20, %v18047_v63 }
 0xe0f   : > { %11117 = vmatpush1.bf16.msra.mxu1 %v15137_v8 }
 0xe10   : > { %11118 = vmatprep.subr.bf16.mxu1 %v15142_v12  ;;  %v8589_v12 = vadd.f32 %v18066_v40, %v8467_v54 }
 0xe13   : > { %11119 = vmatpush1.bf16.msra.mxu1 %v15140_v24 }
 0xe14   : > { %11120 = vmatprep.subr.bf16.mxu1 %v15145_v15 }
 0xe17   : > { %11121 = vmatpush2.bf16.msra.mxu1 %v15143_v35 }
 0xe18   : > { %11122 = vmatprep.subr.bf16.mxu1 %v15148_v1  ;;  %v8591_v1 = vadd.f32 %v18070_v53, %v8471_v32 }
 0xe1b   : > { %11123 = vmatpush2.bf16.msra.mxu1 %v15146_v46 }
 0xe1c   : > { %11124 = vmatprep.subr.bf16.mxu1 %v15151_v23 }
 0xe1f   : > { %11125 = vmatpush2.bf16.msra.mxu1 %v15149_v9 }
 0xe20   : > { %11126 = vmatprep.subr.bf16.mxu1 %v15154_v13 }
 0xe23   : > { %11127 = vmatpush2.bf16.msra.mxu1 %v15152_v28 }
 0xe24   : > { %11128 = vmatprep.subr.bf16.mxu1 %v15157_v41 }
 0xe27   : > { %11129 = vmatpush2.bf16.msra.mxu1 %v15155_v58 }
 0xe28   : > { %11130 = vmatprep.subr.bf16.mxu1 %v15160_v17 }
 0xe2b   : > { %11131 = vmatpush2.bf16.msra.mxu1 %v15158_v6 }
 0xe2c   : > { %11132 = vmatprep.subr.bf16.mxu1 %v15163_v21 }
 0xe2f   : > { %11133 = vmatpush2.bf16.msra.mxu1 %v15161_v19 }
 0xe30   : > { %11134 = vmatprep.subr.bf16.mxu1 %v15166_v48  ;;  %v15839_v48 = vmov 1966171168  }
 0xe33   : > { %11135 = vmatpush2.bf16.msra.mxu1 %v15164_v44  ;;  %v11171_v44 = vunpack.c.l.s4 %v15839_v48 }
 0xe36   : > { %v10892_v4 = vpop.f32.mrf.mxu1  ;;  %11137 = vmatmul.mubr.bf16.vlgmr.msra.gmra.mxu1 %v9034_v11  ;;  %v10933_v26 = vpop.f32.mrf.mxu0 }
 0xe37   : > { %v10893_v34 = vadd.f32 %v10892_v4, %v18156_v57 }
 0xe38   : > { %v10894_v30 = vpop.f32.mrf.mxu1  ;;  %v10935_v60 = vpop.f32.mrf.mxu0 }
 0xe39   : > { %v10895_v38 = vadd.f32 %v10894_v30, %v18158_v14  ;;  %v10934_v59 = vadd.f32 %v10933_v26, %v10893_v34  ;;  %v11172_v34 = vunpack.c.0.s8 %v11171_v44 }
 0xe3a   : > { %v10896_v39 = vpop.f32.mrf.mxu1  ;;  %v10937_v25 = vpop.f32.mrf.mxu0 }
 0xe3b   : > { %v10936_v37 = vadd.f32 %v10935_v60, %v10895_v38 }
 0xe3c   : > { %v10897_v2 = vpop.f32.mrf.mxu1  ;;  %v10938_v55 = vpop.f32.mrf.mxu0 }
 0xe76   : > { %v10974_v29 = vpop.f32.mrf.mxu1  ;;  %v11015_v10 = vpop.f32.mrf.mxu0 }
 0xe77   : > { %v10975_v61 = vadd.f32 %v10974_v29, %v10934_v59  ;;  %v11175_v59 = vsub.s32 %v11172_v34, %v18041_v47 }
 0xe78   : > { %v10976_v45 = vpop.f32.mrf.mxu1  ;;  %v11017_v0 = vpop.f32.mrf.mxu0 }
 0xe79   : > { %v11016_v18 = vadd.f32 %v11015_v10, %v10975_v61  ;;  %v10977_v33 = vadd.f32 %v10976_v45, %v10936_v37 }
 0xe7a   : > { %v10978_v42 = vpop.f32.mrf.mxu1  ;;  %v11019_v50 = vpop.f32.mrf.mxu0 }
 0xe7b   : > { %v11018_v31 = vadd.f32 %v11017_v0, %v10977_v33 }
 0xe7c   : > { %v10979_v27 = vpop.f32.mrf.mxu1  ;;  %v11020_v36 = vpop.f32.mrf.mxu0 }
 0xeb6   : > { %v11056_v57 = vpop.f32.mrf.mxu1  ;;  %v11097_v16 = vpop.f32.mrf.mxu0 }
 0xeb7   : > { %v11057_v56 = vadd.f32 %v11056_v57, %v11016_v18 }
 0xeb8   : > { %v11058_v14 = vpop.f32.mrf.mxu1  ;;  %v11099_v7 = vpop.f32.mrf.mxu0 }
 0xeb9   : > { %v11098_v49 = vadd.f32 %v11097_v16, %v11057_v56  ;;  %v11059_v52 = vadd.f32 %v11058_v14, %v11018_v31 }
 0xeba   : > { %v11060_v51 = vpop.f32.mrf.mxu1  ;;  %v11101_v3 = vpop.f32.mrf.mxu0 }
 0xebb   : > { %v11100_v24 = vadd.f32 %v11099_v7, %v11059_v52 }
 0xebc   : > { %v11061_v62 = vpop.f32.mrf.mxu1  ;;  %v11102_v5 = vpop.f32.mrf.mxu0 }
 0xef6   : > { %v11138_v8 = vpop.f32.mrf.mxu1 }
 0xef7   : > { %v11139_v15 = vadd.f32 %v11138_v8, %v11098_v49 }
 0xef8   : > { %v11140_v35 = vpop.f32.mrf.mxu1 }
 0xef9   : > { %v11145_v46 = vadd.f32 %v11139_v15, %v8589_v12  ;;  %v11141_v23 = vadd.f32 %v11140_v35, %v11100_v24 }
 0xefa   : > { %v11142_v9 = vpop.f32.mrf.mxu1 }
 0xefb   : > { %v11147_v13 = vmax.f32 %v11145_v46, 0.0  ;;  %v11146_v28 = vadd.f32 %v11141_v23, %v8591_v1 }
 0xefc   : > { %v11143_v41 = vpop.f32.mrf.mxu1 }
 0xefd   : > { %v11150_v22 = vsel %vm11149_vm5, %v11147_v13, 0.0  ;;  %v11148_v58 = vmax.f32 %v11146_v28, 0.0 }
 0xefe   : > { %v11151_v17 = vrot.slane %v11150_v22, 4 }
 0xeff   : > { %v11157_v63 = vsel %vm11149_vm5, %v11148_v58, 0.0 }
 0xf00   : > { %v11152_v6 = vadd.f32 %v11151_v17, %v11150_v22  ;;  %v11158_v21 = vrot.slane %v11157_v63, 4 }
 0xf02   : > { %v11153_v40 = vrot.slane %v11152_v6, 2  ;;  %v11159_v19 = vadd.f32 %v11158_v21, %v11157_v63 }
 0xf04   : > { %v11154_v53 = vadd.f32 %v11153_v40, %v11152_v6  ;;  %v11160_v11 = vrot.slane %v11159_v19, 2 }
 0xf06   : > { %v11155_v4 = vrot.slane %v11154_v53, 1  ;;  %v11161_v26 = vadd.f32 %v11160_v11, %v11159_v19 }
 0xf08   : > { %v11156_v30 = vadd.f32 %v11155_v4, %v11154_v53  ;;  %v11162_v60 = vrot.slane %v11161_v26, 1 }
 0xf0a   : > { %v11163_v38 = vadd.f32 %v11162_v60, %v11161_v26  ;;  %v11165_v39 = vmul.f32 0.25, %v11156_v30 }
 0xf0c   : > { %v11166_v25 = vmul.f32 0.25, %v11163_v38 }
 0xf0e   : > { %v11169_v37 = vcombine.low %v11165_v39, %v11166_v25 }
 0xf10   : > { %v11176_v2 = vrot.slane %v11169_v37, %v11175_v59 }
 0xf12   : > { %v11183_v55 = vrot.slane %v11176_v2, %v11175_v59 }
 0xf14   : > { %11189 = vst.msk [vmem:[%s1030_s29] sm:$0x3] %vm11187_vm6, %v11183_v55 }
 0xf15   : > { %15716 = shalt.err (!%p15713_p7)
}
 0xf16   : > { %s15717_s5 = scalar_lea.hbm %s11203_s26, 32  ;;  %s15721_s29 = scalar_lea.hbm %s18316_s0, 64 }
 0xf17   : > { %p15718_p4 = scmp.ne.s32.totalorder %s11203_s26, %s15717_s5  ;;  %p15722_p11 = scmp.lt.s32.totalorder %s11203_s26, %s18316_s0 }
 0xf18   : > { %p15723_p0 = scmp.lt.s32.totalorder %s15721_s29, %s15717_s5 }
 0xf19   : > { %p15719_p8 = pnand %p15718_p4, %p18317_p1 }
 0xf1a   : > { %p15724_p2 = por %p15723_p0, %p15722_p11 }
 0xf1b   : > { %p15720_p12 = pneg %p15719_p8 }
 0xf1d   : > { %p15725_p9 = pnand %p15724_p2, %p15720_p12 }
 0xf1f   : > { %15728 = shalt.err (!%p15725_p9)
}
 0xf20   : > { %13778 = dma.vmem_to_hbm [thread:$0]  (%p18317_p1), %s11206_s2, 32, %s11203_s26, %s11191_s9  }
 0xf21 PF: > { %s18318_s4 = sld [smem:[#allocation50_spill]] }
 0xf22   : > { %s18319_s30 = sld [smem:[#allocation47_spill]] }
 0xf23   : > { %s18320_s27 = sld [smem:[#allocation54_spill]] }
 0xf27   : > { %p13885_p3 = scmp.ge.s32.totalorder %s18318_s4, 2 }
 0xf28   : > { %s11217_s7 = sand.u32 1, %s18319_s30  }
 0xf29   : > { %p18321_p6 = scmp.ne.s32.totalorder %s18320_s27, 0  ;;  %s11218_s25 = scalar_lea.sflag [#allocation4], %s11217_s7 }
 0xf2b   : > { %p13842_p5 = pnand %p13885_p3, %p18321_p6 }
 0xf2d   : > { %p13843_p10 = pneg %p13842_p5 }
 0xf2f   : > { %15790 = dma.done.wait (%p13843_p10), %s11218_s25, 32  }
 0xf30   : > { %15792 = vsyncadd (%p13843_p10), %s11218_s25, 4294967264  ;;  %s18322_s30 = sld [smem:[#allocation51_spill]] }
 0xf31   : > { %s18323_s29 = sld [smem:[#allocation48_spill]] }
 0xf32   : > { %s18324_s2 = sld [smem:[#allocation49_spill]] }
 0xf33   : > { %s18325_s6 = sld [smem:[#allocation52_spill]] }
 0xf36   : > { %p46_p13 = scmp.ge.s32.totalorder %s18322_s30, 4  }
 0xf38   :  { %48 = sbr.rel (!%p46_p13) target bundleno = 27 (0x1b), region = 284 }
 0xf3d   :  { %11223 = vsyncpa [#allocation3], 1 }
 0xf3e   :  { %11225 = vsyncpa [#allocation3 + $0x1], 1 }
 0xf3f   :  { %11226 = vsyncpa [#allocation6], 1 }
 0xf40   :  { %11227 = vsyncpa [#allocation9], 1 }
 0xf41   :  { %11228 = vsyncpa [#allocation12], 1 }
 0xf42   :  { %11229 = vsyncpa [#allocation15], 1 }
 0xf43   :  { %11230 = vsyncpa [#allocation18], 1 }
 0xf44   :  { %11231 = vsyncpa [#allocation21], 1 }
 0xf45   :  { %11232 = vsyncpa [#allocation24], 1 }
 0xf46   :  { %11233 = vsyncpa [#allocation27], 1 }
 0xf47   :  { %11234 = vsyncpa [#allocation30], 1 }
 0xf48   :  { %11235 = vsyncpa [#allocation33], 1 }
 0xf49   :  { %11236 = vsyncpa [#allocation4], 1 }
 0xf4a   :  { %11238 = vsyncpa [#allocation4 + $0x1], 1 }

</bundles_post_ra>
